<compile_context>
chip_gen: v7x
topology: tpu7x:2x2x1
jax: 0.10.0
libtpu: 0.0.40
codegen_flags: <defaults>
</compile_context>

<pallas_src>
import functools

import jax
import jax.numpy as jnp
from jax.experimental import pallas as pl
from jax.experimental.pallas import tpu as pltpu


def _round_up(x, m):
    return ((x + m - 1) // m) * m


# -----------------------------------------------------------------------------
# Pallas kernel: one decode timestep per (batch-tile, t) grid point.
# -----------------------------------------------------------------------------
def _decoder_step_kernel(
    dlen_smem,      # (Bp,)  int32 scalar-prefetch: decode lengths (sorted desc)
    enc_ref,        # (TB, Pp, Ep)  bf16 encoder_out tile (resident per batch tile)
    emb_ref,        # (1, TB, Emp)  bf16 embeddings for step t
    dlen_ref,       # (TB, 1)       int32 decode lengths (per-row mask)
    w_ea, b_ea,     # encoder_att:   (Ep, Ap) bf16, (1, Ap) f32
    w_fa,           # full_att row:  (1, Ap) f32 (bias dropped: softmax-shift-invariant)
    w_init, b_init, # [init_h|init_c]: (Ep, 2*Dp) bf16, (1, 2*Dp) f32
    w_hf, b_hf,     # fused h proj [dec_att|f_beta|W_hh]: (Dp, Ap+Ep+4Dp) bf16, bias f32
    w_ih_emb,       # LSTM input weight, emb rows: (Emp, 4*Dp) bf16
    w_ih_awe,       # LSTM input weight, awe rows: (Ep, 4*Dp) bf16
    w_fc, b_fc,     # fc: (Dp, Vp) bf16, (1, Vp) f32
    preds_ref,      # out (1, TB, Vp) bf16
    alphas_ref,     # out (1, TB, Pp) f32
    h_scr, c_scr,   # VMEM scratch (TB, Dp) f32 — carried across t within a tile
    att1_scr,       # VMEM scratch (TB, Pp, Ap) bf16 — time-invariant enc projection
    *, num_pixels,
):
    b = pl.program_id(0)
    t = pl.program_id(1)

    TB, P_pad, E_pad = enc_ref.shape
    A_pad = att1_scr.shape[-1]
    D_pad = h_scr.shape[-1]

    # Lengths are sorted descending, so row 0 holds this tile's max length.
    # Skip all MXU/VPU work for (tile, t) points past it (ragged lengths).
    tile_active = dlen_smem[b * TB] > t

    @pl.when(tile_active)
    def _step():
        # ---- once per batch tile: att1 precompute + init_hidden_state ------
        @pl.when(t == 0)
        def _init():
            enc = enc_ref[...]                                    # (TB,Pp,Ep) bf16
            enc2d = enc.reshape(TB * P_pad, E_pad)
            att1 = jnp.dot(enc2d, w_ea[...], preferred_element_type=jnp.float32)
            att1_scr[...] = (att1.reshape(TB, P_pad, A_pad)
                             + b_ea[...]).astype(att1_scr.dtype)
            # mean over the *true* pixels (padded rows are zero)
            mean_enc = jnp.sum(enc.astype(jnp.float32), axis=1) * (1.0 / float(num_pixels))
            hc0 = jnp.dot(mean_enc.astype(jnp.bfloat16), w_init[...],
                          preferred_element_type=jnp.float32) + b_init[...]
            h_scr[...] = hc0[:, :D_pad]
            c_scr[...] = hc0[:, D_pad:]

        h = h_scr[...]                                            # (TB, Dp) f32
        c = c_scr[...]                                            # (TB, Dp) f32

        # emb half of the LSTM input matmul: independent of the attention
        # chain, so its MXU work overlaps the attention VPU/XLU phase.
        emb_t = emb_ref[0]                                        # (TB, Emp) bf16
        emb_gates = jnp.dot(emb_t, w_ih_emb[...],
                            preferred_element_type=jnp.float32)   # (TB, 4Dp)

        # ---- one fused matmul for everything driven by h --------------------
        h_proj = jnp.dot(h.astype(jnp.bfloat16), w_hf[...],
                         preferred_element_type=jnp.float32) + b_hf[...]
        att2     = h_proj[:, :A_pad]                              # decoder_att(h)+b
        gate_pre = h_proj[:, A_pad:A_pad + E_pad]                 # f_beta(h)+b
        hh_gates = h_proj[:, A_pad + E_pad:]                      # h@W_hh + b_ih + b_hh

        # ---- Attention: att1 stored bf16, epilogue in f32 --------------------
        att1 = att1_scr[...].astype(jnp.float32)                  # (TB, Pp, Ap)
        att_pre = jnp.maximum(att1 + att2[:, None, :], 0.0)
        att = jnp.sum(att_pre * w_fa[...], axis=-1)               # (TB, Pp)
        if P_pad > num_pixels:                                    # static: only if padded
            pix_valid = jax.lax.broadcasted_iota(jnp.int32, (TB, P_pad), 1) < num_pixels
            att = jnp.where(pix_valid, att, -1e30)                # f32 mask (not bf16-safe)
        att_max = jnp.max(att, axis=-1, keepdims=True)
        att_exp = jnp.exp(att - att_max)
        alpha = att_exp / jnp.sum(att_exp, axis=-1, keepdims=True)  # (TB, Pp) f32

        # attention-weighted encoding on the MXU (batched bf16, f32 acc) -------
        awe = jnp.einsum("bqp,bpe->bqe",
                         alpha[:, None, :].astype(jnp.bfloat16), enc_ref[...],
                         preferred_element_type=jnp.float32)[:, 0, :]   # (TB, Ep)

        gate = jax.nn.sigmoid(gate_pre)
        awe = gate * awe

        # ---- LSTMCell gates ---------------------------------------------------
        awe_gates = jnp.dot(awe.astype(jnp.bfloat16), w_ih_awe[...],
                            preferred_element_type=jnp.float32)
        gates = emb_gates + awe_gates + hh_gates                  # (TB, 4Dp)
        i_g = jax.nn.sigmoid(gates[:, 0 * D_pad:1 * D_pad])       # 128-aligned slices
        f_g = jax.nn.sigmoid(gates[:, 1 * D_pad:2 * D_pad])
        g_g = jnp.tanh(gates[:, 2 * D_pad:3 * D_pad])
        o_g = jax.nn.sigmoid(gates[:, 3 * D_pad:4 * D_pad])
        c_new = f_g * c + i_g * g_g
        h_new = o_g * jnp.tanh(c_new)

        # ---- fc head ------------------------------------------------------------
        # TODO(synk): nn.Dropout(p=0.5) in training mode is stochastic; modeled as
        # eval-mode identity.
        # TODO(synk): for very large vocab on v7x, stream w_fc in Vp column tiles
        # instead of keeping the full (Dp, Vp) weight resident.
        preds = jnp.dot(h_new.astype(jnp.bfloat16), w_fc[...],
                        preferred_element_type=jnp.float32) + b_fc[...]

        # ---- masked update (emulates batch_size_t slicing, lengths sorted desc) -
        active = dlen_ref[...] > t                                # (TB, 1) bool
        h_scr[...] = jnp.where(active, h_new, h)
        c_scr[...] = jnp.where(active, c_new, c)
        preds_ref[0] = jnp.where(active, preds, 0.0).astype(preds_ref.dtype)
        alphas_ref[0] = jnp.where(active, alpha, 0.0)

    @pl.when(jnp.logical_not(tile_active))
    def _skip():
        preds_ref[...] = jnp.zeros_like(preds_ref)
        alphas_ref[...] = jnp.zeros_like(alphas_ref)


# -----------------------------------------------------------------------------
# Parameters in PyTorch layout (deterministic).
# -----------------------------------------------------------------------------
def init_params(key, attention_dim, embed_dim, decoder_dim, vocab_size, encoder_dim):
    A, Em, D, V, E = attention_dim, embed_dim, decoder_dim, vocab_size, encoder_dim
    ks = jax.random.split(key, 18)

    def u(k, shape, scale=0.1):
        return jax.random.uniform(k, shape, jnp.float32, -scale, scale)

    p = {}
    p["embedding"] = u(ks[0], (V, Em))                       # uniform_(-0.1, 0.1)
    p["encoder_att_w"] = u(ks[1], (A, E)); p["encoder_att_b"] = u(ks[2], (A,))
    p["decoder_att_w"] = u(ks[3], (A, D)); p["decoder_att_b"] = u(ks[4], (A,))
    p["full_att_w"] = u(ks[5], (1, A));    p["full_att_b"] = u(ks[6], (1,))
    p["init_h_w"] = u(ks[7], (D, E));      p["init_h_b"] = u(ks[8], (D,))
    p["init_c_w"] = u(ks[9], (D, E));      p["init_c_b"] = u(ks[10], (D,))
    p["f_beta_w"] = u(ks[11], (E, D));     p["f_beta_b"] = u(ks[12], (E,))
    p["lstm_w_ih"] = u(ks[13], (4 * D, Em + E))              # gate order i,f,g,o
    p["lstm_w_hh"] = u(ks[14], (4 * D, D))
    p["lstm_b_ih"] = u(ks[15], (4 * D,))
    p["lstm_b_hh"] = u(ks[16], (4 * D,))
    p["fc_w"] = u(ks[17], (V, D))                            # uniform_(-0.1, 0.1)
    p["fc_b"] = jnp.zeros((V,), jnp.float32)                 # fc.bias.fill_(0)
    return p


# -----------------------------------------------------------------------------
# Pad / fuse weights into the kernel layout (lane-aligned segments, bf16 matmul
# operands, f32 biases).
# -----------------------------------------------------------------------------
def prepare_kernel_weights(params):
    A, E = params["encoder_att_w"].shape
    D = params["init_h_w"].shape[0]
    V = params["fc_w"].shape[0]
    Em = params["embedding"].shape[1]
    Ap, Ep, Dp, Vp, Emp = (_round_up(x, 128) for x in (A, E, D, V, Em))
    f32, bf16 = jnp.float32, jnp.bfloat16

    def pad2(x, r, c):
        return jnp.pad(x, ((0, r - x.shape[0]), (0, c - x.shape[1])))

    w_ea = pad2(params["encoder_att_w"].T, Ep, Ap).astype(bf16)
    b_ea = jnp.pad(params["encoder_att_b"], (0, Ap - A)).reshape(1, Ap).astype(f32)
    # full_att weight used as a VPU multiplier; its bias is constant over pixels
    # and cancels in the softmax, so it is dropped from the kernel.
    w_fa = jnp.pad(params["full_att_w"][0], (0, Ap - A)).reshape(1, Ap).astype(f32)

    w_init = jnp.concatenate(
        [pad2(params["init_h_w"].T, Ep, Dp), pad2(params["init_c_w"].T, Ep, Dp)],
        axis=1).astype(bf16)
    b_init = jnp.concatenate(
        [jnp.pad(params["init_h_b"], (0, Dp - D)),
         jnp.pad(params["init_c_b"], (0, Dp - D))]).reshape(1, 2 * Dp).astype(f32)

    def pad_gate_cols(w_t, rows_p):          # (X, 4D) -> (rows_p, 4*Dp), per-gate padded
        X = w_t.shape[0]
        g = w_t.reshape(X, 4, D)
        g = jnp.pad(g, ((0, rows_p - X), (0, 0), (0, Dp - D)))
        return g.reshape(rows_p, 4 * Dp)

    def pad_gate_bias(bvec):                 # (4D,) -> (1, 4*Dp)
        return jnp.pad(bvec.reshape(4, D), ((0, 0), (0, Dp - D))).reshape(1, 4 * Dp)

    w_hh_p = pad_gate_cols(params["lstm_w_hh"].T, Dp)
    b_gates = (pad_gate_bias(params["lstm_b_ih"]) +
               pad_gate_bias(params["lstm_b_hh"])).astype(f32)

    # fused h projection [decoder_att | f_beta | W_hh], all segments 128-aligned
    w_hf = jnp.concatenate(
        [pad2(params["decoder_att_w"].T, Dp, Ap),
         pad2(params["f_beta_w"].T, Dp, Ep),
         w_hh_p], axis=1).astype(bf16)
    b_hf = jnp.concatenate(
        [jnp.pad(params["decoder_att_b"], (0, Ap - A)).reshape(1, Ap),
         jnp.pad(params["f_beta_b"], (0, Ep - E)).reshape(1, Ep),
         b_gates], axis=1).astype(f32)

    # LSTM input weight split into emb / awe halves (no per-step concatenate)
    w_ih_t = params["lstm_w_ih"].T                           # (Em+E, 4D)
    w_ih_emb = pad_gate_cols(w_ih_t[:Em], Emp).astype(bf16)  # (Emp, 4*Dp)
    w_ih_awe = pad_gate_cols(w_ih_t[Em:], Ep).astype(bf16)   # (Ep, 4*Dp)

    w_fc = pad2(params["fc_w"].T, Dp, Vp).astype(bf16)
    b_fc = jnp.pad(params["fc_b"], (0, Vp - V)).reshape(1, Vp).astype(f32)

    weights = [w_ea, b_ea, w_fa, w_init, b_init, w_hf, b_hf,
               w_ih_emb, w_ih_awe, w_fc, b_fc]
    dims = dict(A=A, E=E, D=D, V=V, Em=Em, Ap=Ap, Ep=Ep, Dp=Dp, Vp=Vp, Emp=Emp)
    return weights, dims


def _default_vmem_limit_bytes():
    try:
        kind = jax.devices()[0].device_kind.lower()
    except Exception:
        kind = ""
    if any(tag in kind for tag in ("v4", "v5", "v6")):
        return 96 * 1024 * 1024     # 128 MiB physical VMEM parts: spend it on tiles
    return 56 * 1024 * 1024         # v7x: stay inside the 64 MiB/TC budget


# -----------------------------------------------------------------------------
# Forward wrapper (sort, embed, pad, call pallas_call).
# -----------------------------------------------------------------------------
def decoder_forward(params, encoder_out, encoded_captions, caption_lengths,
                    *, batch_tile=16, max_decode_length=None, vmem_limit_bytes=None):
    B = encoder_out.shape[0]
    E = encoder_out.shape[-1]
    enc = encoder_out.reshape(B, -1, E)                      # (B, P, E)
    P = enc.shape[1]

    weights, dims = prepare_kernel_weights(params)
    V, Em = dims["V"], dims["Em"]
    Vp, Emp, Ap, Ep, Dp = dims["Vp"], dims["Emp"], dims["Ap"], dims["Ep"], dims["Dp"]
    # pixel axis is only ever a sublane dim (enc/att1) or a full-extent lane dim
    # (alphas out block), so pad to 16 (bf16 sublane), not 128.
    Pp = _round_up(P, 16)

    # sort by caption length (descending), as in the reference module
    cap_len = caption_lengths[:, 0]
    sort_ind = jnp.argsort(-cap_len)
    cap_len_sorted = cap_len[sort_ind]
    enc = enc[sort_ind]
    caps_sorted = encoded_captions[sort_ind]
    decode_lengths = cap_len_sorted - 1

    if max_decode_length is None:
        # NOTE: host sync; pass max_decode_length for a jit-friendly static bound.
        T = int(jnp.max(decode_lengths))
    else:
        T = int(max_decode_length)

    # >=16 preferred for MXU row occupancy / bf16 sublane packing on real batches;
    # small demo batches fall back to an 8-row tile to avoid pure padding.
    TB = max(8, min(int(batch_tile), _round_up(B, 8)))
    Bp = _round_up(max(B, TB), TB)
    nb = Bp // TB

    # padded, lane-dense kernel inputs (bf16 matmul operands)
    enc_p = jnp.zeros((Bp, Pp, Ep), jnp.bfloat16).at[:B, :P, :E].set(
        enc.astype(jnp.bfloat16))
    dlen_i32 = decode_lengths.astype(jnp.int32)
    dlen_flat = jnp.zeros((Bp,), jnp.int32).at[:B].set(dlen_i32)       # SMEM prefetch
    dlen_col = jnp.zeros((Bp, 1), jnp.int32).at[:B, 0].set(dlen_i32)   # per-row mask
    emb = params["embedding"][caps_sorted[:, :T]]                      # (B, T, Em)
    emb_tm = jnp.zeros((T, Bp, Emp), jnp.bfloat16).at[:, :B, :Em].set(
        jnp.transpose(emb, (1, 0, 2)).astype(jnp.bfloat16))

    if vmem_limit_bytes is None:
        vmem_limit_bytes = _default_vmem_limit_bytes()

    kernel = functools.partial(_decoder_step_kernel, num_pixels=P)
    out_shape = (jax.ShapeDtypeStruct((T, Bp, Vp), jnp.bfloat16),
                 jax.ShapeDtypeStruct((T, Bp, Pp), jnp.float32))
    scratch_shapes = [
        pltpu.VMEM((TB, Dp), jnp.float32),                 # h carry
        pltpu.VMEM((TB, Dp), jnp.float32),                 # c carry
        pltpu.VMEM((TB, Pp, Ap), jnp.bfloat16),            # hoisted att1 (bf16)
    ]

    def build_call(single_buffer_weights):
        def w_spec(w):
            nd = w.ndim
            imap = lambda b, t, dl, _nd=nd: (0,) * _nd
            if single_buffer_weights:
                # weights never change across the grid: one VMEM buffer is enough
                return pl.BlockSpec(w.shape, imap, pipeline_mode=pl.Buffered(1))
            return pl.BlockSpec(w.shape, imap)

        in_specs = [
            pl.BlockSpec((TB, Pp, Ep), lambda b, t, dl: (b, 0, 0)),   # encoder tile
            pl.BlockSpec((1, TB, Emp), lambda b, t, dl: (t, b, 0)),   # embeddings[t]
            pl.BlockSpec((TB, 1), lambda b, t, dl: (b, 0)),           # decode lengths
        ] + [w_spec(w) for w in weights]
        out_specs = [
            pl.BlockSpec((1, TB, Vp), lambda b, t, dl: (t, b, 0)),    # predictions
            pl.BlockSpec((1, TB, Pp), lambda b, t, dl: (t, b, 0)),    # alphas
        ]
        grid_spec = pltpu.PrefetchScalarGridSpec(
            num_scalar_prefetch=1,
            grid=(nb, T),
            in_specs=in_specs,
            out_specs=out_specs,
            scratch_shapes=scratch_shapes,
        )
        return pl.pallas_call(
            kernel,
            out_shape=out_shape,
            grid_spec=grid_spec,
            compiler_params=pltpu.CompilerParams(
                dimension_semantics=("parallel", "arbitrary"),   # megacore over batch tiles
                vmem_limit_bytes=vmem_limit_bytes,
            ),
        )

    args = (dlen_flat, enc_p, emb_tm, dlen_col, *weights)
    try:
        preds_tm, alphas_tm = build_call(True)(*args)
    except Exception:
        # Some JAX builds reject pipeline_mode=pl.Buffered(1); fall back to the
        # default (double-buffered) weight blocks rather than failing to run.
        preds_tm, alphas_tm = build_call(False)(*args)

    predictions = jnp.transpose(preds_tm[:, :B, :V].astype(jnp.float32), (1, 0, 2))
    alphas = jnp.transpose(alphas_tm[:, :B, :P], (1, 0, 2))
    return predictions, caps_sorted, decode_lengths, alphas, sort_ind


# -----------------------------------------------------------------------------
# Plain-JAX reference mirroring the kernel's bf16 rounding points.
# -----------------------------------------------------------------------------
def reference_forward(params, encoder_out, encoded_captions, caption_lengths):
    f32, bf16 = jnp.float32, jnp.bfloat16
    B = encoder_out.shape[0]
    E = encoder_out.shape[-1]
    enc = encoder_out.reshape(B, -1, E)
    P = enc.shape[1]
    cap_len = caption_lengths[:, 0]
    sort_ind = jnp.argsort(-cap_len)
    enc = enc[sort_ind].astype(bf16)
    caps_sorted = encoded_captions[sort_ind]
    decode_lengths = cap_len[sort_ind] - 1
    T = int(jnp.max(decode_lengths))
    A = params["encoder_att_w"].shape[0]
    D = params["init_h_w"].shape[0]
    V = params["fc_w"].shape[0]

    def dot_bf(a, w_t):
        return jnp.dot(a.astype(bf16), w_t.astype(bf16), preferred_element_type=f32)

    emb = params["embedding"][caps_sorted].astype(bf16)
    mean_enc = jnp.sum(enc.astype(f32), axis=1) * (1.0 / P)
    h = dot_bf(mean_enc, params["init_h_w"].T) + params["init_h_b"]
    c = dot_bf(mean_enc, params["init_c_w"].T) + params["init_c_b"]
    att1 = (dot_bf(enc.reshape(B * P, E), params["encoder_att_w"].T)
            .reshape(B, P, A) + params["encoder_att_b"]).astype(bf16)   # stored bf16

    preds_out = jnp.zeros((B, T, V), f32)
    alphas_out = jnp.zeros((B, T, P), f32)
    for t in range(T):
        att2 = dot_bf(h, params["decoder_att_w"].T) + params["decoder_att_b"]
        att_pre = jnp.maximum(att1.astype(f32) + att2[:, None, :], 0.0)
        att = jnp.sum(att_pre * params["full_att_w"][0], axis=-1) + params["full_att_b"][0]
        att_exp = jnp.exp(att - jnp.max(att, axis=-1, keepdims=True))
        alpha = att_exp / jnp.sum(att_exp, axis=-1, keepdims=True)
        awe = jnp.einsum("bp,bpe->be", alpha.astype(bf16), enc,
                         preferred_element_type=f32)
        gate = jax.nn.sigmoid(dot_bf(h, params["f_beta_w"].T) + params["f_beta_b"])
        awe = gate * awe
        x = jnp.concatenate([emb[:, t, :], awe.astype(bf16)], axis=-1)
        gates = (dot_bf(x, params["lstm_w_ih"].T) + params["lstm_b_ih"]
                 + dot_bf(h, params["lstm_w_hh"].T) + params["lstm_b_hh"])
        i_g = jax.nn.sigmoid(gates[:, 0:D])
        f_g = jax.nn.sigmoid(gates[:, D:2 * D])
        g_g = jnp.tanh(gates[:, 2 * D:3 * D])
        o_g = jax.nn.sigmoid(gates[:, 3 * D:4 * D])
        c_new = f_g * c + i_g * g_g
        h_new = o_g * jnp.tanh(c_new)
        preds = (dot_bf(h_new, params["fc_w"].T) + params["fc_b"]).astype(bf16).astype(f32)
        active = (decode_lengths > t)[:, None]
        h = jnp.where(active, h_new, h)
        c = jnp.where(active, c_new, c)
        preds_out = preds_out.at[:, t, :].set(jnp.where(active, preds, 0.0))
        alphas_out = alphas_out.at[:, t, :].set(jnp.where(active, alpha, 0.0))
    return preds_out, caps_sorted, decode_lengths, alphas_out, sort_ind


# -----------------------------------------------------------------------------
if __name__ == "__main__":
    attention_dim = 32
    embed_dim = 16
    decoder_dim = 32
    vocab_size = 80
    encoder_dim = 32
    enc_image_size = 4          # -> num_pixels = 16
    batch = 4
    max_caption_length = 8

    key = jax.random.PRNGKey(0)
    k_par, k_enc, k_cap = jax.random.split(key, 3)

    params = init_params(k_par, attention_dim, embed_dim, decoder_dim,
                         vocab_size, encoder_dim)
    encoder_out = jax.random.normal(
        k_enc, (batch, enc_image_size, enc_image_size, encoder_dim), jnp.float32)
    encoded_captions = jax.random.randint(
        k_cap, (batch, max_caption_length), 0, vocab_size, jnp.int32)
    caption_lengths = jnp.array([[5], [8], [3], [6]], jnp.int32)

    preds, caps_sorted, dec_lens, alphas, sort_ind = decoder_forward(
        params, encoder_out, encoded_captions, caption_lengths)
    jax.block_until_ready(preds)
    jax.block_until_ready(alphas)

    assert preds.shape == (batch, 7, vocab_size)
    assert alphas.shape == (batch, 7, enc_image_size * enc_image_size)

    # sanity check against a plain-JAX reference with matching precision points
    ref_preds, ref_caps, _, ref_alphas, _ = reference_forward(
        params, encoder_out, encoded_captions, caption_lengths)
    err_p = float(jnp.max(jnp.abs(preds - ref_preds)))
    err_a = float(jnp.max(jnp.abs(alphas - ref_alphas)))
    assert bool(jnp.all(caps_sorted == ref_caps))
    assert err_p < 2e-2, f"prediction mismatch: {err_p}"
    assert err_a < 2e-2, f"alpha mismatch: {err_a}"

    print("KERNEL_OK")
</pallas_src>

<mosaic_0001>
module attributes {stable_mosaic.version = 11 : i64} {
  func.func @_decoder_step_kernel(%arg0: i32, %arg1: i32, %arg2: memref<8xi32, #tpu.memory_space<smem>>, %arg3: memref<8x16x128xbf16, #tpu.memory_space<vmem>>, %arg4: memref<1x8x128xbf16, #tpu.memory_space<vmem>>, %arg5: memref<8x1xi32, #tpu.memory_space<vmem>>, %arg6: memref<128x128xbf16, #tpu.memory_space<vmem>>, %arg7: memref<1x128xf32, #tpu.memory_space<vmem>>, %arg8: memref<1x128xf32, #tpu.memory_space<vmem>>, %arg9: memref<128x256xbf16, #tpu.memory_space<vmem>>, %arg10: memref<1x256xf32, #tpu.memory_space<vmem>>, %arg11: memref<128x768xbf16, #tpu.memory_space<vmem>>, %arg12: memref<1x768xf32, #tpu.memory_space<vmem>>, %arg13: memref<128x512xbf16, #tpu.memory_space<vmem>>, %arg14: memref<128x512xbf16, #tpu.memory_space<vmem>>, %arg15: memref<128x128xbf16, #tpu.memory_space<vmem>>, %arg16: memref<1x128xf32, #tpu.memory_space<vmem>>, %arg17: memref<1x8x128xbf16, #tpu.memory_space<vmem>>, %arg18: memref<1x8x16xf32, #tpu.memory_space<vmem>>, %arg19: memref<8x128xf32, #tpu.memory_space<vmem>>, %arg20: memref<8x128xf32, #tpu.memory_space<vmem>>, %arg21: memref<8x16x128xbf16, #tpu.memory_space<vmem>>) attributes {dimension_semantics = [#tpu.dimension_semantics<parallel>, #tpu.dimension_semantics<arbitrary>], iteration_bounds = array<i64: 1, 7>, scalar_prefetch = 1 : i64, scratch_operands = 3 : i64, tpu.core_type = #tpu.core_type<tc>, window_params = [{transform_indices = @transform_0, window_bounds = array<i64: 8, 16, 128>}, {transform_indices = @transform_1, window_bounds = array<i64: 1, 8, 128>}, {transform_indices = @transform_2, window_bounds = array<i64: 8, 1>}, {pipeline_mode = #tpu.pipeline_mode<synchronous>, transform_indices = @transform_3, window_bounds = array<i64: 128, 128>}, {pipeline_mode = #tpu.pipeline_mode<synchronous>, transform_indices = @transform_4, window_bounds = array<i64: 1, 128>}, {pipeline_mode = #tpu.pipeline_mode<synchronous>, transform_indices = @transform_5, window_bounds = array<i64: 1, 128>}, {pipeline_mode = #tpu.pipeline_mode<synchronous>, transform_indices = @transform_6, window_bounds = array<i64: 128, 256>}, {pipeline_mode = #tpu.pipeline_mode<synchronous>, transform_indices = @transform_7, window_bounds = array<i64: 1, 256>}, {pipeline_mode = #tpu.pipeline_mode<synchronous>, transform_indices = @transform_8, window_bounds = array<i64: 128, 768>}, {pipeline_mode = #tpu.pipeline_mode<synchronous>, transform_indices = @transform_9, window_bounds = array<i64: 1, 768>}, {pipeline_mode = #tpu.pipeline_mode<synchronous>, transform_indices = @transform_10, window_bounds = array<i64: 128, 512>}, {pipeline_mode = #tpu.pipeline_mode<synchronous>, transform_indices = @transform_11, window_bounds = array<i64: 128, 512>}, {pipeline_mode = #tpu.pipeline_mode<synchronous>, transform_indices = @transform_12, window_bounds = array<i64: 128, 128>}, {pipeline_mode = #tpu.pipeline_mode<synchronous>, transform_indices = @transform_13, window_bounds = array<i64: 1, 128>}, {transform_indices = @transform_14, window_bounds = array<i64: 1, 8, 128>}, {transform_indices = @transform_15, window_bounds = array<i64: 1, 8, 16>}]} {
    %c8_i32 = arith.constant 8 : i32
    %0 = arith.muli %arg0, %c8_i32 : i32
    %1 = arith.index_cast %0 : i32 to index
    %2 = memref.load %arg2[%1] : memref<8xi32, #tpu.memory_space<smem>>
    %3 = arith.cmpi sgt, %2, %arg1 : i32
    %4 = arith.extui %3 : i1 to i32
    %c0_i32 = arith.constant 0 : i32
    %5 = arith.cmpi ne, %4, %c0_i32 : i32
    scf.if %5 {
      %c0_i32_1 = arith.constant 0 : i32
      %9 = arith.cmpi eq, %arg1, %c0_i32_1 : i32
      %10 = arith.extui %9 : i1 to i32
      %c0_i32_2 = arith.constant 0 : i32
      %11 = arith.cmpi ne, %10, %c0_i32_2 : i32
      scf.if %11 {
        %c0_55 = arith.constant 0 : index
        %c0_56 = arith.constant 0 : index
        %c0_57 = arith.constant 0 : index
        %121 = vector.load %arg3[%c0_55, %c0_56, %c0_57] : memref<8x16x128xbf16, #tpu.memory_space<vmem>>, vector<8x16x128xbf16>
        %122 = vector.shape_cast %121 : vector<8x16x128xbf16> to vector<128x128xbf16>
        %c0_58 = arith.constant 0 : index
        %c0_59 = arith.constant 0 : index
        %123 = vector.load %arg6[%c0_58, %c0_59] : memref<128x128xbf16, #tpu.memory_space<vmem>>, vector<128x128xbf16>
        %cst_60 = arith.constant dense<0.000000e+00> : vector<128x128xf32>
        %124 = tpu.matmul %122, %123, %cst_60 {dimension_numbers = #tpu.dot_dimension_numbers<[1], [0], [0], [1], [0, 0, 1, 1], [], []>} : vector<128x128xbf16>, vector<128x128xbf16>, vector<128x128xf32> -> vector<128x128xf32>
        %125 = vector.shape_cast %124 : vector<128x128xf32> to vector<8x16x128xf32>
        %c0_61 = arith.constant 0 : index
        %c0_62 = arith.constant 0 : index
        %126 = vector.load %arg7[%c0_61, %c0_62] : memref<1x128xf32, #tpu.memory_space<vmem>>, vector<1x128xf32>
        %127 = vector.shape_cast %126 : vector<1x128xf32> to vector<1x1x128xf32>
        %128 = vector.broadcast %127 : vector<1x1x128xf32> to vector<8x16x128xf32>
        %129 = arith.addf %125, %128 : vector<8x16x128xf32>
        %130 = arith.truncf %129 : vector<8x16x128xf32> to vector<8x16x128xbf16>
        %c0_63 = arith.constant 0 : index
        %c0_64 = arith.constant 0 : index
        %c0_65 = arith.constant 0 : index
        %131 = vector.load %arg21[%c0_63, %c0_64, %c0_65] : memref<8x16x128xbf16, #tpu.memory_space<vmem>>, vector<8x16x128xbf16>
        tpu.vector_store %arg21[%c0_63, %c0_64, %c0_65], %130 {strides = array<i32>} : memref<8x16x128xbf16, #tpu.memory_space<vmem>>, vector<8x16x128xbf16>,
        %132 = arith.extf %121 : vector<8x16x128xbf16> to vector<8x16x128xf32>
        %cst_66 = arith.constant dense<0.000000e+00> : vector<8x128xf32>
        %133 = vector.multi_reduction <add>, %132, %cst_66 [1] : vector<8x16x128xf32> to vector<8x128xf32>
        %cst_67 = arith.constant 6.250000e-02 : f32
        %134 = vector.broadcast %cst_67 : f32 to vector<8x128xf32>
        %135 = arith.mulf %133, %134 : vector<8x128xf32>
        %136 = arith.truncf %135 : vector<8x128xf32> to vector<8x128xbf16>
        %c0_68 = arith.constant 0 : index
        %c0_69 = arith.constant 0 : index
        %137 = vector.load %arg9[%c0_68, %c0_69] : memref<128x256xbf16, #tpu.memory_space<vmem>>, vector<128x256xbf16>
        %cst_70 = arith.constant dense<0.000000e+00> : vector<8x256xf32>
        %138 = tpu.matmul %136, %137, %cst_70 {dimension_numbers = #tpu.dot_dimension_numbers<[1], [0], [0], [1], [0, 0, 1, 1], [], []>} : vector<8x128xbf16>, vector<128x256xbf16>, vector<8x256xf32> -> vector<8x256xf32>
        %c0_71 = arith.constant 0 : index
        %c0_72 = arith.constant 0 : index
        %139 = vector.load %arg10[%c0_71, %c0_72] : memref<1x256xf32, #tpu.memory_space<vmem>>, vector<1x256xf32>
        %140 = vector.broadcast %139 : vector<1x256xf32> to vector<8x256xf32>
        %141 = arith.addf %138, %140 : vector<8x256xf32>
        %142 = vector.extract_strided_slice %141 {offsets = [0, 0], sizes = [8, 128], strides = [1, 1]} : vector<8x256xf32> to vector<8x128xf32>
        %c0_73 = arith.constant 0 : index
        %c0_74 = arith.constant 0 : index
        %143 = vector.load %arg19[%c0_73, %c0_74] : memref<8x128xf32, #tpu.memory_space<vmem>>, vector<8x128xf32>
        tpu.vector_store %arg19[%c0_73, %c0_74], %142 {strides = array<i32>} : memref<8x128xf32, #tpu.memory_space<vmem>>, vector<8x128xf32>,
        %144 = vector.extract_strided_slice %141 {offsets = [0, 128], sizes = [8, 128], strides = [1, 1]} : vector<8x256xf32> to vector<8x128xf32>
        %c0_75 = arith.constant 0 : index
        %c0_76 = arith.constant 0 : index
        %145 = vector.load %arg20[%c0_75, %c0_76] : memref<8x128xf32, #tpu.memory_space<vmem>>, vector<8x128xf32>
        tpu.vector_store %arg20[%c0_75, %c0_76], %144 {strides = array<i32>} : memref<8x128xf32, #tpu.memory_space<vmem>>, vector<8x128xf32>,
      } else {
      }
      %c0 = arith.constant 0 : index
      %c0_3 = arith.constant 0 : index
      %12 = vector.load %arg19[%c0, %c0_3] : memref<8x128xf32, #tpu.memory_space<vmem>>, vector<8x128xf32>
      %c0_4 = arith.constant 0 : index
      %c0_5 = arith.constant 0 : index
      %13 = vector.load %arg20[%c0_4, %c0_5] : memref<8x128xf32, #tpu.memory_space<vmem>>, vector<8x128xf32>
      %c0_6 = arith.constant 0 : index
      %c0_7 = arith.constant 0 : index
      %c0_8 = arith.constant 0 : index
      %14 = vector.load %arg4[%c0_6, %c0_7, %c0_8] : memref<1x8x128xbf16, #tpu.memory_space<vmem>>, vector<1x8x128xbf16>
      %15 = vector.shape_cast %14 : vector<1x8x128xbf16> to vector<8x128xbf16>
      %c0_9 = arith.constant 0 : index
      %c0_10 = arith.constant 0 : index
      %16 = vector.load %arg13[%c0_9, %c0_10] : memref<128x512xbf16, #tpu.memory_space<vmem>>, vector<128x512xbf16>
      %cst = arith.constant dense<0.000000e+00> : vector<8x512xf32>
      %17 = tpu.matmul %15, %16, %cst {dimension_numbers = #tpu.dot_dimension_numbers<[1], [0], [0], [1], [0, 0, 1, 1], [], []>} : vector<8x128xbf16>, vector<128x512xbf16>, vector<8x512xf32> -> vector<8x512xf32>
      %18 = arith.truncf %12 : vector<8x128xf32> to vector<8x128xbf16>
      %c0_11 = arith.constant 0 : index
      %c0_12 = arith.constant 0 : index
      %19 = vector.load %arg11[%c0_11, %c0_12] : memref<128x768xbf16, #tpu.memory_space<vmem>>, vector<128x768xbf16>
      %cst_13 = arith.constant dense<0.000000e+00> : vector<8x768xf32>
      %20 = tpu.matmul %18, %19, %cst_13 {dimension_numbers = #tpu.dot_dimension_numbers<[1], [0], [0], [1], [0, 0, 1, 1], [], []>} : vector<8x128xbf16>, vector<128x768xbf16>, vector<8x768xf32> -> vector<8x768xf32>
      %c0_14 = arith.constant 0 : index
      %c0_15 = arith.constant 0 : index
      %21 = vector.load %arg12[%c0_14, %c0_15] : memref<1x768xf32, #tpu.memory_space<vmem>>, vector<1x768xf32>
      %22 = vector.broadcast %21 : vector<1x768xf32> to vector<8x768xf32>
      %23 = arith.addf %20, %22 : vector<8x768xf32>
      %24 = vector.extract_strided_slice %23 {offsets = [0, 0], sizes = [8, 128], strides = [1, 1]} : vector<8x768xf32> to vector<8x128xf32>
      %25 = vector.extract_strided_slice %23 {offsets = [0, 128], sizes = [8, 128], strides = [1, 1]} : vector<8x768xf32> to vector<8x128xf32>
      %26 = vector.extract_strided_slice %23 {offsets = [0, 256], sizes = [8, 512], strides = [1, 1]} : vector<8x768xf32> to vector<8x512xf32>
      %c0_16 = arith.constant 0 : index
      %c0_17 = arith.constant 0 : index
      %c0_18 = arith.constant 0 : index
      %27 = vector.load %arg21[%c0_16, %c0_17, %c0_18] : memref<8x16x128xbf16, #tpu.memory_space<vmem>>, vector<8x16x128xbf16>
      %28 = arith.extf %27 : vector<8x16x128xbf16> to vector<8x16x128xf32>
      %29 = vector.shape_cast %24 : vector<8x128xf32> to vector<8x1x128xf32>
      %30 = vector.broadcast %29 : vector<8x1x128xf32> to vector<8x16x128xf32>
      %31 = arith.addf %28, %30 : vector<8x16x128xf32>
      %cst_19 = arith.constant 0.000000e+00 : f32
      %32 = vector.broadcast %cst_19 : f32 to vector<8x16x128xf32>
      %33 = arith.maximumf %31, %32 : vector<8x16x128xf32>
      %c0_20 = arith.constant 0 : index
      %c0_21 = arith.constant 0 : index
      %34 = vector.load %arg8[%c0_20, %c0_21] : memref<1x128xf32, #tpu.memory_space<vmem>>, vector<1x128xf32>
      %35 = vector.shape_cast %34 : vector<1x128xf32> to vector<1x1x128xf32>
      %36 = vector.broadcast %35 : vector<1x1x128xf32> to vector<8x16x128xf32>
      %37 = arith.mulf %33, %36 : vector<8x16x128xf32>
      %cst_22 = arith.constant dense<0.000000e+00> : vector<8x16xf32>
      %38 = vector.multi_reduction <add>, %37, %cst_22 [2] : vector<8x16x128xf32> to vector<8x16xf32>
      %cst_23 = arith.constant dense<0xFF800000> : vector<8xf32>
      %39 = vector.multi_reduction <maximumf>, %38, %cst_23 [1] : vector<8x16xf32> to vector<8xf32>
      %40 = vector.shape_cast %39 : vector<8xf32> to vector<8x1xf32>
      %41 = vector.broadcast %40 : vector<8x1xf32> to vector<8x16xf32>
      %42 = arith.subf %38, %41 : vector<8x16xf32>
      %43 = math.exp %42 : vector<8x16xf32>
      %cst_24 = arith.constant dense<0.000000e+00> : vector<8xf32>
      %44 = vector.multi_reduction <add>, %43, %cst_24 [1] : vector<8x16xf32> to vector<8xf32>
      %45 = vector.shape_cast %44 : vector<8xf32> to vector<8x1xf32>
      %46 = vector.broadcast %45 : vector<8x1xf32> to vector<8x16xf32>
      %47 = arith.divf %43, %46 : vector<8x16xf32>
      %48 = vector.shape_cast %47 : vector<8x16xf32> to vector<8x1x16xf32>
      %49 = arith.truncf %48 : vector<8x1x16xf32> to vector<8x1x16xbf16>
      %c0_25 = arith.constant 0 : index
      %c0_26 = arith.constant 0 : index
      %c0_27 = arith.constant 0 : index
      %50 = vector.load %arg3[%c0_25, %c0_26, %c0_27] : memref<8x16x128xbf16, #tpu.memory_space<vmem>>, vector<8x16x128xbf16>
      "tpu.trace_start"() <{level = 10 : i32, message = "bqp,bpe->bqe"}> : () -> ()
      %cst_28 = arith.constant dense<0.000000e+00> : vector<8x1x128xf32>
      %51 = tpu.matmul %49, %50, %cst_28 {dimension_numbers = #tpu.dot_dimension_numbers<[2], [1], [1], [2], [0, 0, 0, 1, 1, 2], [0], [0]>} : vector<8x1x16xbf16>, vector<8x16x128xbf16>, vector<8x1x128xf32> -> vector<8x1x128xf32>
      "tpu.trace_stop"() : () -> ()
      %52 = vector.shape_cast %51 : vector<8x1x128xf32> to vector<8x128xf32>
      %53 = arith.negf %25 : vector<8x128xf32>
      %54 = math.exp %53 : vector<8x128xf32>
      %cst_29 = arith.constant 1.000000e+00 : f32
      %55 = vector.broadcast %cst_29 : f32 to vector<8x128xf32>
      %56 = arith.addf %55, %54 : vector<8x128xf32>
      %57 = arith.divf %55, %56 : vector<8x128xf32>
      %58 = arith.mulf %57, %52 : vector<8x128xf32>
      %59 = arith.truncf %58 : vector<8x128xf32> to vector<8x128xbf16>
      %c0_30 = arith.constant 0 : index
      %c0_31 = arith.constant 0 : index
      %60 = vector.load %arg14[%c0_30, %c0_31] : memref<128x512xbf16, #tpu.memory_space<vmem>>, vector<128x512xbf16>
      %cst_32 = arith.constant dense<0.000000e+00> : vector<8x512xf32>
      %61 = tpu.matmul %59, %60, %cst_32 {dimension_numbers = #tpu.dot_dimension_numbers<[1], [0], [0], [1], [0, 0, 1, 1], [], []>} : vector<8x128xbf16>, vector<128x512xbf16>, vector<8x512xf32> -> vector<8x512xf32>
      %62 = arith.addf %17, %61 : vector<8x512xf32>
      %63 = arith.addf %62, %26 : vector<8x512xf32>
      %64 = vector.extract_strided_slice %63 {offsets = [0, 0], sizes = [8, 128], strides = [1, 1]} : vector<8x512xf32> to vector<8x128xf32>
      %65 = arith.negf %64 : vector<8x128xf32>
      %66 = math.exp %65 : vector<8x128xf32>
      %cst_33 = arith.constant 1.000000e+00 : f32
      %67 = vector.broadcast %cst_33 : f32 to vector<8x128xf32>
      %68 = arith.addf %67, %66 : vector<8x128xf32>
      %69 = arith.divf %67, %68 : vector<8x128xf32>
      %70 = vector.extract_strided_slice %63 {offsets = [0, 128], sizes = [8, 128], strides = [1, 1]} : vector<8x512xf32> to vector<8x128xf32>
      %71 = arith.negf %70 : vector<8x128xf32>
      %72 = math.exp %71 : vector<8x128xf32>
      %cst_34 = arith.constant 1.000000e+00 : f32
      %73 = vector.broadcast %cst_34 : f32 to vector<8x128xf32>
      %74 = arith.addf %73, %72 : vector<8x128xf32>
      %75 = arith.divf %73, %74 : vector<8x128xf32>
      %76 = vector.extract_strided_slice %63 {offsets = [0, 256], sizes = [8, 128], strides = [1, 1]} : vector<8x512xf32> to vector<8x128xf32>
      %77 = math.tanh %76 : vector<8x128xf32>
      %78 = vector.extract_strided_slice %63 {offsets = [0, 384], sizes = [8, 128], strides = [1, 1]} : vector<8x512xf32> to vector<8x128xf32>
      %79 = arith.negf %78 : vector<8x128xf32>
      %80 = math.exp %79 : vector<8x128xf32>
      %cst_35 = arith.constant 1.000000e+00 : f32
      %81 = vector.broadcast %cst_35 : f32 to vector<8x128xf32>
      %82 = arith.addf %81, %80 : vector<8x128xf32>
      %83 = arith.divf %81, %82 : vector<8x128xf32>
      %84 = arith.mulf %75, %13 : vector<8x128xf32>
      %85 = arith.mulf %69, %77 : vector<8x128xf32>
      %86 = arith.addf %84, %85 : vector<8x128xf32>
      %87 = math.tanh %86 : vector<8x128xf32>
      %88 = arith.mulf %83, %87 : vector<8x128xf32>
      %89 = arith.truncf %88 : vector<8x128xf32> to vector<8x128xbf16>
      %c0_36 = arith.constant 0 : index
      %c0_37 = arith.constant 0 : index
      %90 = vector.load %arg15[%c0_36, %c0_37] : memref<128x128xbf16, #tpu.memory_space<vmem>>, vector<128x128xbf16>
      %cst_38 = arith.constant dense<0.000000e+00> : vector<8x128xf32>
      %91 = tpu.matmul %89, %90, %cst_38 {dimension_numbers = #tpu.dot_dimension_numbers<[1], [0], [0], [1], [0, 0, 1, 1], [], []>} : vector<8x128xbf16>, vector<128x128xbf16>, vector<8x128xf32> -> vector<8x128xf32>
      %c0_39 = arith.constant 0 : index
      %c0_40 = arith.constant 0 : index
      %92 = vector.load %arg16[%c0_39, %c0_40] : memref<1x128xf32, #tpu.memory_space<vmem>>, vector<1x128xf32>
      %93 = vector.broadcast %92 : vector<1x128xf32> to vector<8x128xf32>
      %94 = arith.addf %91, %93 : vector<8x128xf32>
      %c0_41 = arith.constant 0 : index
      %c0_42 = arith.constant 0 : index
      %95 = vector.load %arg5[%c0_41, %c0_42] : memref<8x1xi32, #tpu.memory_space<vmem>>, vector<8x1xi32>
      %96 = vector.broadcast %arg1 : i32 to vector<8x1xi32>
      %97 = arith.cmpi sgt, %95, %96 : vector<8x1xi32>
      %98 = vector.shape_cast %97 : vector<8x1xi1> to vector<8x1xi1>
      %99 = vector.broadcast %98 : vector<8x1xi1> to vector<8x128xi1>
      %100 = arith.select %99, %88, %12 : vector<8x128xi1>, vector<8x128xf32>
      %c0_43 = arith.constant 0 : index
      %c0_44 = arith.constant 0 : index
      %101 = vector.load %arg19[%c0_43, %c0_44] : memref<8x128xf32, #tpu.memory_space<vmem>>, vector<8x128xf32>
      tpu.vector_store %arg19[%c0_43, %c0_44], %100 {strides = array<i32>} : memref<8x128xf32, #tpu.memory_space<vmem>>, vector<8x128xf32>,
      %102 = vector.shape_cast %97 : vector<8x1xi1> to vector<8x1xi1>
      %103 = vector.broadcast %102 : vector<8x1xi1> to vector<8x128xi1>
      %104 = arith.select %103, %86, %13 : vector<8x128xi1>, vector<8x128xf32>
      %c0_45 = arith.constant 0 : index
      %c0_46 = arith.constant 0 : index
      %105 = vector.load %arg20[%c0_45, %c0_46] : memref<8x128xf32, #tpu.memory_space<vmem>>, vector<8x128xf32>
      tpu.vector_store %arg20[%c0_45, %c0_46], %104 {strides = array<i32>} : memref<8x128xf32, #tpu.memory_space<vmem>>, vector<8x128xf32>,
      %cst_47 = arith.constant 0.000000e+00 : f32
      %106 = vector.shape_cast %97 : vector<8x1xi1> to vector<8x1xi1>
      %107 = vector.broadcast %106 : vector<8x1xi1> to vector<8x128xi1>
      %108 = vector.broadcast %cst_47 : f32 to vector<8x128xf32>
      %109 = arith.select %107, %94, %108 : vector<8x128xi1>, vector<8x128xf32>
      %110 = arith.truncf %109 : vector<8x128xf32> to vector<8x128xbf16>
      %c0_48 = arith.constant 0 : index
      %c0_49 = arith.constant 0 : index
      %c0_50 = arith.constant 0 : index
      %111 = vector.load %arg17[%c0_48, %c0_49, %c0_50] : memref<1x8x128xbf16, #tpu.memory_space<vmem>>, vector<1x8x128xbf16>
      %112 = vector.shape_cast %111 : vector<1x8x128xbf16> to vector<8x128xbf16>
      %113 = vector.shape_cast %110 : vector<8x128xbf16> to vector<1x8x128xbf16>
      tpu.vector_store %arg17[%c0_48, %c0_49, %c0_50], %113 {strides = array<i32>} : memref<1x8x128xbf16, #tpu.memory_space<vmem>>, vector<1x8x128xbf16>,
      %cst_51 = arith.constant 0.000000e+00 : f32
      %114 = vector.shape_cast %97 : vector<8x1xi1> to vector<8x1xi1>
      %115 = vector.broadcast %114 : vector<8x1xi1> to vector<8x16xi1>
      %116 = vector.broadcast %cst_51 : f32 to vector<8x16xf32>
      %117 = arith.select %115, %47, %116 : vector<8x16xi1>, vector<8x16xf32>
      %c0_52 = arith.constant 0 : index
      %c0_53 = arith.constant 0 : index
      %c0_54 = arith.constant 0 : index
      %118 = vector.load %arg18[%c0_52, %c0_53, %c0_54] : memref<1x8x16xf32, #tpu.memory_space<vmem>>, vector<1x8x16xf32>
      %119 = vector.shape_cast %118 : vector<1x8x16xf32> to vector<8x16xf32>
      %120 = vector.shape_cast %117 : vector<8x16xf32> to vector<1x8x16xf32>
      tpu.vector_store %arg18[%c0_52, %c0_53, %c0_54], %120 {strides = array<i32>} : memref<1x8x16xf32, #tpu.memory_space<vmem>>, vector<1x8x16xf32>,
    } else {
    }
    %true = arith.constant true
    %6 = arith.xori %3, %true : i1
    %7 = arith.extui %6 : i1 to i32
    %c0_i32_0 = arith.constant 0 : i32
    %8 = arith.cmpi ne, %7, %c0_i32_0 : i32
    scf.if %8 {
      %cst = arith.constant 0.000000e+00 : bf16
      %9 = vector.broadcast %cst : bf16 to vector<1x8x128xbf16>
      %c0 = arith.constant 0 : index
      %c0_1 = arith.constant 0 : index
      %c0_2 = arith.constant 0 : index
      %10 = vector.load %arg17[%c0, %c0_1, %c0_2] : memref<1x8x128xbf16, #tpu.memory_space<vmem>>, vector<1x8x128xbf16>
      tpu.vector_store %arg17[%c0, %c0_1, %c0_2], %9 {strides = array<i32>} : memref<1x8x128xbf16, #tpu.memory_space<vmem>>, vector<1x8x128xbf16>,
      %cst_3 = arith.constant 0.000000e+00 : f32
      %11 = vector.broadcast %cst_3 : f32 to vector<1x8x16xf32>
      %c0_4 = arith.constant 0 : index
      %c0_5 = arith.constant 0 : index
      %c0_6 = arith.constant 0 : index
      %12 = vector.load %arg18[%c0_4, %c0_5, %c0_6] : memref<1x8x16xf32, #tpu.memory_space<vmem>>, vector<1x8x16xf32>
      tpu.vector_store %arg18[%c0_4, %c0_5, %c0_6], %11 {strides = array<i32>} : memref<1x8x16xf32, #tpu.memory_space<vmem>>, vector<1x8x16xf32>,
    } else {
    }
    return
  }
  func.func @transform_0(%arg0: i32, %arg1: i32, %arg2: memref<8xi32, #tpu.memory_space<smem>>) -> (i32, i32, i32) {
    %c0_i32 = arith.constant 0 : i32
    %c0_i32_0 = arith.constant 0 : i32
    %c0_i32_1 = arith.constant 0 : i32
    return %arg0, %c0_i32, %c0_i32_0 : i32, i32, i32
  }
  func.func @transform_1(%arg0: i32, %arg1: i32, %arg2: memref<8xi32, #tpu.memory_space<smem>>) -> (i32, i32, i32) {
    %c0_i32 = arith.constant 0 : i32
    %c0_i32_0 = arith.constant 0 : i32
    return %arg1, %arg0, %c0_i32 : i32, i32, i32
  }
  func.func @transform_2(%arg0: i32, %arg1: i32, %arg2: memref<8xi32, #tpu.memory_space<smem>>) -> (i32, i32) {
    %c0_i32 = arith.constant 0 : i32
    %c0_i32_0 = arith.constant 0 : i32
    return %arg0, %c0_i32 : i32, i32
  }
  func.func @transform_3(%arg0: i32, %arg1: i32, %arg2: memref<8xi32, #tpu.memory_space<smem>>) -> (i32, i32) {
    %c0_i32 = arith.constant 0 : i32
    %c0_i32_0 = arith.constant 0 : i32
    %c0_i32_1 = arith.constant 0 : i32
    return %c0_i32, %c0_i32_0 : i32, i32
  }
  func.func @transform_4(%arg0: i32, %arg1: i32, %arg2: memref<8xi32, #tpu.memory_space<smem>>) -> (i32, i32) {
    %c0_i32 = arith.constant 0 : i32
    %c0_i32_0 = arith.constant 0 : i32
    %c0_i32_1 = arith.constant 0 : i32
    return %c0_i32, %c0_i32_0 : i32, i32
  }
  func.func @transform_5(%arg0: i32, %arg1: i32, %arg2: memref<8xi32, #tpu.memory_space<smem>>) -> (i32, i32) {
    %c0_i32 = arith.constant 0 : i32
    %c0_i32_0 = arith.constant 0 : i32
    %c0_i32_1 = arith.constant 0 : i32
    return %c0_i32, %c0_i32_0 : i32, i32
  }
  func.func @transform_6(%arg0: i32, %arg1: i32, %arg2: memref<8xi32, #tpu.memory_space<smem>>) -> (i32, i32) {
    %c0_i32 = arith.constant 0 : i32
    %c0_i32_0 = arith.constant 0 : i32
    %c0_i32_1 = arith.constant 0 : i32
    return %c0_i32, %c0_i32_0 : i32, i32
  }
  func.func @transform_7(%arg0: i32, %arg1: i32, %arg2: memref<8xi32, #tpu.memory_space<smem>>) -> (i32, i32) {
    %c0_i32 = arith.constant 0 : i32
    %c0_i32_0 = arith.constant 0 : i32
    %c0_i32_1 = arith.constant 0 : i32
    return %c0_i32, %c0_i32_0 : i32, i32
  }
  func.func @transform_8(%arg0: i32, %arg1: i32, %arg2: memref<8xi32, #tpu.memory_space<smem>>) -> (i32, i32) {
    %c0_i32 = arith.constant 0 : i32
    %c0_i32_0 = arith.constant 0 : i32
    %c0_i32_1 = arith.constant 0 : i32
    return %c0_i32, %c0_i32_0 : i32, i32
  }
  func.func @transform_9(%arg0: i32, %arg1: i32, %arg2: memref<8xi32, #tpu.memory_space<smem>>) -> (i32, i32) {
    %c0_i32 = arith.constant 0 : i32
    %c0_i32_0 = arith.constant 0 : i32
    %c0_i32_1 = arith.constant 0 : i32
    return %c0_i32, %c0_i32_0 : i32, i32
  }
  func.func @transform_10(%arg0: i32, %arg1: i32, %arg2: memref<8xi32, #tpu.memory_space<smem>>) -> (i32, i32) {
    %c0_i32 = arith.constant 0 : i32
    %c0_i32_0 = arith.constant 0 : i32
    %c0_i32_1 = arith.constant 0 : i32
    return %c0_i32, %c0_i32_0 : i32, i32
  }
  func.func @transform_11(%arg0: i32, %arg1: i32, %arg2: memref<8xi32, #tpu.memory_space<smem>>) -> (i32, i32) {
    %c0_i32 = arith.constant 0 : i32
    %c0_i32_0 = arith.constant 0 : i32
    %c0_i32_1 = arith.constant 0 : i32
    return %c0_i32, %c0_i32_0 : i32, i32
  }
  func.func @transform_12(%arg0: i32, %arg1: i32, %arg2: memref<8xi32, #tpu.memory_space<smem>>) -> (i32, i32) {
    %c0_i32 = arith.constant 0 : i32
    %c0_i32_0 = arith.constant 0 : i32
    %c0_i32_1 = arith.constant 0 : i32
    return %c0_i32, %c0_i32_0 : i32, i32
  }
  func.func @transform_13(%arg0: i32, %arg1: i32, %arg2: memref<8xi32, #tpu.memory_space<smem>>) -> (i32, i32) {
    %c0_i32 = arith.constant 0 : i32
    %c0_i32_0 = arith.constant 0 : i32
    %c0_i32_1 = arith.constant 0 : i32
    return %c0_i32, %c0_i32_0 : i32, i32
  }
  func.func @transform_14(%arg0: i32, %arg1: i32, %arg2: memref<8xi32, #tpu.memory_space<smem>>) -> (i32, i32, i32) {
    %c0_i32 = arith.constant 0 : i32
    %c0_i32_0 = arith.constant 0 : i32
    return %arg1, %arg0, %c0_i32 : i32, i32, i32
  }
  func.func @transform_15(%arg0: i32, %arg1: i32, %arg2: memref<8xi32, #tpu.memory_space<smem>>) -> (i32, i32, i32) {
    %c0_i32 = arith.constant 0 : i32
    %c0_i32_0 = arith.constant 0 : i32
    return %arg1, %arg0, %c0_i32 : i32, i32, i32
  }
}

module attributes {stable_mosaic.version = 11 : i64} {
  func.func @_decoder_step_kernel(%arg0: i32, %arg1: i32, %arg2: memref<8xi32, #tpu.memory_space<smem>>, %arg3: memref<8x16x128xbf16, #tpu.memory_space<vmem>>, %arg4: memref<1x8x128xbf16, #tpu.memory_space<vmem>>, %arg5: memref<8x1xi32, #tpu.memory_space<vmem>>, %arg6: memref<128x128xbf16, #tpu.memory_space<vmem>>, %arg7: memref<1x128xf32, #tpu.memory_space<vmem>>, %arg8: memref<1x128xf32, #tpu.memory_space<vmem>>, %arg9: memref<128x256xbf16, #tpu.memory_space<vmem>>, %arg10: memref<1x256xf32, #tpu.memory_space<vmem>>, %arg11: memref<128x768xbf16, #tpu.memory_space<vmem>>, %arg12: memref<1x768xf32, #tpu.memory_space<vmem>>, %arg13: memref<128x512xbf16, #tpu.memory_space<vmem>>, %arg14: memref<128x512xbf16, #tpu.memory_space<vmem>>, %arg15: memref<128x128xbf16, #tpu.memory_space<vmem>>, %arg16: memref<1x128xf32, #tpu.memory_space<vmem>>, %arg17: memref<1x8x128xbf16, #tpu.memory_space<vmem>>, %arg18: memref<1x8x16xf32, #tpu.memory_space<vmem>>, %arg19: memref<8x128xf32, #tpu.memory_space<vmem>>, %arg20: memref<8x128xf32, #tpu.memory_space<vmem>>, %arg21: memref<8x16x128xbf16, #tpu.memory_space<vmem>>) attributes {dimension_semantics = [#tpu.dimension_semantics<parallel>, #tpu.dimension_semantics<arbitrary>], iteration_bounds = array<i64: 1, 7>, scalar_prefetch = 1 : i64, scratch_operands = 3 : i64, tpu.core_type = #tpu.core_type<tc>, window_params = [{transform_indices = @transform_0, window_bounds = array<i64: 8, 16, 128>}, {transform_indices = @transform_1, window_bounds = array<i64: 1, 8, 128>}, {transform_indices = @transform_2, window_bounds = array<i64: 8, 1>}, {pipeline_mode = #tpu.pipeline_mode<synchronous>, transform_indices = @transform_3, window_bounds = array<i64: 128, 128>}, {pipeline_mode = #tpu.pipeline_mode<synchronous>, transform_indices = @transform_4, window_bounds = array<i64: 1, 128>}, {pipeline_mode = #tpu.pipeline_mode<synchronous>, transform_indices = @transform_5, window_bounds = array<i64: 1, 128>}, {pipeline_mode = #tpu.pipeline_mode<synchronous>, transform_indices = @transform_6, window_bounds = array<i64: 128, 256>}, {pipeline_mode = #tpu.pipeline_mode<synchronous>, transform_indices = @transform_7, window_bounds = array<i64: 1, 256>}, {pipeline_mode = #tpu.pipeline_mode<synchronous>, transform_indices = @transform_8, window_bounds = array<i64: 128, 768>}, {pipeline_mode = #tpu.pipeline_mode<synchronous>, transform_indices = @transform_9, window_bounds = array<i64: 1, 768>}, {pipeline_mode = #tpu.pipeline_mode<synchronous>, transform_indices = @transform_10, window_bounds = array<i64: 128, 512>}, {pipeline_mode = #tpu.pipeline_mode<synchronous>, transform_indices = @transform_11, window_bounds = array<i64: 128, 512>}, {pipeline_mode = #tpu.pipeline_mode<synchronous>, transform_indices = @transform_12, window_bounds = array<i64: 128, 128>}, {pipeline_mode = #tpu.pipeline_mode<synchronous>, transform_indices = @transform_13, window_bounds = array<i64: 1, 128>}, {transform_indices = @transform_14, window_bounds = array<i64: 1, 8, 128>}, {transform_indices = @transform_15, window_bounds = array<i64: 1, 8, 16>}]} {
    %c8_i32 = arith.constant 8 : i32
    %0 = arith.muli %arg0, %c8_i32 : i32
    %1 = arith.index_cast %0 : i32 to index
    %2 = memref.load %arg2[%1] : memref<8xi32, #tpu.memory_space<smem>>
    %3 = arith.cmpi sgt, %2, %arg1 : i32
    %4 = arith.extui %3 : i1 to i32
    %c0_i32 = arith.constant 0 : i32
    %5 = arith.cmpi ne, %4, %c0_i32 : i32
    scf.if %5 {
      %c0_i32_1 = arith.constant 0 : i32
      %9 = arith.cmpi eq, %arg1, %c0_i32_1 : i32
      %10 = arith.extui %9 : i1 to i32
      %c0_i32_2 = arith.constant 0 : i32
      %11 = arith.cmpi ne, %10, %c0_i32_2 : i32
      scf.if %11 {
        %c0_55 = arith.constant 0 : index
        %c0_56 = arith.constant 0 : index
        %c0_57 = arith.constant 0 : index
        %121 = vector.load %arg3[%c0_55, %c0_56, %c0_57] : memref<8x16x128xbf16, #tpu.memory_space<vmem>>, vector<8x16x128xbf16>
        %122 = vector.shape_cast %121 : vector<8x16x128xbf16> to vector<128x128xbf16>
        %c0_58 = arith.constant 0 : index
        %c0_59 = arith.constant 0 : index
        %123 = vector.load %arg6[%c0_58, %c0_59] : memref<128x128xbf16, #tpu.memory_space<vmem>>, vector<128x128xbf16>
        %cst_60 = arith.constant dense<0.000000e+00> : vector<128x128xf32>
        %124 = tpu.matmul %122, %123, %cst_60 {dimension_numbers = #tpu.dot_dimension_numbers<[1], [0], [0], [1], [0, 0, 1, 1], [], []>} : vector<128x128xbf16>, vector<128x128xbf16>, vector<128x128xf32> -> vector<128x128xf32>
        %125 = vector.shape_cast %124 : vector<128x128xf32> to vector<8x16x128xf32>
        %c0_61 = arith.constant 0 : index
        %c0_62 = arith.constant 0 : index
        %126 = vector.load %arg7[%c0_61, %c0_62] : memref<1x128xf32, #tpu.memory_space<vmem>>, vector<1x128xf32>
        %127 = vector.shape_cast %126 : vector<1x128xf32> to vector<1x1x128xf32>
        %128 = vector.broadcast %127 : vector<1x1x128xf32> to vector<8x16x128xf32>
        %129 = arith.addf %125, %128 : vector<8x16x128xf32>
        %130 = arith.truncf %129 : vector<8x16x128xf32> to vector<8x16x128xbf16>
        %c0_63 = arith.constant 0 : index
        %c0_64 = arith.constant 0 : index
        %c0_65 = arith.constant 0 : index
        %131 = vector.load %arg21[%c0_63, %c0_64, %c0_65] : memref<8x16x128xbf16, #tpu.memory_space<vmem>>, vector<8x16x128xbf16>
        tpu.vector_store %arg21[%c0_63, %c0_64, %c0_65], %130 {strides = array<i32>} : memref<8x16x128xbf16, #tpu.memory_space<vmem>>, vector<8x16x128xbf16>,
        %132 = arith.extf %121 : vector<8x16x128xbf16> to vector<8x16x128xf32>
        %cst_66 = arith.constant dense<0.000000e+00> : vector<8x128xf32>
        %133 = vector.multi_reduction <add>, %132, %cst_66 [1] : vector<8x16x128xf32> to vector<8x128xf32>
        %cst_67 = arith.constant 6.250000e-02 : f32
        %134 = vector.broadcast %cst_67 : f32 to vector<8x128xf32>
        %135 = arith.mulf %133, %134 : vector<8x128xf32>
        %136 = arith.truncf %135 : vector<8x128xf32> to vector<8x128xbf16>
        %c0_68 = arith.constant 0 : index
        %c0_69 = arith.constant 0 : index
        %137 = vector.load %arg9[%c0_68, %c0_69] : memref<128x256xbf16, #tpu.memory_space<vmem>>, vector<128x256xbf16>
        %cst_70 = arith.constant dense<0.000000e+00> : vector<8x256xf32>
        %138 = tpu.matmul %136, %137, %cst_70 {dimension_numbers = #tpu.dot_dimension_numbers<[1], [0], [0], [1], [0, 0, 1, 1], [], []>} : vector<8x128xbf16>, vector<128x256xbf16>, vector<8x256xf32> -> vector<8x256xf32>
        %c0_71 = arith.constant 0 : index
        %c0_72 = arith.constant 0 : index
        %139 = vector.load %arg10[%c0_71, %c0_72] : memref<1x256xf32, #tpu.memory_space<vmem>>, vector<1x256xf32>
        %140 = vector.broadcast %139 : vector<1x256xf32> to vector<8x256xf32>
        %141 = arith.addf %138, %140 : vector<8x256xf32>
        %142 = vector.extract_strided_slice %141 {offsets = [0, 0], sizes = [8, 128], strides = [1, 1]} : vector<8x256xf32> to vector<8x128xf32>
        %c0_73 = arith.constant 0 : index
        %c0_74 = arith.constant 0 : index
        %143 = vector.load %arg19[%c0_73, %c0_74] : memref<8x128xf32, #tpu.memory_space<vmem>>, vector<8x128xf32>
        tpu.vector_store %arg19[%c0_73, %c0_74], %142 {strides = array<i32>} : memref<8x128xf32, #tpu.memory_space<vmem>>, vector<8x128xf32>,
        %144 = vector.extract_strided_slice %141 {offsets = [0, 128], sizes = [8, 128], strides = [1, 1]} : vector<8x256xf32> to vector<8x128xf32>
        %c0_75 = arith.constant 0 : index
        %c0_76 = arith.constant 0 : index
        %145 = vector.load %arg20[%c0_75, %c0_76] : memref<8x128xf32, #tpu.memory_space<vmem>>, vector<8x128xf32>
        tpu.vector_store %arg20[%c0_75, %c0_76], %144 {strides = array<i32>} : memref<8x128xf32, #tpu.memory_space<vmem>>, vector<8x128xf32>,
      } else {
      }
      %c0 = arith.constant 0 : index
      %c0_3 = arith.constant 0 : index
      %12 = vector.load %arg19[%c0, %c0_3] : memref<8x128xf32, #tpu.memory_space<vmem>>, vector<8x128xf32>
      %c0_4 = arith.constant 0 : index
      %c0_5 = arith.constant 0 : index
      %13 = vector.load %arg20[%c0_4, %c0_5] : memref<8x128xf32, #tpu.memory_space<vmem>>, vector<8x128xf32>
      %c0_6 = arith.constant 0 : index
      %c0_7 = arith.constant 0 : index
      %c0_8 = arith.constant 0 : index
      %14 = vector.load %arg4[%c0_6, %c0_7, %c0_8] : memref<1x8x128xbf16, #tpu.memory_space<vmem>>, vector<1x8x128xbf16>
      %15 = vector.shape_cast %14 : vector<1x8x128xbf16> to vector<8x128xbf16>
      %c0_9 = arith.constant 0 : index
      %c0_10 = arith.constant 0 : index
      %16 = vector.load %arg13[%c0_9, %c0_10] : memref<128x512xbf16, #tpu.memory_space<vmem>>, vector<128x512xbf16>
      %cst = arith.constant dense<0.000000e+00> : vector<8x512xf32>
      %17 = tpu.matmul %15, %16, %cst {dimension_numbers = #tpu.dot_dimension_numbers<[1], [0], [0], [1], [0, 0, 1, 1], [], []>} : vector<8x128xbf16>, vector<128x512xbf16>, vector<8x512xf32> -> vector<8x512xf32>
      %18 = arith.truncf %12 : vector<8x128xf32> to vector<8x128xbf16>
      %c0_11 = arith.constant 0 : index
      %c0_12 = arith.constant 0 : index
      %19 = vector.load %arg11[%c0_11, %c0_12] : memref<128x768xbf16, #tpu.memory_space<vmem>>, vector<128x768xbf16>
      %cst_13 = arith.constant dense<0.000000e+00> : vector<8x768xf32>
      %20 = tpu.matmul %18, %19, %cst_13 {dimension_numbers = #tpu.dot_dimension_numbers<[1], [0], [0], [1], [0, 0, 1, 1], [], []>} : vector<8x128xbf16>, vector<128x768xbf16>, vector<8x768xf32> -> vector<8x768xf32>
      %c0_14 = arith.constant 0 : index
      %c0_15 = arith.constant 0 : index
      %21 = vector.load %arg12[%c0_14, %c0_15] : memref<1x768xf32, #tpu.memory_space<vmem>>, vector<1x768xf32>
      %22 = vector.broadcast %21 : vector<1x768xf32> to vector<8x768xf32>
      %23 = arith.addf %20, %22 : vector<8x768xf32>
      %24 = vector.extract_strided_slice %23 {offsets = [0, 0], sizes = [8, 128], strides = [1, 1]} : vector<8x768xf32> to vector<8x128xf32>
      %25 = vector.extract_strided_slice %23 {offsets = [0, 128], sizes = [8, 128], strides = [1, 1]} : vector<8x768xf32> to vector<8x128xf32>
      %26 = vector.extract_strided_slice %23 {offsets = [0, 256], sizes = [8, 512], strides = [1, 1]} : vector<8x768xf32> to vector<8x512xf32>
      %c0_16 = arith.constant 0 : index
      %c0_17 = arith.constant 0 : index
      %c0_18 = arith.constant 0 : index
      %27 = vector.load %arg21[%c0_16, %c0_17, %c0_18] : memref<8x16x128xbf16, #tpu.memory_space<vmem>>, vector<8x16x128xbf16>
      %28 = arith.extf %27 : vector<8x16x128xbf16> to vector<8x16x128xf32>
      %29 = vector.shape_cast %24 : vector<8x128xf32> to vector<8x1x128xf32>
      %30 = vector.broadcast %29 : vector<8x1x128xf32> to vector<8x16x128xf32>
      %31 = arith.addf %28, %30 : vector<8x16x128xf32>
      %cst_19 = arith.constant 0.000000e+00 : f32
      %32 = vector.broadcast %cst_19 : f32 to vector<8x16x128xf32>
      %33 = arith.maximumf %31, %32 : vector<8x16x128xf32>
      %c0_20 = arith.constant 0 : index
      %c0_21 = arith.constant 0 : index
      %34 = vector.load %arg8[%c0_20, %c0_21] : memref<1x128xf32, #tpu.memory_space<vmem>>, vector<1x128xf32>
      %35 = vector.shape_cast %34 : vector<1x128xf32> to vector<1x1x128xf32>
      %36 = vector.broadcast %35 : vector<1x1x128xf32> to vector<8x16x128xf32>
      %37 = arith.mulf %33, %36 : vector<8x16x128xf32>
      %cst_22 = arith.constant dense<0.000000e+00> : vector<8x16xf32>
      %38 = vector.multi_reduction <add>, %37, %cst_22 [2] : vector<8x16x128xf32> to vector<8x16xf32>
      %cst_23 = arith.constant dense<0xFF800000> : vector<8xf32>
      %39 = vector.multi_reduction <maximumf>, %38, %cst_23 [1] : vector<8x16xf32> to vector<8xf32>
      %40 = vector.shape_cast %39 : vector<8xf32> to vector<8x1xf32>
      %41 = vector.broadcast %40 : vector<8x1xf32> to vector<8x16xf32>
      %42 = arith.subf %38, %41 : vector<8x16xf32>
      %43 = math.exp %42 : vector<8x16xf32>
      %cst_24 = arith.constant dense<0.000000e+00> : vector<8xf32>
      %44 = vector.multi_reduction <add>, %43, %cst_24 [1] : vector<8x16xf32> to vector<8xf32>
      %45 = vector.shape_cast %44 : vector<8xf32> to vector<8x1xf32>
      %46 = vector.broadcast %45 : vector<8x1xf32> to vector<8x16xf32>
      %47 = arith.divf %43, %46 : vector<8x16xf32>
      %48 = vector.shape_cast %47 : vector<8x16xf32> to vector<8x1x16xf32>
      %49 = arith.truncf %48 : vector<8x1x16xf32> to vector<8x1x16xbf16>
      %c0_25 = arith.constant 0 : index
      %c0_26 = arith.constant 0 : index
      %c0_27 = arith.constant 0 : index
      %50 = vector.load %arg3[%c0_25, %c0_26, %c0_27] : memref<8x16x128xbf16, #tpu.memory_space<vmem>>, vector<8x16x128xbf16>
      "tpu.trace_start"() <{level = 10 : i32, message = "bqp,bpe->bqe"}> : () -> ()
      %cst_28 = arith.constant dense<0.000000e+00> : vector<8x1x128xf32>
      %51 = tpu.matmul %49, %50, %cst_28 {dimension_numbers = #tpu.dot_dimension_numbers<[2], [1], [1], [2], [0, 0, 0, 1, 1, 2], [0], [0]>} : vector<8x1x16xbf16>, vector<8x16x128xbf16>, vector<8x1x128xf32> -> vector<8x1x128xf32>
      "tpu.trace_stop"() : () -> ()
      %52 = vector.shape_cast %51 : vector<8x1x128xf32> to vector<8x128xf32>
      %53 = arith.negf %25 : vector<8x128xf32>
      %54 = math.exp %53 : vector<8x128xf32>
      %cst_29 = arith.constant 1.000000e+00 : f32
      %55 = vector.broadcast %cst_29 : f32 to vector<8x128xf32>
      %56 = arith.addf %55, %54 : vector<8x128xf32>
      %57 = arith.divf %55, %56 : vector<8x128xf32>
      %58 = arith.mulf %57, %52 : vector<8x128xf32>
      %59 = arith.truncf %58 : vector<8x128xf32> to vector<8x128xbf16>
      %c0_30 = arith.constant 0 : index
      %c0_31 = arith.constant 0 : index
      %60 = vector.load %arg14[%c0_30, %c0_31] : memref<128x512xbf16, #tpu.memory_space<vmem>>, vector<128x512xbf16>
      %cst_32 = arith.constant dense<0.000000e+00> : vector<8x512xf32>
      %61 = tpu.matmul %59, %60, %cst_32 {dimension_numbers = #tpu.dot_dimension_numbers<[1], [0], [0], [1], [0, 0, 1, 1], [], []>} : vector<8x128xbf16>, vector<128x512xbf16>, vector<8x512xf32> -> vector<8x512xf32>
      %62 = arith.addf %17, %61 : vector<8x512xf32>
      %63 = arith.addf %62, %26 : vector<8x512xf32>
      %64 = vector.extract_strided_slice %63 {offsets = [0, 0], sizes = [8, 128], strides = [1, 1]} : vector<8x512xf32> to vector<8x128xf32>
      %65 = arith.negf %64 : vector<8x128xf32>
      %66 = math.exp %65 : vector<8x128xf32>
      %cst_33 = arith.constant 1.000000e+00 : f32
      %67 = vector.broadcast %cst_33 : f32 to vector<8x128xf32>
      %68 = arith.addf %67, %66 : vector<8x128xf32>
      %69 = arith.divf %67, %68 : vector<8x128xf32>
      %70 = vector.extract_strided_slice %63 {offsets = [0, 128], sizes = [8, 128], strides = [1, 1]} : vector<8x512xf32> to vector<8x128xf32>
      %71 = arith.negf %70 : vector<8x128xf32>
      %72 = math.exp %71 : vector<8x128xf32>
      %cst_34 = arith.constant 1.000000e+00 : f32
      %73 = vector.broadcast %cst_34 : f32 to vector<8x128xf32>
      %74 = arith.addf %73, %72 : vector<8x128xf32>
      %75 = arith.divf %73, %74 : vector<8x128xf32>
      %76 = vector.extract_strided_slice %63 {offsets = [0, 256], sizes = [8, 128], strides = [1, 1]} : vector<8x512xf32> to vector<8x128xf32>
      %77 = math.tanh %76 : vector<8x128xf32>
      %78 = vector.extract_strided_slice %63 {offsets = [0, 384], sizes = [8, 128], strides = [1, 1]} : vector<8x512xf32> to vector<8x128xf32>
      %79 = arith.negf %78 : vector<8x128xf32>
      %80 = math.exp %79 : vector<8x128xf32>
      %cst_35 = arith.constant 1.000000e+00 : f32
      %81 = vector.broadcast %cst_35 : f32 to vector<8x128xf32>
      %82 = arith.addf %81, %80 : vector<8x128xf32>
      %83 = arith.divf %81, %82 : vector<8x128xf32>
      %84 = arith.mulf %75, %13 : vector<8x128xf32>
      %85 = arith.mulf %69, %77 : vector<8x128xf32>
      %86 = arith.addf %84, %85 : vector<8x128xf32>
      %87 = math.tanh %86 : vector<8x128xf32>
      %88 = arith.mulf %83, %87 : vector<8x128xf32>
      %89 = arith.truncf %88 : vector<8x128xf32> to vector<8x128xbf16>
      %c0_36 = arith.constant 0 : index
      %c0_37 = arith.constant 0 : index
      %90 = vector.load %arg15[%c0_36, %c0_37] : memref<128x128xbf16, #tpu.memory_space<vmem>>, vector<128x128xbf16>
      %cst_38 = arith.constant dense<0.000000e+00> : vector<8x128xf32>
      %91 = tpu.matmul %89, %90, %cst_38 {dimension_numbers = #tpu.dot_dimension_numbers<[1], [0], [0], [1], [0, 0, 1, 1], [], []>} : vector<8x128xbf16>, vector<128x128xbf16>, vector<8x128xf32> -> vector<8x128xf32>
      %c0_39 = arith.constant 0 : index
      %c0_40 = arith.constant 0 : index
      %92 = vector.load %arg16[%c0_39, %c0_40] : memref<1x128xf32, #tpu.memory_space<vmem>>, vector<1x128xf32>
      %93 = vector.broadcast %92 : vector<1x128xf32> to vector<8x128xf32>
      %94 = arith.addf %91, %93 : vector<8x128xf32>
      %c0_41 = arith.constant 0 : index
      %c0_42 = arith.constant 0 : index
      %95 = vector.load %arg5[%c0_41, %c0_42] : memref<8x1xi32, #tpu.memory_space<vmem>>, vector<8x1xi32>
      %96 = vector.broadcast %arg1 : i32 to vector<8x1xi32>
      %97 = arith.cmpi sgt, %95, %96 : vector<8x1xi32>
      %98 = vector.shape_cast %97 : vector<8x1xi1> to vector<8x1xi1>
      %99 = vector.broadcast %98 : vector<8x1xi1> to vector<8x128xi1>
      %100 = arith.select %99, %88, %12 : vector<8x128xi1>, vector<8x128xf32>
      %c0_43 = arith.constant 0 : index
      %c0_44 = arith.constant 0 : index
      %101 = vector.load %arg19[%c0_43, %c0_44] : memref<8x128xf32, #tpu.memory_space<vmem>>, vector<8x128xf32>
      tpu.vector_store %arg19[%c0_43, %c0_44], %100 {strides = array<i32>} : memref<8x128xf32, #tpu.memory_space<vmem>>, vector<8x128xf32>,
      %102 = vector.shape_cast %97 : vector<8x1xi1> to vector<8x1xi1>
      %103 = vector.broadcast %102 : vector<8x1xi1> to vector<8x128xi1>
      %104 = arith.select %103, %86, %13 : vector<8x128xi1>, vector<8x128xf32>
      %c0_45 = arith.constant 0 : index
      %c0_46 = arith.constant 0 : index
      %105 = vector.load %arg20[%c0_45, %c0_46] : memref<8x128xf32, #tpu.memory_space<vmem>>, vector<8x128xf32>
      tpu.vector_store %arg20[%c0_45, %c0_46], %104 {strides = array<i32>} : memref<8x128xf32, #tpu.memory_space<vmem>>, vector<8x128xf32>,
      %cst_47 = arith.constant 0.000000e+00 : f32
      %106 = vector.shape_cast %97 : vector<8x1xi1> to vector<8x1xi1>
      %107 = vector.broadcast %106 : vector<8x1xi1> to vector<8x128xi1>
      %108 = vector.broadcast %cst_47 : f32 to vector<8x128xf32>
      %109 = arith.select %107, %94, %108 : vector<8x128xi1>, vector<8x128xf32>
      %110 = arith.truncf %109 : vector<8x128xf32> to vector<8x128xbf16>
      %c0_48 = arith.constant 0 : index
      %c0_49 = arith.constant 0 : index
      %c0_50 = arith.constant 0 : index
      %111 = vector.load %arg17[%c0_48, %c0_49, %c0_50] : memref<1x8x128xbf16, #tpu.memory_space<vmem>>, vector<1x8x128xbf16>
      %112 = vector.shape_cast %111 : vector<1x8x128xbf16> to vector<8x128xbf16>
      %113 = vector.shape_cast %110 : vector<8x128xbf16> to vector<1x8x128xbf16>
      tpu.vector_store %arg17[%c0_48, %c0_49, %c0_50], %113 {strides = array<i32>} : memref<1x8x128xbf16, #tpu.memory_space<vmem>>, vector<1x8x128xbf16>,
      %cst_51 = arith.constant 0.000000e+00 : f32
      %114 = vector.shape_cast %97 : vector<8x1xi1> to vector<8x1xi1>
      %115 = vector.broadcast %114 : vector<8x1xi1> to vector<8x16xi1>
      %116 = vector.broadcast %cst_51 : f32 to vector<8x16xf32>
      %117 = arith.select %115, %47, %116 : vector<8x16xi1>, vector<8x16xf32>
      %c0_52 = arith.constant 0 : index
      %c0_53 = arith.constant 0 : index
      %c0_54 = arith.constant 0 : index
      %118 = vector.load %arg18[%c0_52, %c0_53, %c0_54] : memref<1x8x16xf32, #tpu.memory_space<vmem>>, vector<1x8x16xf32>
      %119 = vector.shape_cast %118 : vector<1x8x16xf32> to vector<8x16xf32>
      %120 = vector.shape_cast %117 : vector<8x16xf32> to vector<1x8x16xf32>
      tpu.vector_store %arg18[%c0_52, %c0_53, %c0_54], %120 {strides = array<i32>} : memref<1x8x16xf32, #tpu.memory_space<vmem>>, vector<1x8x16xf32>,
    } else {
    }
    %true = arith.constant true
    %6 = arith.xori %3, %true : i1
    %7 = arith.extui %6 : i1 to i32
    %c0_i32_0 = arith.constant 0 : i32
    %8 = arith.cmpi ne, %7, %c0_i32_0 : i32
    scf.if %8 {
      %cst = arith.constant 0.000000e+00 : bf16
      %9 = vector.broadcast %cst : bf16 to vector<1x8x128xbf16>
      %c0 = arith.constant 0 : index
      %c0_1 = arith.constant 0 : index
      %c0_2 = arith.constant 0 : index
      %10 = vector.load %arg17[%c0, %c0_1, %c0_2] : memref<1x8x128xbf16, #tpu.memory_space<vmem>>, vector<1x8x128xbf16>
      tpu.vector_store %arg17[%c0, %c0_1, %c0_2], %9 {strides = array<i32>} : memref<1x8x128xbf16, #tpu.memory_space<vmem>>, vector<1x8x128xbf16>,
      %cst_3 = arith.constant 0.000000e+00 : f32
      %11 = vector.broadcast %cst_3 : f32 to vector<1x8x16xf32>
      %c0_4 = arith.constant 0 : index
      %c0_5 = arith.constant 0 : index
      %c0_6 = arith.constant 0 : index
      %12 = vector.load %arg18[%c0_4, %c0_5, %c0_6] : memref<1x8x16xf32, #tpu.memory_space<vmem>>, vector<1x8x16xf32>
      tpu.vector_store %arg18[%c0_4, %c0_5, %c0_6], %11 {strides = array<i32>} : memref<1x8x16xf32, #tpu.memory_space<vmem>>, vector<1x8x16xf32>,
    } else {
    }
    return
  }
  func.func @transform_0(%arg0: i32, %arg1: i32, %arg2: memref<8xi32, #tpu.memory_space<smem>>) -> (i32, i32, i32) {
    %c0_i32 = arith.constant 0 : i32
    %c0_i32_0 = arith.constant 0 : i32
    %c0_i32_1 = arith.constant 0 : i32
    return %arg0, %c0_i32, %c0_i32_0 : i32, i32, i32
  }
  func.func @transform_1(%arg0: i32, %arg1: i32, %arg2: memref<8xi32, #tpu.memory_space<smem>>) -> (i32, i32, i32) {
    %c0_i32 = arith.constant 0 : i32
    %c0_i32_0 = arith.constant 0 : i32
    return %arg1, %arg0, %c0_i32 : i32, i32, i32
  }
  func.func @transform_2(%arg0: i32, %arg1: i32, %arg2: memref<8xi32, #tpu.memory_space<smem>>) -> (i32, i32) {
    %c0_i32 = arith.constant 0 : i32
    %c0_i32_0 = arith.constant 0 : i32
    return %arg0, %c0_i32 : i32, i32
  }
  func.func @transform_3(%arg0: i32, %arg1: i32, %arg2: memref<8xi32, #tpu.memory_space<smem>>) -> (i32, i32) {
    %c0_i32 = arith.constant 0 : i32
    %c0_i32_0 = arith.constant 0 : i32
    %c0_i32_1 = arith.constant 0 : i32
    return %c0_i32, %c0_i32_0 : i32, i32
  }
  func.func @transform_4(%arg0: i32, %arg1: i32, %arg2: memref<8xi32, #tpu.memory_space<smem>>) -> (i32, i32) {
    %c0_i32 = arith.constant 0 : i32
    %c0_i32_0 = arith.constant 0 : i32
    %c0_i32_1 = arith.constant 0 : i32
    return %c0_i32, %c0_i32_0 : i32, i32
  }
  func.func @transform_5(%arg0: i32, %arg1: i32, %arg2: memref<8xi32, #tpu.memory_space<smem>>) -> (i32, i32) {
    %c0_i32 = arith.constant 0 : i32
    %c0_i32_0 = arith.constant 0 : i32
    %c0_i32_1 = arith.constant 0 : i32
    return %c0_i32, %c0_i32_0 : i32, i32
  }
  func.func @transform_6(%arg0: i32, %arg1: i32, %arg2: memref<8xi32, #tpu.memory_space<smem>>) -> (i32, i32) {
    %c0_i32 = arith.constant 0 : i32
    %c0_i32_0 = arith.constant 0 : i32
    %c0_i32_1 = arith.constant 0 : i32
    return %c0_i32, %c0_i32_0 : i32, i32
  }
  func.func @transform_7(%arg0: i32, %arg1: i32, %arg2: memref<8xi32, #tpu.memory_space<smem>>) -> (i32, i32) {
    %c0_i32 = arith.constant 0 : i32
    %c0_i32_0 = arith.constant 0 : i32
    %c0_i32_1 = arith.constant 0 : i32
    return %c0_i32, %c0_i32_0 : i32, i32
  }
  func.func @transform_8(%arg0: i32, %arg1: i32, %arg2: memref<8xi32, #tpu.memory_space<smem>>) -> (i32, i32) {
    %c0_i32 = arith.constant 0 : i32
    %c0_i32_0 = arith.constant 0 : i32
    %c0_i32_1 = arith.constant 0 : i32
    return %c0_i32, %c0_i32_0 : i32, i32
  }
  func.func @transform_9(%arg0: i32, %arg1: i32, %arg2: memref<8xi32, #tpu.memory_space<smem>>) -> (i32, i32) {
    %c0_i32 = arith.constant 0 : i32
    %c0_i32_0 = arith.constant 0 : i32
    %c0_i32_1 = arith.constant 0 : i32
    return %c0_i32, %c0_i32_0 : i32, i32
  }
  func.func @transform_10(%arg0: i32, %arg1: i32, %arg2: memref<8xi32, #tpu.memory_space<smem>>) -> (i32, i32) {
    %c0_i32 = arith.constant 0 : i32
    %c0_i32_0 = arith.constant 0 : i32
    %c0_i32_1 = arith.constant 0 : i32
    return %c0_i32, %c0_i32_0 : i32, i32
  }
  func.func @transform_11(%arg0: i32, %arg1: i32, %arg2: memref<8xi32, #tpu.memory_space<smem>>) -> (i32, i32) {
    %c0_i32 = arith.constant 0 : i32
    %c0_i32_0 = arith.constant 0 : i32
    %c0_i32_1 = arith.constant 0 : i32
    return %c0_i32, %c0_i32_0 : i32, i32
  }
  func.func @transform_12(%arg0: i32, %arg1: i32, %arg2: memref<8xi32, #tpu.memory_space<smem>>) -> (i32, i32) {
    %c0_i32 = arith.constant 0 : i32
    %c0_i32_0 = arith.constant 0 : i32
    %c0_i32_1 = arith.constant 0 : i32
    return %c0_i32, %c0_i32_0 : i32, i32
  }
  func.func @transform_13(%arg0: i32, %arg1: i32, %arg2: memref<8xi32, #tpu.memory_space<smem>>) -> (i32, i32) {
    %c0_i32 = arith.constant 0 : i32
    %c0_i32_0 = arith.constant 0 : i32
    %c0_i32_1 = arith.constant 0 : i32
    return %c0_i32, %c0_i32_0 : i32, i32
  }
  func.func @transform_14(%arg0: i32, %arg1: i32, %arg2: memref<8xi32, #tpu.memory_space<smem>>) -> (i32, i32, i32) {
    %c0_i32 = arith.constant 0 : i32
    %c0_i32_0 = arith.constant 0 : i32
    return %arg1, %arg0, %c0_i32 : i32, i32, i32
  }
  func.func @transform_15(%arg0: i32, %arg1: i32, %arg2: memref<8xi32, #tpu.memory_space<smem>>) -> (i32, i32, i32) {
    %c0_i32 = arith.constant 0 : i32
    %c0_i32_0 = arith.constant 0 : i32
    return %arg1, %arg0, %c0_i32 : i32, i32, i32
  }
}

</mosaic_0001>

<bundles_post_ra>
// kernel: tpu_custom_call.1
= control target key start
LH: loop header
LB: loop body
LE: loop exit
PB: predicated region body
PF: predicated region fallthrough
CT: control target
= control target key end

     0   :  { %s6221_s0 = inlined_call_operand.vmem [shape: s32[8], index: 0, kind: input, shape index: {}]   ;;  %s6222_s1 = inlined_call_operand.hbm [shape: bf16[8,16,128], index: 1, kind: input, shape index: {}]   ;;  %s6223_s2 = inlined_call_operand.hbm [shape: bf16[7,8,128], index: 2, kind: input, shape index: {}]   ;;  %s6224_s3 = inlined_call_operand.vmem [shape: s32[8,1], index: 3, kind: input, shape index: {}]   ;;  %s6225_s4 = inlined_call_operand.hbm [shape: bf16[128,128], index: 4, kind: input, shape index: {}]   ;;  %s6226_s5 = inlined_call_operand.vmem [shape: f32[1,128], index: 5, kind: input, shape index: {}]   ;;  %s6227_s6 = inlined_call_operand.vmem [shape: f32[1,128], index: 6, kind: input, shape index: {}]   ;;  %s6228_s7 = inlined_call_operand.hbm [shape: bf16[128,256], index: 7, kind: input, shape index: {}]   ;;  %s6229_s8 = inlined_call_operand.vmem [shape: f32[1,256], index: 8, kind: input, shape index: {}]   ;;  %s6230_s9 = inlined_call_operand.hbm [shape: bf16[128,768], index: 9, kind: input, shape index: {}]   ;;  %s6231_s10 = inlined_call_operand.vmem [shape: f32[1,768], index: 10, kind: input, shape index: {}]   ;;  %s6232_s11 = inlined_call_operand.hbm [shape: bf16[128,512], index: 11, kind: input, shape index: {}]   ;;  %s6233_s12 = inlined_call_operand.hbm [shape: bf16[128,512], index: 12, kind: input, shape index: {}]   ;;  %s6234_s13 = inlined_call_operand.hbm [shape: bf16[128,128], index: 13, kind: input, shape index: {}]   ;;  %s6235_s14 = inlined_call_operand.vmem [shape: f32[1,128], index: 14, kind: input, shape index: {}]   ;;  %s6236_s15 = inlined_call_operand.hbm [shape: bf16[7,8,128], index: 15, kind: output, shape index: {0}]   ;;  %s6237_s16 = inlined_call_operand.hbm [shape: f32[7,8,16], index: 16, kind: output, shape index: {1}]  }
   0x1   :  { %6252 = sst [smem:[#allocation34_spill]] %s6221_s0 }
   0x2   :  { %6253 = sst [smem:[#allocation35_spill]] %s6222_s1  ;;  %s6266_s23 = sld [smem:[#allocation34_spill]] }
   0x3   :  { %6254 = sst [smem:[#allocation36_spill]] %s6223_s2 }
   0x4   :  { %6255 = sst [smem:[#allocation37_spill]] %s6224_s3 }
   0x5   :  { %6256 = sst [smem:[#allocation38_spill]] %s6225_s4 }
   0x6   :  { %6257 = sst [smem:[#allocation39_spill]] %s6226_s5 }
   0x7   :  { %6258 = sst [smem:[#allocation40_spill]] %s6227_s6 }
   0x8   :  { %6259 = sst [smem:[#allocation41_spill]] %s6228_s7  ;;  %s22_s3 = sshll.u32 %s6266_s23, 4  ;;  %s23_s3 = int_to_ptr.vmem [resolvable:$true] %s22_s3 }
   0x9   :  { %6260 = sst [smem:[#allocation42_spill]] %s6229_s8  ;;  %s4798_s24 = scalar_lea.vmem %s23_s3, 16 }
   0xa   :  { %6261 = sst [smem:[#allocation43_spill]] %s6231_s10  ;;  %p4799_p0 = scmp.ne.s32.totalorder %s23_s3, %s4798_s24 }
   0xb   :  { %6262 = sst [smem:[#allocation44_spill]] %s6232_s11  ;;  %p4803_p1 = scmp.lt.s32.totalorder %s23_s3, %s23_s3 }
   0xc   :  { %6263 = sst [smem:[#allocation45_spill]] %s6235_s14  ;;  %p4804_p2 = scmp.lt.s32.totalorder %s4798_s24, %s4798_s24 }
   0xd   :  { %6264 = sst [smem:[#allocation46_spill]] %s6236_s15 }
   0xe   :  { %6265 = sst [smem:[#allocation47_spill]] %s6237_s16  ;;  %p4805_p3 = por %p4804_p2, %p4803_p1 }
  0x10   :  { %p4806_p4 = pnand %p4805_p3, %p4799_p0 }
  0x12   :  { %4809 = shalt.err (!%p4806_p4)  }
  0x13   :  { %s5174_s25 = smov [#allocation6]  }
  0x14   :  { %25 = dma.vmem_to_smem %s23_s3, 16, %s5174_s25, [#allocation5] }
  0x15   :  { %5116 = dma.done.wait [#allocation5], 16 }
  0x16   :  { %5117 = vsyncadd [#allocation5], 4294967280 }
  0x17   :  { %27 = sfence }
  0x18   :  { %28 = vsyncpa [#allocation8], 0 }
  0x19   :  { %29 = vsyncpa [#allocation11], 0 }
  0x1a   :  { %31 = vsyncpa [#allocation11 + $0x1], 0 }
  0x1b   :  { %32 = vsyncpa [#allocation14], 0 }
  0x1c   :  { %33 = vsyncpa [#allocation17], 0 }
  0x1d   :  { %34 = vsyncpa [#allocation20], 0 }
  0x1e   :  { %35 = vsyncpa [#allocation9], 0 }
  0x1f   :  { %37 = vsyncpa [#allocation9 + $0x1], 0 }
  0x20   :  { %38 = vsyncpa [#allocation23], 0 }
  0x21   :  { %40 = vsyncpa [#allocation23 + $0x1], 0  ;;  %s5288_s26 = smov 0   ;;  %s5290_s27 = smov 0  }
  0x22   :  { %s5292_s28 = smov 0   ;;  %s5294_s3 = smov 0  }
  0x23   :  { %s5296_s29 = smov 0   ;;  %s5298_s30 = smov 0  }
  0x24 LB: > { %6267 = sst [smem:[#allocation33_spill]] %s5164_s3  ;;  %s5319_s0 = sadd.s32 4294967295, %s5172_s30   ;;  %s5172_s30 = sphi %s5298_s30, %s46_s30   ;;  %s5168_s29 = sphi %s5296_s29, %s6317_s29   ;;  %s5164_s3 = sphi %s5294_s3, %s6316_s3   ;;  %s5160_s28 = sphi %s5292_s28, %s6315_s28   ;;  %s5156_s27 = sphi %s5290_s27, %s6314_s27   ;;  %s5152_s26 = sphi %s5288_s26, %s6313_s26  }
  0x25   : > { %p3972_p5 = scmp.ge.s32.totalorder %s5172_s30, 1  ;;  %p6244_p6 = scmp.eq.s32.totalorder %s5319_s0, 0 }
  0x26   : > { %p430_p7 = scmp.lt.s32.totalorder %s5172_s30, 8  ;;  %s5175_s18 = smov [#allocation12]  }
  0x27   : > { %s466_s19 = sshll.u32 %s5175_s18, 4  ;;  %s5176_s20 = smov [#allocation13]   ;;  %s5328_s19 = int_to_ptr.vmem [resolvable:$true] %s466_s19 }
  0x28   : > { %p5324_p8 = pnand %p3972_p5, %p430_p7  ;;  %s485_s21 = sshll.u32 %s5176_s20, 4  ;;  %s5338_s21 = int_to_ptr.vmem [resolvable:$true] %s485_s21 }
  0x29   : > { %s5177_s23 = smov [#allocation16]   ;;  %s6270_s4 = sld [smem:[#allocation38_spill]] }
  0x2a   : > { %s6268_s17 = scalar_select %p5324_p8, 1, 0 }
  0x2b   : > { %p4374_p9 = pneg %p5324_p8  ;;  %s5340_s24 = sshll.u32 %s5177_s23, 4  ;;  %s518_s24 = int_to_ptr.vmem [resolvable:$true] %s5340_s24 }
  0x2d   : > { %p5334_p10 = pnand %p4374_p9, %p6244_p6 }
  0x2f   : > { %s4810_s18 = scalar_lea.hbm %s6270_s4, 1024  ;;  %p5350_p12 = pneg %p5334_p10 }
  0x30   : > { %p4811_p11 = scmp.ne.s32.totalorder %s6270_s4, %s4810_s18  ;;  %p4817_p1 = scmp.lt.u32.totalorder %s4810_s18, %s6270_s4 }
  0x32   : > { %p4813_p13 = pnand %p5350_p12, %p4811_p11 }
  0x34   : > { %p4814_p0 = pneg %p4813_p13 }
  0x36   : > { %p4819_p2 = pnand %p4817_p1, %p4814_p0 }
  0x38   : > { %4822 = shalt.err (!%p4819_p2)
}
  0x39   : > { %s4823_s14 = scalar_lea.vmem %s5328_s19, 1024  ;;  %p4831_p7 = scmp.lt.s32.totalorder %s5328_s19, %s5328_s19 }
  0x3a   : > { %p4824_p3 = scmp.ne.s32.totalorder %s5328_s19, %s4823_s14  ;;  %p4832_p9 = scmp.lt.s32.totalorder %s4823_s14, %s4823_s14 }
  0x3c   : > { %p4826_p4 = pnand %p4824_p3, %p5350_p12  ;;  %p4833_p11 = por %p4832_p9, %p4831_p7 }
  0x3e   : > { %p4827_p5 = pneg %p4826_p4 }
  0x40   : > { %p4834_p13 = pnand %p4833_p11, %p4827_p5 }
  0x42   : > { %4837 = shalt.err (!%p4834_p13)
}
  0x43   : > { %s6242_s15 = smov 64   ;;  %s6246_s6 = smov 4  }
  0x44   : > { %4380 = dma.hbm_to_vmem [thread:$0]  (!%p5334_p10), %s6270_s4, 1024, %s5328_s19, [#allocation11], %s6242_s15, %s6242_s15, %s6246_s6  }
  0x45   : > { %s6272_s7 = sld [smem:[#allocation41_spill]] }
  0x4b   : > { %s4838_s14 = scalar_lea.hbm %s6272_s7, 2048 }
  0x4c   : > { %p4839_p0 = scmp.ne.s32.totalorder %s6272_s7, %s4838_s14  ;;  %p4845_p3 = scmp.lt.u32.totalorder %s4838_s14, %s6272_s7 }
  0x4e   : > { %p4841_p1 = pnand %p4839_p0, %p5350_p12 }
  0x50   : > { %p4842_p2 = pneg %p4841_p1 }
  0x52   : > { %p4847_p4 = pnand %p4845_p3, %p4842_p2 }
  0x54   : > { %4850 = shalt.err (!%p4847_p4)
}
  0x55   : > { %s4851_s19 = scalar_lea.vmem %s5338_s21, 2048  ;;  %p4859_p11 = scmp.lt.s32.totalorder %s5338_s21, %s5338_s21 }
  0x56   : > { %p4852_p5 = scmp.ne.s32.totalorder %s5338_s21, %s4851_s19  ;;  %p4860_p13 = scmp.lt.s32.totalorder %s4851_s19, %s4851_s19 }
  0x58   : > { %p4854_p7 = pnand %p4852_p5, %p5350_p12  ;;  %p4861_p0 = por %p4860_p13, %p4859_p11 }
  0x5a   : > { %p4855_p9 = pneg %p4854_p7 }
  0x5c   : > { %p4862_p1 = pnand %p4861_p0, %p4855_p9 }
  0x5e   : > { %4865 = shalt.err (!%p4862_p1)
}
  0x5f   : > { %s5180_s8 = smov 128   ;;  %s5181_s5 = smov 8  }
  0x60   : > { %4383 = dma.hbm_to_vmem [thread:$0]  (!%p5334_p10), %s6272_s7, 2048, %s5338_s21, [#allocation14], %s5180_s8, %s5180_s8, %s5181_s5  }
  0x61   : > { %s6273_s11 = sld [smem:[#allocation44_spill]] }
  0x67   : > { %s4866_s18 = scalar_lea.hbm %s6273_s11, 4096 }
  0x68   : > { %p4867_p2 = scmp.ne.s32.totalorder %s6273_s11, %s4866_s18  ;;  %p4873_p5 = scmp.lt.u32.totalorder %s4866_s18, %s6273_s11 }
  0x6a   : > { %p4869_p3 = pnand %p4867_p2, %p5350_p12 }
  0x6c   : > { %p4870_p4 = pneg %p4869_p3 }
  0x6e   : > { %p4875_p7 = pnand %p4873_p5, %p4870_p4 }
  0x70   : > { %4878 = shalt.err (!%p4875_p7)
}
  0x71   : > { %s4879_s10 = scalar_lea.vmem %s518_s24, 4096  ;;  %p4887_p0 = scmp.lt.s32.totalorder %s518_s24, %s518_s24 }
  0x72   : > { %p4880_p9 = scmp.ne.s32.totalorder %s518_s24, %s4879_s10  ;;  %p4888_p1 = scmp.lt.s32.totalorder %s4879_s10, %s4879_s10 }
  0x74   : > { %p4882_p11 = pnand %p4880_p9, %p5350_p12  ;;  %p4889_p6 = por %p4888_p1, %p4887_p0 }
  0x76   : > { %p4883_p13 = pneg %p4882_p11 }
  0x78   : > { %p4890_p8 = pnand %p4889_p6, %p4883_p13 }
  0x7a   : > { %4893 = shalt.err (!%p4890_p8)
}
  0x7b   : > { %s6248_s21 = smov 256   ;;  %s6249_s8 = smov 16  }
  0x7c   : > { %4389 = dma.hbm_to_vmem [thread:$0]  (!%p5334_p10), %s6273_s11, 4096, %s518_s24, [#allocation17], %s6248_s21, %s6248_s21, %s6249_s8  }
  0x7d   : > { %s5184_s3 = smov [#allocation7]   ;;  %s5185_s25 = smov [#allocation15]  }
  0x7e   : > { %s446_s16 = sshll.u32 %s5184_s3, 4  ;;  %s501_s18 = sshll.u32 %s5185_s25, 4  ;;  %s447_s16 = int_to_ptr.vmem [resolvable:$true] %s446_s16  ;;  %s502_s18 = int_to_ptr.vmem [resolvable:$true] %s501_s18 }
  0x7f   : > { %s6274_s1 = sld [smem:[#allocation35_spill]] }
  0x85   : > { %s4894_s19 = scalar_lea.hbm %s6274_s1, 1024 }
  0x86   : > { %p4895_p6 = scmp.ne.s32.totalorder %s6274_s1, %s4894_s19  ;;  %p4901_p3 = scmp.lt.u32.totalorder %s4894_s19, %s6274_s1 }
  0x88   : > { %p4897_p8 = pnand %p4895_p6, %p5350_p12 }
  0x8a   : > { %p4898_p2 = pneg %p4897_p8 }
  0x8c   : > { %p4903_p4 = pnand %p4901_p3, %p4898_p2 }
  0x8e   : > { %4906 = shalt.err (!%p4903_p4)
}
  0x8f   : > { %s4907_s24 = scalar_lea.vmem %s447_s16, 1024  ;;  %p4915_p11 = scmp.lt.s32.totalorder %s447_s16, %s447_s16 }
  0x90   : > { %p4908_p5 = scmp.ne.s32.totalorder %s447_s16, %s4907_s24  ;;  %p4916_p13 = scmp.lt.s32.totalorder %s4907_s24, %s4907_s24 }
  0x92   : > { %p4910_p7 = pnand %p4908_p5, %p5350_p12  ;;  %p4917_p0 = por %p4916_p13, %p4915_p11 }
  0x94   : > { %p4911_p9 = pneg %p4910_p7 }
  0x96   : > { %p4918_p1 = pnand %p4917_p0, %p4911_p9 }
  0x98   : > { %4921 = shalt.err (!%p4918_p1)
}
  0x99   : > { %s6275_s6 = smov 4   ;;  %s6276_s15 = smov 64  }
  0x9a   : > { %4377 = dma.hbm_to_vmem [thread:$0]  (!%p5334_p10), %s6274_s1, 1024, %s447_s16, [#allocation8], %s6276_s15, %s6276_s15, %s6275_s6  }
  0x9b   : > { %s4922_s25 = scalar_lea.hbm %s6230_s9, 6144 }
  0x9c   : > { %p4923_p6 = scmp.ne.s32.totalorder %s6230_s9, %s4922_s25  ;;  %p4929_p3 = scmp.lt.u32.totalorder %s4922_s25, %s6230_s9 }
  0x9e   : > { %p4925_p8 = pnand %p4923_p6, %p5350_p12 }
  0xa0   : > { %p4926_p2 = pneg %p4925_p8 }
  0xa2   : > { %p4931_p4 = pnand %p4929_p3, %p4926_p2 }
  0xa4   : > { %4934 = shalt.err (!%p4931_p4)
}
  0xa5   : > { %s4935_s24 = scalar_lea.vmem %s502_s18, 6144  ;;  %p4943_p11 = scmp.lt.s32.totalorder %s502_s18, %s502_s18 }
  0xa6   : > { %p4936_p5 = scmp.ne.s32.totalorder %s502_s18, %s4935_s24  ;;  %p4944_p13 = scmp.lt.s32.totalorder %s4935_s24, %s4935_s24 }
  0xa8   : > { %p4938_p7 = pnand %p4936_p5, %p5350_p12  ;;  %p4945_p0 = por %p4944_p13, %p4943_p11 }
  0xaa   : > { %p4939_p9 = pneg %p4938_p7 }
  0xac   : > { %p4946_p1 = pnand %p4945_p0, %p4939_p9 }
  0xae   : > { %4949 = shalt.err (!%p4946_p1)
}
  0xaf   : > { %s5186_s16 = smov 384   ;;  %s5187_s4 = smov 24  }
  0xb0   : > { %4386 = dma.hbm_to_vmem [thread:$0]  (!%p5334_p10), %s6230_s9, 6144, %s502_s18, [#allocation14], %s5186_s16, %s5186_s16, %s5187_s4  }
  0xb1   : > { %s5188_s3 = smov [#allocation18]   ;;  %s5189_s23 = smov [#allocation19]  }
  0xb2   : > { %s530_s25 = sshll.u32 %s5188_s3, 4  ;;  %s543_s14 = sshll.u32 %s5189_s23, 4  ;;  %s531_s25 = int_to_ptr.vmem [resolvable:$true] %s530_s25  ;;  %s544_s14 = int_to_ptr.vmem [resolvable:$true] %s543_s14 }
  0xb3   : > { %s4950_s24 = scalar_lea.hbm %s6233_s12, 4096 }
  0xb4   : > { %p4951_p6 = scmp.ne.s32.totalorder %s6233_s12, %s4950_s24  ;;  %p4957_p3 = scmp.lt.u32.totalorder %s4950_s24, %s6233_s12 }
  0xb6   : > { %p4953_p8 = pnand %p4951_p6, %p5350_p12 }
  0xb8   : > { %p4954_p2 = pneg %p4953_p8 }
  0xba   : > { %p4959_p4 = pnand %p4957_p3, %p4954_p2 }
  0xbc   : > { %4962 = shalt.err (!%p4959_p4)
}
  0xbd   : > { %s4963_s18 = scalar_lea.vmem %s531_s25, 4096  ;;  %p4971_p11 = scmp.lt.s32.totalorder %s531_s25, %s531_s25 }
  0xbe   : > { %p4964_p5 = scmp.ne.s32.totalorder %s531_s25, %s4963_s18  ;;  %p4972_p13 = scmp.lt.s32.totalorder %s4963_s18, %s4963_s18 }
  0xc0   : > { %p4966_p7 = pnand %p4964_p5, %p5350_p12  ;;  %p4973_p0 = por %p4972_p13, %p4971_p11 }
  0xc2   : > { %p4967_p9 = pneg %p4966_p7 }
  0xc4   : > { %p4974_p1 = pnand %p4973_p0, %p4967_p9 }
  0xc6   : > { %4977 = shalt.err (!%p4974_p1)
}
  0xc7   : > { %s6277_s21 = smov 16   ;;  %s6278_s8 = smov 256  }
  0xc8   : > { %4392 = dma.hbm_to_vmem [thread:$0]  (!%p5334_p10), %s6233_s12, 4096, %s531_s25, [#allocation17], %s6278_s8, %s6278_s8, %s6277_s21  }
  0xc9   : > { %s4978_s7 = scalar_lea.hbm %s6234_s13, 1024 }
  0xca   : > { %p4979_p6 = scmp.ne.s32.totalorder %s6234_s13, %s4978_s7  ;;  %p4985_p3 = scmp.lt.u32.totalorder %s4978_s7, %s6234_s13 }
  0xcc   : > { %p4981_p8 = pnand %p4979_p6, %p5350_p12 }
  0xce   : > { %p4982_p2 = pneg %p4981_p8 }
  0xd0   : > { %p4987_p4 = pnand %p4985_p3, %p4982_p2 }
  0xd2   : > { %4990 = shalt.err (!%p4987_p4)
}
  0xd3   : > { %s4991_s10 = scalar_lea.vmem %s544_s14, 1024  ;;  %p4999_p11 = scmp.lt.s32.totalorder %s544_s14, %s544_s14 }
  0xd4   : > { %p4992_p5 = scmp.ne.s32.totalorder %s544_s14, %s4991_s10  ;;  %p5000_p13 = scmp.lt.s32.totalorder %s4991_s10, %s4991_s10 }
  0xd6   : > { %p4994_p7 = pnand %p4992_p5, %p5350_p12  ;;  %p5001_p0 = por %p5000_p13, %p4999_p11 }
  0xd8   : > { %p4995_p9 = pneg %p4994_p7 }
  0xda   : > { %p5002_p1 = pnand %p5001_p0, %p4995_p9 }
  0xdc   : > { %5005 = shalt.err (!%p5002_p1)
}
  0xdd   : > { %4395 = dma.hbm_to_vmem [thread:$0]  (!%p5334_p10), %s6234_s13, 1024, %s544_s14, [#allocation20], %s6276_s15, %s6276_s15, %s6275_s6  }
  0xde   : > { %s3971_s22 = sadd.s32 4294967294, %s5172_s30   ;;  %s55_s20 = sadd.s32 1, %s5168_s29 }
  0xdf   : > { %s93_s18 = sadd.s32 1, %s5160_s28  ;;  %p56_p12 = scmp.ge.s32.totalorder %s55_s20, 7 }
  0xe0   : > { %p100_p6 = scmp.ne.s32.totalorder %s5160_s28, %s5156_s27  ;;  %p101_p8 = scmp.eq.s32.totalorder %s5172_s30, 0 }
  0xe1   : > { %p106_p2 = scmp.ne.s32.totalorder %s5156_s27, %s5152_s26  ;;  %s6319_s20 = smov (%p56_p12, %s55_s20), 0 }
  0xe2   : > { %p5510_p3 = por %p101_p8, %p100_p6  ;;  %p6280_p10 = scmp.eq.s32.totalorder %s5319_s0, 0 }
  0xe3   : > { %s88_s15 = ssub.s32 %s5168_s29, %s6319_s20  ;;  %p389_p5 = scmp.eq.s32.totalorder %s5319_s0, 6 }
  0xe4   : > { %p5516_p4 = por %p6280_p10, %p106_p2  ;;  %p91_p7 = scmp.eq.s32.totalorder %s88_s15, 0 }
  0xe5   : > { %p395_p9 = scmp.eq.s32.totalorder %s3971_s22, 6  ;;  %p5523_p11 = por %p389_p5, %p100_p6 }
  0xe6   : > { %p4414_p13 = scmp.lt.s32.totalorder %s5172_s30, 7  ;;  %s560_s11 = sand.u32 1, %s5172_s30  }
  0xe7   : > { %s6282_s14 = scalar_select %p5523_p11, 1, 0 }
  0xe8   : > { %s5529_s8 = scalar_select %p91_p7, %s5160_s28, %s93_s18  }
  0xe9   : > { %p5531_p0 = por %p395_p9, %p106_p2  ;;  %s562_s16 = sand.u32 1, %s5160_s28  }
  0xea   : > { %s3982_s4 = sshll.u32 %s562_s16, 2  ;;  %s3983_s7 = sshll.u32 %s5168_s29, 6 }
  0xeb   : > { %s6283_s1 = scalar_select %p5531_p0, 1, 0 }
  0xec   : > { %s6284_s2 = sld [smem:[#allocation36_spill]]  ;;  %s564_s19 = scalar_lea.vmem [#allocation10], %s3982_s4 }
  0xed   : > { %s572_s10 = sshll.u32 %s564_s19, 4  ;;  %p5545_p1 = pnand %p4414_p13, %p5510_p3  ;;  %s5549_s10 = int_to_ptr.vmem [resolvable:$true] %s572_s10 }
  0xee   : > { %s561_s24 = scalar_lea.sflag [#allocation11], %s560_s11 }
  0xef   : > { %p5008_p6 = pneg %p5545_p1 }
  0xf2   : > { %s5541_s23 = scalar_lea.hbm %s6284_s2, %s3983_s7  ;;  %s5011_s21 = scalar_lea.hbm %s6284_s2, 448 }
  0xf3   : > { %s5006_s22 = scalar_lea.hbm %s5541_s23, 64  ;;  %p5012_p3 = scmp.lt.u32.totalorder %s5541_s23, %s6284_s2 }
  0xf4   : > { %p5007_p12 = scmp.ne.s32.totalorder %s5541_s23, %s5006_s22  ;;  %p5013_p10 = scmp.lt.u32.totalorder %s5011_s21, %s5006_s22 }
  0xf5   : > { %p5015_p7 = scmp.lt.u32.totalorder %s5006_s22, %s5541_s23 }
  0xf6   : > { %p5009_p8 = pnand %p5008_p6, %p5007_p12  ;;  %p5014_p5 = por %p5013_p10, %p5012_p3 }
  0xf8   : > { %p5010_p2 = pneg %p5009_p8  ;;  %p5016_p9 = por %p5015_p7, %p5014_p5 }
  0xfa   : > { %p5017_p13 = pnand %p5016_p9, %p5010_p2 }
  0xfc   : > { %5020 = shalt.err (!%p5017_p13)
}
  0xfd   : > { %s5021_s11 = scalar_lea.vmem %s5549_s10, 64  ;;  %s5190_s7 = smov [#allocation10]  }
  0xfe   : > { %p5022_p12 = scmp.ne.s32.totalorder %s5549_s10, %s5021_s11  ;;  %s5026_s5 = sshll.u32 %s5190_s7, 4  ;;  %s5027_s5 = int_to_ptr.vmem [resolvable:$false] %s5026_s5 }
  0xff   : > { %s5028_s3 = scalar_lea.vmem %s5027_s5, 128  ;;  %p5029_p11 = scmp.lt.s32.totalorder %s5549_s10, %s5027_s5 }
 0x100   : > { %p5024_p8 = pnand %p5022_p12, %p5008_p6  ;;  %p5030_p3 = scmp.lt.s32.totalorder %s5028_s3, %s5021_s11 }
 0x102   : > { %p5025_p0 = pneg %p5024_p8  ;;  %p5031_p10 = por %p5030_p3, %p5029_p11 }
 0x104   : > { %p5032_p5 = pnand %p5031_p10, %p5025_p0 }
 0x106   : > { %5035 = shalt.err (!%p5032_p5)
}
 0x107   : > { %4399 = dma.hbm_to_vmem [thread:$0]  (!%p5545_p1), %s5541_s23, 64, %s5549_s10, %s561_s24  }
 0x108   : > { %p6286_p2 = scmp.ne.s32.totalorder %s6268_s17, 0 }
 0x109   : > { %p6287_p6 = scmp.eq.s32.totalorder (!%p6286_p2), %s5319_s0, 0 }
 0x10a   : > { %581 = sbr.rel (%p6286_p2) target bundleno = 2508 (0x9cc), region = 76 }
 0x111   : > { %5119 = dma.done.wait (%p6287_p6), [#allocation8], 1024   ;;  %p6288_p7 = pmov %p6287_p6 }
 0x112   : > { %s587_s19 = sand.u32 1, %s5319_s0   ;;  %s5584_s22 = sand.u32 1, %s5156_s27  }
 0x113   : > { %5121 = vsyncadd (%p6288_p7), [#allocation8], 4294966272  ;;  %s3986_s25 = sshll.u32 %s5584_s22, 2  ;;  %s588_s18 = scalar_lea.sflag [#allocation11], %s587_s19 }
 0x114   : > { %s5587_s15 = scalar_lea.vmem [#allocation10], %s3986_s25 }
 0x115   : > { %5123 = dma.done.wait (%p5516_p4), %s588_s18, 64  }
 0x116   : > { %5125 = vsyncadd (%p5516_p4), %s588_s18, 4294967232  ;;  %p6289_p11 = pmov %p6287_p6 }
 0x117   : > { %p6290_p0 = pmov %p6287_p6 }
 0x118   : > { %5127 = dma.done.wait (%p6289_p11), [#allocation11], 1024  }
 0x119   : > { %5129 = vsyncadd (%p6290_p0), [#allocation11], 4294966272  ;;  %p6291_p1 = pmov %p6290_p0 }
 0x11a   : > { %p6292_p9 = pmov %p6290_p0 }
 0x11b   : > { %5131 = dma.done.wait (%p6291_p1), [#allocation14], 8192  }
 0x11c   : > { %5133 = vsyncadd (%p6292_p9), [#allocation14], 4294959104  ;;  %p6293_p13 = pmov %p6290_p0 }
 0x11d   : > { %p6294_p12 = pmov %p6290_p0 }
 0x11e   : > { %5135 = dma.done.wait (%p6293_p13), [#allocation17], 8192  }
 0x11f   : > { %5137 = vsyncadd (%p6294_p12), [#allocation17], 4294959104  ;;  %p6295_p4 = pmov %p6290_p0 }
 0x120   : > { %p6296_p8 = pmov %p6290_p0 }
 0x121   : > { %5139 = dma.done.wait (%p6295_p4), [#allocation20], 1024  }
 0x122   : > { %5141 = vsyncadd (%p6296_p8), [#allocation20], 4294966272  ;;  %s3994_s17 = sshll.u32 %s5584_s22, 3  ;;  %s5610_s6 = sld [smem:[#allocation6]] }
 0x123   : > { %s5612_s23 = scalar_lea.vmem [#allocation21], %s3986_s25  ;;  %s5614_s10 = scalar_lea.vmem [#allocation22], %s3994_s17 }
 0x124   : > { %s6297_s24 = sld [smem:[#allocation33_spill]] }
 0x12a   : > { %p3995_p3 = scmp.le.s32.totalorder %s5610_s6, %s6297_s24 }
 0x12b   : > { %s6298_s21 = sld [smem:[#allocation33_spill]] (!%p3995_p3) }
 0x12c   : > { %682 = sbr.rel (%p3995_p3) target bundleno = 2441 (0x989), region = 112 }
 0x131   : > { %p3996_p10 = scmp.ne.s32.totalorder (!%p3995_p3), %s6298_s21, 0 }
 0x133   : > { %686 = sbr.rel (%p3996_p10) target bundleno = 584 (0x248), region = 116  ;;  %v4494_v0 = vld [vmem:[#allocation12] sm:$0xff] (!%p3996_p10)   ;;  %v4495_v1 = vld [vmem:[#allocation12 + $0x8] sm:$0xff] (!%p3996_p10)   ;;  %v5191_v2 = vmov (!%p3996_p10), 0   ;;  %v4496_v3 = vld [vmem:[#allocation12 + $0x10] sm:$0xff] (!%p3996_p10)   ;;  %vm1083_vm0 = vcmask (!%p3996_p10), 1041409  }
 0x134   : > { %1211 = vmatprep.mubr.bf16.mxu1 (!%p3996_p10), %v5191_v2  ;;  %4220 = vmatprep.subr.bf16.mxu0 (!%p3996_p10), %v4494_v0  ;;  %v4497_v4 = vld [vmem:[#allocation12 + $0x18] sm:$0xff] (!%p3996_p10)   ;;  %v4501_v5 = vld [vmem:[#allocation13 + $0x4] ss:$8 sps:$4 sm:$0xff] (!%p3996_p10)   ;;  %v4503_v6 = vld [vmem:[#allocation13] ss:$8 sps:$4 sm:$0xff] (!%p3996_p10)   ;;  %vm1085_vm1 = vcmask (!%p3996_p10), 1042434  }
 0x135   : > { %4221 = vmatpush3.bf16.msra.mxu0 (!%p3996_p10), %v4494_v0  ;;  %1179 = vmatprep.subr.bf16.mxu1 (!%p3996_p10), %v4501_v5  ;;  %v4505_v7 = vld [vmem:[#allocation13 + $0x14] ss:$8 sps:$4 sm:$0xff] (!%p3996_p10)   ;;  %v4507_v8 = vld [vmem:[#allocation13 + $0x10] ss:$8 sps:$4 sm:$0xff] (!%p3996_p10)   ;;  %v5619_v12 = vld [vmem:[#allocation7 + $0x8] sm:$0xff] (!%p3996_p10)   ;;  %vm1087_vm2 = vcmask (!%p3996_p10), 1043459  }
 0x136   : > { %4222 = vmatprep.subr.bf16.mxu0 (!%p3996_p10), %v4495_v1  ;;  %1180 = vmatpush1.bf16.msra.mxu1 (!%p3996_p10), %v4503_v6  ;;  %v687_v9 = vld [vmem:[#allocation7] sm:$0xff] (!%p3996_p10)   ;;  %v4498_v13 = vld [vmem:[#allocation12 + $0x20] sm:$0xff] (!%p3996_p10)   ;;  %v953_v14 = vunpack.c.l.bf16 (!%p3996_p10), %v5619_v12  ;;  %v954_v15 = vunpack.c.h.bf16 (!%p3996_p10), %v5619_v12  ;;  %v5623_v20 = vld [vmem:[#allocation7 + $0x10] sm:$0xff] (!%p3996_p10)   ;;  %vm1089_vm3 = vcmask (!%p3996_p10), 1044484   ;;  %vm1091_vm4 = vcmask (!%p3996_p10), 1045509   ;;  %s6299_s4 = sld [smem:[#allocation39_spill]] (!%p3996_p10) }
 0x137   : > { %v951_v10 = vunpack.c.l.bf16 (!%p3996_p10), %v687_v9  ;;  %v952_v11 = vunpack.c.h.bf16 (!%p3996_p10), %v687_v9  ;;  %1181 = vmatprep.subr.bf16.mxu1 (!%p3996_p10), %v4505_v7  ;;  %v4510_v16 = vld [vmem:[#allocation13 + $0x24] ss:$8 sps:$4 sm:$0xff] (!%p3996_p10)   ;;  %4236 = vmatprep.mubr.bf16.mxu0 (!%p3996_p10), %v687_v9  ;;  %v4512_v18 = vld [vmem:[#allocation13 + $0x20] ss:$8 sps:$4 sm:$0xff] (!%p3996_p10)   ;;  %v5625_v21 = vld [vmem:[#allocation7 + $0x18] sm:$0xff] (!%p3996_p10)   ;;  %v955_v24 = vunpack.c.l.bf16 (!%p3996_p10), %v5623_v20  ;;  %v956_v25 = vunpack.c.h.bf16 (!%p3996_p10), %v5623_v20  ;;  %s6300_s5 = sld [smem:[#allocation42_spill]] (!%p3996_p10) }
 0x138   : > { %v974_v19 = vadd.f32 (!%p3996_p10), %v954_v15, %v953_v14  ;;  %v4513_v23 = vld [vmem:[#allocation13 + $0x34] ss:$8 sps:$4 sm:$0xff] (!%p3996_p10)   ;;  %v4499_v26 = vld [vmem:[#allocation12 + $0x28] sm:$0xff] (!%p3996_p10)   ;;  %v957_v28 = vunpack.c.l.bf16 (!%p3996_p10), %v5625_v21  ;;  %v958_v29 = vunpack.c.h.bf16 (!%p3996_p10), %v5625_v21  ;;  %v5633_v33 = vld [vmem:[#allocation7 + $0x28] sm:$0xff] (!%p3996_p10)   ;;  %vm1093_vm5 = vcmask (!%p3996_p10), 1046534  }
 0x139   : > { %4223 = vmatpush3.bf16.msra.mxu0 (!%p3996_p10), %v4495_v1  ;;  %v967_v17 = vadd.f32 (!%p3996_p10), %v952_v11, %v951_v10  ;;  %v981_v31 = vadd.f32 (!%p3996_p10), %v956_v25, %v955_v24  ;;  %v5631_v32 = vld [vmem:[#allocation7 + $0x20] sm:$0xff] (!%p3996_p10)   ;;  %v4518_v40 = vld [vmem:[#allocation13 + $0x44] ss:$8 sps:$4 sm:$0xff] (!%p3996_p10)   ;;  %v4500_v42 = vld [vmem:[#allocation12 + $0x30] sm:$0xff] (!%p3996_p10)   ;;  %v961_v45 = vunpack.c.l.bf16 (!%p3996_p10), %v5633_v33  ;;  %v962_v46 = vunpack.c.h.bf16 (!%p3996_p10), %v5633_v33 }
 0x13a   : > { %4224 = vmatprep.subr.bf16.mxu0 %v4496_v3  ;;  %1182 = vmatpush1.bf16.msra.mxu1 %v4507_v8  ;;  %v975_v27 = vrot.slane %v974_v19, 4  ;;  %v4515_v35 = vld [vmem:[#allocation13 + $0x30] ss:$8 sps:$4 sm:$0xff]   ;;  %v988_v36 = vadd.f32 %v958_v29, %v957_v28  ;;  %v959_v37 = vunpack.c.l.bf16 %v5631_v32  ;;  %v960_v41 = vunpack.c.h.bf16 %v5631_v32  ;;  %v5639_v50 = vld [vmem:[#allocation7 + $0x30] sm:$0xff]   ;;  %v4521_v57 = vld [vmem:[#allocation13 + $0x54] ss:$8 sps:$4 sm:$0xff]  }
 0x13b   : > { %v968_v22 = vrot.slane %v967_v17, 4  ;;  %1183 = vmatprep.subr.bf16.mxu1 %v4510_v16  ;;  %v982_v39 = vrot.slane %v981_v31, 4  ;;  %v4520_v53 = vld [vmem:[#allocation13 + $0x40] ss:$8 sps:$4 sm:$0xff]   ;;  %v1002_v54 = vadd.f32 %v962_v46, %v961_v45  ;;  %v963_v59 = vunpack.c.l.bf16 %v5639_v50  ;;  %v4504_v60 = vld [vmem:[#allocation12 + $0x38] sm:$0xff]   ;;  %v5643_v1 = vld [vmem:[#allocation7 + $0x38] sm:$0xff]  }
 0x13c   : > { %v976_v34 = vadd.f32 %v975_v27, %v974_v19  ;;  %v989_v44 = vrot.slane %v988_v36, 4  ;;  %v995_v49 = vadd.f32 %v960_v41, %v959_v37  ;;  %v964_v0 = vunpack.c.h.bf16 %v5639_v50  ;;  %v4523_v7 = vld [vmem:[#allocation13 + $0x50] ss:$8 sps:$4 sm:$0xff]   ;;  %v4526_v14 = vld [vmem:[#allocation13 + $0x64] ss:$8 sps:$4 sm:$0xff]  }
 0x13d   : > { %4225 = vmatpush3.bf16.msra.mxu0 %v4496_v3  ;;  %v969_v30 = vadd.f32 %v968_v22, %v967_v17  ;;  %v983_v48 = vadd.f32 %v982_v39, %v981_v31  ;;  %v1003_v63 = vrot.slane %v1002_v54, 4  ;;  %v965_v15 = vunpack.c.l.bf16 %v5643_v1  ;;  %v4528_v29 = vld [vmem:[#allocation13 + $0x60] ss:$8 sps:$4 sm:$0xff]  }
 0x13e   : > { %4226 = vmatprep.subr.bf16.mxu0 %v4497_v4  ;;  %1184 = vmatpush1.bf16.msra.mxu1 %v4512_v18  ;;  %v977_v43 = vrot.slane %v976_v34, 2  ;;  %v990_v52 = vadd.f32 %v989_v44, %v988_v36  ;;  %v996_v58 = vrot.slane %v995_v49, 4  ;;  %v1009_v9 = vadd.f32 %v964_v0, %v963_v59  ;;  %v4529_v36 = vld [vmem:[#allocation13 + $0x74] ss:$8 sps:$4 sm:$0xff]  }
 0x13f   : > { %v970_v38 = vrot.slane %v969_v30, 2  ;;  %1185 = vmatprep.subr.bf16.mxu1 %v4513_v23  ;;  %v984_v56 = vrot.slane %v983_v48, 2  ;;  %v1004_v8 = vadd.f32 %v1003_v63, %v1002_v54  ;;  %v966_v25 = vunpack.c.h.bf16 %v5643_v1 }
 0x140   : > { %v978_v51 = vadd.f32 %v977_v43, %v976_v34  ;;  %v991_v62 = vrot.slane %v990_v52, 2  ;;  %v1010_v19 = vrot.slane %v1009_v9, 4  ;;  %vm1095_vm6 = vcmask 1047559  }
 0x141   : > { %4227 = vmatpush3.bf16.msra.mxu0 %v4497_v4  ;;  %v971_v47 = vadd.f32 %v970_v38, %v969_v30  ;;  %v985_v3 = vadd.f32 %v984_v56, %v983_v48  ;;  %v997_v4 = vadd.f32 %v996_v58, %v995_v49  ;;  %v1005_v18 = vrot.slane %v1004_v8, 2 }
 0x142   : > { %4228 = vmatprep.subr.bf16.mxu0 %v4498_v13  ;;  %1186 = vmatpush1.bf16.msra.mxu1 %v4515_v35  ;;  %v979_v61 = vrot.slane %v978_v51, 1  ;;  %v992_v6 = vadd.f32 %v991_v62, %v990_v52  ;;  %v1011_v30 = vadd.f32 %v1010_v19, %v1009_v9  ;;  %v1016_v37 = vadd.f32 %v966_v25, %v965_v15 }
 0x143   : > { %v972_v55 = vrot.slane %v971_v47, 1  ;;  %1187 = vmatprep.subr.bf16.mxu1 %v4518_v40  ;;  %v986_v11 = vrot.slane %v985_v3, 1  ;;  %v1006_v28 = vadd.f32 %v1005_v18, %v1004_v8 }
 0x144   : > { %v980_v5 = vadd.f32 %v979_v61, %v978_v51  ;;  %v993_v17 = vrot.slane %v992_v6, 1  ;;  %v1012_v41 = vrot.slane %v1011_v30, 2  ;;  %v1017_v44 = vrot.slane %v1016_v37, 4 }
 0x145   : > { %4229 = vmatpush3.bf16.msra.mxu0 %v4498_v13  ;;  %v973_v2 = vadd.f32 %v972_v55, %v971_v47  ;;  %v998_v13 = vrot.slane %v997_v4, 2  ;;  %v987_v23 = vadd.f32 %v986_v11, %v985_v3  ;;  %v1007_v40 = vrot.slane %v1006_v28, 1  ;;  %v4531_v47 = vld [vmem:[#allocation13 + $0x70] ss:$8 sps:$4 sm:$0xff]  }
 0x146   : > { %4230 = vmatprep.subr.bf16.mxu0 %v4499_v26  ;;  %1188 = vmatpush1.bf16.msra.mxu1 %v4520_v53  ;;  %v1024_v16 = vmul.f32 0.0625, %v980_v5  ;;  %v994_v27 = vadd.f32 %v993_v17, %v992_v6  ;;  %v1013_v48 = vadd.f32 %v1012_v41, %v1011_v30  ;;  %v1018_v52 = vadd.f32 %v1017_v44, %v1016_v37 }
 0x147   : > { %v1023_v10 = vmul.f32 0.0625, %v973_v2  ;;  %1189 = vmatprep.subr.bf16.mxu1 %v4521_v57  ;;  %v999_v24 = vadd.f32 %v998_v13, %v997_v4  ;;  %v1025_v34 = vmul.f32 0.0625, %v987_v23  ;;  %v1008_v46 = vadd.f32 %v1007_v40, %v1006_v28 }
 0x148   : > { %v1026_v39 = vmul.f32 0.0625, %v994_v27  ;;  %v1014_v55 = vrot.slane %v1013_v48, 1 }
 0x149   : > { %4231 = vmatpush3.bf16.msra.mxu0 %v4499_v26  ;;  %v1031_v22 = vpack.c.bf16 %v1023_v10, %v1023_v10  ;;  %v1032_v26 = vpack.c.bf16 %v1024_v16, %v1024_v16  ;;  %v1000_v35 = vrot.slane %v999_v24, 1  ;;  %v1028_v56 = vmul.f32 0.0625, %v1008_v46 }
 0x14a   : > { %4232 = vmatprep.subr.bf16.mxu0 %v4500_v42  ;;  %1190 = vmatpush1.bf16.msra.mxu1 %v4523_v7  ;;  %v1034_v45 = vpack.c.bf16 %v1026_v39, %v1026_v39  ;;  %v1015_v59 = vadd.f32 %v1014_v55, %v1013_v48 }
 0x14b   : > { %v1075_v31 = vunpack.c.l.b16 %v1031_v22  ;;  %1191 = vmatprep.subr.bf16.mxu1 %v4526_v14  ;;  %v1076_v38 = vunpack.c.l.b16 %v1032_v26  ;;  %v1001_v43 = vadd.f32 %v1000_v35, %v999_v24  ;;  %v1057_v24 = vlaneseq }
 0x14c   : > { %v1078_v54 = vunpack.c.l.b16 %v1034_v45  ;;  %v1029_v63 = vmul.f32 0.0625, %v1015_v59 }
 0x14d   : > { %4233 = vmatpush3.bf16.msra.mxu0 %v4500_v42  ;;  %v1033_v42 = vpack.c.bf16 %v1025_v34, %v1025_v34  ;;  %v1027_v51 = vmul.f32 0.0625, %v1001_v43  ;;  %v1084_v53 = vsel %vm1083_vm0, %v1076_v38, %v1075_v31  ;;  %v1055_v38 = vld [vmem:[%s6300_s5] sm:$0x3] }
 0x14e   : > { %4234 = vmatprep.subr.bf16.mxu0 %v4504_v60  ;;  %1192 = vmatpush1.bf16.msra.mxu1 %v4528_v29  ;;  %v1037_v3 = vpack.c.bf16 %v1029_v63, %v1029_v63 }
 0x14f   : > { %v1077_v49 = vunpack.c.l.b16 %v1033_v42  ;;  %1193 = vmatprep.subr.bf16.mxu1 %v4529_v36  ;;  %v1035_v57 = vpack.c.bf16 %v1027_v51, %v1027_v51 }
 0x150   : > { %v1081_v6 = vunpack.c.l.b16 %v1037_v3 }
 0x151   : > { %4235 = vmatpush3.bf16.msra.mxu0 %v4504_v60  ;;  %v1086_v58 = vsel %vm1085_vm1, %v1077_v49, %v1084_v53  ;;  %v1036_v60 = vpack.c.bf16 %v1028_v56, %v1028_v56  ;;  %v1079_v62 = vunpack.c.l.b16 %v1035_v57 }
 0x152   : > { %1194 = vmatpush1.bf16.msra.mxu1 %v4531_v47 }
 0x153   : > { %v1080_v2 = vunpack.c.l.b16 %v1036_v60 }
 0x154   : > { %4237 = vmatmul.mubr.bf16.vlgmr.msra.gmra.mrb[0].mxu0 %v5619_v12  ;;  %v1019_v12 = vrot.slane %v1018_v52, 2 }
 0x155   : > { %4240 = vmatprep.mubr.bf16.mxu0 %v5623_v20  ;;  %v1088_v20 = vsel %vm1087_vm2, %v1078_v54, %v1086_v58 }
 0x156   : > { %v1020_v61 = vadd.f32 %v1019_v12, %v1018_v52  ;;  %v1090_v4 = vsel %vm1089_vm3, %v1079_v62, %v1088_v20 }
 0x157   : > { %v1092_v8 = vsel %vm1091_vm4, %v1080_v2, %v1090_v4 }
 0x158   : > { %v1021_v0 = vrot.slane %v1020_v61, 1  ;;  %v1094_v10 = vsel %vm1093_vm5, %v1081_v6, %v1092_v8 }
 0x15a   : > { %v1022_v5 = vadd.f32 %v1021_v0, %v1020_v61 }
 0x15c   : > { %4241 = vmatmul.mubr.bf16.gmra.mrb[4].mxu0 %v5625_v21  ;;  %v1030_v7 = vmul.f32 0.0625, %v1022_v5 }
 0x15d   : > { %4244 = vmatprep.mubr.bf16.mxu0 %v5631_v32  ;;  %v4013_v32 = vld [vmem:[%s6299_s4] ss:$0 sm:$0xff] }
 0x15e   : > { %v1038_v9 = vpack.c.bf16 %v1030_v7, %v1030_v7 }
 0x160   : > { %v1082_v11 = vunpack.c.l.b16 %v1038_v9 }
 0x162   : > { %v1096_v13 = vsel %vm1095_vm6, %v1082_v11, %v1094_v10 }
 0x163   : > { %v1097_v21 = vpack.c.b16 %v1096_v13, %v1096_v13 }
 0x164   : > { %4245 = vmatmul.mubr.bf16.gmra.mrb[8].mxu0 %v5633_v33 }
 0x165   : > { %4248 = vmatprep.mubr.bf16.mxu0 %v5639_v50  ;;  %1212 = vmatmul.mubr.bf16.vlgmr.msra.gmra.mrb[0].mxu1 %v1097_v21 }
 0x16c   : > { %4249 = vmatmul.mubr.bf16.gmra.mrb[12].mxu0 %v5643_v1  ;;  %v1058_v1 = vshrl.u32 %v1057_v24, 7 }
 0x16e   : > { %v1059_v36 = vsub.s32 0, %v1058_v1  ;;  %v1063_v39 = vsub.s32 1, %v1058_v1 }
 0x170   : > { %v1060_v42 = vrot.slane %v1055_v38, %v1059_v36  ;;  %v1064_v44 = vrot.slane %v1055_v38, %v1063_v39 }
 0x227   : > { %v4238_v14 = vpop.f32.mrb[0].mxu0 }
 0x228   : > { %v849_v15 = vpop.f32.mrb[1].mxu0  ;;  %v921_v17 = vadd.f32 %v4238_v14, %v4013_v32 }
 0x229   : > { %v4239_v16 = vpop.f32.mrb[2].mxu0  ;;  %v919_v22 = vadd.f32 %v4013_v32, %v849_v15 }
 0x22a   : > { %v922_v18 = vadd.f32 %v4239_v16, %v4013_v32  ;;  %v852_v19 = vpop.f32.mrb[3].mxu0 }
 0x22b   : > { %v920_v23 = vadd.f32 %v4013_v32, %v852_v19 }
 0x22c   : > { %v936_v33 = vpack.c.bf16 %v922_v18, %v921_v17 }
 0x22d   : > { %v935_v50 = vpack.c.bf16 %v920_v23, %v919_v22 }
 0x22e   : > { %944 = vst [vmem:[#allocation4 + $0x8] sm:$0xff] %v936_v33 }
 0x22f   : > { %943 = vst [vmem:[#allocation4] sm:$0xff] %v935_v50  ;;  %v4242_v25 = vpop.f32.mrb[4].mxu0 }
 0x230   : > { %v865_v26 = vpop.f32.mrb[5].mxu0  ;;  %v925_v28 = vadd.f32 %v4242_v25, %v4013_v32 }
 0x231   : > { %v4243_v27 = vpop.f32.mrb[6].mxu0  ;;  %v923_v31 = vadd.f32 %v4013_v32, %v865_v26 }
 0x232   : > { %v926_v29 = vadd.f32 %v4243_v27, %v4013_v32  ;;  %v868_v30 = vpop.f32.mrb[7].mxu0 }
 0x233   : > { %v924_v34 = vadd.f32 %v4013_v32, %v868_v30 }
 0x234   : > { %v938_v35 = vpack.c.bf16 %v926_v29, %v925_v28 }
 0x235   : > { %v937_v37 = vpack.c.bf16 %v924_v34, %v923_v31 }
 0x236   : > { %946 = vst [vmem:[#allocation4 + $0x18] sm:$0xff] %v938_v35 }
 0x237   : > { %945 = vst [vmem:[#allocation4 + $0x10] sm:$0xff] %v937_v37  ;;  %v4246_v40 = vpop.f32.mrb[8].mxu0 }
 0x238   : > { %v881_v41 = vpop.f32.mrb[9].mxu0  ;;  %v929_v45 = vadd.f32 %v4246_v40, %v4013_v32  ;;  %v1213_v51 = vpop.f32.mrb[0].mxu1 }
 0x239   : > { %v4247_v43 = vpop.f32.mrb[10].mxu0  ;;  %v927_v48 = vadd.f32 %v4013_v32, %v881_v41  ;;  %v1214_v53 = vadd.f32 %v1213_v51, %v1060_v42  ;;  %v1215_v54 = vpop.f32.mrb[1].mxu1 }
 0x23a   : > { %v930_v46 = vadd.f32 %v4247_v43, %v4013_v32  ;;  %v884_v47 = vpop.f32.mrb[11].mxu0  ;;  %v1216_v56 = vadd.f32 %v1215_v54, %v1064_v44  ;;  %v1217_v57 = vpop.f32.mrb[2].mxu1 }
 0x23b   : > { %v928_v49 = vadd.f32 %v4013_v32, %v884_v47  ;;  %1220 = vst [vmem:[#allocation2] sm:$0xff] %v1214_v53  ;;  %v1218_v12 = vpop.f32.mrb[3].mxu1 }
 0x23c   : > { %v940_v52 = vpack.c.bf16 %v930_v46, %v929_v45  ;;  %1221 = vst [vmem:[#allocation3] sm:$0xff] %v1216_v56 }
 0x23d   : > { %v939_v55 = vpack.c.bf16 %v928_v49, %v927_v48 }
 0x23e   : > { %948 = vst [vmem:[#allocation4 + $0x28] sm:$0xff] %v940_v52 }
 0x23f   : > { %947 = vst [vmem:[#allocation4 + $0x20] sm:$0xff] %v939_v55  ;;  %v4250_v58 = vpop.f32.mrb[12].mxu0 }
 0x240   : > { %v897_v59 = vpop.f32.mrb[13].mxu0  ;;  %v933_v61 = vadd.f32 %v4250_v58, %v4013_v32 }
 0x241   : > { %v4251_v60 = vpop.f32.mrb[14].mxu0  ;;  %v931_v63 = vadd.f32 %v4013_v32, %v897_v59 }
 0x242   : > { %v934_v62 = vadd.f32 %v4251_v60, %v4013_v32  ;;  %v900_v20 = vpop.f32.mrb[15].mxu0 }
 0x243   : > { %v932_v0 = vadd.f32 %v4013_v32, %v900_v20 }
 0x244   : > { %v942_v2 = vpack.c.bf16 %v934_v62, %v933_v61 }
 0x245   : > { %v941_v3 = vpack.c.bf16 %v932_v0, %v931_v63 }
 0x246   : > { %950 = vst [vmem:[#allocation4 + $0x38] sm:$0xff] %v942_v2 }
 0x247   : > { %949 = vst [vmem:[#allocation4 + $0x30] sm:$0xff] %v941_v3 }
 0x248 PF: > { %v4544_v4 = vld [vmem:[#allocation15 + $0x4] ss:$24 sps:$4 sm:$0xff]   ;;  %v4546_v5 = vld [vmem:[#allocation15] ss:$24 sps:$4 sm:$0xff]   ;;  %v5192_v6 = vmov 0   ;;  %v1222_v22 = vld [vmem:[#allocation2] sm:$0xff]  ;;  %v1308_v33 = vlaneseq }
 0x249   : > { %1610 = vmatprep.mubr.bf16.mxu0 %v5192_v6  ;;  %4543 = vset.pattern.permute.xlu0 %v5192_v6  ;;  %v4547_v7 = vld [vmem:[#allocation15 + $0x34] ss:$24 sps:$4 sm:$0xff]   ;;  %v4549_v8 = vld [vmem:[#allocation15 + $0x30] ss:$24 sps:$4 sm:$0xff]   ;;  %v4550_v9 = vld [vmem:[#allocation15 + $0x64] ss:$24 sps:$4 sm:$0xff]   ;;  %v5665_v23 = vpack.c.bf16 %v1222_v22, %v1222_v22 }
 0x24a   : > { %1578 = vmatprep.subr.bf16.mxu0 %v4544_v4  ;;  %4542 = vset.pattern.permute.xlu1 %v5192_v6  ;;  %v4552_v10 = vld [vmem:[#allocation15 + $0x60] ss:$24 sps:$4 sm:$0xff]   ;;  %v4553_v11 = vld [vmem:[#allocation15 + $0x94] ss:$24 sps:$4 sm:$0xff]   ;;  %v4555_v13 = vld [vmem:[#allocation15 + $0x90] ss:$24 sps:$4 sm:$0xff]  }
 0x24b   : > { %1579 = vmatpush1.bf16.msra.mxu0 %v4546_v5  ;;  %1651 = vmatprep.mubr.bf16.mxu1 %v5192_v6  ;;  %v4556_v21 = vld [vmem:[#allocation15 + $0xc4] ss:$24 sps:$4 sm:$0xff]   ;;  %v4558_v14 = vld [vmem:[#allocation15 + $0xc0] ss:$24 sps:$4 sm:$0xff]   ;;  %v4559_v32 = vld [vmem:[#allocation15 + $0xf4] ss:$24 sps:$4 sm:$0xff]  }
 0x24c   : > { %1580 = vmatprep.subr.bf16.mxu0 %v4547_v7  ;;  %v4561_v15 = vld [vmem:[#allocation15 + $0xf0] ss:$24 sps:$4 sm:$0xff]   ;;  %v4562_v16 = vld [vmem:[#allocation15 + $0x124] ss:$24 sps:$4 sm:$0xff]   ;;  %v4564_v17 = vld [vmem:[#allocation15 + $0x120] ss:$24 sps:$4 sm:$0xff]  }
 0x24d   : > { %v4565_v18 = vld [vmem:[#allocation15 + $0x154] ss:$24 sps:$4 sm:$0xff]   ;;  %v4567_v19 = vld [vmem:[#allocation15 + $0x150] ss:$24 sps:$4 sm:$0xff]   ;;  %v5670_v24 = vshrl.u32 %v1308_v33, 7  ;;  %s6301_s25 = sld [smem:[#allocation43_spill]] }
 0x24e   : > { %v5193_v50 = vmov 1966171168   ;;  %v1701_v35 = vld [vmem:[#allocation4] sm:$0xff]  ;;  %v1702_v44 = vld [vmem:[#allocation4 + $0x8] sm:$0xff]  ;;  %v1703_v46 = vld [vmem:[#allocation4 + $0x10] sm:$0xff]  ;;  %s6302_s24 = sld [smem:[#allocation40_spill]] }
 0x24f   : > { %1581 = vmatpush1.bf16.msra.mxu0 %v4549_v8  ;;  %v1728_v25 = vunpack.c.l.s4 %v5193_v50  ;;  %v5673_v26 = vsub.s32 0, %v5670_v24  ;;  %v1709_v40 = vunpack.c.l.bf16 %v1701_v35  ;;  %v1710_v45 = vunpack.c.h.bf16 %v1701_v35  ;;  %v1705_v54 = vld [vmem:[#allocation4 + $0x20] sm:$0xff]  ;;  %v1704_v3 = vld [vmem:[#allocation4 + $0x18] sm:$0xff]  ;;  %s6303_s21 = sld [smem:[#allocation33_spill]]  ;;  %s6304_s4 = sld [smem:[#allocation37_spill]] }
 0x250   : > { %1582 = vmatprep.subr.bf16.mxu0 %v4550_v9  ;;  %v1711_v51 = vunpack.c.l.bf16 %v1702_v44  ;;  %v1712_v53 = vunpack.c.h.bf16 %v1702_v44  ;;  %v1713_v57 = vunpack.c.l.bf16 %v1703_v46  ;;  %v1714_v61 = vunpack.c.h.bf16 %v1703_v46  ;;  %v1708_v46 = vld [vmem:[#allocation4 + $0x38] sm:$0xff]  ;;  %s6305_s3 = sld [smem:[#allocation45_spill]] }
 0x251   : > { %v1729_v27 = vunpack.c.0.s8 %v1728_v25  ;;  %v1717_v62 = vunpack.c.l.bf16 %v1705_v54  ;;  %v1716_v22 = vunpack.c.h.bf16 %v1704_v3  ;;  %vm1929_vm7 = vcmask 130112  }
 0x252   : > { %vm1994_vm8 = vcmask 1041409   ;;  %vm1996_vm9 = vcmask 1042434   ;;  %vm1998_vm10 = vcmask 1043459   ;;  %vm2000_vm11 = vcmask 1044484  }
 0x253   : > { %1583 = vmatpush1.bf16.msra.mxu0 %v4552_v10  ;;  %v1306_v1 = vld [vmem:[%s6301_s25] sm:$0x3f]  ;;  %v1732_v29 = vsub.s32 %v1729_v27, %v5670_v24  ;;  %v1718_v10 = vunpack.c.h.bf16 %v1705_v54  ;;  %vm2002_vm12 = vcmask 1045509   ;;  %vm2004_vm13 = vcmask 1046534  }
 0x254   : > { %1584 = vmatprep.subr.bf16.mxu0 %v4553_v11  ;;  %v1311_v28 = vrot.slane %v1306_v1, %v5673_v26  ;;  %v5687_v58 = vld [vmem:[%s6302_s24] ss:$0 sm:$0xff]  ;;  %v1715_v11 = vunpack.c.l.bf16 %v1704_v3  ;;  %vm2006_vm14 = vcmask 1047559   ;;  %vm2009_vm15 = vcmask 130048  }
 0x255   : > { %vm5195_vm0 = vmmov 0  }
 0x257   : > { %1585 = vmatpush1.bf16.msra.mxu0 %v4555_v13 }
 0x258   : > { %1586 = vmatprep.subr.bf16.mxu0 %v4556_v21 }
 0x25b   : > { %1587 = vmatpush1.bf16.msra.mxu0 %v4558_v14 }
 0x25c   : > { %1588 = vmatprep.subr.bf16.mxu0 %v4559_v32 }
 0x25f   : > { %1589 = vmatpush1.bf16.msra.mxu0 %v4561_v15  ;;  %v1706_v15 = vld [vmem:[#allocation4 + $0x28] sm:$0xff] }
 0x260   : > { %1590 = vmatprep.subr.bf16.mxu0 %v4562_v16  ;;  %v1719_v50 = vunpack.c.l.bf16 %v1706_v15 }
 0x263   : > { %1591 = vmatpush1.bf16.msra.mxu0 %v4564_v17 }
 0x264   : > { %1592 = vmatprep.subr.bf16.mxu0 %v4565_v18 }
 0x267   : > { %1593 = vmatpush1.bf16.msra.mxu0 %v4567_v19 }
 0x26a   : > { %1611 = vmatmul.mubr.bf16.vlgmr.msra.gmra.mrb[0].mxu0 %v5665_v23 }
 0x26b   : > { %1692 = vmatprep.mubr.bf16.mxu0 %v5192_v6 }
 0x33d   : > { %v1612_v30 = vpop.f32.mrb[0].mxu0 }
 0x33e   : > { %v1613_v31 = vadd.f32 %v1612_v30, %v1311_v28  ;;  %v5680_v34 = vpop.f32.mrb[1].mxu0  ;;  %v1707_v30 = vld [vmem:[#allocation4 + $0x30] sm:$0xff] }
 0x33f   : > { %v1616_v36 = vpop.f32.mrb[2].mxu0 }
 0x340   : > { %v1726_v37 = vcombine.high %v1613_v31, %v1613_v31  ;;  %v1733_v38 = vrot.slane %v1613_v31, %v1732_v29  ;;  %v1617_v39 = vpop.f32.mrb[3].mxu0 }
 0x342   : > { %v1740_v41 = vrot.slane %v1726_v37, %v1732_v29  ;;  %v1741_v42 = vcombine.high %v1733_v38, %v1733_v38  ;;  %v1749_v43 = vrot.slane %v1733_v38, %v1732_v29  ;;  %v1720_v38 = vunpack.c.h.bf16 %v1706_v15 }
 0x344   : > { %v1771_v47 = vcombine.high %v1749_v43, %v1749_v43  ;;  %v1778_v48 = vrot.slane %v1749_v43, %v5673_v26  ;;  %v1756_v49 = vrot.slane %v1740_v41, %v1732_v29  ;;  %v1763_v52 = vrot.slane %v1741_v42, %v1732_v29 }
 0x345   : > { %v1742_v20 = vcombine.high %v1740_v41, %v1740_v41 }
 0x346   : > { %v1815_v55 = vadd.f32 %v1778_v48, %v1709_v40  ;;  %v1816_v56 = vadd.f32 %v1778_v48, %v1710_v45  ;;  %v1786_v12 = vrot.slane %v1771_v47, %v5673_v26  ;;  %v1782_v59 = vrot.slane %v1763_v52, %v5673_v26 }
 0x347   : > { %v1794_v2 = vrot.slane %v1756_v49, %v5673_v26  ;;  %v1773_v8 = vcombine.high %v1763_v52, %v1763_v52  ;;  %v1770_v19 = vrot.slane %v1742_v20, %v1732_v29  ;;  %v1772_v37 = vcombine.high %v1756_v49, %v1756_v49 }
 0x348   : > { %v1831_v60 = vmax.f32 %v1815_v55, 0.0  ;;  %v1817_v63 = vadd.f32 %v1782_v59, %v1711_v51  ;;  %v1818_v0 = vadd.f32 %v1782_v59, %v1712_v53  ;;  %v1832_v5 = vmax.f32 %v1816_v56, 0.0 }
 0x349   : > { %v1819_v7 = vadd.f32 %v1786_v12, %v1713_v57  ;;  %v1820_v14 = vadd.f32 %v1786_v12, %v1714_v61  ;;  %v1823_v32 = vadd.f32 %v1794_v2, %v1717_v62  ;;  %v1790_v18 = vrot.slane %v1773_v8, %v5673_v26 }
 0x34a   : > { %v1854_v4 = vmul.f32 %v5687_v58, %v1831_v60  ;;  %v1833_v9 = vmax.f32 %v1817_v63, 0.0  ;;  %v1834_v21 = vmax.f32 %v1818_v0, 0.0  ;;  %v1855_v16 = vmul.f32 %v5687_v58, %v1832_v5 }
 0x34b   : > { %v1835_v17 = vmax.f32 %v1819_v7, 0.0  ;;  %v1836_v1 = vmax.f32 %v1820_v14, 0.0  ;;  %v1839_v27 = vmax.f32 %v1823_v32, 0.0  ;;  %v1824_v28 = vadd.f32 %v1794_v2, %v1718_v10 }
 0x34c   : > { %1870 = vadd.xlane.f32.xlu0 %v1854_v4  ;;  %v1856_v13 = vmul.f32 %v5687_v58, %v1833_v9  ;;  %v1857_v25 = vmul.f32 %v5687_v58, %v1834_v21  ;;  %v1821_v35 = vadd.f32 %v1790_v18, %v1715_v11  ;;  %v1798_v36 = vrot.slane %v1770_v19, %v5673_v26 }
 0x34d   : > { %v1858_v31 = vmul.f32 %v5687_v58, %v1835_v17  ;;  %v1721_v29 = vunpack.c.l.bf16 %v1707_v30  ;;  %v1859_v39 = vmul.f32 %v5687_v58, %v1836_v1  ;;  %v1862_v40 = vmul.f32 %v5687_v58, %v1839_v27 }
 0x34e   : > { %1874 = vadd.xlane.f32.xlu1 %v1856_v13  ;;  %v1840_v41 = vmax.f32 %v1824_v28, 0.0  ;;  %v1822_v42 = vadd.f32 %v1790_v18, %v1716_v22  ;;  %v1837_v43 = vmax.f32 %v1821_v35, 0.0  ;;  %v1825_v44 = vadd.f32 %v1798_v36, %v1719_v50 }
 0x34f   : > { %v1802_v45 = vrot.slane %v1772_v37, %v5673_v26  ;;  %v1774_v47 = vcombine.high %v1770_v19, %v1770_v19  ;;  %v1722_v48 = vunpack.c.h.bf16 %v1707_v30  ;;  %v1826_v52 = vadd.f32 %v1798_v36, %v1720_v38 }
 0x350   : > { %1872 = vadd.xlane.f32.xlu0 %v1855_v16  ;;  %v1863_v49 = vmul.f32 %v5687_v58, %v1840_v41  ;;  %v1838_v51 = vmax.f32 %v1822_v42, 0.0  ;;  %v1723_v53 = vunpack.c.l.bf16 %v1708_v46  ;;  %v1860_v54 = vmul.f32 %v5687_v58, %v1837_v43 }
 0x351   : > { %v1841_v55 = vmax.f32 %v1825_v44, 0.0  ;;  %v1827_v56 = vadd.f32 %v1802_v45, %v1721_v29  ;;  %v1806_v57 = vrot.slane %v1774_v47, %v5673_v26  ;;  %v1842_v59 = vmax.f32 %v1826_v52, 0.0 }
 0x352   : > { %1876 = vadd.xlane.f32.xlu1 %v1857_v25  ;;  %v1861_v12 = vmul.f32 %v5687_v58, %v1838_v51  ;;  %v1828_v60 = vadd.f32 %v1802_v45, %v1722_v48  ;;  %v1724_v61 = vunpack.c.h.bf16 %v1708_v46  ;;  %v1919_v16 = vand.u32 127, %v1308_v33 }
 0x353   : > { %v1864_v62 = vmul.f32 %v5687_v58, %v1841_v55  ;;  %v1843_v20 = vmax.f32 %v1827_v56, 0.0  ;;  %v1829_v63 = vadd.f32 %v1806_v57, %v1723_v53  ;;  %v1865_v0 = vmul.f32 %v5687_v58, %v1842_v59 }
 0x354   : > { %1878 = vadd.xlane.f32.xlu0 %v1858_v31  ;;  %v1844_v2 = vmax.f32 %v1828_v60, 0.0  ;;  %v1830_v3 = vadd.f32 %v1806_v57, %v1724_v61  ;;  %v1924_v18 = vadd.s32 4294967288, %v1919_v16  ;;  %v5736_v25 = vsub.s32 %v1919_v16, %v5670_v24 }
 0x355   : > { %v1866_v4 = vmul.f32 %v5687_v58, %v1843_v20  ;;  %v1845_v5 = vmax.f32 %v1829_v63, 0.0  ;;  %v5809_v16 = vsub.s32 2, %v5670_v24 }
 0x356   : > { %1880 = vadd.xlane.f32.xlu1 %v1859_v39  ;;  %v1867_v7 = vmul.f32 %v5687_v58, %v1844_v2  ;;  %v1846_v8 = vmax.f32 %v1830_v3, 0.0  ;;  %v5731_v22 = vsub.s32 %v1924_v18, %v5670_v24  ;;  %v5799_v3 = vsub.s32 1, %v5670_v24 }
 0x357   : > { %v1868_v9 = vmul.f32 %v5687_v58, %v1845_v5 }
 0x358   : > { %1886 = vadd.xlane.f32.xlu0 %v1862_v40  ;;  %v1869_v10 = vmul.f32 %v5687_v58, %v1846_v8  ;;  %v5804_v8 = vsub.s32 5, %v5670_v24 }
 0x35a   : > { %1888 = vadd.xlane.f32.xlu1 %v1863_v49 }
 0x35c   : > { %1882 = vadd.xlane.f32.xlu0 %v1860_v54 }
 0x35e   : > { %1884 = vadd.xlane.f32.xlu1 %v1861_v12 }
 0x360   : > { %1890 = vadd.xlane.f32.xlu0 %v1864_v62 }
 0x362   : > { %1892 = vadd.xlane.f32.xlu1 %v1865_v0 }
 0x364   : > { %1894 = vadd.xlane.f32.xlu0 %v1866_v4 }
 0x366   : > { %1896 = vadd.xlane.f32.xlu1 %v1867_v7 }
 0x368   : > { %1898 = vadd.xlane.f32.xlu0 %v1868_v9 }
 0x36a   : > { %1900 = vadd.xlane.f32.xlu1 %v1869_v10 }
 0x3d9   : > { %v5711_v11 = vpop.xlane.xlu0 %1870 }
 0x3da   : > { %v1923_v37 = vrot.slane %v5711_v11, %v5736_v25 }
 0x3db   : > { %v5713_v13 = vpop.xlane.xlu1 %1874 }
 0x3dc   : > { %v1934_v28 = vrot.slane %v5713_v13, %v5736_v25 }
 0x3dd   : > { %v5715_v21 = vpop.xlane.xlu0 %1872 }
 0x3de   : > { %v1928_v30 = vrot.slane %v5715_v21, %v5731_v22 }
 0x3df   : > { %v5717_v14 = vpop.xlane.xlu1 %1876 }
 0x3e0   : > { %v1938_v1 = vrot.slane %v5717_v14, %v5731_v22  ;;  %v1930_v41 = vsel %vm1929_vm7, %v1928_v30, %v1923_v37 }
 0x3e1   : > { %v5719_v32 = vpop.xlane.xlu0 %1878 }
 0x3e2   : > { %v1943_v35 = vrot.slane %v5719_v32, %v5736_v25  ;;  %v1939_v38 = vsel %vm1929_vm7, %v1938_v1, %v1934_v28  ;;  %v2040_v1 = vsub.s32 6, %v5670_v24 }
 0x3e3   : > { %v5721_v15 = vpop.xlane.xlu1 %1880  ;;  %v1995_v44 = vsel %vm1994_vm8, %v1939_v38, %v1930_v41  ;;  %v5826_v38 = vsub.s32 3, %v5670_v24 }
 0x3e4   : > { %v1947_v33 = vrot.slane %v5721_v15, %v5731_v22 }
 0x3e5   : > { %v5724_v17 = vpop.xlane.xlu0 %1886 }
 0x3e6   : > { %v1948_v40 = vsel %vm1929_vm7, %v1947_v33, %v1943_v35  ;;  %v1961_v51 = vrot.slane %v5724_v17, %v5736_v25 }
 0x3e7   : > { %v5726_v19 = vpop.xlane.xlu1 %1888  ;;  %v1997_v47 = vsel %vm1996_vm9, %v1948_v40, %v1995_v44 }
 0x3e8   : > { %v1965_v45 = vrot.slane %v5726_v19, %v5731_v22 }
 0x3e9   : > { %v5728_v58 = vpop.xlane.xlu0 %1882 }
 0x3ea   : > { %v1952_v29 = vrot.slane %v5728_v58, %v5736_v25  ;;  %v1966_v56 = vsel %vm1929_vm7, %v1965_v45, %v1961_v51 }
 0x3eb   : > { %v5733_v50 = vpop.xlane.xlu1 %1884 }
 0x3ec   : > { %v1956_v31 = vrot.slane %v5733_v50, %v5731_v22 }
 0x3ed   : > { %v5740_v27 = vpop.xlane.xlu0 %1890 }
 0x3ee   : > { %v1957_v42 = vsel %vm1929_vm7, %v1956_v31, %v1952_v29  ;;  %v1970_v48 = vrot.slane %v5740_v27, %v5736_v25 }
 0x3ef   : > { %v5752_v36 = vpop.xlane.xlu1 %1892  ;;  %v1999_v52 = vsel %vm1998_vm10, %v1957_v42, %v1997_v47 }
 0x3f0   : > { %v1974_v43 = vrot.slane %v5752_v36, %v5731_v22  ;;  %v2001_v61 = vsel %vm2000_vm11, %v1966_v56, %v1999_v52 }
 0x3f1   : > { %v5759_v39 = vpop.xlane.xlu0 %1894 }
 0x3f2   : > { %v1979_v53 = vrot.slane %v5759_v39, %v5736_v25  ;;  %v1975_v55 = vsel %vm1929_vm7, %v1974_v43, %v1970_v48 }
 0x3f3   : > { %v5769_v46 = vpop.xlane.xlu1 %1896  ;;  %v2003_v62 = vsel %vm2002_vm12, %v1975_v55, %v2001_v61 }
 0x3f4   : > { %v1983_v49 = vrot.slane %v5769_v46, %v5731_v22 }
 0x3f5   : > { %v5781_v54 = vpop.xlane.xlu0 %1898 }
 0x3f6   : > { %v1984_v12 = vsel %vm1929_vm7, %v1983_v49, %v1979_v53  ;;  %v1988_v59 = vrot.slane %v5781_v54, %v5736_v25  ;;  %v5842_v49 = vsub.s32 4, %v5670_v24 }
 0x3f7   : > { %v5785_v57 = vpop.xlane.xlu1 %1900  ;;  %v2005_v63 = vsel %vm2004_vm13, %v1984_v12, %v2003_v62 }
 0x3f8   : > { %v1992_v60 = vrot.slane %v5785_v57, %v5731_v22 }
 0x3fa   : > { %v1993_v20 = vsel %vm1929_vm7, %v1992_v60, %v1988_v59 }
 0x3fb   : > { %v2007_v0 = vsel %vm2006_vm14, %v1993_v20, %v2005_v63 }
 0x3fc   : > { %v2010_v2 = vsel %vm2009_vm15, %v2007_v0, -inf }
 0x3fd   : > { %2011 = vmax.xlane.f32.xlu0 %v2010_v2 }
 0x48a   : > { %v2012_v4 = vpop.xlane.xlu0 %2011 }
 0x48b   : > { %v2017_v5 = vrot.slane %v2012_v4, %v5673_v26  ;;  %v2021_v7 = vrot.slane %v2012_v4, %v5799_v3  ;;  %v5814_v33 = vrot.slane %v2012_v4, %v5804_v8  ;;  %v2025_v31 = vrot.slane %v2012_v4, %v5809_v16 }
 0x48c   : > { %v5821_v37 = vrot.slane %v2012_v4, %v2040_v1  ;;  %v2029_v43 = vrot.slane %v2012_v4, %v5826_v38  ;;  %v2033_v53 = vrot.slane %v2012_v4, %v5842_v49 }
 0x48d   : > { %v2054_v9 = vsub.f32 %v5711_v11, %v2017_v5  ;;  %v2055_v10 = vsub.f32 %v5715_v21, %v2017_v5  ;;  %v2056_v18 = vsub.f32 %v5713_v13, %v2021_v7  ;;  %v2057_v35 = vsub.f32 %v5717_v14, %v2021_v7 }
 0x48e   : > { %v2044_v21 = vsub.s32 7, %v5670_v24  ;;  %v2064_v13 = vsub.f32 %v5740_v27, %v5814_v33  ;;  %v2058_v29 = vsub.f32 %v5719_v32, %v2025_v31  ;;  %v2066_v41 = vsub.f32 %v5759_v39, %v5821_v37 }
 0x48f   : > { %v2070_v28 = vmul.f32 1.442695, %v2054_v9  ;;  %v2072_v30 = vmul.f32 1.442695, %v2055_v10  ;;  %v2074_v11 = vmul.f32 1.442695, %v2056_v18  ;;  %v2059_v44 = vsub.f32 %v5721_v15, %v2025_v31 }
 0x490   : > { %v2076_v40 = vmul.f32 1.442695, %v2057_v35  ;;  %v2045_v14 = vrot.slane %v2012_v4, %v2044_v21  ;;  %v2090_v42 = vmul.f32 1.442695, %v2064_v13  ;;  %v2078_v27 = vmul.f32 1.442695, %v2058_v29 }
 0x491   : > { %4728 = vpow2.f32 %v2070_v28  ;;  %v2094_v32 = vmul.f32 1.442695, %v2066_v41  ;;  %v2060_v39 = vsub.f32 %v5728_v58, %v2029_v43  ;;  %v2080_v51 = vmul.f32 1.442695, %v2059_v44 }
 0x492   : > { %4730 = vpow2.f32 %v2072_v30  ;;  %v2068_v47 = vsub.f32 %v5781_v54, %v2045_v14  ;;  %v2061_v54 = vsub.f32 %v5733_v50, %v2029_v43  ;;  %v2062_v12 = vsub.f32 %v5724_v17, %v2033_v53 }
 0x493   : > { %4732 = vpow2.f32 %v2074_v11  ;;  %v2082_v55 = vmul.f32 1.442695, %v2060_v39  ;;  %v2063_v61 = vsub.f32 %v5726_v19, %v2033_v53  ;;  %v2065_v63 = vsub.f32 %v5752_v36, %v5814_v33 }
 0x494   : > { %4734 = vpow2.f32 %v2076_v40  ;;  %v2098_v52 = vmul.f32 1.442695, %v2068_v47  ;;  %v2084_v59 = vmul.f32 1.442695, %v2061_v54  ;;  %v2086_v62 = vmul.f32 1.442695, %v2062_v12 }
 0x495   : > { %4736 = vpow2.f32 %v2090_v42  ;;  %v2088_v0 = vmul.f32 1.442695, %v2063_v61  ;;  %v2067_v19 = vsub.f32 %v5769_v46, %v5821_v37  ;;  %v2092_v4 = vmul.f32 1.442695, %v2065_v63 }
 0x496   : > { %4738 = vpow2.f32 %v2078_v27  ;;  %v2069_v7 = vsub.f32 %v5785_v57, %v2045_v14 }
 0x497   : > { %4740 = vpow2.f32 %v2094_v32  ;;  %v2096_v36 = vmul.f32 1.442695, %v2067_v19 }
 0x498   : > { %4742 = vpow2.f32 %v2080_v51  ;;  %v2100_v10 = vmul.f32 1.442695, %v2069_v7 }
 0x499   : > { %4744 = vpow2.f32 %v2098_v52 }
 0x49a   : > { %4746 = vpow2.f32 %v2082_v55 }
 0x49b   : > { %v5835_v45 = vpop.eup %4728  ;;  %4748 = vpow2.f32 %v2084_v59 }
 0x49c   : > { %v5838_v48 = vpop.eup %4730  ;;  %2119 = vperm.xlu1 %4542, %v5835_v45   ;;  %4750 = vpow2.f32 %v2086_v62 }
 0x49d   : > { %2122 = vperm.xlu0 %4543, %v5838_v48   ;;  %v5846_v15 = vpop.eup %4732  ;;  %4752 = vpow2.f32 %v2088_v0 }
 0x49e   : > { %v5851_v56 = vpop.eup %4734  ;;  %4754 = vpow2.f32 %v2092_v4 }
 0x49f   : > { %v5854_v58 = vpop.eup %4736  ;;  %4756 = vpow2.f32 %v2096_v36 }
 0x4a0   : > { %2125 = vperm.xlu1 %4542, %v5846_v15   ;;  %v5858_v60 = vpop.eup %4738  ;;  %4758 = vpow2.f32 %v2100_v10 }
 0x4a1   : > { %2149 = vperm.xlu0 %4543, %v5854_v58   ;;  %v5861_v50 = vpop.eup %4740 }
 0x4a2   : > { %v5865_v20 = vpop.eup %4742 }
 0x4a3   : > { %v5868_v17 = vpop.eup %4744 }
 0x4a4   : > { %2128 = vperm.xlu1 %4542, %v5851_v56   ;;  %v5873_v2 = vpop.eup %4746 }
 0x4a5   : > { %2155 = vperm.xlu0 %4543, %v5861_v50   ;;  %v5878_v5 = vpop.eup %4748 }
 0x4a6   : > { %v5882_v9 = vpop.eup %4750 }
 0x4a7   : > { %v5885_v18 = vpop.eup %4752 }
 0x4a8   : > { %2131 = vperm.xlu1 %4542, %v5858_v60   ;;  %v5888_v46 = vpop.eup %4754 }
 0x4a9   : > { %2161 = vperm.xlu0 %4543, %v5868_v17   ;;  %v5891_v33 = vpop.eup %4756 }
 0x4aa   : > { %v5894_v57 = vpop.eup %4758 }
 0x4ac   : > { %2134 = vperm.xlu1 %4542, %v5865_v20  }
 0x4b0   : > { %2137 = vperm.xlu1 %4542, %v5873_v2  }
 0x4b4   : > { %2140 = vperm.xlu1 %4542, %v5878_v5  }
 0x4b8   : > { %2143 = vperm.xlu1 %4542, %v5882_v9  }
 0x4bc   : > { %2146 = vperm.xlu1 %4542, %v5885_v18  }
 0x4c0   : > { %2152 = vperm.xlu1 %4542, %v5888_v46  }
 0x4c4   : > { %2158 = vperm.xlu1 %4542, %v5891_v33  }
 0x4c8   : > { %2164 = vperm.xlu1 %4542, %v5894_v57  }
 0x51b   : > { %v2120_v28 = vpop.permute.xlu1 %2119 }
 0x51c   : > { %v2123_v13 = vpop.permute.xlu0 %2122  ;;  %v2169_v32 = vrot.slane %v2120_v28, %v5736_v25 }
 0x51d   : > { %v2173_v47 = vrot.slane %v2123_v13, %v5731_v22 }
 0x51f   : > { %v2126_v30 = vpop.permute.xlu1 %2125  ;;  %v2174_v63 = vsel %vm1929_vm7, %v2173_v47, %v2169_v32  ;;  %v4570_v47 = vld [vmem:[#allocation15 + $0x8] ss:$24 sps:$4 sm:$0xff]   ;;  %v4571_v32 = vld [vmem:[#allocation15 + $0x3c] ss:$24 sps:$4 sm:$0xff]  }
 0x520   : > { %v2150_v14 = vpop.permute.xlu0 %2149  ;;  %v2178_v39 = vrot.slane %v2126_v30, %v5736_v25 }
 0x521   : > { %v2214_v0 = vrot.slane %v2150_v14, %v5736_v25 }
 0x523   : > { %v2129_v31 = vpop.permute.xlu1 %2128 }
 0x524   : > { %v2182_v42 = vrot.slane %v2129_v31, %v5731_v22  ;;  %v2156_v43 = vpop.permute.xlu0 %2155 }
 0x525   : > { %v2223_v7 = vrot.slane %v2156_v43, %v5736_v25 }
 0x526   : > { %v2183_v54 = vsel %vm1929_vm7, %v2182_v42, %v2178_v39  ;;  %v4573_v39 = vld [vmem:[#allocation15 + $0x38] ss:$24 sps:$4 sm:$0xff]  }
 0x527   : > { %v2132_v35 = vpop.permute.xlu1 %2131  ;;  %v2238_v36 = vsel %vm1994_vm8, %v2183_v54, %v2174_v63  ;;  %v4579_v54 = vld [vmem:[#allocation15 + $0x98] ss:$24 sps:$4 sm:$0xff]  }
 0x528   : > { %v2187_v52 = vrot.slane %v2132_v35, %v5736_v25  ;;  %v2162_v10 = vpop.permute.xlu0 %2161 }
 0x529   : > { %v2232_v13 = vrot.slane %v2162_v10, %v5736_v25 }
 0x52b   : > { %v2135_v11 = vpop.permute.xlu1 %2134 }
 0x52c   : > { %v2191_v44 = vrot.slane %v2135_v11, %v5731_v22 }
 0x52e   : > { %v2192_v59 = vsel %vm1929_vm7, %v2191_v44, %v2187_v52  ;;  %v4576_v52 = vld [vmem:[#allocation15 + $0x68] ss:$24 sps:$4 sm:$0xff]  }
 0x52f   : > { %v2138_v37 = vpop.permute.xlu1 %2137  ;;  %v2239_v30 = vsel %vm1996_vm9, %v2192_v59, %v2238_v36  ;;  %v4583_v59 = vld [vmem:[#allocation15 + $0xfc] ss:$24 sps:$4 sm:$0xff]  }
 0x530   : > { %v2196_v55 = vrot.slane %v2138_v37, %v5736_v25  ;;  %v4589_v36 = vld [vmem:[#allocation15 + $0x15c] ss:$24 sps:$4 sm:$0xff]  }
 0x533   : > { %v2141_v29 = vpop.permute.xlu1 %2140 }
 0x534   : > { %v2200_v51 = vrot.slane %v2141_v29, %v5731_v22 }
 0x536   : > { %v2201_v19 = vsel %vm1929_vm7, %v2200_v51, %v2196_v55  ;;  %v4574_v51 = vld [vmem:[#allocation15 + $0x6c] ss:$24 sps:$4 sm:$0xff]  }
 0x537   : > { %v2144_v40 = vpop.permute.xlu1 %2143  ;;  %v2240_v35 = vsel %vm1998_vm10, %v2201_v19, %v2239_v30  ;;  %v4580_v55 = vld [vmem:[#allocation15 + $0xcc] ss:$24 sps:$4 sm:$0xff]  }
 0x538   : > { %v2205_v61 = vrot.slane %v2144_v40, %v5736_v25 }
 0x53b   : > { %v2147_v41 = vpop.permute.xlu1 %2146 }
 0x53c   : > { %v2209_v53 = vrot.slane %v2147_v41, %v5731_v22 }
 0x53e   : > { %v2210_v28 = vsel %vm1929_vm7, %v2209_v53, %v2205_v61  ;;  %v4577_v53 = vld [vmem:[#allocation15 + $0x9c] ss:$24 sps:$4 sm:$0xff]   ;;  %v4585_v61 = vld [vmem:[#allocation15 + $0xf8] ss:$24 sps:$4 sm:$0xff]  }
 0x53f   : > { %v2153_v27 = vpop.permute.xlu1 %2152  ;;  %v2241_v29 = vsel %vm2000_vm11, %v2210_v28, %v2240_v35  ;;  %v4591_v28 = vld [vmem:[#allocation15 + $0x158] ss:$24 sps:$4 sm:$0xff]  }
 0x540   : > { %v2218_v12 = vrot.slane %v2153_v27, %v5731_v22  ;;  %v4568_v27 = vld [vmem:[#allocation15 + $0xc] ss:$24 sps:$4 sm:$0xff]  }
 0x541   : > { %1619 = vmatprep.subr.bf16.mxu1 %v4568_v27 }
 0x542   : > { %v2219_v31 = vsel %vm1929_vm7, %v2218_v12, %v2214_v0  ;;  %1620 = vmatpush1.bf16.msra.mxu1 %v4570_v47  ;;  %v4582_v12 = vld [vmem:[#allocation15 + $0xc8] ss:$24 sps:$4 sm:$0xff]  }
 0x543   : > { %v2159_v62 = vpop.permute.xlu1 %2158  ;;  %v2242_v14 = vsel %vm2002_vm12, %v2219_v31, %v2241_v29  ;;  %1621 = vmatprep.subr.bf16.mxu1 %v4571_v32  ;;  %v4588_v0 = vld [vmem:[#allocation15 + $0x128] ss:$24 sps:$4 sm:$0xff]  }
 0x544   : > { %v2227_v4 = vrot.slane %v2159_v62, %v5731_v22  ;;  %v4586_v62 = vld [vmem:[#allocation15 + $0x12c] ss:$24 sps:$4 sm:$0xff]  }
 0x546   : > { %v2228_v11 = vsel %vm1929_vm7, %v2227_v4, %v2223_v7  ;;  %1622 = vmatpush1.bf16.msra.mxu1 %v4573_v39  ;;  %v5194_v39 = vmov 0.0  }
 0x547   : > { %v2165_v37 = vpop.permute.xlu1 %2164  ;;  %v2243_v42 = vsel %vm2004_vm13, %v2228_v11, %v2242_v14  ;;  %1623 = vmatprep.subr.bf16.mxu1 %v4574_v51 }
 0x548   : > { %v2236_v40 = vrot.slane %v2165_v37, %v5731_v22 }
 0x54a   : > { %v2237_v41 = vsel %vm1929_vm7, %v2236_v40, %v2232_v13  ;;  %1624 = vmatpush1.bf16.msra.mxu1 %v4576_v52 }
 0x54b   : > { %v2244_v43 = vsel %vm2006_vm14, %v2237_v41, %v2243_v42  ;;  %1625 = vmatprep.subr.bf16.mxu1 %v4577_v53 }
 0x54c   : > { %v2246_v44 = vsel %vm2009_vm15, %v2244_v43, 0.0 }
 0x54d   : > { %2247 = vadd.xlane.f32.xlu0 %v2246_v44 }
 0x54e   : > { %1626 = vmatpush1.bf16.msra.mxu1 %v4579_v54 }
 0x54f   : > { %1627 = vmatprep.subr.bf16.mxu1 %v4580_v55 }
 0x552   : > { %1628 = vmatpush1.bf16.msra.mxu1 %v4582_v12 }
 0x553   : > { %1629 = vmatprep.subr.bf16.mxu1 %v4583_v59 }
 0x556   : > { %1630 = vmatpush1.bf16.msra.mxu1 %v4585_v61 }
 0x557   : > { %1631 = vmatprep.subr.bf16.mxu1 %v4586_v62 }
 0x55a   : > { %1632 = vmatpush1.bf16.msra.mxu1 %v4588_v0 }
 0x55b   : > { %1633 = vmatprep.subr.bf16.mxu1 %v4589_v36  ;;  %v3569_v36 = vld [vmem:[%s6304_s4] sm:$0xff] }
 0x55e   : > { %1634 = vmatpush1.bf16.msra.mxu1 %v4591_v28 }
 0x55f   : > { %4252 = vmatprep.subr.bf16.mxu1 %v5194_v39 }
 0x561   : > { %1652 = vmatmul.mubr.bf16.vlgmr.msra.gmra.mrb[0].mxu1 %v5665_v23 }
 0x562   : > { %4254 = vmatprep.mubr.msk.bf16.mxu1 %vm5195_vm0, %v5194_v39 }
 0x5da   : > { %v5929_v63 = vpop.xlane.xlu0 %2247 }
 0x5db   : > { %v2269_v19 = vrot.slane %v5929_v63, %v5842_v49  ;;  %v2253_v4 = vrot.slane %v5929_v63, %v5673_v26  ;;  %v2281_v7 = vrot.slane %v5929_v63, %v2044_v21  ;;  %v2257_v10 = vrot.slane %v5929_v63, %v5799_v3 }
 0x5dc   : > { %v2261_v26 = vrot.slane %v5929_v63, %v5809_v16  ;;  %v2273_v52 = vrot.slane %v5929_v63, %v5804_v8 }
 0x5dd   : > { %4760 = vrcp.f32 %v2269_v19 }
 0x5de   : > { %4762 = vrcp.f32 %v2253_v4 }
 0x5df   : > { %4764 = vrcp.f32 %v2281_v7 }
 0x5e0   : > { %4766 = vrcp.f32 %v2257_v10  ;;  %v3570_v10 = vstv %s6303_s21 }
 0x5e1   : > { %4768 = vrcp.f32 %v2261_v26  ;;  %vm3571_vm1 = vcmp.gt.s32.totalorder %v3569_v36, %v3570_v10 }
 0x5e7   : > { %v4761_v30 = vpop.eup %4760 }
 0x5e8   : > { %v4763_v21 = vpop.eup %4762  ;;  %v2303_v31 = vmul.f32 %v4761_v30, %v5882_v9  ;;  %v5945_v35 = vmul.f32 %v4761_v30, %v5885_v18 }
 0x5e9   : > { %v4765_v11 = vpop.eup %4764  ;;  %v2291_v37 = vmul.f32 %v4763_v21, %v5835_v45  ;;  %v5949_v13 = vmul.f32 %v4763_v21, %v5838_v48  ;;  %v2265_v48 = vrot.slane %v5929_v63, %v5826_v38 }
 0x5ea   : > { %v4767_v29 = vpop.eup %4766  ;;  %v5952_v40 = vpack.c.bf16 %v5945_v35, %v2303_v31  ;;  %v5955_v14 = vmul.f32 %v4765_v11, %v5868_v17  ;;  %v5958_v41 = vmul.f32 %v4765_v11, %v5894_v57  ;;  %v4592_v57 = vld [vmem:[#allocation7] sm:$0xff]   ;;  %v4602_v11 = vld [vmem:[#allocation15 + $0x14] ss:$24 sps:$4 sm:$0xff]  }
 0x5eb   : > { %v2314_v9 = vpack.c.bf16 %v5949_v13, %v2291_v37  ;;  %v2294_v43 = vmul.f32 %v4767_v29, %v5846_v15  ;;  %v5970_v17 = vmul.f32 %v4767_v29, %v5851_v56  ;;  %4770 = vrcp.f32 %v2265_v48  ;;  %v4769_v32 = vpop.eup %4768  ;;  %4253 = vmatpush3.bf16.msra.mxu1 %v4592_v57  ;;  %1660 = vmatprep.subr.bf16.mxu0 %v4602_v11 }
 0x5ec   : > { %v2611_v18 = vunpack.c.l.b16 %v5952_v40  ;;  %v5964_v45 = vpack.c.bf16 %v5958_v41, %v5955_v14  ;;  %4258 = vmatprep.subr.bf16.mxu1 %v5194_v39  ;;  %v2297_v56 = vmul.f32 %v4769_v32, %v5858_v60  ;;  %v2298_v51 = vmul.f32 %v4769_v32, %v5865_v20 }
 0x5ed   : > { %v2339_v42 = vunpack.c.l.b16 %v2314_v9  ;;  %v2340_v27 = vunpack.c.h.b16 %v2314_v9  ;;  %v2315_v47 = vpack.c.bf16 %v5970_v17, %v2294_v43  ;;  %4772 = vrcp.f32 %v2273_v52  ;;  %v4593_v9 = vld [vmem:[#allocation7 + $0x8] sm:$0xff]  }
 0x5ee   : > { %2614 = vperm.xlu0 %4543, %v2611_v18   ;;  %v2815_v44 = vunpack.c.l.b16 %v5964_v45  ;;  %v2316_v54 = vpack.c.bf16 %v2298_v51, %v2297_v56  ;;  %v2277_v60 = vrot.slane %v5929_v63, %v2040_v1  ;;  %v2612_v4 = vunpack.c.h.b16 %v5952_v40 }
 0x5ef   : > { %2342 = vperm.xlu1 %4542, %v2339_v42   ;;  %v2407_v15 = vunpack.c.l.b16 %v2315_v47  ;;  %v2408_v53 = vunpack.c.h.b16 %v2315_v47 }
 0x5f0   : > { %v2475_v20 = vunpack.c.l.b16 %v2316_v54  ;;  %4774 = vrcp.f32 %v2277_v60  ;;  %v2476_v61 = vunpack.c.h.b16 %v2316_v54 }
 0x5f2   : > { %2818 = vperm.xlu0 %4543, %v2815_v44  }
 0x5f3   : > { %2345 = vperm.xlu1 %4542, %v2340_v27  }
 0x5f5   : > { %v4771_v55 = vpop.eup %4770 }
 0x5f6   : > { %3601 = vperm.xlu0 %4543, %v2291_v37   ;;  %v2300_v12 = vmul.f32 %v4771_v55, %v5873_v2  ;;  %v2301_v59 = vmul.f32 %v4771_v55, %v5878_v5 }
 0x5f7   : > { %2410 = vperm.xlu1 %4542, %v2407_v15   ;;  %v4773_v0 = vpop.eup %4772  ;;  %v4595_v15 = vld [vmem:[#allocation7 + $0x18] sm:$0xff]  }
 0x5f8   : > { %v2317_v62 = vpack.c.bf16 %v2301_v59, %v2300_v12  ;;  %v2306_v24 = vmul.f32 %v4773_v0, %v5854_v58  ;;  %v2307_v2 = vmul.f32 %v4773_v0, %v5888_v46  ;;  %v3572_v46 = vsel %vm3571_vm1, 1, %v5192_v6 }
 0x5fa   : > { %3607 = vperm.xlu0 %4543, %v2294_v43   ;;  %v2543_v19 = vunpack.c.l.b16 %v2317_v62  ;;  %v4775_v1 = vpop.eup %4774  ;;  %v2544_v63 = vunpack.c.h.b16 %v2317_v62  ;;  %v2319_v7 = vpack.c.bf16 %v2307_v2, %v2306_v24  ;;  %v4594_v43 = vld [vmem:[#allocation7 + $0x10] sm:$0xff]  }
 0x5fb   : > { %2413 = vperm.xlu1 %4542, %v2408_v53   ;;  %v2309_v5 = vmul.f32 %v4775_v1, %v5861_v50  ;;  %v2310_v28 = vmul.f32 %v4775_v1, %v5891_v33  ;;  %v4600_v33 = vld [vmem:[#allocation15 + $0x10] ss:$24 sps:$4 sm:$0xff]  }
 0x5fc   : > { %v2679_v58 = vunpack.c.l.b16 %v2319_v7  ;;  %v2680_v50 = vunpack.c.h.b16 %v2319_v7  ;;  %1661 = vmatpush1.bf16.msra.mxu0 %v4600_v33 }
 0x5fd   : > { %v2320_v26 = vpack.c.bf16 %v2310_v28, %v2309_v5 }
 0x5fe   : > { %3613 = vperm.xlu0 %4543, %v2297_v56  }
 0x5ff   : > { %2478 = vperm.xlu1 %4542, %v2475_v20   ;;  %v2747_v30 = vunpack.c.l.b16 %v2320_v26  ;;  %v2748_v21 = vunpack.c.h.b16 %v2320_v26 }
 0x602   : > { %3619 = vperm.xlu0 %4543, %v2300_v12   ;;  %v4596_v12 = vld [vmem:[#allocation7 + $0x20] sm:$0xff]  }
 0x603   : > { %2481 = vperm.xlu1 %4542, %v2476_v61  }
 0x606   : > { %3625 = vperm.xlu0 %4543, %v2303_v31   ;;  %v2816_v31 = vunpack.c.h.b16 %v5964_v45 }
 0x607   : > { %2546 = vperm.xlu1 %4542, %v2543_v19  }
 0x60a   : > { %3631 = vperm.xlu0 %4543, %v2306_v24  }
 0x60b   : > { %2549 = vperm.xlu1 %4542, %v2544_v63   ;;  %v4597_v63 = vld [vmem:[#allocation7 + $0x28] sm:$0xff]  }
 0x60e   : > { %3637 = vperm.xlu0 %4543, %v2309_v5  }
 0x60f   : > { %2617 = vperm.xlu1 %4542, %v2612_v4  }
 0x612   : > { %3643 = vperm.xlu0 %4543, %v5955_v14  }
 0x613   : > { %2682 = vperm.xlu1 %4542, %v2679_v58  }
 0x616   : > { %3574 = vperm.xlu0 %4543, %v3572_v46  }
 0x617   : > { %2685 = vperm.xlu1 %4542, %v2680_v50  }
 0x61b   : > { %2750 = vperm.xlu1 %4542, %v2747_v30  }
 0x61f   : > { %2753 = vperm.xlu1 %4542, %v2748_v21  }
 0x623   : > { %2821 = vperm.xlu1 %4542, %v2816_v31  }
 0x627   : > { %3604 = vperm.xlu1 %4542, %v5949_v13  }
 0x62b   : > { %3610 = vperm.xlu1 %4542, %v5970_v17  }
 0x62f   : > { %3616 = vperm.xlu1 %4542, %v2298_v51  }
 0x633   : > { %3622 = vperm.xlu1 %4542, %v2301_v59  }
 0x637   : > { %3628 = vperm.xlu1 %4542, %v5945_v35  }
 0x63b   : > { %3634 = vperm.xlu1 %4542, %v2307_v2  }
 0x63f   : > { %3640 = vperm.xlu1 %4542, %v2310_v28   ;;  %v4598_v28 = vld [vmem:[#allocation7 + $0x30] sm:$0xff]  }
 0x643   : > { %3646 = vperm.xlu1 %4542, %v5958_v41  }
 0x66d   : > { %v2615_v52 = vpop.permute.xlu0 %2614 }
 0x66e   : > { %v2343_v37 = vpop.permute.xlu1 %2342  ;;  %v2622_v0 = vrot.slane %v2615_v52, %v5736_v25 }
 0x66f   : > { %v2350_v40 = vrot.slane %v2343_v37, %v5736_v25  ;;  %v4599_v37 = vld [vmem:[#allocation7 + $0x38] sm:$0xff]  }
 0x671   : > { %v2819_v60 = vpop.permute.xlu0 %2818 }
 0x672   : > { %v2346_v29 = vpop.permute.xlu1 %2345 }
 0x673   : > { %v2354_v13 = vrot.slane %v2346_v29, %v5731_v22 }
 0x675   : > { %v2355_v14 = vsel %vm1929_vm7, %v2354_v13, %v2350_v40  ;;  %v6033_v24 = vpop.permute.xlu0 %3601 }
 0x676   : > { %v2356_v18 = vpack.c.b16 %v2355_v14, %v2355_v14  ;;  %v2411_v45 = vpop.permute.xlu1 %2410  ;;  %v2826_v14 = vrot.slane %v2819_v60, %v5736_v25  ;;  %v3651_v52 = vrot.slane %v6033_v24, %v5736_v25 }
 0x677   : > { %v2418_v41 = vrot.slane %v2411_v45, %v5736_v25 }
 0x678   : > { %4255 = vmatmul.mubr.msk.bf16.vlgmr.msra.gmra.mrb[4].mxu1 %vm2009_vm15, %v2356_v18 }
 0x679   : > { %4259 = vmatpush3.bf16.msra.mxu1 %v4593_v9  ;;  %4260 = vmatprep.mubr.msk.bf16.mxu1 %vm5195_vm0, %v5194_v39  ;;  %v3608_v7 = vpop.permute.xlu0 %3607 }
 0x67a   : > { %v2414_v35 = vpop.permute.xlu1 %2413  ;;  %4264 = vmatprep.subr.bf16.mxu1 %v5194_v39 }
 0x67b   : > { %v2422_v48 = vrot.slane %v2414_v35, %v5731_v22 }
 0x67d   : > { %v2423_v42 = vsel %vm1929_vm7, %v2422_v48, %v2418_v41  ;;  %v3614_v26 = vpop.permute.xlu0 %3613 }
 0x67e   : > { %v2424_v17 = vpack.c.b16 %v2423_v42, %v2423_v42  ;;  %v2479_v57 = vpop.permute.xlu1 %2478 }
 0x67f   : > { %v2486_v27 = vrot.slane %v2479_v57, %v5736_v25 }
 0x680   : > { %4261 = vmatmul.mubr.msk.bf16.vlgmr.msra.gmra.mrb[8].mxu1 %vm2009_vm15, %v2424_v17 }
 0x681   : > { %4265 = vmatpush3.bf16.msra.mxu1 %v4594_v43  ;;  %4266 = vmatprep.mubr.msk.bf16.mxu1 %vm5195_vm0, %v5194_v39  ;;  %v3620_v11 = vpop.permute.xlu0 %3619 }
 0x682   : > { %v2482_v44 = vpop.permute.xlu1 %2481  ;;  %4270 = vmatprep.subr.bf16.mxu1 %v5194_v39 }
 0x683   : > { %v2490_v47 = vrot.slane %v2482_v44, %v5731_v22 }
 0x685   : > { %v2491_v32 = vsel %vm1929_vm7, %v2490_v47, %v2486_v27  ;;  %v3626_v18 = vpop.permute.xlu0 %3625  ;;  %v3660_v47 = vrot.slane %v3608_v7, %v5736_v25 }
 0x686   : > { %v2492_v56 = vpack.c.b16 %v2491_v32, %v2491_v32  ;;  %v2547_v51 = vpop.permute.xlu1 %2546 }
 0x687   : > { %v2554_v54 = vrot.slane %v2547_v51, %v5736_v25 }
 0x688   : > { %4267 = vmatmul.mubr.msk.bf16.vlgmr.msra.gmra.mrb[12].mxu1 %vm2009_vm15, %v2492_v56  ;;  %v3669_v56 = vrot.slane %v3614_v26, %v5736_v25 }
 0x689   : > { %4271 = vmatpush3.bf16.msra.mxu1 %v4595_v15  ;;  %4272 = vmatprep.mubr.msk.bf16.mxu1 %vm5195_vm0, %v5194_v39  ;;  %v3632_v48 = vpop.permute.xlu0 %3631 }
 0x68a   : > { %v2550_v53 = vpop.permute.xlu1 %2549  ;;  %4276 = vmatprep.subr.bf16.mxu1 %v5194_v39 }
 0x68b   : > { %v2558_v55 = vrot.slane %v2550_v53, %v5731_v22  ;;  %v3678_v53 = vrot.slane %v3620_v11, %v5736_v25  ;;  %v4608_v11 = vld [vmem:[#allocation15 + $0x74] ss:$24 sps:$4 sm:$0xff]  }
 0x68d   : > { %v2559_v20 = vsel %vm1929_vm7, %v2558_v55, %v2554_v54  ;;  %v3638_v17 = vpop.permute.xlu0 %3637 }
 0x68e   : > { %v2560_v59 = vpack.c.b16 %v2559_v20, %v2559_v20  ;;  %v2618_v61 = vpop.permute.xlu1 %2617  ;;  %v3687_v20 = vrot.slane %v3626_v18, %v5736_v25  ;;  %v3705_v24 = vrot.slane %v3638_v17, %v5736_v25  ;;  %v4620_v18 = vld [vmem:[#allocation15 + $0x134] ss:$24 sps:$4 sm:$0xff]   ;;  %v4627_v17 = vld [vmem:[#allocation18 + $0x8] ss:$16 sps:$4 sm:$0xff]  }
 0x68f   : > { %v2626_v62 = vrot.slane %v2618_v61, %v5731_v22  ;;  %v3696_v61 = vrot.slane %v3632_v48, %v5736_v25  ;;  %v4624_v48 = vld [vmem:[#allocation18] ss:$16 sps:$4 sm:$0xff]  }
 0x690   : > { %4273 = vmatmul.mubr.msk.bf16.vlgmr.msra.gmra.mrb[16].mxu1 %vm2009_vm15, %v2560_v59 }
 0x691   : > { %4277 = vmatpush3.bf16.msra.mxu1 %v4596_v12  ;;  %4278 = vmatprep.mubr.msk.bf16.mxu1 %vm5195_vm0, %v5194_v39  ;;  %v2627_v1 = vsel %vm1929_vm7, %v2626_v62, %v2622_v0  ;;  %v3644_v54 = vpop.permute.xlu0 %3643 }
 0x692   : > { %v2683_v19 = vpop.permute.xlu1 %2682  ;;  %4282 = vmatprep.subr.bf16.mxu1 %v5194_v39  ;;  %v2628_v2 = vpack.c.b16 %v2627_v1, %v2627_v1 }
 0x693   : > { %v2690_v36 = vrot.slane %v2683_v19, %v5736_v25 }
 0x696   : > { %v2686_v5 = vpop.permute.xlu1 %2685 }
 0x697   : > { %v2694_v4 = vrot.slane %v2686_v5, %v5731_v22 }
 0x698   : > { %4279 = vmatmul.mubr.msk.bf16.vlgmr.msra.gmra.mrb[20].mxu1 %vm2009_vm15, %v2628_v2 }
 0x699   : > { %4283 = vmatpush3.bf16.msra.mxu1 %v4597_v63  ;;  %4284 = vmatprep.mubr.msk.bf16.mxu1 %vm5195_vm0, %v5194_v39  ;;  %v2695_v58 = vsel %vm1929_vm7, %v2694_v4, %v2690_v36 }
 0x69a   : > { %v2751_v10 = vpop.permute.xlu1 %2750  ;;  %4288 = vmatprep.subr.bf16.mxu1 %v5194_v39  ;;  %v2696_v46 = vpack.c.b16 %v2695_v58, %v2695_v58  ;;  %v6084_v58 = vpop.permute.xlu0 %3574 }
 0x69b   : > { %v2758_v21 = vrot.slane %v2751_v10, %v5736_v25  ;;  %v3714_v10 = vrot.slane %v3644_v54, %v5736_v25  ;;  %vm3576_vm2 = vcmp.eq.s32.totalorder %v6084_v58, 1  ;;  %v4603_v25 = vld [vmem:[#allocation15 + $0x40] ss:$24 sps:$4 sm:$0xff]   ;;  %v4647_v54 = vld [vmem:[#allocation18 + $0x6c] ss:$16 sps:$4 sm:$0xff]  }
 0x69e   : > { %v2754_v50 = vpop.permute.xlu1 %2753 }
 0x69f   : > { %v2762_v30 = vrot.slane %v2754_v50, %v5731_v22 }
 0x6a0   : > { %4285 = vmatmul.mubr.msk.bf16.vlgmr.msra.gmra.mrb[24].mxu1 %vm2009_vm15, %v2696_v46 }
 0x6a1   : > { %4289 = vmatpush3.bf16.msra.mxu1 %v4598_v28  ;;  %4290 = vmatprep.mubr.msk.bf16.mxu1 %vm5195_vm0, %v5194_v39  ;;  %v2763_v33 = vsel %vm1929_vm7, %v2762_v30, %v2758_v21 }
 0x6a2   : > { %v2822_v31 = vpop.permute.xlu1 %2821  ;;  %4294 = vmatprep.subr.bf16.mxu1 %v5194_v39  ;;  %v2764_v29 = vpack.c.b16 %v2763_v33, %v2763_v33  ;;  %v4605_v33 = vld [vmem:[#allocation15 + $0x44] ss:$24 sps:$4 sm:$0xff]  }
 0x6a3   : > { %v2830_v13 = vrot.slane %v2822_v31, %v5731_v22  ;;  %1662 = vmatprep.subr.bf16.mxu0 %v4605_v33 }
 0x6a4   : > { %1663 = vmatpush1.bf16.msra.mxu0 %v4603_v25 }
 0x6a5   : > { %v2831_v45 = vsel %vm1929_vm7, %v2830_v13, %v2826_v14  ;;  %1664 = vmatprep.subr.bf16.mxu0 %v4608_v11  ;;  %v4612_v13 = vld [vmem:[#allocation15 + $0xd0] ss:$24 sps:$4 sm:$0xff]   ;;  %v4615_v14 = vld [vmem:[#allocation15 + $0x100] ss:$24 sps:$4 sm:$0xff]  }
 0x6a6   : > { %v3605_v40 = vpop.permute.xlu1 %3604  ;;  %v2832_v35 = vpack.c.b16 %v2831_v45, %v2831_v45  ;;  %v4618_v45 = vld [vmem:[#allocation15 + $0x130] ss:$24 sps:$4 sm:$0xff]  }
 0x6a7   : > { %v3655_v32 = vrot.slane %v3605_v40, %v5731_v22  ;;  %v4614_v40 = vld [vmem:[#allocation15 + $0xd4] ss:$24 sps:$4 sm:$0xff]  }
 0x6a8   : > { %4291 = vmatmul.mubr.msk.bf16.vlgmr.msra.gmra.mrb[28].mxu1 %vm2009_vm15, %v2764_v29  ;;  %v4611_v29 = vld [vmem:[#allocation15 + $0xa4] ss:$24 sps:$4 sm:$0xff]  }
 0x6a9   : > { %4295 = vmatpush3.bf16.msra.mxu1 %v4599_v37  ;;  %4296 = vmatprep.mubr.msk.bf16.mxu1 %vm5195_vm0, %v5194_v39  ;;  %v3656_v62 = vsel %vm1929_vm7, %v3655_v32, %v3651_v52  ;;  %v4609_v37 = vld [vmem:[#allocation15 + $0xa0] ss:$24 sps:$4 sm:$0xff]   ;;  %v4638_v32 = vld [vmem:[#allocation18 + $0x44] ss:$16 sps:$4 sm:$0xff]  }
 0x6aa   : > { %v3611_v9 = vpop.permute.xlu1 %3610  ;;  %v4644_v52 = vld [vmem:[#allocation18 + $0x64] ss:$16 sps:$4 sm:$0xff]  }
 0x6ab   : > { %v3664_v57 = vrot.slane %v3611_v9, %v5731_v22  ;;  %v4617_v9 = vld [vmem:[#allocation15 + $0x104] ss:$24 sps:$4 sm:$0xff]  }
 0x6ad   : > { %v3665_v55 = vsel %vm1929_vm7, %v3664_v57, %v3660_v47  ;;  %v4630_v57 = vld [vmem:[#allocation18 + $0x20] ss:$16 sps:$4 sm:$0xff]   ;;  %v4635_v47 = vld [vmem:[#allocation18 + $0x2c] ss:$16 sps:$4 sm:$0xff]  }
 0x6ae   : > { %v3617_v41 = vpop.permute.xlu1 %3616  ;;  %v3720_v1 = vsel %vm1994_vm8, %v3665_v55, %v3656_v62  ;;  %v4650_v55 = vld [vmem:[#allocation18 + $0x84] ss:$16 sps:$4 sm:$0xff]   ;;  %v4657_v62 = vld [vmem:[#allocation18 + $0xa8] ss:$16 sps:$4 sm:$0xff]  }
 0x6af   : > { %v3673_v44 = vrot.slane %v3617_v41, %v5731_v22  ;;  %v4623_v41 = vld [vmem:[#allocation15 + $0x164] ss:$24 sps:$4 sm:$0xff]  }
 0x6b0   : > { %4297 = vmatmul.mubr.msk.bf16.vlgmr.msra.gmra.mrb[32].mxu1 %vm2009_vm15, %v2832_v35  ;;  %v4621_v35 = vld [vmem:[#allocation15 + $0x160] ss:$24 sps:$4 sm:$0xff]  }
 0x6b1   : > { %3137 = vmatprep.mubr.bf16.mxu1 %v5192_v6  ;;  %v3674_v12 = vsel %vm1929_vm7, %v3673_v44, %v3669_v56  ;;  %v4632_v44 = vld [vmem:[#allocation18 + $0x24] ss:$16 sps:$4 sm:$0xff]   ;;  %v4636_v56 = vld [vmem:[#allocation18 + $0x40] ss:$16 sps:$4 sm:$0xff]  }
 0x6b2   : > { %v3623_v42 = vpop.permute.xlu1 %3622  ;;  %v3721_v2 = vsel %vm1996_vm9, %v3674_v12, %v3720_v1  ;;  %v4651_v12 = vld [vmem:[#allocation18 + $0x88] ss:$16 sps:$4 sm:$0xff]   ;;  %v4660_v1 = vld [vmem:[#allocation18 + $0xc0] ss:$16 sps:$4 sm:$0xff]  }
 0x6b3   : > { %v3682_v15 = vrot.slane %v3623_v42, %v5731_v22  ;;  %v4626_v42 = vld [vmem:[#allocation18 + $0x4] ss:$16 sps:$4 sm:$0xff]  }
 0x6b4   : > { %3105 = vmatprep.subr.bf16.mxu1 %v4626_v42 }
 0x6b5   : > { %v3683_v0 = vsel %vm1929_vm7, %v3682_v15, %v3678_v53  ;;  %3106 = vmatpush1.bf16.msra.mxu1 %v4624_v48  ;;  %v4641_v15 = vld [vmem:[#allocation18 + $0x4c] ss:$16 sps:$4 sm:$0xff]   ;;  %v4645_v53 = vld [vmem:[#allocation18 + $0x68] ss:$16 sps:$4 sm:$0xff]  }
 0x6b6   : > { %v3629_v43 = vpop.permute.xlu1 %3628  ;;  %v3722_v4 = vsel %vm1998_vm10, %v3683_v0, %v3721_v2  ;;  %3107 = vmatprep.subr.bf16.mxu1 %v4632_v44  ;;  %v4659_v0 = vld [vmem:[#allocation18 + $0xac] ss:$16 sps:$4 sm:$0xff]   ;;  %v4666_v2 = vld [vmem:[#allocation18 + $0xe0] ss:$16 sps:$4 sm:$0xff]  }
 0x6b7   : > { %v3691_v51 = vrot.slane %v3629_v43, %v5731_v22  ;;  %v4629_v43 = vld [vmem:[#allocation18 + $0xc] ss:$16 sps:$4 sm:$0xff]  }
 0x6b9   : > { %v3692_v63 = vsel %vm1929_vm7, %v3691_v51, %v3687_v20  ;;  %3108 = vmatpush1.bf16.msra.mxu1 %v4630_v57  ;;  %v4639_v51 = vld [vmem:[#allocation18 + $0x48] ss:$16 sps:$4 sm:$0xff]   ;;  %v4648_v20 = vld [vmem:[#allocation18 + $0x80] ss:$16 sps:$4 sm:$0xff]  }
 0x6ba   : > { %v3635_v27 = vpop.permute.xlu1 %3634  ;;  %v3723_v28 = vsel %vm2000_vm11, %v3692_v63, %v3722_v4  ;;  %3109 = vmatprep.subr.bf16.mxu1 %v4638_v32  ;;  %v4663_v63 = vld [vmem:[#allocation18 + $0xc8] ss:$16 sps:$4 sm:$0xff]  }
 0x6bb   : > { %v3700_v60 = vrot.slane %v3635_v27, %v5731_v22  ;;  %v4633_v27 = vld [vmem:[#allocation18 + $0x28] ss:$16 sps:$4 sm:$0xff]  }
 0x6bc   : > { %v4669_v4 = vld [vmem:[#allocation18 + $0xe8] ss:$16 sps:$4 sm:$0xff]  }
 0x6bd   : > { %v3701_v5 = vsel %vm1929_vm7, %v3700_v60, %v3696_v61  ;;  %3110 = vmatpush1.bf16.msra.mxu1 %v4636_v56  ;;  %v4653_v60 = vld [vmem:[#allocation18 + $0x8c] ss:$16 sps:$4 sm:$0xff]   ;;  %v4656_v61 = vld [vmem:[#allocation18 + $0xa4] ss:$16 sps:$4 sm:$0xff]  }
 0x6be   : > { %v3641_v59 = vpop.permute.xlu1 %3640  ;;  %v3724_v50 = vsel %vm2002_vm12, %v3701_v5, %v3723_v28  ;;  %3111 = vmatprep.subr.bf16.mxu1 %v4644_v52  ;;  %v4668_v5 = vld [vmem:[#allocation18 + $0xe4] ss:$16 sps:$4 sm:$0xff]  }
 0x6bf   : > { %v3709_v19 = vrot.slane %v3641_v59, %v5731_v22  ;;  %v4654_v59 = vld [vmem:[#allocation18 + $0xa0] ss:$16 sps:$4 sm:$0xff]  }
 0x6c1   : > { %v3710_v7 = vsel %vm1929_vm7, %v3709_v19, %v3705_v24  ;;  %v4662_v19 = vld [vmem:[#allocation18 + $0xc4] ss:$16 sps:$4 sm:$0xff]   ;;  %v4665_v24 = vld [vmem:[#allocation18 + $0xcc] ss:$16 sps:$4 sm:$0xff]  }
 0x6c2   : > { %v3647_v36 = vpop.permute.xlu1 %3646  ;;  %v3725_v26 = vsel %vm2004_vm13, %v3710_v7, %v3724_v50  ;;  %v4671_v7 = vld [vmem:[#allocation18 + $0xec] ss:$16 sps:$4 sm:$0xff]  }
 0x6c3   : > { %v3718_v46 = vrot.slane %v3647_v36, %v5731_v22  ;;  %v4606_v22 = vld [vmem:[#allocation15 + $0x70] ss:$24 sps:$4 sm:$0xff]   ;;  %v4674_v36 = vld [vmem:[#allocation16 + $0x4] ss:$16 sps:$4 sm:$0xff]  }
 0x6c4   : > { %1665 = vmatpush1.bf16.msra.mxu0 %v4606_v22 }
 0x6c5   : > { %v3719_v30 = vsel %vm1929_vm7, %v3718_v46, %v3714_v10  ;;  %1666 = vmatprep.subr.bf16.mxu0 %v4611_v29  ;;  %v4677_v10 = vld [vmem:[#allocation16 + $0xc] ss:$16 sps:$4 sm:$0xff]  }
 0x6c6   : > { %v3726_v21 = vsel %vm2006_vm14, %v3719_v30, %v3725_v26 }
 0x6c7   : > { %v3728_v31 = vsel %vm3576_vm2, %v3726_v21, 0.0 }
 0x6c8   : > { %3729 = vst.msk [vmem:[%s5614_s10] sm:$0xff] %vm2009_vm15, %v3728_v31  ;;  %1667 = vmatpush1.bf16.msra.mxu0 %v4609_v37 }
 0x6c9   : > { %1668 = vmatprep.subr.bf16.mxu0 %v4614_v40 }
 0x6cc   : > { %1669 = vmatpush1.bf16.msra.mxu0 %v4612_v13 }
 0x6cd   : > { %1670 = vmatprep.subr.bf16.mxu0 %v4617_v9  ;;  %v6104_v9 = vld [vmem:[%s6301_s25] sm:$0x3f] }
 0x6d0   : > { %1671 = vmatpush1.bf16.msra.mxu0 %v4615_v14 }
 0x6d1   : > { %1672 = vmatprep.subr.bf16.mxu0 %v4620_v18  ;;  %v1315_v18 = vrot.slane %v6104_v9, %v5799_v3 }
 0x6d4   : > { %1673 = vmatpush1.bf16.msra.mxu0 %v4618_v45  ;;  %v1615_v45 = vadd.f32 %v5680_v34, %v1315_v18  ;;  %v4707_v18 = vld [vmem:[#allocation16 + $0xac] ss:$16 sps:$4 sm:$0xff]  }
 0x6d5   : > { %1674 = vmatprep.subr.bf16.mxu0 %v4623_v41 }
 0x6d6   : > { %v4095_v57 = vmul.f32 -1.442695, %v1615_v45  ;;  %v4702_v45 = vld [vmem:[#allocation16 + $0xa0] ss:$16 sps:$4 sm:$0xff]  }
 0x6d8   : > { %1675 = vmatpush1.bf16.msra.mxu0 %v4621_v35  ;;  %4776 = vpow2.f32 %v4095_v57  ;;  %v4719_v57 = vld [vmem:[#allocation16 + $0xec] ss:$16 sps:$4 sm:$0xff]  }
 0x6d9   : > { %3146 = vmatprep.subr.bf16.mxu0 %v4629_v43 }
 0x6db   : > { %1693 = vmatmul.mubr.bf16.vlgmr.msra.gmra.mrb[4].mxu0 %v5665_v23  ;;  %v4642_v23 = vld [vmem:[#allocation18 + $0x60] ss:$16 sps:$4 sm:$0xff]  }
 0x6dc   : > { %3147 = vmatpush1.bf16.msra.mxu0 %v4627_v17  ;;  %3178 = vmatprep.mubr.bf16.mxu0 %v5192_v6 }
 0x6dd   : > { %3148 = vmatprep.subr.bf16.mxu0 %v4635_v47  ;;  %3112 = vmatpush1.bf16.msra.mxu1 %v4642_v23 }
 0x6de   : > { %3113 = vmatprep.subr.bf16.mxu1 %v4650_v55 }
 0x6e0   : > { %3149 = vmatpush1.bf16.msra.mxu0 %v4633_v27 }
 0x6e1   : > { %3150 = vmatprep.subr.bf16.mxu0 %v4641_v15  ;;  %3114 = vmatpush1.bf16.msra.mxu1 %v4648_v20 }
 0x6e2   : > { %3115 = vmatprep.subr.bf16.mxu1 %v4656_v61  ;;  %v4777_v34 = vpop.eup %4776 }
 0x6e3   : > { %v2885_v55 = vadd.f32 1.0, %v4777_v34  ;;  %v4726_v34 = vld [vmem:[#allocation19 + $0x30] sm:$0xff]  }
 0x6e4   : > { %3151 = vmatpush1.bf16.msra.mxu0 %v4639_v51 }
 0x6e5   : > { %3152 = vmatprep.subr.bf16.mxu0 %v4647_v54  ;;  %3116 = vmatpush1.bf16.msra.mxu1 %v4654_v59  ;;  %4778 = vrcp.f32 %v2885_v55 }
 0x6e6   : > { %3117 = vmatprep.subr.bf16.mxu1 %v4662_v19 }
 0x6e8   : > { %3153 = vmatpush1.bf16.msra.mxu0 %v4645_v53 }
 0x6e9   : > { %3154 = vmatprep.subr.bf16.mxu0 %v4653_v60  ;;  %3118 = vmatpush1.bf16.msra.mxu1 %v4660_v1 }
 0x6ea   : > { %3119 = vmatprep.subr.bf16.mxu1 %v4668_v5 }
 0x6ec   : > { %3155 = vmatpush1.bf16.msra.mxu0 %v4651_v12 }
 0x6ed   : > { %3156 = vmatprep.subr.bf16.mxu0 %v4659_v0  ;;  %3120 = vmatpush1.bf16.msra.mxu1 %v4666_v2 }
 0x6ee   : > { %3347 = vmatprep.subr.bf16.mxu1 %v4674_v36  ;;  %v4675_v36 = vld [vmem:[#allocation16 + $0x8] ss:$16 sps:$4 sm:$0xff]  }
 0x6f0   : > { %3157 = vmatpush1.bf16.msra.mxu0 %v4657_v62 }
 0x6f1   : > { %3158 = vmatprep.subr.bf16.mxu0 %v4665_v24 }
 0x6f4   : > { %3159 = vmatpush1.bf16.msra.mxu0 %v4663_v63  ;;  %v4779_v63 = vpop.eup %4778 }
 0x6f5   : > { %3160 = vmatprep.subr.bf16.mxu0 %v4671_v7  ;;  %v4672_v7 = vld [vmem:[#allocation16] ss:$16 sps:$4 sm:$0xff]  }
 0x6f8   : > { %3161 = vmatpush1.bf16.msra.mxu0 %v4669_v4 }
 0x6f9   : > { %3388 = vmatprep.subr.bf16.mxu0 %v4677_v10 }
 0x74b   : > { %v2400_v28 = vpop.f32.mrb[4].mxu1 }
 0x74c   : > { %v4256_v46 = vpop.f32.mrb[5].mxu1 }
 0x74d   : > { %v2403_v50 = vpop.f32.mrb[6].mxu1  ;;  %v4683_v46 = vld [vmem:[#allocation16 + $0x2c] ss:$16 sps:$4 sm:$0xff]  }
 0x74e   : > { %v4257_v26 = vpop.f32.mrb[7].mxu1  ;;  %v4678_v50 = vld [vmem:[#allocation16 + $0x20] ss:$16 sps:$4 sm:$0xff]  }
 0x74f   : > { %v4681_v26 = vld [vmem:[#allocation16 + $0x28] ss:$16 sps:$4 sm:$0xff]  }
 0x753   : > { %v2468_v30 = vpop.f32.mrb[8].mxu1 }
 0x754   : > { %v2896_v21 = vrot.slane %v2468_v30, 7  ;;  %v4262_v31 = vpop.f32.mrb[9].mxu1  ;;  %v4686_v30 = vld [vmem:[#allocation16 + $0x44] ss:$16 sps:$4 sm:$0xff]  }
 0x755   : > { %v2471_v25 = vpop.f32.mrb[10].mxu1  ;;  %v4684_v31 = vld [vmem:[#allocation16 + $0x40] ss:$16 sps:$4 sm:$0xff]  }
 0x756   : > { %v2897_v33 = vsel %vm1994_vm8, %v2896_v21, %v2400_v28  ;;  %v4263_v11 = vpop.f32.mrb[11].mxu1  ;;  %v4680_v28 = vld [vmem:[#allocation16 + $0x24] ss:$16 sps:$4 sm:$0xff]   ;;  %v4689_v21 = vld [vmem:[#allocation16 + $0x4c] ss:$16 sps:$4 sm:$0xff]  }
 0x757   : > { %v4687_v25 = vld [vmem:[#allocation16 + $0x48] ss:$16 sps:$4 sm:$0xff]   ;;  %v4695_v11 = vld [vmem:[#allocation16 + $0x6c] ss:$16 sps:$4 sm:$0xff]  }
 0x75b   : > { %v2536_v22 = vpop.f32.mrb[12].mxu1 }
 0x75c   : > { %v2898_v37 = vrot.slane %v2536_v22, 6  ;;  %v4268_v29 = vpop.f32.mrb[13].mxu1  ;;  %v4690_v22 = vld [vmem:[#allocation16 + $0x60] ss:$16 sps:$4 sm:$0xff]  }
 0x75d   : > { %v2539_v40 = vpop.f32.mrb[14].mxu1  ;;  %v4698_v29 = vld [vmem:[#allocation16 + $0x84] ss:$16 sps:$4 sm:$0xff]  }
 0x75e   : > { %v2899_v13 = vsel %vm1996_vm9, %v2898_v37, %v2897_v33  ;;  %v4269_v14 = vpop.f32.mrb[15].mxu1  ;;  %v4692_v33 = vld [vmem:[#allocation16 + $0x64] ss:$16 sps:$4 sm:$0xff]   ;;  %v4693_v37 = vld [vmem:[#allocation16 + $0x68] ss:$16 sps:$4 sm:$0xff]  }
 0x75f   : > { %v4701_v40 = vld [vmem:[#allocation16 + $0x8c] ss:$16 sps:$4 sm:$0xff]   ;;  %v4704_v14 = vld [vmem:[#allocation16 + $0xa4] ss:$16 sps:$4 sm:$0xff]  }
 0x763   : > { %v2604_v35 = vpop.f32.mrb[16].mxu1 }
 0x764   : > { %v2900_v41 = vrot.slane %v2604_v35, 5  ;;  %v4274_v48 = vpop.f32.mrb[17].mxu1  ;;  %v4705_v35 = vld [vmem:[#allocation16 + $0xa8] ss:$16 sps:$4 sm:$0xff]  }
 0x765   : > { %v2607_v42 = vpop.f32.mrb[18].mxu1  ;;  %v4713_v48 = vld [vmem:[#allocation16 + $0xcc] ss:$16 sps:$4 sm:$0xff]  }
 0x766   : > { %v2901_v43 = vsel %vm1998_vm10, %v2900_v41, %v2899_v13  ;;  %v4275_v17 = vpop.f32.mrb[19].mxu1  ;;  %v4696_v13 = vld [vmem:[#allocation16 + $0x80] ss:$16 sps:$4 sm:$0xff]   ;;  %v4710_v41 = vld [vmem:[#allocation16 + $0xc4] ss:$16 sps:$4 sm:$0xff]  }
 0x767   : > { %v4708_v42 = vld [vmem:[#allocation16 + $0xc0] ss:$16 sps:$4 sm:$0xff]   ;;  %v4716_v17 = vld [vmem:[#allocation16 + $0xe4] ss:$16 sps:$4 sm:$0xff]  }
 0x76b   : > { %v2672_v44 = vpop.f32.mrb[20].mxu1 }
 0x76c   : > { %v2902_v27 = vrot.slane %v2672_v44, 4  ;;  %v4280_v47 = vpop.f32.mrb[21].mxu1  ;;  %v4714_v44 = vld [vmem:[#allocation16 + $0xe0] ss:$16 sps:$4 sm:$0xff]  }
 0x76d   : > { %v2675_v32 = vpop.f32.mrb[22].mxu1  ;;  %v1224_v47 = vld [vmem:[%s5587_s15] sm:$0xf] }
 0x76e   : > { %v2903_v15 = vsel %vm2000_vm11, %v2902_v27, %v2901_v43  ;;  %v4281_v56 = vpop.f32.mrb[23].mxu1  ;;  %v4711_v43 = vld [vmem:[#allocation16 + $0xc8] ss:$16 sps:$4 sm:$0xff]   ;;  %v4720_v32 = vld [vmem:[#allocation19] sm:$0xff]  }
 0x76f   : > { %v4717_v27 = vld [vmem:[#allocation16 + $0xe8] ss:$16 sps:$4 sm:$0xff]   ;;  %v4722_v56 = vld [vmem:[#allocation19 + $0x10] sm:$0xff]  }
 0x773   : > { %v2740_v51 = vpop.f32.mrb[24].mxu1 }
 0x774   : > { %v2904_v3 = vrot.slane %v2740_v51, 3  ;;  %v4286_v23 = vpop.f32.mrb[25].mxu1  ;;  %v4723_v51 = vld [vmem:[#allocation19 + $0x18] sm:$0xff]  }
 0x775   : > { %v2743_v52 = vpop.f32.mrb[26].mxu1  ;;  %v4725_v23 = vld [vmem:[#allocation19 + $0x28] sm:$0xff]  }
 0x776   : > { %v2905_v53 = vsel %vm2002_vm12, %v2904_v3, %v2903_v15  ;;  %v4287_v54 = vpop.f32.mrb[27].mxu1  ;;  %v4721_v15 = vld [vmem:[#allocation19 + $0x8] sm:$0xff]   ;;  %v4724_v3 = vld [vmem:[#allocation19 + $0x20] sm:$0xff]   ;;  %v4727_v52 = vld [vmem:[#allocation19 + $0x38] sm:$0xff]  }
 0x777   : > { %v1323_v54 = vrot.slane %v6104_v9, %v5826_v38  ;;  %v1327_v38 = vrot.slane %v6104_v9, %v5842_v49 }
 0x77b   : > { %v2808_v60 = vpop.f32.mrb[28].mxu1 }
 0x77c   : > { %v2906_v20 = vrot.slane %v2808_v60, 2  ;;  %v4292_v12 = vpop.f32.mrb[29].mxu1 }
 0x77d   : > { %v2811_v59 = vpop.f32.mrb[30].mxu1 }
 0x77e   : > { %v2907_v61 = vsel %vm2004_vm13, %v2906_v20, %v2905_v53  ;;  %v4293_v62 = vpop.f32.mrb[31].mxu1  ;;  %v1319_v53 = vrot.slane %v6104_v9, %v5809_v16 }
 0x783   : > { %v2876_v0 = vpop.f32.mrb[32].mxu1 }
 0x784   : > { %v2908_v19 = vrot.slane %v2876_v0, 1  ;;  %v4298_v24 = vpop.f32.mrb[33].mxu1 }
 0x785   : > { %v2879_v1 = vpop.f32.mrb[34].mxu1 }
 0x786   : > { %v2909_v2 = vsel %vm2006_vm14, %v2908_v19, %v2907_v61  ;;  %v4299_v5 = vpop.f32.mrb[35].mxu1 }
 0x787   : > { %v2911_v4 = vmul.f32 %v4779_v63, %v2909_v2 }
 0x789   : > { %v2912_v10 = vpack.c.bf16 %v2911_v4, %v2911_v4 }
 0x78b   : > { %3138 = vmatmul.mubr.bf16.vlgmr.msra.gmra.mrb[0].mxu1 %v2912_v10  ;;  %3179 = vmatmul.mubr.bf16.vlgmr.msra.gmra.mrb[4].mxu0 %v2912_v10 }
 0x78c   : > { %3348 = vmatpush1.bf16.msra.mxu1 %v4672_v7  ;;  %3389 = vmatpush1.bf16.msra.mxu0 %v4675_v36 }
 0x78d   : > { %3349 = vmatprep.subr.bf16.mxu1 %v4680_v28  ;;  %3390 = vmatprep.subr.bf16.mxu0 %v4683_v46 }
 0x78e   : > { %3379 = vmatprep.mubr.bf16.mxu1 %v5192_v6  ;;  %3420 = vmatprep.mubr.bf16.mxu0 %v5192_v6  ;;  %v4699_v6 = vld [vmem:[#allocation16 + $0x88] ss:$16 sps:$4 sm:$0xff]  }
 0x790   : > { %3350 = vmatpush1.bf16.msra.mxu1 %v4678_v50  ;;  %3391 = vmatpush1.bf16.msra.mxu0 %v4681_v26  ;;  %v1223_v50 = vld [vmem:[#allocation3] sm:$0xff] }
 0x791   : > { %3351 = vmatprep.subr.bf16.mxu1 %v4686_v30  ;;  %3392 = vmatprep.subr.bf16.mxu0 %v4689_v21 }
 0x794   : > { %3352 = vmatpush1.bf16.msra.mxu1 %v4684_v31  ;;  %3393 = vmatpush1.bf16.msra.mxu0 %v4687_v25 }
 0x795   : > { %3353 = vmatprep.subr.bf16.mxu1 %v4692_v33  ;;  %3394 = vmatprep.subr.bf16.mxu0 %v4695_v11 }
 0x798   : > { %3354 = vmatpush1.bf16.msra.mxu1 %v4690_v22  ;;  %3395 = vmatpush1.bf16.msra.mxu0 %v4693_v37  ;;  %v4797_v37 = vld [vmem:[#allocation2] sm:$0xff] }
 0x799   : > { %3355 = vmatprep.subr.bf16.mxu1 %v4698_v29  ;;  %3396 = vmatprep.subr.bf16.mxu0 %v4701_v40  ;;  %v4163_v40 = vld [vmem:[%s6305_s3] ss:$0 sm:$0xff] }
 0x79c   : > { %3356 = vmatpush1.bf16.msra.mxu1 %v4696_v13  ;;  %3397 = vmatpush1.bf16.msra.mxu0 %v4699_v6 }
 0x79d   : > { %3357 = vmatprep.subr.bf16.mxu1 %v4704_v14  ;;  %3398 = vmatprep.subr.bf16.mxu0 %v4707_v18 }
 0x7a0   : > { %3358 = vmatpush1.bf16.msra.mxu1 %v4702_v45  ;;  %3399 = vmatpush1.bf16.msra.mxu0 %v4705_v35 }
 0x7a1   : > { %3359 = vmatprep.subr.bf16.mxu1 %v4710_v41  ;;  %3400 = vmatprep.subr.bf16.mxu0 %v4713_v48 }
 0x7a4   : > { %3360 = vmatpush1.bf16.msra.mxu1 %v4708_v42  ;;  %3401 = vmatpush1.bf16.msra.mxu0 %v4711_v43 }
 0x7a5   : > { %3361 = vmatprep.subr.bf16.mxu1 %v4716_v17  ;;  %3402 = vmatprep.subr.bf16.mxu0 %v4719_v57 }
 0x7a8   : > { %3362 = vmatpush1.bf16.msra.mxu1 %v4714_v44  ;;  %3403 = vmatpush1.bf16.msra.mxu0 %v4717_v27 }
 0x7a9   : > { %4300 = vmatprep.subr.bf16.mxu0 %v5194_v39 }
 0x7ab   : > { %3380 = vmatmul.mubr.bf16.vlgmr.msra.gmra.mrb[0].mxu1 %v1224_v47  ;;  %3421 = vmatmul.mubr.bf16.vlgmr.msra.gmra.mrb[4].mxu0 %v1224_v47 }
 0x7ac   : > { %4316 = vmatprep.mubr.msk.bf16.mxu0 %vm5195_vm0, %v5194_v39  ;;  %4301 = vmatpush3.bf16.msra.mxu0 %v4720_v32 }
 0x7ad   : > { %4302 = vmatprep.subr.bf16.mxu0 %v5194_v39 }
 0x7b0   : > { %4303 = vmatpush3.bf16.msra.mxu0 %v4721_v15 }
 0x7b1   : > { %4304 = vmatprep.subr.bf16.mxu0 %v5194_v39 }
 0x7b4   : > { %4305 = vmatpush3.bf16.msra.mxu0 %v4722_v56 }
 0x7b5   : > { %4306 = vmatprep.subr.bf16.mxu0 %v5194_v39 }
 0x7b8   : > { %4307 = vmatpush3.bf16.msra.mxu0 %v4723_v51 }
 0x7b9   : > { %4308 = vmatprep.subr.bf16.mxu0 %v5194_v39 }
 0x7bc   : > { %4309 = vmatpush3.bf16.msra.mxu0 %v4724_v3 }
 0x7bd   : > { %4310 = vmatprep.subr.bf16.mxu0 %v5194_v39 }
 0x7c0   : > { %4311 = vmatpush3.bf16.msra.mxu0 %v4725_v23 }
 0x7c1   : > { %4312 = vmatprep.subr.bf16.mxu0 %v5194_v39 }
 0x7c4   : > { %4313 = vmatpush3.bf16.msra.mxu0 %v4726_v34 }
 0x7c5   : > { %4314 = vmatprep.subr.bf16.mxu0 %v5194_v39  ;;  %v1331_v39 = vrot.slane %v6104_v9, %v5804_v8 }
 0x7c8   : > { %4315 = vmatpush3.bf16.msra.mxu0 %v4727_v52 }
 0x87e   : > { %v3381_v55 = vpop.f32.mrb[0].mxu1  ;;  %v3422_v60 = vpop.f32.mrb[4].mxu0 }
 0x87f   : > { %v4320_v20 = vadd.f32 %v3381_v55, %v1319_v53  ;;  %v3383_v12 = vpop.f32.mrb[1].mxu1  ;;  %v3424_v59 = vpop.f32.mrb[5].mxu0  ;;  %v4322_v5 = vadd.f32 %v3422_v60, %v1327_v38 }
 0x880   : > { %v4321_v61 = vadd.f32 %v3383_v12, %v1323_v54  ;;  %v3385_v62 = vpop.f32.mrb[2].mxu1  ;;  %v3426_v0 = vpop.f32.mrb[6].mxu0  ;;  %v4323_v16 = vadd.f32 %v3424_v59, %v1331_v39 }
 0x881   : > { %v4160_v19 = vmul.f32 -1.442695, %v4320_v20  ;;  %v3386_v24 = vpop.f32.mrb[3].mxu1  ;;  %v3427_v1 = vpop.f32.mrb[7].mxu0 }
 0x882   : > { %v4161_v63 = vmul.f32 -1.442695, %v4321_v61  ;;  %v4162_v2 = vmul.f32 -1.442695, %v4323_v16 }
 0x883   : > { %4780 = vpow2.f32 %v4160_v19 }
 0x884   : > { %4782 = vpow2.f32 %v4161_v63 }
 0x885   : > { %4784 = vpow2.f32 %v4162_v2 }
 0x886   : > { %4786 = vtanh.f32 %v4322_v5 }
 0x88d   : > { %v4781_v4 = vpop.eup %4780 }
 0x88e   : > { %v4783_v7 = vpop.eup %4782  ;;  %v3436_v36 = vadd.f32 1.0, %v4781_v4 }
 0x88f   : > { %v3442_v10 = vadd.f32 1.0, %v4783_v7  ;;  %v4785_v28 = vpop.eup %4784 }
 0x890   : > { %4788 = vrcp.f32 %v3436_v36  ;;  %v4787_v46 = vpop.eup %4786  ;;  %v3449_v21 = vadd.f32 1.0, %v4785_v28 }
 0x891   : > { %4790 = vrcp.f32 %v3442_v10 }
 0x892   : > { %4792 = vrcp.f32 %v3449_v21 }
 0x89a   : > { %v4789_v8 = vpop.eup %4788 }
 0x89b   : > { %v4791_v26 = vpop.eup %4790  ;;  %v3453_v30 = vmul.f32 %v4789_v8, %v4787_v46 }
 0x89c   : > { %v3452_v31 = vmul.f32 %v4791_v26, %v1223_v50  ;;  %v4793_v9 = vpop.eup %4792 }
 0x89e   : > { %v3454_v25 = vadd.f32 %v3453_v30, %v3452_v31 }
 0x8a0   : > { %4794 = vtanh.f32 %v3454_v25  ;;  %v3579_v49 = vsel %vm3576_vm2, %v3454_v25, %v1223_v50 }
 0x8a1   : > { %3580 = vst [vmem:[#allocation3] sm:$0xff] %v3579_v49 }
 0x8aa   : > { %v4795_v33 = vpop.eup %4794 }
 0x8ab   : > { %v3456_v11 = vmul.f32 %v4795_v33, %v4793_v9 }
 0x8ad   : > { %v3457_v22 = vpack.c.bf16 %v3456_v11, %v3456_v11  ;;  %v3577_v29 = vsel %vm3576_vm2, %v3456_v11, %v4797_v37 }
 0x8ae   : > { %3578 = vst [vmem:[#allocation2] sm:$0xff] %v3577_v29 }
 0x8af   : > { %4317 = vmatmul.mubr.bf16.vlgmr.msra.gmra.mrb[8].mxu0 %v3457_v22 }
 0x982   : > { %v3563_v13 = vpop.f32.mrb[8].mxu0 }
 0x983   : > { %v3564_v6 = vadd.f32 %v4163_v40, %v3563_v13  ;;  %v4318_v14 = vpop.f32.mrb[9].mxu0 }
 0x984   : > { %v3566_v18 = vpop.f32.mrb[10].mxu0 }
 0x985   : > { %v3581_v45 = vsel %vm3576_vm2, %v3564_v6, 0.0  ;;  %v4319_v35 = vpop.f32.mrb[11].mxu0 }
 0x986   : > { %v3582_v41 = vpack.c.bf16 %v3581_v45, %v3581_v45 }
 0x988   : > { %3583 = vst [vmem:[%s5612_s23] sm:$0xf] %v3582_v41 }
 0x989 PF: > { %s6306_s19 = sld [smem:[#allocation33_spill]] }
 0x98f   : > { %p4172_p5 = scmp.gt.s32.totalorder %s5610_s6, %s6306_s19 }
 0x990   : > { %vm3735_vm3 = vcmask (!%p4172_p5), 130048   ;;  %v5196_v48 = vmov (!%p4172_p5), 0   ;;  %v5197_v42 = vmov (!%p4172_p5), 0.0  }
 0x991   : > { %3733 = sbr.rel (%p4172_p5) target bundleno = 2456 (0x998), region = 120  ;;  %3734 = vst [vmem:[%s5612_s23] sm:$0xf] (!%p4172_p5), %v5196_v48  ;;  %3736 = vst.msk [vmem:[%s5614_s10] sm:$0xff] (!%p4172_p5), %vm3735_vm3, %v5197_v42 }
 0x998 PF: > { %s6307_s18 = sld [smem:[#allocation33_spill]]  ;;  %s6308_s0 = sld [smem:[#allocation46_spill]] }
 0x999   : > { %s3757_s6 = sshll.u32 %s5612_s23, 4  ;;  %s3738_s4 = scalar_lea.sflag [#allocation9], %s5584_s22  ;;  %s3758_s6 = int_to_ptr.vmem [resolvable:$true] %s3757_s6 }
 0x99a   : > { %s5036_s11 = scalar_lea.vmem %s3758_s6, 64  ;;  %p6309_p6 = scmp.ne.s32.totalorder %s6282_s14, 0 }
 0x99b   : > { %p5037_p2 = scmp.ne.s32.totalorder %s3758_s6, %s5036_s11  ;;  %s5198_s7 = smov [#allocation21]  }
 0x99c   : > { %s5040_s15 = sshll.u32 %s5198_s7, 4  ;;  %s5041_s15 = int_to_ptr.vmem [resolvable:$false] %s5040_s15 }
 0x99d   : > { %p5038_p7 = pnand %p5037_p2, %p6309_p6  ;;  %s5042_s5 = scalar_lea.vmem %s5041_s15, 128 }
 0x99e   : > { %s4175_s17 = sshll.u32 %s6307_s18, 6  ;;  %p5043_p0 = scmp.lt.s32.totalorder %s3758_s6, %s5041_s15 }
 0x99f   : > { %s6153_s16 = scalar_lea.hbm %s6308_s0, %s4175_s17  ;;  %p5039_p11 = pneg %p5038_p7 }
 0x9a0   : > { %p5044_p1 = scmp.lt.s32.totalorder %s5042_s5, %s5036_s11 }
 0x9a2   : > { %p5045_p9 = por %p5044_p1, %p5043_p0 }
 0x9a4   : > { %p5046_p13 = pnand %p5045_p9, %p5039_p11 }
 0x9a6   : > { %5049 = shalt.err (!%p5046_p13)
}
 0x9a7   : > { %s5050_s23 = scalar_lea.hbm %s6153_s16, 64  ;;  %s5054_s17 = scalar_lea.hbm %s6308_s0, 448 }
 0x9a8   : > { %p5051_p12 = scmp.ne.s32.totalorder %s6153_s16, %s5050_s23  ;;  %p5055_p3 = scmp.lt.u32.totalorder %s6153_s16, %s6308_s0 }
 0x9a9   : > { %p5056_p10 = scmp.lt.u32.totalorder %s5054_s17, %s5050_s23  ;;  %p5058_p2 = scmp.lt.u32.totalorder %s5050_s23, %s6153_s16 }
 0x9aa   : > { %p5052_p4 = pnand %p5051_p12, %p6309_p6 }
 0x9ab   : > { %p5057_p5 = por %p5056_p10, %p5055_p3 }
 0x9ac   : > { %p5053_p8 = pneg %p5052_p4 }
 0x9ad   : > { %p5059_p7 = por %p5058_p2, %p5057_p5 }
 0x9af   : > { %p5060_p11 = pnand %p5059_p7, %p5053_p8 }
 0x9b1   : > { %5063 = shalt.err (!%p5060_p11)
}
 0x9b2   : > { %4370 = dma.vmem_to_hbm [thread:$0]  (%p6309_p6), %s3758_s6, 64, %s6153_s16, %s3738_s4  }
 0x9b3   : > { %s4176_s11 = sshll.u32 %s6307_s18, 7  ;;  %s3771_s7 = sshll.u32 %s5614_s10, 4  ;;  %s3772_s7 = int_to_ptr.vmem [resolvable:$true] %s3771_s7 }
 0x9b4   : > { %s6310_s3 = sld [smem:[#allocation47_spill]]  ;;  %s3743_s23 = scalar_lea.sflag [#allocation23], %s5584_s22 }
 0x9b5   : > { %s5064_s17 = scalar_lea.vmem %s3772_s7, 128  ;;  %s5199_s21 = smov [#allocation22]  }
 0x9b6   : > { %p5065_p0 = scmp.ne.s32.totalorder %s3772_s7, %s5064_s17  ;;  %s5068_s0 = sshll.u32 %s5199_s21, 4  ;;  %s5069_s0 = int_to_ptr.vmem [resolvable:$false] %s5068_s0 }
 0x9b7   : > { %s5070_s2 = scalar_lea.vmem %s5069_s0, 256  ;;  %p5071_p13 = scmp.lt.s32.totalorder %s3772_s7, %s5069_s0 }
 0x9b8   : > { %p5066_p1 = pnand %p5065_p0, %p6309_p6  ;;  %p5072_p12 = scmp.lt.s32.totalorder %s5070_s2, %s5064_s17 }
 0x9ba   : > { %s6311_s19 = smov %s6310_s3  ;;  %s6179_s24 = scalar_lea.hbm %s6310_s3, %s4176_s11 }
 0x9bb   : > { %p5067_p9 = pneg %p5066_p1  ;;  %p5073_p4 = por %p5072_p12, %p5071_p13 }
 0x9bd   : > { %p5074_p8 = pnand %p5073_p4, %p5067_p9 }
 0x9bf   : > { %5077 = shalt.err (!%p5074_p8)
}
 0x9c0   : > { %s5078_s22 = scalar_lea.hbm %s6179_s24, 128  ;;  %s5082_s16 = scalar_lea.hbm %s6311_s19, 896 }
 0x9c1   : > { %p5079_p3 = scmp.ne.s32.totalorder %s6179_s24, %s5078_s22  ;;  %p5083_p2 = scmp.lt.u32.totalorder %s6179_s24, %s6311_s19 }
 0x9c2   : > { %p5084_p7 = scmp.lt.u32.totalorder %s5082_s16, %s5078_s22  ;;  %p5086_p0 = scmp.lt.u32.totalorder %s5078_s22, %s6179_s24 }
 0x9c3   : > { %p5080_p10 = pnand %p5079_p3, %p6309_p6 }
 0x9c4   : > { %p5085_p11 = por %p5084_p7, %p5083_p2 }
 0x9c5   : > { %p5081_p5 = pneg %p5080_p10 }
 0x9c6   : > { %p5087_p1 = por %p5086_p0, %p5085_p11 }
 0x9c8   : > { %p5088_p9 = pnand %p5087_p1, %p5081_p5 }
 0x9ca   : > { %5091 = shalt.err (!%p5088_p9)
}
 0x9cb   : > { %4371 = dma.vmem_to_hbm [thread:$0]  (%p6309_p6), %s3772_s7, 128, %s6179_s24, %s3743_s23  }
 0x9cc PF: > { %p4422_p13 = scmp.ge.s32.totalorder %s5172_s30, 2  ;;  %s3783_s2 = sand.u32 1, %s5152_s26  }
 0x9cd   : > { %p6312_p12 = scmp.ne.s32.totalorder %s6283_s1, 0  ;;  %s3784_s4 = scalar_lea.sflag [#allocation9], %s3783_s2 }
 0x9cf   : > { %p4401_p4 = pnand %p4422_p13, %p6312_p12 }
 0x9d1   : > { %5143 = dma.done.wait (!%p4401_p4), %s3784_s4, 64  }
 0x9d2   : > { %5145 = vsyncadd (!%p4401_p4), %s3784_s4, 4294967232  ;;  %s3793_s11 = scalar_lea.sflag [#allocation23], %s3783_s2 }
 0x9d3   : > { %5147 = dma.done.wait (!%p4401_p4), %s3793_s11, 128  }
 0x9d4   : > { %5149 = vsyncadd (!%p4401_p4), %s3793_s11, 4294967168  ;;  %s46_s30 = sadd.s32 1, %s5172_s30   ;;  %s6313_s26 = smov %s5156_s27 }
 0x9d5   : > { %p43_p8 = scmp.ge.s32.totalorder %s46_s30, 9   ;;  %s6314_s27 = smov %s5160_s28 }
 0x9d6   : > { %s6315_s28 = smov %s5529_s8  ;;  %s6316_s3 = smov %s5168_s29 }
 0x9d7   : > { %s6317_s29 = smov %s6319_s20  ;;  %45 = sbr.rel (!%p43_p8) target bundleno = 36 (0x24), region = 183 }
 0x9de   :  { %3798 = vsyncpa [#allocation8], 1 }
 0x9df   :  { %3800 = vsyncpa [#allocation8 + $0x1], 1 }
 0x9e0   :  { %3801 = vsyncpa [#allocation11], 1 }
 0x9e1   :  { %3803 = vsyncpa [#allocation11 + $0x1], 1 }
 0x9e2   :  { %3804 = vsyncpa [#allocation14], 1 }
 0x9e3   :  { %3805 = vsyncpa [#allocation17], 1 }
 0x9e4   :  { %3806 = vsyncpa [#allocation20], 1 }
 0x9e5   :  { %3807 = vsyncpa [#allocation9], 1 }
 0x9e6   :  { %3809 = vsyncpa [#allocation9 + $0x1], 1 }
 0x9e7   :  { %3810 = vsyncpa [#allocation23], 1 }
 0x9e8   :  { %3812 = vsyncpa [#allocation23 + $0x1], 1 }

// kernel: tpu_custom_call.1
= control target key start
LH: loop header
LB: loop body
LE: loop exit
PB: predicated region body
PF: predicated region fallthrough
CT: control target
= control target key end

     0   :  { %s6221_s0 = inlined_call_operand.vmem [shape: s32[8], index: 0, kind: input, shape index: {}]   ;;  %s6222_s1 = inlined_call_operand.hbm [shape: bf16[8,16,128], index: 1, kind: input, shape index: {}]   ;;  %s6223_s2 = inlined_call_operand.hbm [shape: bf16[7,8,128], index: 2, kind: input, shape index: {}]   ;;  %s6224_s3 = inlined_call_operand.vmem [shape: s32[8,1], index: 3, kind: input, shape index: {}]   ;;  %s6225_s4 = inlined_call_operand.hbm [shape: bf16[128,128], index: 4, kind: input, shape index: {}]   ;;  %s6226_s5 = inlined_call_operand.vmem [shape: f32[1,128], index: 5, kind: input, shape index: {}]   ;;  %s6227_s6 = inlined_call_operand.vmem [shape: f32[1,128], index: 6, kind: input, shape index: {}]   ;;  %s6228_s7 = inlined_call_operand.hbm [shape: bf16[128,256], index: 7, kind: input, shape index: {}]   ;;  %s6229_s8 = inlined_call_operand.vmem [shape: f32[1,256], index: 8, kind: input, shape index: {}]   ;;  %s6230_s9 = inlined_call_operand.hbm [shape: bf16[128,768], index: 9, kind: input, shape index: {}]   ;;  %s6231_s10 = inlined_call_operand.vmem [shape: f32[1,768], index: 10, kind: input, shape index: {}]   ;;  %s6232_s11 = inlined_call_operand.hbm [shape: bf16[128,512], index: 11, kind: input, shape index: {}]   ;;  %s6233_s12 = inlined_call_operand.hbm [shape: bf16[128,512], index: 12, kind: input, shape index: {}]   ;;  %s6234_s13 = inlined_call_operand.hbm [shape: bf16[128,128], index: 13, kind: input, shape index: {}]   ;;  %s6235_s14 = inlined_call_operand.vmem [shape: f32[1,128], index: 14, kind: input, shape index: {}]   ;;  %s6236_s15 = inlined_call_operand.hbm [shape: bf16[7,8,128], index: 15, kind: output, shape index: {0}]   ;;  %s6237_s16 = inlined_call_operand.hbm [shape: f32[7,8,16], index: 16, kind: output, shape index: {1}]  }
   0x1   :  { %6252 = sst [smem:[#allocation34_spill]] %s6221_s0 }
   0x2   :  { %6253 = sst [smem:[#allocation35_spill]] %s6222_s1  ;;  %s6266_s23 = sld [smem:[#allocation34_spill]] }
   0x3   :  { %6254 = sst [smem:[#allocation36_spill]] %s6223_s2 }
   0x4   :  { %6255 = sst [smem:[#allocation37_spill]] %s6224_s3 }
   0x5   :  { %6256 = sst [smem:[#allocation38_spill]] %s6225_s4 }
   0x6   :  { %6257 = sst [smem:[#allocation39_spill]] %s6226_s5 }
   0x7   :  { %6258 = sst [smem:[#allocation40_spill]] %s6227_s6 }
   0x8   :  { %6259 = sst [smem:[#allocation41_spill]] %s6228_s7  ;;  %s22_s3 = sshll.u32 %s6266_s23, 4  ;;  %s23_s3 = int_to_ptr.vmem [resolvable:$true] %s22_s3 }
   0x9   :  { %6260 = sst [smem:[#allocation42_spill]] %s6229_s8  ;;  %s4798_s24 = scalar_lea.vmem %s23_s3, 16 }
   0xa   :  { %6261 = sst [smem:[#allocation43_spill]] %s6231_s10  ;;  %p4799_p0 = scmp.ne.s32.totalorder %s23_s3, %s4798_s24 }
   0xb   :  { %6262 = sst [smem:[#allocation44_spill]] %s6232_s11  ;;  %p4803_p1 = scmp.lt.s32.totalorder %s23_s3, %s23_s3 }
   0xc   :  { %6263 = sst [smem:[#allocation45_spill]] %s6235_s14  ;;  %p4804_p2 = scmp.lt.s32.totalorder %s4798_s24, %s4798_s24 }
   0xd   :  { %6264 = sst [smem:[#allocation46_spill]] %s6236_s15 }
   0xe   :  { %6265 = sst [smem:[#allocation47_spill]] %s6237_s16  ;;  %p4805_p3 = por %p4804_p2, %p4803_p1 }
  0x10   :  { %p4806_p4 = pnand %p4805_p3, %p4799_p0 }
  0x12   :  { %4809 = shalt.err (!%p4806_p4)  }
  0x13   :  { %s5174_s25 = smov [#allocation6]  }
  0x14   :  { %25 = dma.vmem_to_smem %s23_s3, 16, %s5174_s25, [#allocation5] }
  0x15   :  { %5116 = dma.done.wait [#allocation5], 16 }
  0x16   :  { %5117 = vsyncadd [#allocation5], 4294967280 }
  0x17   :  { %27 = sfence }
  0x18   :  { %28 = vsyncpa [#allocation8], 0 }
  0x19   :  { %29 = vsyncpa [#allocation11], 0 }
  0x1a   :  { %31 = vsyncpa [#allocation11 + $0x1], 0 }
  0x1b   :  { %32 = vsyncpa [#allocation14], 0 }
  0x1c   :  { %33 = vsyncpa [#allocation17], 0 }
  0x1d   :  { %34 = vsyncpa [#allocation20], 0 }
  0x1e   :  { %35 = vsyncpa [#allocation9], 0 }
  0x1f   :  { %37 = vsyncpa [#allocation9 + $0x1], 0 }
  0x20   :  { %38 = vsyncpa [#allocation23], 0 }
  0x21   :  { %40 = vsyncpa [#allocation23 + $0x1], 0  ;;  %s5288_s26 = smov 0   ;;  %s5290_s27 = smov 0  }
  0x22   :  { %s5292_s28 = smov 0   ;;  %s5294_s3 = smov 0  }
  0x23   :  { %s5296_s29 = smov 0   ;;  %s5298_s30 = smov 0  }
  0x24 LB: > { %6267 = sst [smem:[#allocation33_spill]] %s5164_s3  ;;  %s5319_s0 = sadd.s32 4294967295, %s5172_s30   ;;  %s5172_s30 = sphi %s5298_s30, %s46_s30   ;;  %s5168_s29 = sphi %s5296_s29, %s6317_s29   ;;  %s5164_s3 = sphi %s5294_s3, %s6316_s3   ;;  %s5160_s28 = sphi %s5292_s28, %s6315_s28   ;;  %s5156_s27 = sphi %s5290_s27, %s6314_s27   ;;  %s5152_s26 = sphi %s5288_s26, %s6313_s26  }
  0x25   : > { %p3972_p5 = scmp.ge.s32.totalorder %s5172_s30, 1  ;;  %p6244_p6 = scmp.eq.s32.totalorder %s5319_s0, 0 }
  0x26   : > { %p430_p7 = scmp.lt.s32.totalorder %s5172_s30, 8  ;;  %s5175_s18 = smov [#allocation12]  }
  0x27   : > { %s466_s19 = sshll.u32 %s5175_s18, 4  ;;  %s5176_s20 = smov [#allocation13]   ;;  %s5328_s19 = int_to_ptr.vmem [resolvable:$true] %s466_s19 }
  0x28   : > { %p5324_p8 = pnand %p3972_p5, %p430_p7  ;;  %s485_s21 = sshll.u32 %s5176_s20, 4  ;;  %s5338_s21 = int_to_ptr.vmem [resolvable:$true] %s485_s21 }
  0x29   : > { %s5177_s23 = smov [#allocation16]   ;;  %s6270_s4 = sld [smem:[#allocation38_spill]] }
  0x2a   : > { %s6268_s17 = scalar_select %p5324_p8, 1, 0 }
  0x2b   : > { %p4374_p9 = pneg %p5324_p8  ;;  %s5340_s24 = sshll.u32 %s5177_s23, 4  ;;  %s518_s24 = int_to_ptr.vmem [resolvable:$true] %s5340_s24 }
  0x2d   : > { %p5334_p10 = pnand %p4374_p9, %p6244_p6 }
  0x2f   : > { %s4810_s18 = scalar_lea.hbm %s6270_s4, 1024  ;;  %p5350_p12 = pneg %p5334_p10 }
  0x30   : > { %p4811_p11 = scmp.ne.s32.totalorder %s6270_s4, %s4810_s18  ;;  %p4817_p1 = scmp.lt.u32.totalorder %s4810_s18, %s6270_s4 }
  0x32   : > { %p4813_p13 = pnand %p5350_p12, %p4811_p11 }
  0x34   : > { %p4814_p0 = pneg %p4813_p13 }
  0x36   : > { %p4819_p2 = pnand %p4817_p1, %p4814_p0 }
  0x38   : > { %4822 = shalt.err (!%p4819_p2)
}
  0x39   : > { %s4823_s14 = scalar_lea.vmem %s5328_s19, 1024  ;;  %p4831_p7 = scmp.lt.s32.totalorder %s5328_s19, %s5328_s19 }
  0x3a   : > { %p4824_p3 = scmp.ne.s32.totalorder %s5328_s19, %s4823_s14  ;;  %p4832_p9 = scmp.lt.s32.totalorder %s4823_s14, %s4823_s14 }
  0x3c   : > { %p4826_p4 = pnand %p4824_p3, %p5350_p12  ;;  %p4833_p11 = por %p4832_p9, %p4831_p7 }
  0x3e   : > { %p4827_p5 = pneg %p4826_p4 }
  0x40   : > { %p4834_p13 = pnand %p4833_p11, %p4827_p5 }
  0x42   : > { %4837 = shalt.err (!%p4834_p13)
}
  0x43   : > { %s6242_s15 = smov 64   ;;  %s6246_s6 = smov 4  }
  0x44   : > { %4380 = dma.hbm_to_vmem [thread:$0]  (!%p5334_p10), %s6270_s4, 1024, %s5328_s19, [#allocation11], %s6242_s15, %s6242_s15, %s6246_s6  }
  0x45   : > { %s6272_s7 = sld [smem:[#allocation41_spill]] }
  0x4b   : > { %s4838_s14 = scalar_lea.hbm %s6272_s7, 2048 }
  0x4c   : > { %p4839_p0 = scmp.ne.s32.totalorder %s6272_s7, %s4838_s14  ;;  %p4845_p3 = scmp.lt.u32.totalorder %s4838_s14, %s6272_s7 }
  0x4e   : > { %p4841_p1 = pnand %p4839_p0, %p5350_p12 }
  0x50   : > { %p4842_p2 = pneg %p4841_p1 }
  0x52   : > { %p4847_p4 = pnand %p4845_p3, %p4842_p2 }
  0x54   : > { %4850 = shalt.err (!%p4847_p4)
}
  0x55   : > { %s4851_s19 = scalar_lea.vmem %s5338_s21, 2048  ;;  %p4859_p11 = scmp.lt.s32.totalorder %s5338_s21, %s5338_s21 }
  0x56   : > { %p4852_p5 = scmp.ne.s32.totalorder %s5338_s21, %s4851_s19  ;;  %p4860_p13 = scmp.lt.s32.totalorder %s4851_s19, %s4851_s19 }
  0x58   : > { %p4854_p7 = pnand %p4852_p5, %p5350_p12  ;;  %p4861_p0 = por %p4860_p13, %p4859_p11 }
  0x5a   : > { %p4855_p9 = pneg %p4854_p7 }
  0x5c   : > { %p4862_p1 = pnand %p4861_p0, %p4855_p9 }
  0x5e   : > { %4865 = shalt.err (!%p4862_p1)
}
  0x5f   : > { %s5180_s8 = smov 128   ;;  %s5181_s5 = smov 8  }
  0x60   : > { %4383 = dma.hbm_to_vmem [thread:$0]  (!%p5334_p10), %s6272_s7, 2048, %s5338_s21, [#allocation14], %s5180_s8, %s5180_s8, %s5181_s5  }
  0x61   : > { %s6273_s11 = sld [smem:[#allocation44_spill]] }
  0x67   : > { %s4866_s18 = scalar_lea.hbm %s6273_s11, 4096 }
  0x68   : > { %p4867_p2 = scmp.ne.s32.totalorder %s6273_s11, %s4866_s18  ;;  %p4873_p5 = scmp.lt.u32.totalorder %s4866_s18, %s6273_s11 }
  0x6a   : > { %p4869_p3 = pnand %p4867_p2, %p5350_p12 }
  0x6c   : > { %p4870_p4 = pneg %p4869_p3 }
  0x6e   : > { %p4875_p7 = pnand %p4873_p5, %p4870_p4 }
  0x70   : > { %4878 = shalt.err (!%p4875_p7)
}
  0x71   : > { %s4879_s10 = scalar_lea.vmem %s518_s24, 4096  ;;  %p4887_p0 = scmp.lt.s32.totalorder %s518_s24, %s518_s24 }
  0x72   : > { %p4880_p9 = scmp.ne.s32.totalorder %s518_s24, %s4879_s10  ;;  %p4888_p1 = scmp.lt.s32.totalorder %s4879_s10, %s4879_s10 }
  0x74   : > { %p4882_p11 = pnand %p4880_p9, %p5350_p12  ;;  %p4889_p6 = por %p4888_p1, %p4887_p0 }
  0x76   : > { %p4883_p13 = pneg %p4882_p11 }
  0x78   : > { %p4890_p8 = pnand %p4889_p6, %p4883_p13 }
  0x7a   : > { %4893 = shalt.err (!%p4890_p8)
}
  0x7b   : > { %s6248_s21 = smov 256   ;;  %s6249_s8 = smov 16  }
  0x7c   : > { %4389 = dma.hbm_to_vmem [thread:$0]  (!%p5334_p10), %s6273_s11, 4096, %s518_s24, [#allocation17], %s6248_s21, %s6248_s21, %s6249_s8  }
  0x7d   : > { %s5184_s3 = smov [#allocation7]   ;;  %s5185_s25 = smov [#allocation15]  }
  0x7e   : > { %s446_s16 = sshll.u32 %s5184_s3, 4  ;;  %s501_s18 = sshll.u32 %s5185_s25, 4  ;;  %s447_s16 = int_to_ptr.vmem [resolvable:$true] %s446_s16  ;;  %s502_s18 = int_to_ptr.vmem [resolvable:$true] %s501_s18 }
  0x7f   : > { %s6274_s1 = sld [smem:[#allocation35_spill]] }
  0x85   : > { %s4894_s19 = scalar_lea.hbm %s6274_s1, 1024 }
  0x86   : > { %p4895_p6 = scmp.ne.s32.totalorder %s6274_s1, %s4894_s19  ;;  %p4901_p3 = scmp.lt.u32.totalorder %s4894_s19, %s6274_s1 }
  0x88   : > { %p4897_p8 = pnand %p4895_p6, %p5350_p12 }
  0x8a   : > { %p4898_p2 = pneg %p4897_p8 }
  0x8c   : > { %p4903_p4 = pnand %p4901_p3, %p4898_p2 }
  0x8e   : > { %4906 = shalt.err (!%p4903_p4)
}
  0x8f   : > { %s4907_s24 = scalar_lea.vmem %s447_s16, 1024  ;;  %p4915_p11 = scmp.lt.s32.totalorder %s447_s16, %s447_s16 }
  0x90   : > { %p4908_p5 = scmp.ne.s32.totalorder %s447_s16, %s4907_s24  ;;  %p4916_p13 = scmp.lt.s32.totalorder %s4907_s24, %s4907_s24 }
  0x92   : > { %p4910_p7 = pnand %p4908_p5, %p5350_p12  ;;  %p4917_p0 = por %p4916_p13, %p4915_p11 }
  0x94   : > { %p4911_p9 = pneg %p4910_p7 }
  0x96   : > { %p4918_p1 = pnand %p4917_p0, %p4911_p9 }
  0x98   : > { %4921 = shalt.err (!%p4918_p1)
}
  0x99   : > { %s6275_s6 = smov 4   ;;  %s6276_s15 = smov 64  }
  0x9a   : > { %4377 = dma.hbm_to_vmem [thread:$0]  (!%p5334_p10), %s6274_s1, 1024, %s447_s16, [#allocation8], %s6276_s15, %s6276_s15, %s6275_s6  }
  0x9b   : > { %s4922_s25 = scalar_lea.hbm %s6230_s9, 6144 }
  0x9c   : > { %p4923_p6 = scmp.ne.s32.totalorder %s6230_s9, %s4922_s25  ;;  %p4929_p3 = scmp.lt.u32.totalorder %s4922_s25, %s6230_s9 }
  0x9e   : > { %p4925_p8 = pnand %p4923_p6, %p5350_p12 }
  0xa0   : > { %p4926_p2 = pneg %p4925_p8 }
  0xa2   : > { %p4931_p4 = pnand %p4929_p3, %p4926_p2 }
  0xa4   : > { %4934 = shalt.err (!%p4931_p4)
}
  0xa5   : > { %s4935_s24 = scalar_lea.vmem %s502_s18, 6144  ;;  %p4943_p11 = scmp.lt.s32.totalorder %s502_s18, %s502_s18 }
  0xa6   : > { %p4936_p5 = scmp.ne.s32.totalorder %s502_s18, %s4935_s24  ;;  %p4944_p13 = scmp.lt.s32.totalorder %s4935_s24, %s4935_s24 }
  0xa8   : > { %p4938_p7 = pnand %p4936_p5, %p5350_p12  ;;  %p4945_p0 = por %p4944_p13, %p4943_p11 }
  0xaa   : > { %p4939_p9 = pneg %p4938_p7 }
  0xac   : > { %p4946_p1 = pnand %p4945_p0, %p4939_p9 }
  0xae   : > { %4949 = shalt.err (!%p4946_p1)
}
  0xaf   : > { %s5186_s16 = smov 384   ;;  %s5187_s4 = smov 24  }
  0xb0   : > { %4386 = dma.hbm_to_vmem [thread:$0]  (!%p5334_p10), %s6230_s9, 6144, %s502_s18, [#allocation14], %s5186_s16, %s5186_s16, %s5187_s4  }
  0xb1   : > { %s5188_s3 = smov [#allocation18]   ;;  %s5189_s23 = smov [#allocation19]  }
  0xb2   : > { %s530_s25 = sshll.u32 %s5188_s3, 4  ;;  %s543_s14 = sshll.u32 %s5189_s23, 4  ;;  %s531_s25 = int_to_ptr.vmem [resolvable:$true] %s530_s25  ;;  %s544_s14 = int_to_ptr.vmem [resolvable:$true] %s543_s14 }
  0xb3   : > { %s4950_s24 = scalar_lea.hbm %s6233_s12, 4096 }
  0xb4   : > { %p4951_p6 = scmp.ne.s32.totalorder %s6233_s12, %s4950_s24  ;;  %p4957_p3 = scmp.lt.u32.totalorder %s4950_s24, %s6233_s12 }
  0xb6   : > { %p4953_p8 = pnand %p4951_p6, %p5350_p12 }
  0xb8   : > { %p4954_p2 = pneg %p4953_p8 }
  0xba   : > { %p4959_p4 = pnand %p4957_p3, %p4954_p2 }
  0xbc   : > { %4962 = shalt.err (!%p4959_p4)
}
  0xbd   : > { %s4963_s18 = scalar_lea.vmem %s531_s25, 4096  ;;  %p4971_p11 = scmp.lt.s32.totalorder %s531_s25, %s531_s25 }
  0xbe   : > { %p4964_p5 = scmp.ne.s32.totalorder %s531_s25, %s4963_s18  ;;  %p4972_p13 = scmp.lt.s32.totalorder %s4963_s18, %s4963_s18 }
  0xc0   : > { %p4966_p7 = pnand %p4964_p5, %p5350_p12  ;;  %p4973_p0 = por %p4972_p13, %p4971_p11 }
  0xc2   : > { %p4967_p9 = pneg %p4966_p7 }
  0xc4   : > { %p4974_p1 = pnand %p4973_p0, %p4967_p9 }
  0xc6   : > { %4977 = shalt.err (!%p4974_p1)
}
  0xc7   : > { %s6277_s21 = smov 16   ;;  %s6278_s8 = smov 256  }
  0xc8   : > { %4392 = dma.hbm_to_vmem [thread:$0]  (!%p5334_p10), %s6233_s12, 4096, %s531_s25, [#allocation17], %s6278_s8, %s6278_s8, %s6277_s21  }
  0xc9   : > { %s4978_s7 = scalar_lea.hbm %s6234_s13, 1024 }
  0xca   : > { %p4979_p6 = scmp.ne.s32.totalorder %s6234_s13, %s4978_s7  ;;  %p4985_p3 = scmp.lt.u32.totalorder %s4978_s7, %s6234_s13 }
  0xcc   : > { %p4981_p8 = pnand %p4979_p6, %p5350_p12 }
  0xce   : > { %p4982_p2 = pneg %p4981_p8 }
  0xd0   : > { %p4987_p4 = pnand %p4985_p3, %p4982_p2 }
  0xd2   : > { %4990 = shalt.err (!%p4987_p4)
}
  0xd3   : > { %s4991_s10 = scalar_lea.vmem %s544_s14, 1024  ;;  %p4999_p11 = scmp.lt.s32.totalorder %s544_s14, %s544_s14 }
  0xd4   : > { %p4992_p5 = scmp.ne.s32.totalorder %s544_s14, %s4991_s10  ;;  %p5000_p13 = scmp.lt.s32.totalorder %s4991_s10, %s4991_s10 }
  0xd6   : > { %p4994_p7 = pnand %p4992_p5, %p5350_p12  ;;  %p5001_p0 = por %p5000_p13, %p4999_p11 }
  0xd8   : > { %p4995_p9 = pneg %p4994_p7 }
  0xda   : > { %p5002_p1 = pnand %p5001_p0, %p4995_p9 }
  0xdc   : > { %5005 = shalt.err (!%p5002_p1)
}
  0xdd   : > { %4395 = dma.hbm_to_vmem [thread:$0]  (!%p5334_p10), %s6234_s13, 1024, %s544_s14, [#allocation20], %s6276_s15, %s6276_s15, %s6275_s6  }
  0xde   : > { %s3971_s22 = sadd.s32 4294967294, %s5172_s30   ;;  %s55_s20 = sadd.s32 1, %s5168_s29 }
  0xdf   : > { %s93_s18 = sadd.s32 1, %s5160_s28  ;;  %p56_p12 = scmp.ge.s32.totalorder %s55_s20, 7 }
  0xe0   : > { %p100_p6 = scmp.ne.s32.totalorder %s5160_s28, %s5156_s27  ;;  %p101_p8 = scmp.eq.s32.totalorder %s5172_s30, 0 }
  0xe1   : > { %p106_p2 = scmp.ne.s32.totalorder %s5156_s27, %s5152_s26  ;;  %s6319_s20 = smov (%p56_p12, %s55_s20), 0 }
  0xe2   : > { %p5510_p3 = por %p101_p8, %p100_p6  ;;  %p6280_p10 = scmp.eq.s32.totalorder %s5319_s0, 0 }
  0xe3   : > { %s88_s15 = ssub.s32 %s5168_s29, %s6319_s20  ;;  %p389_p5 = scmp.eq.s32.totalorder %s5319_s0, 6 }
  0xe4   : > { %p5516_p4 = por %p6280_p10, %p106_p2  ;;  %p91_p7 = scmp.eq.s32.totalorder %s88_s15, 0 }
  0xe5   : > { %p395_p9 = scmp.eq.s32.totalorder %s3971_s22, 6  ;;  %p5523_p11 = por %p389_p5, %p100_p6 }
  0xe6   : > { %p4414_p13 = scmp.lt.s32.totalorder %s5172_s30, 7  ;;  %s560_s11 = sand.u32 1, %s5172_s30  }
  0xe7   : > { %s6282_s14 = scalar_select %p5523_p11, 1, 0 }
  0xe8   : > { %s5529_s8 = scalar_select %p91_p7, %s5160_s28, %s93_s18  }
  0xe9   : > { %p5531_p0 = por %p395_p9, %p106_p2  ;;  %s562_s16 = sand.u32 1, %s5160_s28  }
  0xea   : > { %s3982_s4 = sshll.u32 %s562_s16, 2  ;;  %s3983_s7 = sshll.u32 %s5168_s29, 6 }
  0xeb   : > { %s6283_s1 = scalar_select %p5531_p0, 1, 0 }
  0xec   : > { %s6284_s2 = sld [smem:[#allocation36_spill]]  ;;  %s564_s19 = scalar_lea.vmem [#allocation10], %s3982_s4 }
  0xed   : > { %s572_s10 = sshll.u32 %s564_s19, 4  ;;  %p5545_p1 = pnand %p4414_p13, %p5510_p3  ;;  %s5549_s10 = int_to_ptr.vmem [resolvable:$true] %s572_s10 }
  0xee   : > { %s561_s24 = scalar_lea.sflag [#allocation11], %s560_s11 }
  0xef   : > { %p5008_p6 = pneg %p5545_p1 }
  0xf2   : > { %s5541_s23 = scalar_lea.hbm %s6284_s2, %s3983_s7  ;;  %s5011_s21 = scalar_lea.hbm %s6284_s2, 448 }
  0xf3   : > { %s5006_s22 = scalar_lea.hbm %s5541_s23, 64  ;;  %p5012_p3 = scmp.lt.u32.totalorder %s5541_s23, %s6284_s2 }
  0xf4   : > { %p5007_p12 = scmp.ne.s32.totalorder %s5541_s23, %s5006_s22  ;;  %p5013_p10 = scmp.lt.u32.totalorder %s5011_s21, %s5006_s22 }
  0xf5   : > { %p5015_p7 = scmp.lt.u32.totalorder %s5006_s22, %s5541_s23 }
  0xf6   : > { %p5009_p8 = pnand %p5008_p6, %p5007_p12  ;;  %p5014_p5 = por %p5013_p10, %p5012_p3 }
  0xf8   : > { %p5010_p2 = pneg %p5009_p8  ;;  %p5016_p9 = por %p5015_p7, %p5014_p5 }
  0xfa   : > { %p5017_p13 = pnand %p5016_p9, %p5010_p2 }
  0xfc   : > { %5020 = shalt.err (!%p5017_p13)
}
  0xfd   : > { %s5021_s11 = scalar_lea.vmem %s5549_s10, 64  ;;  %s5190_s7 = smov [#allocation10]  }
  0xfe   : > { %p5022_p12 = scmp.ne.s32.totalorder %s5549_s10, %s5021_s11  ;;  %s5026_s5 = sshll.u32 %s5190_s7, 4  ;;  %s5027_s5 = int_to_ptr.vmem [resolvable:$false] %s5026_s5 }
  0xff   : > { %s5028_s3 = scalar_lea.vmem %s5027_s5, 128  ;;  %p5029_p11 = scmp.lt.s32.totalorder %s5549_s10, %s5027_s5 }
 0x100   : > { %p5024_p8 = pnand %p5022_p12, %p5008_p6  ;;  %p5030_p3 = scmp.lt.s32.totalorder %s5028_s3, %s5021_s11 }
 0x102   : > { %p5025_p0 = pneg %p5024_p8  ;;  %p5031_p10 = por %p5030_p3, %p5029_p11 }
 0x104   : > { %p5032_p5 = pnand %p5031_p10, %p5025_p0 }
 0x106   : > { %5035 = shalt.err (!%p5032_p5)
}
 0x107   : > { %4399 = dma.hbm_to_vmem [thread:$0]  (!%p5545_p1), %s5541_s23, 64, %s5549_s10, %s561_s24  }
 0x108   : > { %p6286_p2 = scmp.ne.s32.totalorder %s6268_s17, 0 }
 0x109   : > { %p6287_p6 = scmp.eq.s32.totalorder (!%p6286_p2), %s5319_s0, 0 }
 0x10a   : > { %581 = sbr.rel (%p6286_p2) target bundleno = 2508 (0x9cc), region = 76 }
 0x111   : > { %5119 = dma.done.wait (%p6287_p6), [#allocation8], 1024   ;;  %p6288_p7 = pmov %p6287_p6 }
 0x112   : > { %s587_s19 = sand.u32 1, %s5319_s0   ;;  %s5584_s22 = sand.u32 1, %s5156_s27  }
 0x113   : > { %5121 = vsyncadd (%p6288_p7), [#allocation8], 4294966272  ;;  %s3986_s25 = sshll.u32 %s5584_s22, 2  ;;  %s588_s18 = scalar_lea.sflag [#allocation11], %s587_s19 }
 0x114   : > { %s5587_s15 = scalar_lea.vmem [#allocation10], %s3986_s25 }
 0x115   : > { %5123 = dma.done.wait (%p5516_p4), %s588_s18, 64  }
 0x116   : > { %5125 = vsyncadd (%p5516_p4), %s588_s18, 4294967232  ;;  %p6289_p11 = pmov %p6287_p6 }
 0x117   : > { %p6290_p0 = pmov %p6287_p6 }
 0x118   : > { %5127 = dma.done.wait (%p6289_p11), [#allocation11], 1024  }
 0x119   : > { %5129 = vsyncadd (%p6290_p0), [#allocation11], 4294966272  ;;  %p6291_p1 = pmov %p6290_p0 }
 0x11a   : > { %p6292_p9 = pmov %p6290_p0 }
 0x11b   : > { %5131 = dma.done.wait (%p6291_p1), [#allocation14], 8192  }
 0x11c   : > { %5133 = vsyncadd (%p6292_p9), [#allocation14], 4294959104  ;;  %p6293_p13 = pmov %p6290_p0 }
 0x11d   : > { %p6294_p12 = pmov %p6290_p0 }
 0x11e   : > { %5135 = dma.done.wait (%p6293_p13), [#allocation17], 8192  }
 0x11f   : > { %5137 = vsyncadd (%p6294_p12), [#allocation17], 4294959104  ;;  %p6295_p4 = pmov %p6290_p0 }
 0x120   : > { %p6296_p8 = pmov %p6290_p0 }
 0x121   : > { %5139 = dma.done.wait (%p6295_p4), [#allocation20], 1024  }
 0x122   : > { %5141 = vsyncadd (%p6296_p8), [#allocation20], 4294966272  ;;  %s3994_s17 = sshll.u32 %s5584_s22, 3  ;;  %s5610_s6 = sld [smem:[#allocation6]] }
 0x123   : > { %s5612_s23 = scalar_lea.vmem [#allocation21], %s3986_s25  ;;  %s5614_s10 = scalar_lea.vmem [#allocation22], %s3994_s17 }
 0x124   : > { %s6297_s24 = sld [smem:[#allocation33_spill]] }
 0x12a   : > { %p3995_p3 = scmp.le.s32.totalorder %s5610_s6, %s6297_s24 }
 0x12b   : > { %s6298_s21 = sld [smem:[#allocation33_spill]] (!%p3995_p3) }
 0x12c   : > { %682 = sbr.rel (%p3995_p3) target bundleno = 2441 (0x989), region = 112 }
 0x131   : > { %p3996_p10 = scmp.ne.s32.totalorder (!%p3995_p3), %s6298_s21, 0 }
 0x133   : > { %686 = sbr.rel (%p3996_p10) target bundleno = 584 (0x248), region = 116  ;;  %v4494_v0 = vld [vmem:[#allocation12] sm:$0xff] (!%p3996_p10)   ;;  %v4495_v1 = vld [vmem:[#allocation12 + $0x8] sm:$0xff] (!%p3996_p10)   ;;  %v5191_v2 = vmov (!%p3996_p10), 0   ;;  %v4496_v3 = vld [vmem:[#allocation12 + $0x10] sm:$0xff] (!%p3996_p10)   ;;  %vm1083_vm0 = vcmask (!%p3996_p10), 1041409  }
 0x134   : > { %1211 = vmatprep.mubr.bf16.mxu1 (!%p3996_p10), %v5191_v2  ;;  %4220 = vmatprep.subr.bf16.mxu0 (!%p3996_p10), %v4494_v0  ;;  %v4497_v4 = vld [vmem:[#allocation12 + $0x18] sm:$0xff] (!%p3996_p10)   ;;  %v4501_v5 = vld [vmem:[#allocation13 + $0x4] ss:$8 sps:$4 sm:$0xff] (!%p3996_p10)   ;;  %v4503_v6 = vld [vmem:[#allocation13] ss:$8 sps:$4 sm:$0xff] (!%p3996_p10)   ;;  %vm1085_vm1 = vcmask (!%p3996_p10), 1042434  }
 0x135   : > { %4221 = vmatpush3.bf16.msra.mxu0 (!%p3996_p10), %v4494_v0  ;;  %1179 = vmatprep.subr.bf16.mxu1 (!%p3996_p10), %v4501_v5  ;;  %v4505_v7 = vld [vmem:[#allocation13 + $0x14] ss:$8 sps:$4 sm:$0xff] (!%p3996_p10)   ;;  %v4507_v8 = vld [vmem:[#allocation13 + $0x10] ss:$8 sps:$4 sm:$0xff] (!%p3996_p10)   ;;  %v5619_v12 = vld [vmem:[#allocation7 + $0x8] sm:$0xff] (!%p3996_p10)   ;;  %vm1087_vm2 = vcmask (!%p3996_p10), 1043459  }
 0x136   : > { %4222 = vmatprep.subr.bf16.mxu0 (!%p3996_p10), %v4495_v1  ;;  %1180 = vmatpush1.bf16.msra.mxu1 (!%p3996_p10), %v4503_v6  ;;  %v687_v9 = vld [vmem:[#allocation7] sm:$0xff] (!%p3996_p10)   ;;  %v4498_v13 = vld [vmem:[#allocation12 + $0x20] sm:$0xff] (!%p3996_p10)   ;;  %v953_v14 = vunpack.c.l.bf16 (!%p3996_p10), %v5619_v12  ;;  %v954_v15 = vunpack.c.h.bf16 (!%p3996_p10), %v5619_v12  ;;  %v5623_v20 = vld [vmem:[#allocation7 + $0x10] sm:$0xff] (!%p3996_p10)   ;;  %vm1089_vm3 = vcmask (!%p3996_p10), 1044484   ;;  %vm1091_vm4 = vcmask (!%p3996_p10), 1045509   ;;  %s6299_s4 = sld [smem:[#allocation39_spill]] (!%p3996_p10) }
 0x137   : > { %v951_v10 = vunpack.c.l.bf16 (!%p3996_p10), %v687_v9  ;;  %v952_v11 = vunpack.c.h.bf16 (!%p3996_p10), %v687_v9  ;;  %1181 = vmatprep.subr.bf16.mxu1 (!%p3996_p10), %v4505_v7  ;;  %v4510_v16 = vld [vmem:[#allocation13 + $0x24] ss:$8 sps:$4 sm:$0xff] (!%p3996_p10)   ;;  %4236 = vmatprep.mubr.bf16.mxu0 (!%p3996_p10), %v687_v9  ;;  %v4512_v18 = vld [vmem:[#allocation13 + $0x20] ss:$8 sps:$4 sm:$0xff] (!%p3996_p10)   ;;  %v5625_v21 = vld [vmem:[#allocation7 + $0x18] sm:$0xff] (!%p3996_p10)   ;;  %v955_v24 = vunpack.c.l.bf16 (!%p3996_p10), %v5623_v20  ;;  %v956_v25 = vunpack.c.h.bf16 (!%p3996_p10), %v5623_v20  ;;  %s6300_s5 = sld [smem:[#allocation42_spill]] (!%p3996_p10) }
 0x138   : > { %v974_v19 = vadd.f32 (!%p3996_p10), %v954_v15, %v953_v14  ;;  %v4513_v23 = vld [vmem:[#allocation13 + $0x34] ss:$8 sps:$4 sm:$0xff] (!%p3996_p10)   ;;  %v4499_v26 = vld [vmem:[#allocation12 + $0x28] sm:$0xff] (!%p3996_p10)   ;;  %v957_v28 = vunpack.c.l.bf16 (!%p3996_p10), %v5625_v21  ;;  %v958_v29 = vunpack.c.h.bf16 (!%p3996_p10), %v5625_v21  ;;  %v5633_v33 = vld [vmem:[#allocation7 + $0x28] sm:$0xff] (!%p3996_p10)   ;;  %vm1093_vm5 = vcmask (!%p3996_p10), 1046534  }
 0x139   : > { %4223 = vmatpush3.bf16.msra.mxu0 (!%p3996_p10), %v4495_v1  ;;  %v967_v17 = vadd.f32 (!%p3996_p10), %v952_v11, %v951_v10  ;;  %v981_v31 = vadd.f32 (!%p3996_p10), %v956_v25, %v955_v24  ;;  %v5631_v32 = vld [vmem:[#allocation7 + $0x20] sm:$0xff] (!%p3996_p10)   ;;  %v4518_v40 = vld [vmem:[#allocation13 + $0x44] ss:$8 sps:$4 sm:$0xff] (!%p3996_p10)   ;;  %v4500_v42 = vld [vmem:[#allocation12 + $0x30] sm:$0xff] (!%p3996_p10)   ;;  %v961_v45 = vunpack.c.l.bf16 (!%p3996_p10), %v5633_v33  ;;  %v962_v46 = vunpack.c.h.bf16 (!%p3996_p10), %v5633_v33 }
 0x13a   : > { %4224 = vmatprep.subr.bf16.mxu0 %v4496_v3  ;;  %1182 = vmatpush1.bf16.msra.mxu1 %v4507_v8  ;;  %v975_v27 = vrot.slane %v974_v19, 4  ;;  %v4515_v35 = vld [vmem:[#allocation13 + $0x30] ss:$8 sps:$4 sm:$0xff]   ;;  %v988_v36 = vadd.f32 %v958_v29, %v957_v28  ;;  %v959_v37 = vunpack.c.l.bf16 %v5631_v32  ;;  %v960_v41 = vunpack.c.h.bf16 %v5631_v32  ;;  %v5639_v50 = vld [vmem:[#allocation7 + $0x30] sm:$0xff]   ;;  %v4521_v57 = vld [vmem:[#allocation13 + $0x54] ss:$8 sps:$4 sm:$0xff]  }
 0x13b   : > { %v968_v22 = vrot.slane %v967_v17, 4  ;;  %1183 = vmatprep.subr.bf16.mxu1 %v4510_v16  ;;  %v982_v39 = vrot.slane %v981_v31, 4  ;;  %v4520_v53 = vld [vmem:[#allocation13 + $0x40] ss:$8 sps:$4 sm:$0xff]   ;;  %v1002_v54 = vadd.f32 %v962_v46, %v961_v45  ;;  %v963_v59 = vunpack.c.l.bf16 %v5639_v50  ;;  %v4504_v60 = vld [vmem:[#allocation12 + $0x38] sm:$0xff]   ;;  %v5643_v1 = vld [vmem:[#allocation7 + $0x38] sm:$0xff]  }
 0x13c   : > { %v976_v34 = vadd.f32 %v975_v27, %v974_v19  ;;  %v989_v44 = vrot.slane %v988_v36, 4  ;;  %v995_v49 = vadd.f32 %v960_v41, %v959_v37  ;;  %v964_v0 = vunpack.c.h.bf16 %v5639_v50  ;;  %v4523_v7 = vld [vmem:[#allocation13 + $0x50] ss:$8 sps:$4 sm:$0xff]   ;;  %v4526_v14 = vld [vmem:[#allocation13 + $0x64] ss:$8 sps:$4 sm:$0xff]  }
 0x13d   : > { %4225 = vmatpush3.bf16.msra.mxu0 %v4496_v3  ;;  %v969_v30 = vadd.f32 %v968_v22, %v967_v17  ;;  %v983_v48 = vadd.f32 %v982_v39, %v981_v31  ;;  %v1003_v63 = vrot.slane %v1002_v54, 4  ;;  %v965_v15 = vunpack.c.l.bf16 %v5643_v1  ;;  %v4528_v29 = vld [vmem:[#allocation13 + $0x60] ss:$8 sps:$4 sm:$0xff]  }
 0x13e   : > { %4226 = vmatprep.subr.bf16.mxu0 %v4497_v4  ;;  %1184 = vmatpush1.bf16.msra.mxu1 %v4512_v18  ;;  %v977_v43 = vrot.slane %v976_v34, 2  ;;  %v990_v52 = vadd.f32 %v989_v44, %v988_v36  ;;  %v996_v58 = vrot.slane %v995_v49, 4  ;;  %v1009_v9 = vadd.f32 %v964_v0, %v963_v59  ;;  %v4529_v36 = vld [vmem:[#allocation13 + $0x74] ss:$8 sps:$4 sm:$0xff]  }
 0x13f   : > { %v970_v38 = vrot.slane %v969_v30, 2  ;;  %1185 = vmatprep.subr.bf16.mxu1 %v4513_v23  ;;  %v984_v56 = vrot.slane %v983_v48, 2  ;;  %v1004_v8 = vadd.f32 %v1003_v63, %v1002_v54  ;;  %v966_v25 = vunpack.c.h.bf16 %v5643_v1 }
 0x140   : > { %v978_v51 = vadd.f32 %v977_v43, %v976_v34  ;;  %v991_v62 = vrot.slane %v990_v52, 2  ;;  %v1010_v19 = vrot.slane %v1009_v9, 4  ;;  %vm1095_vm6 = vcmask 1047559  }
 0x141   : > { %4227 = vmatpush3.bf16.msra.mxu0 %v4497_v4  ;;  %v971_v47 = vadd.f32 %v970_v38, %v969_v30  ;;  %v985_v3 = vadd.f32 %v984_v56, %v983_v48  ;;  %v997_v4 = vadd.f32 %v996_v58, %v995_v49  ;;  %v1005_v18 = vrot.slane %v1004_v8, 2 }
 0x142   : > { %4228 = vmatprep.subr.bf16.mxu0 %v4498_v13  ;;  %1186 = vmatpush1.bf16.msra.mxu1 %v4515_v35  ;;  %v979_v61 = vrot.slane %v978_v51, 1  ;;  %v992_v6 = vadd.f32 %v991_v62, %v990_v52  ;;  %v1011_v30 = vadd.f32 %v1010_v19, %v1009_v9  ;;  %v1016_v37 = vadd.f32 %v966_v25, %v965_v15 }
 0x143   : > { %v972_v55 = vrot.slane %v971_v47, 1  ;;  %1187 = vmatprep.subr.bf16.mxu1 %v4518_v40  ;;  %v986_v11 = vrot.slane %v985_v3, 1  ;;  %v1006_v28 = vadd.f32 %v1005_v18, %v1004_v8 }
 0x144   : > { %v980_v5 = vadd.f32 %v979_v61, %v978_v51  ;;  %v993_v17 = vrot.slane %v992_v6, 1  ;;  %v1012_v41 = vrot.slane %v1011_v30, 2  ;;  %v1017_v44 = vrot.slane %v1016_v37, 4 }
 0x145   : > { %4229 = vmatpush3.bf16.msra.mxu0 %v4498_v13  ;;  %v973_v2 = vadd.f32 %v972_v55, %v971_v47  ;;  %v998_v13 = vrot.slane %v997_v4, 2  ;;  %v987_v23 = vadd.f32 %v986_v11, %v985_v3  ;;  %v1007_v40 = vrot.slane %v1006_v28, 1  ;;  %v4531_v47 = vld [vmem:[#allocation13 + $0x70] ss:$8 sps:$4 sm:$0xff]  }
 0x146   : > { %4230 = vmatprep.subr.bf16.mxu0 %v4499_v26  ;;  %1188 = vmatpush1.bf16.msra.mxu1 %v4520_v53  ;;  %v1024_v16 = vmul.f32 0.0625, %v980_v5  ;;  %v994_v27 = vadd.f32 %v993_v17, %v992_v6  ;;  %v1013_v48 = vadd.f32 %v1012_v41, %v1011_v30  ;;  %v1018_v52 = vadd.f32 %v1017_v44, %v1016_v37 }
 0x147   : > { %v1023_v10 = vmul.f32 0.0625, %v973_v2  ;;  %1189 = vmatprep.subr.bf16.mxu1 %v4521_v57  ;;  %v999_v24 = vadd.f32 %v998_v13, %v997_v4  ;;  %v1025_v34 = vmul.f32 0.0625, %v987_v23  ;;  %v1008_v46 = vadd.f32 %v1007_v40, %v1006_v28 }
 0x148   : > { %v1026_v39 = vmul.f32 0.0625, %v994_v27  ;;  %v1014_v55 = vrot.slane %v1013_v48, 1 }
 0x149   : > { %4231 = vmatpush3.bf16.msra.mxu0 %v4499_v26  ;;  %v1031_v22 = vpack.c.bf16 %v1023_v10, %v1023_v10  ;;  %v1032_v26 = vpack.c.bf16 %v1024_v16, %v1024_v16  ;;  %v1000_v35 = vrot.slane %v999_v24, 1  ;;  %v1028_v56 = vmul.f32 0.0625, %v1008_v46 }
 0x14a   : > { %4232 = vmatprep.subr.bf16.mxu0 %v4500_v42  ;;  %1190 = vmatpush1.bf16.msra.mxu1 %v4523_v7  ;;  %v1034_v45 = vpack.c.bf16 %v1026_v39, %v1026_v39  ;;  %v1015_v59 = vadd.f32 %v1014_v55, %v1013_v48 }
 0x14b   : > { %v1075_v31 = vunpack.c.l.b16 %v1031_v22  ;;  %1191 = vmatprep.subr.bf16.mxu1 %v4526_v14  ;;  %v1076_v38 = vunpack.c.l.b16 %v1032_v26  ;;  %v1001_v43 = vadd.f32 %v1000_v35, %v999_v24  ;;  %v1057_v24 = vlaneseq }
 0x14c   : > { %v1078_v54 = vunpack.c.l.b16 %v1034_v45  ;;  %v1029_v63 = vmul.f32 0.0625, %v1015_v59 }
 0x14d   : > { %4233 = vmatpush3.bf16.msra.mxu0 %v4500_v42  ;;  %v1033_v42 = vpack.c.bf16 %v1025_v34, %v1025_v34  ;;  %v1027_v51 = vmul.f32 0.0625, %v1001_v43  ;;  %v1084_v53 = vsel %vm1083_vm0, %v1076_v38, %v1075_v31  ;;  %v1055_v38 = vld [vmem:[%s6300_s5] sm:$0x3] }
 0x14e   : > { %4234 = vmatprep.subr.bf16.mxu0 %v4504_v60  ;;  %1192 = vmatpush1.bf16.msra.mxu1 %v4528_v29  ;;  %v1037_v3 = vpack.c.bf16 %v1029_v63, %v1029_v63 }
 0x14f   : > { %v1077_v49 = vunpack.c.l.b16 %v1033_v42  ;;  %1193 = vmatprep.subr.bf16.mxu1 %v4529_v36  ;;  %v1035_v57 = vpack.c.bf16 %v1027_v51, %v1027_v51 }
 0x150   : > { %v1081_v6 = vunpack.c.l.b16 %v1037_v3 }
 0x151   : > { %4235 = vmatpush3.bf16.msra.mxu0 %v4504_v60  ;;  %v1086_v58 = vsel %vm1085_vm1, %v1077_v49, %v1084_v53  ;;  %v1036_v60 = vpack.c.bf16 %v1028_v56, %v1028_v56  ;;  %v1079_v62 = vunpack.c.l.b16 %v1035_v57 }
 0x152   : > { %1194 = vmatpush1.bf16.msra.mxu1 %v4531_v47 }
 0x153   : > { %v1080_v2 = vunpack.c.l.b16 %v1036_v60 }
 0x154   : > { %4237 = vmatmul.mubr.bf16.vlgmr.msra.gmra.mrb[0].mxu0 %v5619_v12  ;;  %v1019_v12 = vrot.slane %v1018_v52, 2 }
 0x155   : > { %4240 = vmatprep.mubr.bf16.mxu0 %v5623_v20  ;;  %v1088_v20 = vsel %vm1087_vm2, %v1078_v54, %v1086_v58 }
 0x156   : > { %v1020_v61 = vadd.f32 %v1019_v12, %v1018_v52  ;;  %v1090_v4 = vsel %vm1089_vm3, %v1079_v62, %v1088_v20 }
 0x157   : > { %v1092_v8 = vsel %vm1091_vm4, %v1080_v2, %v1090_v4 }
 0x158   : > { %v1021_v0 = vrot.slane %v1020_v61, 1  ;;  %v1094_v10 = vsel %vm1093_vm5, %v1081_v6, %v1092_v8 }
 0x15a   : > { %v1022_v5 = vadd.f32 %v1021_v0, %v1020_v61 }
 0x15c   : > { %4241 = vmatmul.mubr.bf16.gmra.mrb[4].mxu0 %v5625_v21  ;;  %v1030_v7 = vmul.f32 0.0625, %v1022_v5 }
 0x15d   : > { %4244 = vmatprep.mubr.bf16.mxu0 %v5631_v32  ;;  %v4013_v32 = vld [vmem:[%s6299_s4] ss:$0 sm:$0xff] }
 0x15e   : > { %v1038_v9 = vpack.c.bf16 %v1030_v7, %v1030_v7 }
 0x160   : > { %v1082_v11 = vunpack.c.l.b16 %v1038_v9 }
 0x162   : > { %v1096_v13 = vsel %vm1095_vm6, %v1082_v11, %v1094_v10 }
 0x163   : > { %v1097_v21 = vpack.c.b16 %v1096_v13, %v1096_v13 }
 0x164   : > { %4245 = vmatmul.mubr.bf16.gmra.mrb[8].mxu0 %v5633_v33 }
 0x165   : > { %4248 = vmatprep.mubr.bf16.mxu0 %v5639_v50  ;;  %1212 = vmatmul.mubr.bf16.vlgmr.msra.gmra.mrb[0].mxu1 %v1097_v21 }
 0x16c   : > { %4249 = vmatmul.mubr.bf16.gmra.mrb[12].mxu0 %v5643_v1  ;;  %v1058_v1 = vshrl.u32 %v1057_v24, 7 }
 0x16e   : > { %v1059_v36 = vsub.s32 0, %v1058_v1  ;;  %v1063_v39 = vsub.s32 1, %v1058_v1 }
 0x170   : > { %v1060_v42 = vrot.slane %v1055_v38, %v1059_v36  ;;  %v1064_v44 = vrot.slane %v1055_v38, %v1063_v39 }
 0x227   : > { %v4238_v14 = vpop.f32.mrb[0].mxu0 }
 0x228   : > { %v849_v15 = vpop.f32.mrb[1].mxu0  ;;  %v921_v17 = vadd.f32 %v4238_v14, %v4013_v32 }
 0x229   : > { %v4239_v16 = vpop.f32.mrb[2].mxu0  ;;  %v919_v22 = vadd.f32 %v4013_v32, %v849_v15 }
 0x22a   : > { %v922_v18 = vadd.f32 %v4239_v16, %v4013_v32  ;;  %v852_v19 = vpop.f32.mrb[3].mxu0 }
 0x22b   : > { %v920_v23 = vadd.f32 %v4013_v32, %v852_v19 }
 0x22c   : > { %v936_v33 = vpack.c.bf16 %v922_v18, %v921_v17 }
 0x22d   : > { %v935_v50 = vpack.c.bf16 %v920_v23, %v919_v22 }
 0x22e   : > { %944 = vst [vmem:[#allocation4 + $0x8] sm:$0xff] %v936_v33 }
 0x22f   : > { %943 = vst [vmem:[#allocation4] sm:$0xff] %v935_v50  ;;  %v4242_v25 = vpop.f32.mrb[4].mxu0 }
 0x230   : > { %v865_v26 = vpop.f32.mrb[5].mxu0  ;;  %v925_v28 = vadd.f32 %v4242_v25, %v4013_v32 }
 0x231   : > { %v4243_v27 = vpop.f32.mrb[6].mxu0  ;;  %v923_v31 = vadd.f32 %v4013_v32, %v865_v26 }
 0x232   : > { %v926_v29 = vadd.f32 %v4243_v27, %v4013_v32  ;;  %v868_v30 = vpop.f32.mrb[7].mxu0 }
 0x233   : > { %v924_v34 = vadd.f32 %v4013_v32, %v868_v30 }
 0x234   : > { %v938_v35 = vpack.c.bf16 %v926_v29, %v925_v28 }
 0x235   : > { %v937_v37 = vpack.c.bf16 %v924_v34, %v923_v31 }
 0x236   : > { %946 = vst [vmem:[#allocation4 + $0x18] sm:$0xff] %v938_v35 }
 0x237   : > { %945 = vst [vmem:[#allocation4 + $0x10] sm:$0xff] %v937_v37  ;;  %v4246_v40 = vpop.f32.mrb[8].mxu0 }
 0x238   : > { %v881_v41 = vpop.f32.mrb[9].mxu0  ;;  %v929_v45 = vadd.f32 %v4246_v40, %v4013_v32  ;;  %v1213_v51 = vpop.f32.mrb[0].mxu1 }
 0x239   : > { %v4247_v43 = vpop.f32.mrb[10].mxu0  ;;  %v927_v48 = vadd.f32 %v4013_v32, %v881_v41  ;;  %v1214_v53 = vadd.f32 %v1213_v51, %v1060_v42  ;;  %v1215_v54 = vpop.f32.mrb[1].mxu1 }
 0x23a   : > { %v930_v46 = vadd.f32 %v4247_v43, %v4013_v32  ;;  %v884_v47 = vpop.f32.mrb[11].mxu0  ;;  %v1216_v56 = vadd.f32 %v1215_v54, %v1064_v44  ;;  %v1217_v57 = vpop.f32.mrb[2].mxu1 }
 0x23b   : > { %v928_v49 = vadd.f32 %v4013_v32, %v884_v47  ;;  %1220 = vst [vmem:[#allocation2] sm:$0xff] %v1214_v53  ;;  %v1218_v12 = vpop.f32.mrb[3].mxu1 }
 0x23c   : > { %v940_v52 = vpack.c.bf16 %v930_v46, %v929_v45  ;;  %1221 = vst [vmem:[#allocation3] sm:$0xff] %v1216_v56 }
 0x23d   : > { %v939_v55 = vpack.c.bf16 %v928_v49, %v927_v48 }
 0x23e   : > { %948 = vst [vmem:[#allocation4 + $0x28] sm:$0xff] %v940_v52 }
 0x23f   : > { %947 = vst [vmem:[#allocation4 + $0x20] sm:$0xff] %v939_v55  ;;  %v4250_v58 = vpop.f32.mrb[12].mxu0 }
 0x240   : > { %v897_v59 = vpop.f32.mrb[13].mxu0  ;;  %v933_v61 = vadd.f32 %v4250_v58, %v4013_v32 }
 0x241   : > { %v4251_v60 = vpop.f32.mrb[14].mxu0  ;;  %v931_v63 = vadd.f32 %v4013_v32, %v897_v59 }
 0x242   : > { %v934_v62 = vadd.f32 %v4251_v60, %v4013_v32  ;;  %v900_v20 = vpop.f32.mrb[15].mxu0 }
 0x243   : > { %v932_v0 = vadd.f32 %v4013_v32, %v900_v20 }
 0x244   : > { %v942_v2 = vpack.c.bf16 %v934_v62, %v933_v61 }
 0x245   : > { %v941_v3 = vpack.c.bf16 %v932_v0, %v931_v63 }
 0x246   : > { %950 = vst [vmem:[#allocation4 + $0x38] sm:$0xff] %v942_v2 }
 0x247   : > { %949 = vst [vmem:[#allocation4 + $0x30] sm:$0xff] %v941_v3 }
 0x248 PF: > { %v4544_v4 = vld [vmem:[#allocation15 + $0x4] ss:$24 sps:$4 sm:$0xff]   ;;  %v4546_v5 = vld [vmem:[#allocation15] ss:$24 sps:$4 sm:$0xff]   ;;  %v5192_v6 = vmov 0   ;;  %v1222_v22 = vld [vmem:[#allocation2] sm:$0xff]  ;;  %v1308_v33 = vlaneseq }
 0x249   : > { %1610 = vmatprep.mubr.bf16.mxu0 %v5192_v6  ;;  %4543 = vset.pattern.permute.xlu0 %v5192_v6  ;;  %v4547_v7 = vld [vmem:[#allocation15 + $0x34] ss:$24 sps:$4 sm:$0xff]   ;;  %v4549_v8 = vld [vmem:[#allocation15 + $0x30] ss:$24 sps:$4 sm:$0xff]   ;;  %v4550_v9 = vld [vmem:[#allocation15 + $0x64] ss:$24 sps:$4 sm:$0xff]   ;;  %v5665_v23 = vpack.c.bf16 %v1222_v22, %v1222_v22 }
 0x24a   : > { %1578 = vmatprep.subr.bf16.mxu0 %v4544_v4  ;;  %4542 = vset.pattern.permute.xlu1 %v5192_v6  ;;  %v4552_v10 = vld [vmem:[#allocation15 + $0x60] ss:$24 sps:$4 sm:$0xff]   ;;  %v4553_v11 = vld [vmem:[#allocation15 + $0x94] ss:$24 sps:$4 sm:$0xff]   ;;  %v4555_v13 = vld [vmem:[#allocation15 + $0x90] ss:$24 sps:$4 sm:$0xff]  }
 0x24b   : > { %1579 = vmatpush1.bf16.msra.mxu0 %v4546_v5  ;;  %1651 = vmatprep.mubr.bf16.mxu1 %v5192_v6  ;;  %v4556_v21 = vld [vmem:[#allocation15 + $0xc4] ss:$24 sps:$4 sm:$0xff]   ;;  %v4558_v14 = vld [vmem:[#allocation15 + $0xc0] ss:$24 sps:$4 sm:$0xff]   ;;  %v4559_v32 = vld [vmem:[#allocation15 + $0xf4] ss:$24 sps:$4 sm:$0xff]  }
 0x24c   : > { %1580 = vmatprep.subr.bf16.mxu0 %v4547_v7  ;;  %v4561_v15 = vld [vmem:[#allocation15 + $0xf0] ss:$24 sps:$4 sm:$0xff]   ;;  %v4562_v16 = vld [vmem:[#allocation15 + $0x124] ss:$24 sps:$4 sm:$0xff]   ;;  %v4564_v17 = vld [vmem:[#allocation15 + $0x120] ss:$24 sps:$4 sm:$0xff]  }
 0x24d   : > { %v4565_v18 = vld [vmem:[#allocation15 + $0x154] ss:$24 sps:$4 sm:$0xff]   ;;  %v4567_v19 = vld [vmem:[#allocation15 + $0x150] ss:$24 sps:$4 sm:$0xff]   ;;  %v5670_v24 = vshrl.u32 %v1308_v33, 7  ;;  %s6301_s25 = sld [smem:[#allocation43_spill]] }
 0x24e   : > { %v5193_v50 = vmov 1966171168   ;;  %v1701_v35 = vld [vmem:[#allocation4] sm:$0xff]  ;;  %v1702_v44 = vld [vmem:[#allocation4 + $0x8] sm:$0xff]  ;;  %v1703_v46 = vld [vmem:[#allocation4 + $0x10] sm:$0xff]  ;;  %s6302_s24 = sld [smem:[#allocation40_spill]] }
 0x24f   : > { %1581 = vmatpush1.bf16.msra.mxu0 %v4549_v8  ;;  %v1728_v25 = vunpack.c.l.s4 %v5193_v50  ;;  %v5673_v26 = vsub.s32 0, %v5670_v24  ;;  %v1709_v40 = vunpack.c.l.bf16 %v1701_v35  ;;  %v1710_v45 = vunpack.c.h.bf16 %v1701_v35  ;;  %v1705_v54 = vld [vmem:[#allocation4 + $0x20] sm:$0xff]  ;;  %v1704_v3 = vld [vmem:[#allocation4 + $0x18] sm:$0xff]  ;;  %s6303_s21 = sld [smem:[#allocation33_spill]]  ;;  %s6304_s4 = sld [smem:[#allocation37_spill]] }
 0x250   : > { %1582 = vmatprep.subr.bf16.mxu0 %v4550_v9  ;;  %v1711_v51 = vunpack.c.l.bf16 %v1702_v44  ;;  %v1712_v53 = vunpack.c.h.bf16 %v1702_v44  ;;  %v1713_v57 = vunpack.c.l.bf16 %v1703_v46  ;;  %v1714_v61 = vunpack.c.h.bf16 %v1703_v46  ;;  %v1708_v46 = vld [vmem:[#allocation4 + $0x38] sm:$0xff]  ;;  %s6305_s3 = sld [smem:[#allocation45_spill]] }
 0x251   : > { %v1729_v27 = vunpack.c.0.s8 %v1728_v25  ;;  %v1717_v62 = vunpack.c.l.bf16 %v1705_v54  ;;  %v1716_v22 = vunpack.c.h.bf16 %v1704_v3  ;;  %vm1929_vm7 = vcmask 130112  }
 0x252   : > { %vm1994_vm8 = vcmask 1041409   ;;  %vm1996_vm9 = vcmask 1042434   ;;  %vm1998_vm10 = vcmask 1043459   ;;  %vm2000_vm11 = vcmask 1044484  }
 0x253   : > { %1583 = vmatpush1.bf16.msra.mxu0 %v4552_v10  ;;  %v1306_v1 = vld [vmem:[%s6301_s25] sm:$0x3f]  ;;  %v1732_v29 = vsub.s32 %v1729_v27, %v5670_v24  ;;  %v1718_v10 = vunpack.c.h.bf16 %v1705_v54  ;;  %vm2002_vm12 = vcmask 1045509   ;;  %vm2004_vm13 = vcmask 1046534  }
 0x254   : > { %1584 = vmatprep.subr.bf16.mxu0 %v4553_v11  ;;  %v1311_v28 = vrot.slane %v1306_v1, %v5673_v26  ;;  %v5687_v58 = vld [vmem:[%s6302_s24] ss:$0 sm:$0xff]  ;;  %v1715_v11 = vunpack.c.l.bf16 %v1704_v3  ;;  %vm2006_vm14 = vcmask 1047559   ;;  %vm2009_vm15 = vcmask 130048  }
 0x255   : > { %vm5195_vm0 = vmmov 0  }
 0x257   : > { %1585 = vmatpush1.bf16.msra.mxu0 %v4555_v13 }
 0x258   : > { %1586 = vmatprep.subr.bf16.mxu0 %v4556_v21 }
 0x25b   : > { %1587 = vmatpush1.bf16.msra.mxu0 %v4558_v14 }
 0x25c   : > { %1588 = vmatprep.subr.bf16.mxu0 %v4559_v32 }
 0x25f   : > { %1589 = vmatpush1.bf16.msra.mxu0 %v4561_v15  ;;  %v1706_v15 = vld [vmem:[#allocation4 + $0x28] sm:$0xff] }
 0x260   : > { %1590 = vmatprep.subr.bf16.mxu0 %v4562_v16  ;;  %v1719_v50 = vunpack.c.l.bf16 %v1706_v15 }
 0x263   : > { %1591 = vmatpush1.bf16.msra.mxu0 %v4564_v17 }
 0x264   : > { %1592 = vmatprep.subr.bf16.mxu0 %v4565_v18 }
 0x267   : > { %1593 = vmatpush1.bf16.msra.mxu0 %v4567_v19 }
 0x26a   : > { %1611 = vmatmul.mubr.bf16.vlgmr.msra.gmra.mrb[0].mxu0 %v5665_v23 }
 0x26b   : > { %1692 = vmatprep.mubr.bf16.mxu0 %v5192_v6 }
 0x33d   : > { %v1612_v30 = vpop.f32.mrb[0].mxu0 }
 0x33e   : > { %v1613_v31 = vadd.f32 %v1612_v30, %v1311_v28  ;;  %v5680_v34 = vpop.f32.mrb[1].mxu0  ;;  %v1707_v30 = vld [vmem:[#allocation4 + $0x30] sm:$0xff] }
 0x33f   : > { %v1616_v36 = vpop.f32.mrb[2].mxu0 }
 0x340   : > { %v1726_v37 = vcombine.high %v1613_v31, %v1613_v31  ;;  %v1733_v38 = vrot.slane %v1613_v31, %v1732_v29  ;;  %v1617_v39 = vpop.f32.mrb[3].mxu0 }
 0x342   : > { %v1740_v41 = vrot.slane %v1726_v37, %v1732_v29  ;;  %v1741_v42 = vcombine.high %v1733_v38, %v1733_v38  ;;  %v1749_v43 = vrot.slane %v1733_v38, %v1732_v29  ;;  %v1720_v38 = vunpack.c.h.bf16 %v1706_v15 }
 0x344   : > { %v1771_v47 = vcombine.high %v1749_v43, %v1749_v43  ;;  %v1778_v48 = vrot.slane %v1749_v43, %v5673_v26  ;;  %v1756_v49 = vrot.slane %v1740_v41, %v1732_v29  ;;  %v1763_v52 = vrot.slane %v1741_v42, %v1732_v29 }
 0x345   : > { %v1742_v20 = vcombine.high %v1740_v41, %v1740_v41 }
 0x346   : > { %v1815_v55 = vadd.f32 %v1778_v48, %v1709_v40  ;;  %v1816_v56 = vadd.f32 %v1778_v48, %v1710_v45  ;;  %v1786_v12 = vrot.slane %v1771_v47, %v5673_v26  ;;  %v1782_v59 = vrot.slane %v1763_v52, %v5673_v26 }
 0x347   : > { %v1794_v2 = vrot.slane %v1756_v49, %v5673_v26  ;;  %v1773_v8 = vcombine.high %v1763_v52, %v1763_v52  ;;  %v1770_v19 = vrot.slane %v1742_v20, %v1732_v29  ;;  %v1772_v37 = vcombine.high %v1756_v49, %v1756_v49 }
 0x348   : > { %v1831_v60 = vmax.f32 %v1815_v55, 0.0  ;;  %v1817_v63 = vadd.f32 %v1782_v59, %v1711_v51  ;;  %v1818_v0 = vadd.f32 %v1782_v59, %v1712_v53  ;;  %v1832_v5 = vmax.f32 %v1816_v56, 0.0 }
 0x349   : > { %v1819_v7 = vadd.f32 %v1786_v12, %v1713_v57  ;;  %v1820_v14 = vadd.f32 %v1786_v12, %v1714_v61  ;;  %v1823_v32 = vadd.f32 %v1794_v2, %v1717_v62  ;;  %v1790_v18 = vrot.slane %v1773_v8, %v5673_v26 }
 0x34a   : > { %v1854_v4 = vmul.f32 %v5687_v58, %v1831_v60  ;;  %v1833_v9 = vmax.f32 %v1817_v63, 0.0  ;;  %v1834_v21 = vmax.f32 %v1818_v0, 0.0  ;;  %v1855_v16 = vmul.f32 %v5687_v58, %v1832_v5 }
 0x34b   : > { %v1835_v17 = vmax.f32 %v1819_v7, 0.0  ;;  %v1836_v1 = vmax.f32 %v1820_v14, 0.0  ;;  %v1839_v27 = vmax.f32 %v1823_v32, 0.0  ;;  %v1824_v28 = vadd.f32 %v1794_v2, %v1718_v10 }
 0x34c   : > { %1870 = vadd.xlane.f32.xlu0 %v1854_v4  ;;  %v1856_v13 = vmul.f32 %v5687_v58, %v1833_v9  ;;  %v1857_v25 = vmul.f32 %v5687_v58, %v1834_v21  ;;  %v1821_v35 = vadd.f32 %v1790_v18, %v1715_v11  ;;  %v1798_v36 = vrot.slane %v1770_v19, %v5673_v26 }
 0x34d   : > { %v1858_v31 = vmul.f32 %v5687_v58, %v1835_v17  ;;  %v1721_v29 = vunpack.c.l.bf16 %v1707_v30  ;;  %v1859_v39 = vmul.f32 %v5687_v58, %v1836_v1  ;;  %v1862_v40 = vmul.f32 %v5687_v58, %v1839_v27 }
 0x34e   : > { %1874 = vadd.xlane.f32.xlu1 %v1856_v13  ;;  %v1840_v41 = vmax.f32 %v1824_v28, 0.0  ;;  %v1822_v42 = vadd.f32 %v1790_v18, %v1716_v22  ;;  %v1837_v43 = vmax.f32 %v1821_v35, 0.0  ;;  %v1825_v44 = vadd.f32 %v1798_v36, %v1719_v50 }
 0x34f   : > { %v1802_v45 = vrot.slane %v1772_v37, %v5673_v26  ;;  %v1774_v47 = vcombine.high %v1770_v19, %v1770_v19  ;;  %v1722_v48 = vunpack.c.h.bf16 %v1707_v30  ;;  %v1826_v52 = vadd.f32 %v1798_v36, %v1720_v38 }
 0x350   : > { %1872 = vadd.xlane.f32.xlu0 %v1855_v16  ;;  %v1863_v49 = vmul.f32 %v5687_v58, %v1840_v41  ;;  %v1838_v51 = vmax.f32 %v1822_v42, 0.0  ;;  %v1723_v53 = vunpack.c.l.bf16 %v1708_v46  ;;  %v1860_v54 = vmul.f32 %v5687_v58, %v1837_v43 }
 0x351   : > { %v1841_v55 = vmax.f32 %v1825_v44, 0.0  ;;  %v1827_v56 = vadd.f32 %v1802_v45, %v1721_v29  ;;  %v1806_v57 = vrot.slane %v1774_v47, %v5673_v26  ;;  %v1842_v59 = vmax.f32 %v1826_v52, 0.0 }
 0x352   : > { %1876 = vadd.xlane.f32.xlu1 %v1857_v25  ;;  %v1861_v12 = vmul.f32 %v5687_v58, %v1838_v51  ;;  %v1828_v60 = vadd.f32 %v1802_v45, %v1722_v48  ;;  %v1724_v61 = vunpack.c.h.bf16 %v1708_v46  ;;  %v1919_v16 = vand.u32 127, %v1308_v33 }
 0x353   : > { %v1864_v62 = vmul.f32 %v5687_v58, %v1841_v55  ;;  %v1843_v20 = vmax.f32 %v1827_v56, 0.0  ;;  %v1829_v63 = vadd.f32 %v1806_v57, %v1723_v53  ;;  %v1865_v0 = vmul.f32 %v5687_v58, %v1842_v59 }
 0x354   : > { %1878 = vadd.xlane.f32.xlu0 %v1858_v31  ;;  %v1844_v2 = vmax.f32 %v1828_v60, 0.0  ;;  %v1830_v3 = vadd.f32 %v1806_v57, %v1724_v61  ;;  %v1924_v18 = vadd.s32 4294967288, %v1919_v16  ;;  %v5736_v25 = vsub.s32 %v1919_v16, %v5670_v24 }
 0x355   : > { %v1866_v4 = vmul.f32 %v5687_v58, %v1843_v20  ;;  %v1845_v5 = vmax.f32 %v1829_v63, 0.0  ;;  %v5809_v16 = vsub.s32 2, %v5670_v24 }
 0x356   : > { %1880 = vadd.xlane.f32.xlu1 %v1859_v39  ;;  %v1867_v7 = vmul.f32 %v5687_v58, %v1844_v2  ;;  %v1846_v8 = vmax.f32 %v1830_v3, 0.0  ;;  %v5731_v22 = vsub.s32 %v1924_v18, %v5670_v24  ;;  %v5799_v3 = vsub.s32 1, %v5670_v24 }
 0x357   : > { %v1868_v9 = vmul.f32 %v5687_v58, %v1845_v5 }
 0x358   : > { %1886 = vadd.xlane.f32.xlu0 %v1862_v40  ;;  %v1869_v10 = vmul.f32 %v5687_v58, %v1846_v8  ;;  %v5804_v8 = vsub.s32 5, %v5670_v24 }
 0x35a   : > { %1888 = vadd.xlane.f32.xlu1 %v1863_v49 }
 0x35c   : > { %1882 = vadd.xlane.f32.xlu0 %v1860_v54 }
 0x35e   : > { %1884 = vadd.xlane.f32.xlu1 %v1861_v12 }
 0x360   : > { %1890 = vadd.xlane.f32.xlu0 %v1864_v62 }
 0x362   : > { %1892 = vadd.xlane.f32.xlu1 %v1865_v0 }
 0x364   : > { %1894 = vadd.xlane.f32.xlu0 %v1866_v4 }
 0x366   : > { %1896 = vadd.xlane.f32.xlu1 %v1867_v7 }
 0x368   : > { %1898 = vadd.xlane.f32.xlu0 %v1868_v9 }
 0x36a   : > { %1900 = vadd.xlane.f32.xlu1 %v1869_v10 }
 0x3d9   : > { %v5711_v11 = vpop.xlane.xlu0 %1870 }
 0x3da   : > { %v1923_v37 = vrot.slane %v5711_v11, %v5736_v25 }
 0x3db   : > { %v5713_v13 = vpop.xlane.xlu1 %1874 }
 0x3dc   : > { %v1934_v28 = vrot.slane %v5713_v13, %v5736_v25 }
 0x3dd   : > { %v5715_v21 = vpop.xlane.xlu0 %1872 }
 0x3de   : > { %v1928_v30 = vrot.slane %v5715_v21, %v5731_v22 }
 0x3df   : > { %v5717_v14 = vpop.xlane.xlu1 %1876 }
 0x3e0   : > { %v1938_v1 = vrot.slane %v5717_v14, %v5731_v22  ;;  %v1930_v41 = vsel %vm1929_vm7, %v1928_v30, %v1923_v37 }
 0x3e1   : > { %v5719_v32 = vpop.xlane.xlu0 %1878 }
 0x3e2   : > { %v1943_v35 = vrot.slane %v5719_v32, %v5736_v25  ;;  %v1939_v38 = vsel %vm1929_vm7, %v1938_v1, %v1934_v28  ;;  %v2040_v1 = vsub.s32 6, %v5670_v24 }
 0x3e3   : > { %v5721_v15 = vpop.xlane.xlu1 %1880  ;;  %v1995_v44 = vsel %vm1994_vm8, %v1939_v38, %v1930_v41  ;;  %v5826_v38 = vsub.s32 3, %v5670_v24 }
 0x3e4   : > { %v1947_v33 = vrot.slane %v5721_v15, %v5731_v22 }
 0x3e5   : > { %v5724_v17 = vpop.xlane.xlu0 %1886 }
 0x3e6   : > { %v1948_v40 = vsel %vm1929_vm7, %v1947_v33, %v1943_v35  ;;  %v1961_v51 = vrot.slane %v5724_v17, %v5736_v25 }
 0x3e7   : > { %v5726_v19 = vpop.xlane.xlu1 %1888  ;;  %v1997_v47 = vsel %vm1996_vm9, %v1948_v40, %v1995_v44 }
 0x3e8   : > { %v1965_v45 = vrot.slane %v5726_v19, %v5731_v22 }
 0x3e9   : > { %v5728_v58 = vpop.xlane.xlu0 %1882 }
 0x3ea   : > { %v1952_v29 = vrot.slane %v5728_v58, %v5736_v25  ;;  %v1966_v56 = vsel %vm1929_vm7, %v1965_v45, %v1961_v51 }
 0x3eb   : > { %v5733_v50 = vpop.xlane.xlu1 %1884 }
 0x3ec   : > { %v1956_v31 = vrot.slane %v5733_v50, %v5731_v22 }
 0x3ed   : > { %v5740_v27 = vpop.xlane.xlu0 %1890 }
 0x3ee   : > { %v1957_v42 = vsel %vm1929_vm7, %v1956_v31, %v1952_v29  ;;  %v1970_v48 = vrot.slane %v5740_v27, %v5736_v25 }
 0x3ef   : > { %v5752_v36 = vpop.xlane.xlu1 %1892  ;;  %v1999_v52 = vsel %vm1998_vm10, %v1957_v42, %v1997_v47 }
 0x3f0   : > { %v1974_v43 = vrot.slane %v5752_v36, %v5731_v22  ;;  %v2001_v61 = vsel %vm2000_vm11, %v1966_v56, %v1999_v52 }
 0x3f1   : > { %v5759_v39 = vpop.xlane.xlu0 %1894 }
 0x3f2   : > { %v1979_v53 = vrot.slane %v5759_v39, %v5736_v25  ;;  %v1975_v55 = vsel %vm1929_vm7, %v1974_v43, %v1970_v48 }
 0x3f3   : > { %v5769_v46 = vpop.xlane.xlu1 %1896  ;;  %v2003_v62 = vsel %vm2002_vm12, %v1975_v55, %v2001_v61 }
 0x3f4   : > { %v1983_v49 = vrot.slane %v5769_v46, %v5731_v22 }
 0x3f5   : > { %v5781_v54 = vpop.xlane.xlu0 %1898 }
 0x3f6   : > { %v1984_v12 = vsel %vm1929_vm7, %v1983_v49, %v1979_v53  ;;  %v1988_v59 = vrot.slane %v5781_v54, %v5736_v25  ;;  %v5842_v49 = vsub.s32 4, %v5670_v24 }
 0x3f7   : > { %v5785_v57 = vpop.xlane.xlu1 %1900  ;;  %v2005_v63 = vsel %vm2004_vm13, %v1984_v12, %v2003_v62 }
 0x3f8   : > { %v1992_v60 = vrot.slane %v5785_v57, %v5731_v22 }
 0x3fa   : > { %v1993_v20 = vsel %vm1929_vm7, %v1992_v60, %v1988_v59 }
 0x3fb   : > { %v2007_v0 = vsel %vm2006_vm14, %v1993_v20, %v2005_v63 }
 0x3fc   : > { %v2010_v2 = vsel %vm2009_vm15, %v2007_v0, -inf }
 0x3fd   : > { %2011 = vmax.xlane.f32.xlu0 %v2010_v2 }
 0x48a   : > { %v2012_v4 = vpop.xlane.xlu0 %2011 }
 0x48b   : > { %v2017_v5 = vrot.slane %v2012_v4, %v5673_v26  ;;  %v2021_v7 = vrot.slane %v2012_v4, %v5799_v3  ;;  %v5814_v33 = vrot.slane %v2012_v4, %v5804_v8  ;;  %v2025_v31 = vrot.slane %v2012_v4, %v5809_v16 }
 0x48c   : > { %v5821_v37 = vrot.slane %v2012_v4, %v2040_v1  ;;  %v2029_v43 = vrot.slane %v2012_v4, %v5826_v38  ;;  %v2033_v53 = vrot.slane %v2012_v4, %v5842_v49 }
 0x48d   : > { %v2054_v9 = vsub.f32 %v5711_v11, %v2017_v5  ;;  %v2055_v10 = vsub.f32 %v5715_v21, %v2017_v5  ;;  %v2056_v18 = vsub.f32 %v5713_v13, %v2021_v7  ;;  %v2057_v35 = vsub.f32 %v5717_v14, %v2021_v7 }
 0x48e   : > { %v2044_v21 = vsub.s32 7, %v5670_v24  ;;  %v2064_v13 = vsub.f32 %v5740_v27, %v5814_v33  ;;  %v2058_v29 = vsub.f32 %v5719_v32, %v2025_v31  ;;  %v2066_v41 = vsub.f32 %v5759_v39, %v5821_v37 }
 0x48f   : > { %v2070_v28 = vmul.f32 1.442695, %v2054_v9  ;;  %v2072_v30 = vmul.f32 1.442695, %v2055_v10  ;;  %v2074_v11 = vmul.f32 1.442695, %v2056_v18  ;;  %v2059_v44 = vsub.f32 %v5721_v15, %v2025_v31 }
 0x490   : > { %v2076_v40 = vmul.f32 1.442695, %v2057_v35  ;;  %v2045_v14 = vrot.slane %v2012_v4, %v2044_v21  ;;  %v2090_v42 = vmul.f32 1.442695, %v2064_v13  ;;  %v2078_v27 = vmul.f32 1.442695, %v2058_v29 }
 0x491   : > { %4728 = vpow2.f32 %v2070_v28  ;;  %v2094_v32 = vmul.f32 1.442695, %v2066_v41  ;;  %v2060_v39 = vsub.f32 %v5728_v58, %v2029_v43  ;;  %v2080_v51 = vmul.f32 1.442695, %v2059_v44 }
 0x492   : > { %4730 = vpow2.f32 %v2072_v30  ;;  %v2068_v47 = vsub.f32 %v5781_v54, %v2045_v14  ;;  %v2061_v54 = vsub.f32 %v5733_v50, %v2029_v43  ;;  %v2062_v12 = vsub.f32 %v5724_v17, %v2033_v53 }
 0x493   : > { %4732 = vpow2.f32 %v2074_v11  ;;  %v2082_v55 = vmul.f32 1.442695, %v2060_v39  ;;  %v2063_v61 = vsub.f32 %v5726_v19, %v2033_v53  ;;  %v2065_v63 = vsub.f32 %v5752_v36, %v5814_v33 }
 0x494   : > { %4734 = vpow2.f32 %v2076_v40  ;;  %v2098_v52 = vmul.f32 1.442695, %v2068_v47  ;;  %v2084_v59 = vmul.f32 1.442695, %v2061_v54  ;;  %v2086_v62 = vmul.f32 1.442695, %v2062_v12 }
 0x495   : > { %4736 = vpow2.f32 %v2090_v42  ;;  %v2088_v0 = vmul.f32 1.442695, %v2063_v61  ;;  %v2067_v19 = vsub.f32 %v5769_v46, %v5821_v37  ;;  %v2092_v4 = vmul.f32 1.442695, %v2065_v63 }
 0x496   : > { %4738 = vpow2.f32 %v2078_v27  ;;  %v2069_v7 = vsub.f32 %v5785_v57, %v2045_v14 }
 0x497   : > { %4740 = vpow2.f32 %v2094_v32  ;;  %v2096_v36 = vmul.f32 1.442695, %v2067_v19 }
 0x498   : > { %4742 = vpow2.f32 %v2080_v51  ;;  %v2100_v10 = vmul.f32 1.442695, %v2069_v7 }
 0x499   : > { %4744 = vpow2.f32 %v2098_v52 }
 0x49a   : > { %4746 = vpow2.f32 %v2082_v55 }
 0x49b   : > { %v5835_v45 = vpop.eup %4728  ;;  %4748 = vpow2.f32 %v2084_v59 }
 0x49c   : > { %v5838_v48 = vpop.eup %4730  ;;  %2119 = vperm.xlu1 %4542, %v5835_v45   ;;  %4750 = vpow2.f32 %v2086_v62 }
 0x49d   : > { %2122 = vperm.xlu0 %4543, %v5838_v48   ;;  %v5846_v15 = vpop.eup %4732  ;;  %4752 = vpow2.f32 %v2088_v0 }
 0x49e   : > { %v5851_v56 = vpop.eup %4734  ;;  %4754 = vpow2.f32 %v2092_v4 }
 0x49f   : > { %v5854_v58 = vpop.eup %4736  ;;  %4756 = vpow2.f32 %v2096_v36 }
 0x4a0   : > { %2125 = vperm.xlu1 %4542, %v5846_v15   ;;  %v5858_v60 = vpop.eup %4738  ;;  %4758 = vpow2.f32 %v2100_v10 }
 0x4a1   : > { %2149 = vperm.xlu0 %4543, %v5854_v58   ;;  %v5861_v50 = vpop.eup %4740 }
 0x4a2   : > { %v5865_v20 = vpop.eup %4742 }
 0x4a3   : > { %v5868_v17 = vpop.eup %4744 }
 0x4a4   : > { %2128 = vperm.xlu1 %4542, %v5851_v56   ;;  %v5873_v2 = vpop.eup %4746 }
 0x4a5   : > { %2155 = vperm.xlu0 %4543, %v5861_v50   ;;  %v5878_v5 = vpop.eup %4748 }
 0x4a6   : > { %v5882_v9 = vpop.eup %4750 }
 0x4a7   : > { %v5885_v18 = vpop.eup %4752 }
 0x4a8   : > { %2131 = vperm.xlu1 %4542, %v5858_v60   ;;  %v5888_v46 = vpop.eup %4754 }
 0x4a9   : > { %2161 = vperm.xlu0 %4543, %v5868_v17   ;;  %v5891_v33 = vpop.eup %4756 }
 0x4aa   : > { %v5894_v57 = vpop.eup %4758 }
 0x4ac   : > { %2134 = vperm.xlu1 %4542, %v5865_v20  }
 0x4b0   : > { %2137 = vperm.xlu1 %4542, %v5873_v2  }
 0x4b4   : > { %2140 = vperm.xlu1 %4542, %v5878_v5  }
 0x4b8   : > { %2143 = vperm.xlu1 %4542, %v5882_v9  }
 0x4bc   : > { %2146 = vperm.xlu1 %4542, %v5885_v18  }
 0x4c0   : > { %2152 = vperm.xlu1 %4542, %v5888_v46  }
 0x4c4   : > { %2158 = vperm.xlu1 %4542, %v5891_v33  }
 0x4c8   : > { %2164 = vperm.xlu1 %4542, %v5894_v57  }
 0x51b   : > { %v2120_v28 = vpop.permute.xlu1 %2119 }
 0x51c   : > { %v2123_v13 = vpop.permute.xlu0 %2122  ;;  %v2169_v32 = vrot.slane %v2120_v28, %v5736_v25 }
 0x51d   : > { %v2173_v47 = vrot.slane %v2123_v13, %v5731_v22 }
 0x51f   : > { %v2126_v30 = vpop.permute.xlu1 %2125  ;;  %v2174_v63 = vsel %vm1929_vm7, %v2173_v47, %v2169_v32  ;;  %v4570_v47 = vld [vmem:[#allocation15 + $0x8] ss:$24 sps:$4 sm:$0xff]   ;;  %v4571_v32 = vld [vmem:[#allocation15 + $0x3c] ss:$24 sps:$4 sm:$0xff]  }
 0x520   : > { %v2150_v14 = vpop.permute.xlu0 %2149  ;;  %v2178_v39 = vrot.slane %v2126_v30, %v5736_v25 }
 0x521   : > { %v2214_v0 = vrot.slane %v2150_v14, %v5736_v25 }
 0x523   : > { %v2129_v31 = vpop.permute.xlu1 %2128 }
 0x524   : > { %v2182_v42 = vrot.slane %v2129_v31, %v5731_v22  ;;  %v2156_v43 = vpop.permute.xlu0 %2155 }
 0x525   : > { %v2223_v7 = vrot.slane %v2156_v43, %v5736_v25 }
 0x526   : > { %v2183_v54 = vsel %vm1929_vm7, %v2182_v42, %v2178_v39  ;;  %v4573_v39 = vld [vmem:[#allocation15 + $0x38] ss:$24 sps:$4 sm:$0xff]  }
 0x527   : > { %v2132_v35 = vpop.permute.xlu1 %2131  ;;  %v2238_v36 = vsel %vm1994_vm8, %v2183_v54, %v2174_v63  ;;  %v4579_v54 = vld [vmem:[#allocation15 + $0x98] ss:$24 sps:$4 sm:$0xff]  }
 0x528   : > { %v2187_v52 = vrot.slane %v2132_v35, %v5736_v25  ;;  %v2162_v10 = vpop.permute.xlu0 %2161 }
 0x529   : > { %v2232_v13 = vrot.slane %v2162_v10, %v5736_v25 }
 0x52b   : > { %v2135_v11 = vpop.permute.xlu1 %2134 }
 0x52c   : > { %v2191_v44 = vrot.slane %v2135_v11, %v5731_v22 }
 0x52e   : > { %v2192_v59 = vsel %vm1929_vm7, %v2191_v44, %v2187_v52  ;;  %v4576_v52 = vld [vmem:[#allocation15 + $0x68] ss:$24 sps:$4 sm:$0xff]  }
 0x52f   : > { %v2138_v37 = vpop.permute.xlu1 %2137  ;;  %v2239_v30 = vsel %vm1996_vm9, %v2192_v59, %v2238_v36  ;;  %v4583_v59 = vld [vmem:[#allocation15 + $0xfc] ss:$24 sps:$4 sm:$0xff]  }
 0x530   : > { %v2196_v55 = vrot.slane %v2138_v37, %v5736_v25  ;;  %v4589_v36 = vld [vmem:[#allocation15 + $0x15c] ss:$24 sps:$4 sm:$0xff]  }
 0x533   : > { %v2141_v29 = vpop.permute.xlu1 %2140 }
 0x534   : > { %v2200_v51 = vrot.slane %v2141_v29, %v5731_v22 }
 0x536   : > { %v2201_v19 = vsel %vm1929_vm7, %v2200_v51, %v2196_v55  ;;  %v4574_v51 = vld [vmem:[#allocation15 + $0x6c] ss:$24 sps:$4 sm:$0xff]  }
 0x537   : > { %v2144_v40 = vpop.permute.xlu1 %2143  ;;  %v2240_v35 = vsel %vm1998_vm10, %v2201_v19, %v2239_v30  ;;  %v4580_v55 = vld [vmem:[#allocation15 + $0xcc] ss:$24 sps:$4 sm:$0xff]  }
 0x538   : > { %v2205_v61 = vrot.slane %v2144_v40, %v5736_v25 }
 0x53b   : > { %v2147_v41 = vpop.permute.xlu1 %2146 }
 0x53c   : > { %v2209_v53 = vrot.slane %v2147_v41, %v5731_v22 }
 0x53e   : > { %v2210_v28 = vsel %vm1929_vm7, %v2209_v53, %v2205_v61  ;;  %v4577_v53 = vld [vmem:[#allocation15 + $0x9c] ss:$24 sps:$4 sm:$0xff]   ;;  %v4585_v61 = vld [vmem:[#allocation15 + $0xf8] ss:$24 sps:$4 sm:$0xff]  }
 0x53f   : > { %v2153_v27 = vpop.permute.xlu1 %2152  ;;  %v2241_v29 = vsel %vm2000_vm11, %v2210_v28, %v2240_v35  ;;  %v4591_v28 = vld [vmem:[#allocation15 + $0x158] ss:$24 sps:$4 sm:$0xff]  }
 0x540   : > { %v2218_v12 = vrot.slane %v2153_v27, %v5731_v22  ;;  %v4568_v27 = vld [vmem:[#allocation15 + $0xc] ss:$24 sps:$4 sm:$0xff]  }
 0x541   : > { %1619 = vmatprep.subr.bf16.mxu1 %v4568_v27 }
 0x542   : > { %v2219_v31 = vsel %vm1929_vm7, %v2218_v12, %v2214_v0  ;;  %1620 = vmatpush1.bf16.msra.mxu1 %v4570_v47  ;;  %v4582_v12 = vld [vmem:[#allocation15 + $0xc8] ss:$24 sps:$4 sm:$0xff]  }
 0x543   : > { %v2159_v62 = vpop.permute.xlu1 %2158  ;;  %v2242_v14 = vsel %vm2002_vm12, %v2219_v31, %v2241_v29  ;;  %1621 = vmatprep.subr.bf16.mxu1 %v4571_v32  ;;  %v4588_v0 = vld [vmem:[#allocation15 + $0x128] ss:$24 sps:$4 sm:$0xff]  }
 0x544   : > { %v2227_v4 = vrot.slane %v2159_v62, %v5731_v22  ;;  %v4586_v62 = vld [vmem:[#allocation15 + $0x12c] ss:$24 sps:$4 sm:$0xff]  }
 0x546   : > { %v2228_v11 = vsel %vm1929_vm7, %v2227_v4, %v2223_v7  ;;  %1622 = vmatpush1.bf16.msra.mxu1 %v4573_v39  ;;  %v5194_v39 = vmov 0.0  }
 0x547   : > { %v2165_v37 = vpop.permute.xlu1 %2164  ;;  %v2243_v42 = vsel %vm2004_vm13, %v2228_v11, %v2242_v14  ;;  %1623 = vmatprep.subr.bf16.mxu1 %v4574_v51 }
 0x548   : > { %v2236_v40 = vrot.slane %v2165_v37, %v5731_v22 }
 0x54a   : > { %v2237_v41 = vsel %vm1929_vm7, %v2236_v40, %v2232_v13  ;;  %1624 = vmatpush1.bf16.msra.mxu1 %v4576_v52 }
 0x54b   : > { %v2244_v43 = vsel %vm2006_vm14, %v2237_v41, %v2243_v42  ;;  %1625 = vmatprep.subr.bf16.mxu1 %v4577_v53 }
 0x54c   : > { %v2246_v44 = vsel %vm2009_vm15, %v2244_v43, 0.0 }
 0x54d   : > { %2247 = vadd.xlane.f32.xlu0 %v2246_v44 }
 0x54e   : > { %1626 = vmatpush1.bf16.msra.mxu1 %v4579_v54 }
 0x54f   : > { %1627 = vmatprep.subr.bf16.mxu1 %v4580_v55 }
 0x552   : > { %1628 = vmatpush1.bf16.msra.mxu1 %v4582_v12 }
 0x553   : > { %1629 = vmatprep.subr.bf16.mxu1 %v4583_v59 }
 0x556   : > { %1630 = vmatpush1.bf16.msra.mxu1 %v4585_v61 }
 0x557   : > { %1631 = vmatprep.subr.bf16.mxu1 %v4586_v62 }
 0x55a   : > { %1632 = vmatpush1.bf16.msra.mxu1 %v4588_v0 }
 0x55b   : > { %1633 = vmatprep.subr.bf16.mxu1 %v4589_v36  ;;  %v3569_v36 = vld [vmem:[%s6304_s4] sm:$0xff] }
 0x55e   : > { %1634 = vmatpush1.bf16.msra.mxu1 %v4591_v28 }
 0x55f   : > { %4252 = vmatprep.subr.bf16.mxu1 %v5194_v39 }
 0x561   : > { %1652 = vmatmul.mubr.bf16.vlgmr.msra.gmra.mrb[0].mxu1 %v5665_v23 }
 0x562   : > { %4254 = vmatprep.mubr.msk.bf16.mxu1 %vm5195_vm0, %v5194_v39 }
 0x5da   : > { %v5929_v63 = vpop.xlane.xlu0 %2247 }
 0x5db   : > { %v2269_v19 = vrot.slane %v5929_v63, %v5842_v49  ;;  %v2253_v4 = vrot.slane %v5929_v63, %v5673_v26  ;;  %v2281_v7 = vrot.slane %v5929_v63, %v2044_v21  ;;  %v2257_v10 = vrot.slane %v5929_v63, %v5799_v3 }
 0x5dc   : > { %v2261_v26 = vrot.slane %v5929_v63, %v5809_v16  ;;  %v2273_v52 = vrot.slane %v5929_v63, %v5804_v8 }
 0x5dd   : > { %4760 = vrcp.f32 %v2269_v19 }
 0x5de   : > { %4762 = vrcp.f32 %v2253_v4 }
 0x5df   : > { %4764 = vrcp.f32 %v2281_v7 }
 0x5e0   : > { %4766 = vrcp.f32 %v2257_v10  ;;  %v3570_v10 = vstv %s6303_s21 }
 0x5e1   : > { %4768 = vrcp.f32 %v2261_v26  ;;  %vm3571_vm1 = vcmp.gt.s32.totalorder %v3569_v36, %v3570_v10 }
 0x5e7   : > { %v4761_v30 = vpop.eup %4760 }
 0x5e8   : > { %v4763_v21 = vpop.eup %4762  ;;  %v2303_v31 = vmul.f32 %v4761_v30, %v5882_v9  ;;  %v5945_v35 = vmul.f32 %v4761_v30, %v5885_v18 }
 0x5e9   : > { %v4765_v11 = vpop.eup %4764  ;;  %v2291_v37 = vmul.f32 %v4763_v21, %v5835_v45  ;;  %v5949_v13 = vmul.f32 %v4763_v21, %v5838_v48  ;;  %v2265_v48 = vrot.slane %v5929_v63, %v5826_v38 }
 0x5ea   : > { %v4767_v29 = vpop.eup %4766  ;;  %v5952_v40 = vpack.c.bf16 %v5945_v35, %v2303_v31  ;;  %v5955_v14 = vmul.f32 %v4765_v11, %v5868_v17  ;;  %v5958_v41 = vmul.f32 %v4765_v11, %v5894_v57  ;;  %v4592_v57 = vld [vmem:[#allocation7] sm:$0xff]   ;;  %v4602_v11 = vld [vmem:[#allocation15 + $0x14] ss:$24 sps:$4 sm:$0xff]  }
 0x5eb   : > { %v2314_v9 = vpack.c.bf16 %v5949_v13, %v2291_v37  ;;  %v2294_v43 = vmul.f32 %v4767_v29, %v5846_v15  ;;  %v5970_v17 = vmul.f32 %v4767_v29, %v5851_v56  ;;  %4770 = vrcp.f32 %v2265_v48  ;;  %v4769_v32 = vpop.eup %4768  ;;  %4253 = vmatpush3.bf16.msra.mxu1 %v4592_v57  ;;  %1660 = vmatprep.subr.bf16.mxu0 %v4602_v11 }
 0x5ec   : > { %v2611_v18 = vunpack.c.l.b16 %v5952_v40  ;;  %v5964_v45 = vpack.c.bf16 %v5958_v41, %v5955_v14  ;;  %4258 = vmatprep.subr.bf16.mxu1 %v5194_v39  ;;  %v2297_v56 = vmul.f32 %v4769_v32, %v5858_v60  ;;  %v2298_v51 = vmul.f32 %v4769_v32, %v5865_v20 }
 0x5ed   : > { %v2339_v42 = vunpack.c.l.b16 %v2314_v9  ;;  %v2340_v27 = vunpack.c.h.b16 %v2314_v9  ;;  %v2315_v47 = vpack.c.bf16 %v5970_v17, %v2294_v43  ;;  %4772 = vrcp.f32 %v2273_v52  ;;  %v4593_v9 = vld [vmem:[#allocation7 + $0x8] sm:$0xff]  }
 0x5ee   : > { %2614 = vperm.xlu0 %4543, %v2611_v18   ;;  %v2815_v44 = vunpack.c.l.b16 %v5964_v45  ;;  %v2316_v54 = vpack.c.bf16 %v2298_v51, %v2297_v56  ;;  %v2277_v60 = vrot.slane %v5929_v63, %v2040_v1  ;;  %v2612_v4 = vunpack.c.h.b16 %v5952_v40 }
 0x5ef   : > { %2342 = vperm.xlu1 %4542, %v2339_v42   ;;  %v2407_v15 = vunpack.c.l.b16 %v2315_v47  ;;  %v2408_v53 = vunpack.c.h.b16 %v2315_v47 }
 0x5f0   : > { %v2475_v20 = vunpack.c.l.b16 %v2316_v54  ;;  %4774 = vrcp.f32 %v2277_v60  ;;  %v2476_v61 = vunpack.c.h.b16 %v2316_v54 }
 0x5f2   : > { %2818 = vperm.xlu0 %4543, %v2815_v44  }
 0x5f3   : > { %2345 = vperm.xlu1 %4542, %v2340_v27  }
 0x5f5   : > { %v4771_v55 = vpop.eup %4770 }
 0x5f6   : > { %3601 = vperm.xlu0 %4543, %v2291_v37   ;;  %v2300_v12 = vmul.f32 %v4771_v55, %v5873_v2  ;;  %v2301_v59 = vmul.f32 %v4771_v55, %v5878_v5 }
 0x5f7   : > { %2410 = vperm.xlu1 %4542, %v2407_v15   ;;  %v4773_v0 = vpop.eup %4772  ;;  %v4595_v15 = vld [vmem:[#allocation7 + $0x18] sm:$0xff]  }
 0x5f8   : > { %v2317_v62 = vpack.c.bf16 %v2301_v59, %v2300_v12  ;;  %v2306_v24 = vmul.f32 %v4773_v0, %v5854_v58  ;;  %v2307_v2 = vmul.f32 %v4773_v0, %v5888_v46  ;;  %v3572_v46 = vsel %vm3571_vm1, 1, %v5192_v6 }
 0x5fa   : > { %3607 = vperm.xlu0 %4543, %v2294_v43   ;;  %v2543_v19 = vunpack.c.l.b16 %v2317_v62  ;;  %v4775_v1 = vpop.eup %4774  ;;  %v2544_v63 = vunpack.c.h.b16 %v2317_v62  ;;  %v2319_v7 = vpack.c.bf16 %v2307_v2, %v2306_v24  ;;  %v4594_v43 = vld [vmem:[#allocation7 + $0x10] sm:$0xff]  }
 0x5fb   : > { %2413 = vperm.xlu1 %4542, %v2408_v53   ;;  %v2309_v5 = vmul.f32 %v4775_v1, %v5861_v50  ;;  %v2310_v28 = vmul.f32 %v4775_v1, %v5891_v33  ;;  %v4600_v33 = vld [vmem:[#allocation15 + $0x10] ss:$24 sps:$4 sm:$0xff]  }
 0x5fc   : > { %v2679_v58 = vunpack.c.l.b16 %v2319_v7  ;;  %v2680_v50 = vunpack.c.h.b16 %v2319_v7  ;;  %1661 = vmatpush1.bf16.msra.mxu0 %v4600_v33 }
 0x5fd   : > { %v2320_v26 = vpack.c.bf16 %v2310_v28, %v2309_v5 }
 0x5fe   : > { %3613 = vperm.xlu0 %4543, %v2297_v56  }
 0x5ff   : > { %2478 = vperm.xlu1 %4542, %v2475_v20   ;;  %v2747_v30 = vunpack.c.l.b16 %v2320_v26  ;;  %v2748_v21 = vunpack.c.h.b16 %v2320_v26 }
 0x602   : > { %3619 = vperm.xlu0 %4543, %v2300_v12   ;;  %v4596_v12 = vld [vmem:[#allocation7 + $0x20] sm:$0xff]  }
 0x603   : > { %2481 = vperm.xlu1 %4542, %v2476_v61  }
 0x606   : > { %3625 = vperm.xlu0 %4543, %v2303_v31   ;;  %v2816_v31 = vunpack.c.h.b16 %v5964_v45 }
 0x607   : > { %2546 = vperm.xlu1 %4542, %v2543_v19  }
 0x60a   : > { %3631 = vperm.xlu0 %4543, %v2306_v24  }
 0x60b   : > { %2549 = vperm.xlu1 %4542, %v2544_v63   ;;  %v4597_v63 = vld [vmem:[#allocation7 + $0x28] sm:$0xff]  }
 0x60e   : > { %3637 = vperm.xlu0 %4543, %v2309_v5  }
 0x60f   : > { %2617 = vperm.xlu1 %4542, %v2612_v4  }
 0x612   : > { %3643 = vperm.xlu0 %4543, %v5955_v14  }
 0x613   : > { %2682 = vperm.xlu1 %4542, %v2679_v58  }
 0x616   : > { %3574 = vperm.xlu0 %4543, %v3572_v46  }
 0x617   : > { %2685 = vperm.xlu1 %4542, %v2680_v50  }
 0x61b   : > { %2750 = vperm.xlu1 %4542, %v2747_v30  }
 0x61f   : > { %2753 = vperm.xlu1 %4542, %v2748_v21  }
 0x623   : > { %2821 = vperm.xlu1 %4542, %v2816_v31  }
 0x627   : > { %3604 = vperm.xlu1 %4542, %v5949_v13  }
 0x62b   : > { %3610 = vperm.xlu1 %4542, %v5970_v17  }
 0x62f   : > { %3616 = vperm.xlu1 %4542, %v2298_v51  }
 0x633   : > { %3622 = vperm.xlu1 %4542, %v2301_v59  }
 0x637   : > { %3628 = vperm.xlu1 %4542, %v5945_v35  }
 0x63b   : > { %3634 = vperm.xlu1 %4542, %v2307_v2  }
 0x63f   : > { %3640 = vperm.xlu1 %4542, %v2310_v28   ;;  %v4598_v28 = vld [vmem:[#allocation7 + $0x30] sm:$0xff]  }
 0x643   : > { %3646 = vperm.xlu1 %4542, %v5958_v41  }
 0x66d   : > { %v2615_v52 = vpop.permute.xlu0 %2614 }
 0x66e   : > { %v2343_v37 = vpop.permute.xlu1 %2342  ;;  %v2622_v0 = vrot.slane %v2615_v52, %v5736_v25 }
 0x66f   : > { %v2350_v40 = vrot.slane %v2343_v37, %v5736_v25  ;;  %v4599_v37 = vld [vmem:[#allocation7 + $0x38] sm:$0xff]  }
 0x671   : > { %v2819_v60 = vpop.permute.xlu0 %2818 }
 0x672   : > { %v2346_v29 = vpop.permute.xlu1 %2345 }
 0x673   : > { %v2354_v13 = vrot.slane %v2346_v29, %v5731_v22 }
 0x675   : > { %v2355_v14 = vsel %vm1929_vm7, %v2354_v13, %v2350_v40  ;;  %v6033_v24 = vpop.permute.xlu0 %3601 }
 0x676   : > { %v2356_v18 = vpack.c.b16 %v2355_v14, %v2355_v14  ;;  %v2411_v45 = vpop.permute.xlu1 %2410  ;;  %v2826_v14 = vrot.slane %v2819_v60, %v5736_v25  ;;  %v3651_v52 = vrot.slane %v6033_v24, %v5736_v25 }
 0x677   : > { %v2418_v41 = vrot.slane %v2411_v45, %v5736_v25 }
 0x678   : > { %4255 = vmatmul.mubr.msk.bf16.vlgmr.msra.gmra.mrb[4].mxu1 %vm2009_vm15, %v2356_v18 }
 0x679   : > { %4259 = vmatpush3.bf16.msra.mxu1 %v4593_v9  ;;  %4260 = vmatprep.mubr.msk.bf16.mxu1 %vm5195_vm0, %v5194_v39  ;;  %v3608_v7 = vpop.permute.xlu0 %3607 }
 0x67a   : > { %v2414_v35 = vpop.permute.xlu1 %2413  ;;  %4264 = vmatprep.subr.bf16.mxu1 %v5194_v39 }
 0x67b   : > { %v2422_v48 = vrot.slane %v2414_v35, %v5731_v22 }
 0x67d   : > { %v2423_v42 = vsel %vm1929_vm7, %v2422_v48, %v2418_v41  ;;  %v3614_v26 = vpop.permute.xlu0 %3613 }
 0x67e   : > { %v2424_v17 = vpack.c.b16 %v2423_v42, %v2423_v42  ;;  %v2479_v57 = vpop.permute.xlu1 %2478 }
 0x67f   : > { %v2486_v27 = vrot.slane %v2479_v57, %v5736_v25 }
 0x680   : > { %4261 = vmatmul.mubr.msk.bf16.vlgmr.msra.gmra.mrb[8].mxu1 %vm2009_vm15, %v2424_v17 }
 0x681   : > { %4265 = vmatpush3.bf16.msra.mxu1 %v4594_v43  ;;  %4266 = vmatprep.mubr.msk.bf16.mxu1 %vm5195_vm0, %v5194_v39  ;;  %v3620_v11 = vpop.permute.xlu0 %3619 }
 0x682   : > { %v2482_v44 = vpop.permute.xlu1 %2481  ;;  %4270 = vmatprep.subr.bf16.mxu1 %v5194_v39 }
 0x683   : > { %v2490_v47 = vrot.slane %v2482_v44, %v5731_v22 }
 0x685   : > { %v2491_v32 = vsel %vm1929_vm7, %v2490_v47, %v2486_v27  ;;  %v3626_v18 = vpop.permute.xlu0 %3625  ;;  %v3660_v47 = vrot.slane %v3608_v7, %v5736_v25 }
 0x686   : > { %v2492_v56 = vpack.c.b16 %v2491_v32, %v2491_v32  ;;  %v2547_v51 = vpop.permute.xlu1 %2546 }
 0x687   : > { %v2554_v54 = vrot.slane %v2547_v51, %v5736_v25 }
 0x688   : > { %4267 = vmatmul.mubr.msk.bf16.vlgmr.msra.gmra.mrb[12].mxu1 %vm2009_vm15, %v2492_v56  ;;  %v3669_v56 = vrot.slane %v3614_v26, %v5736_v25 }
 0x689   : > { %4271 = vmatpush3.bf16.msra.mxu1 %v4595_v15  ;;  %4272 = vmatprep.mubr.msk.bf16.mxu1 %vm5195_vm0, %v5194_v39  ;;  %v3632_v48 = vpop.permute.xlu0 %3631 }
 0x68a   : > { %v2550_v53 = vpop.permute.xlu1 %2549  ;;  %4276 = vmatprep.subr.bf16.mxu1 %v5194_v39 }
 0x68b   : > { %v2558_v55 = vrot.slane %v2550_v53, %v5731_v22  ;;  %v3678_v53 = vrot.slane %v3620_v11, %v5736_v25  ;;  %v4608_v11 = vld [vmem:[#allocation15 + $0x74] ss:$24 sps:$4 sm:$0xff]  }
 0x68d   : > { %v2559_v20 = vsel %vm1929_vm7, %v2558_v55, %v2554_v54  ;;  %v3638_v17 = vpop.permute.xlu0 %3637 }
 0x68e   : > { %v2560_v59 = vpack.c.b16 %v2559_v20, %v2559_v20  ;;  %v2618_v61 = vpop.permute.xlu1 %2617  ;;  %v3687_v20 = vrot.slane %v3626_v18, %v5736_v25  ;;  %v3705_v24 = vrot.slane %v3638_v17, %v5736_v25  ;;  %v4620_v18 = vld [vmem:[#allocation15 + $0x134] ss:$24 sps:$4 sm:$0xff]   ;;  %v4627_v17 = vld [vmem:[#allocation18 + $0x8] ss:$16 sps:$4 sm:$0xff]  }
 0x68f   : > { %v2626_v62 = vrot.slane %v2618_v61, %v5731_v22  ;;  %v3696_v61 = vrot.slane %v3632_v48, %v5736_v25  ;;  %v4624_v48 = vld [vmem:[#allocation18] ss:$16 sps:$4 sm:$0xff]  }
 0x690   : > { %4273 = vmatmul.mubr.msk.bf16.vlgmr.msra.gmra.mrb[16].mxu1 %vm2009_vm15, %v2560_v59 }
 0x691   : > { %4277 = vmatpush3.bf16.msra.mxu1 %v4596_v12  ;;  %4278 = vmatprep.mubr.msk.bf16.mxu1 %vm5195_vm0, %v5194_v39  ;;  %v2627_v1 = vsel %vm1929_vm7, %v2626_v62, %v2622_v0  ;;  %v3644_v54 = vpop.permute.xlu0 %3643 }
 0x692   : > { %v2683_v19 = vpop.permute.xlu1 %2682  ;;  %4282 = vmatprep.subr.bf16.mxu1 %v5194_v39  ;;  %v2628_v2 = vpack.c.b16 %v2627_v1, %v2627_v1 }
 0x693   : > { %v2690_v36 = vrot.slane %v2683_v19, %v5736_v25 }
 0x696   : > { %v2686_v5 = vpop.permute.xlu1 %2685 }
 0x697   : > { %v2694_v4 = vrot.slane %v2686_v5, %v5731_v22 }
 0x698   : > { %4279 = vmatmul.mubr.msk.bf16.vlgmr.msra.gmra.mrb[20].mxu1 %vm2009_vm15, %v2628_v2 }
 0x699   : > { %4283 = vmatpush3.bf16.msra.mxu1 %v4597_v63  ;;  %4284 = vmatprep.mubr.msk.bf16.mxu1 %vm5195_vm0, %v5194_v39  ;;  %v2695_v58 = vsel %vm1929_vm7, %v2694_v4, %v2690_v36 }
 0x69a   : > { %v2751_v10 = vpop.permute.xlu1 %2750  ;;  %4288 = vmatprep.subr.bf16.mxu1 %v5194_v39  ;;  %v2696_v46 = vpack.c.b16 %v2695_v58, %v2695_v58  ;;  %v6084_v58 = vpop.permute.xlu0 %3574 }
 0x69b   : > { %v2758_v21 = vrot.slane %v2751_v10, %v5736_v25  ;;  %v3714_v10 = vrot.slane %v3644_v54, %v5736_v25  ;;  %vm3576_vm2 = vcmp.eq.s32.totalorder %v6084_v58, 1  ;;  %v4603_v25 = vld [vmem:[#allocation15 + $0x40] ss:$24 sps:$4 sm:$0xff]   ;;  %v4647_v54 = vld [vmem:[#allocation18 + $0x6c] ss:$16 sps:$4 sm:$0xff]  }
 0x69e   : > { %v2754_v50 = vpop.permute.xlu1 %2753 }
 0x69f   : > { %v2762_v30 = vrot.slane %v2754_v50, %v5731_v22 }
 0x6a0   : > { %4285 = vmatmul.mubr.msk.bf16.vlgmr.msra.gmra.mrb[24].mxu1 %vm2009_vm15, %v2696_v46 }
 0x6a1   : > { %4289 = vmatpush3.bf16.msra.mxu1 %v4598_v28  ;;  %4290 = vmatprep.mubr.msk.bf16.mxu1 %vm5195_vm0, %v5194_v39  ;;  %v2763_v33 = vsel %vm1929_vm7, %v2762_v30, %v2758_v21 }
 0x6a2   : > { %v2822_v31 = vpop.permute.xlu1 %2821  ;;  %4294 = vmatprep.subr.bf16.mxu1 %v5194_v39  ;;  %v2764_v29 = vpack.c.b16 %v2763_v33, %v2763_v33  ;;  %v4605_v33 = vld [vmem:[#allocation15 + $0x44] ss:$24 sps:$4 sm:$0xff]  }
 0x6a3   : > { %v2830_v13 = vrot.slane %v2822_v31, %v5731_v22  ;;  %1662 = vmatprep.subr.bf16.mxu0 %v4605_v33 }
 0x6a4   : > { %1663 = vmatpush1.bf16.msra.mxu0 %v4603_v25 }
 0x6a5   : > { %v2831_v45 = vsel %vm1929_vm7, %v2830_v13, %v2826_v14  ;;  %1664 = vmatprep.subr.bf16.mxu0 %v4608_v11  ;;  %v4612_v13 = vld [vmem:[#allocation15 + $0xd0] ss:$24 sps:$4 sm:$0xff]   ;;  %v4615_v14 = vld [vmem:[#allocation15 + $0x100] ss:$24 sps:$4 sm:$0xff]  }
 0x6a6   : > { %v3605_v40 = vpop.permute.xlu1 %3604  ;;  %v2832_v35 = vpack.c.b16 %v2831_v45, %v2831_v45  ;;  %v4618_v45 = vld [vmem:[#allocation15 + $0x130] ss:$24 sps:$4 sm:$0xff]  }
 0x6a7   : > { %v3655_v32 = vrot.slane %v3605_v40, %v5731_v22  ;;  %v4614_v40 = vld [vmem:[#allocation15 + $0xd4] ss:$24 sps:$4 sm:$0xff]  }
 0x6a8   : > { %4291 = vmatmul.mubr.msk.bf16.vlgmr.msra.gmra.mrb[28].mxu1 %vm2009_vm15, %v2764_v29  ;;  %v4611_v29 = vld [vmem:[#allocation15 + $0xa4] ss:$24 sps:$4 sm:$0xff]  }
 0x6a9   : > { %4295 = vmatpush3.bf16.msra.mxu1 %v4599_v37  ;;  %4296 = vmatprep.mubr.msk.bf16.mxu1 %vm5195_vm0, %v5194_v39  ;;  %v3656_v62 = vsel %vm1929_vm7, %v3655_v32, %v3651_v52  ;;  %v4609_v37 = vld [vmem:[#allocation15 + $0xa0] ss:$24 sps:$4 sm:$0xff]   ;;  %v4638_v32 = vld [vmem:[#allocation18 + $0x44] ss:$16 sps:$4 sm:$0xff]  }
 0x6aa   : > { %v3611_v9 = vpop.permute.xlu1 %3610  ;;  %v4644_v52 = vld [vmem:[#allocation18 + $0x64] ss:$16 sps:$4 sm:$0xff]  }
 0x6ab   : > { %v3664_v57 = vrot.slane %v3611_v9, %v5731_v22  ;;  %v4617_v9 = vld [vmem:[#allocation15 + $0x104] ss:$24 sps:$4 sm:$0xff]  }
 0x6ad   : > { %v3665_v55 = vsel %vm1929_vm7, %v3664_v57, %v3660_v47  ;;  %v4630_v57 = vld [vmem:[#allocation18 + $0x20] ss:$16 sps:$4 sm:$0xff]   ;;  %v4635_v47 = vld [vmem:[#allocation18 + $0x2c] ss:$16 sps:$4 sm:$0xff]  }
 0x6ae   : > { %v3617_v41 = vpop.permute.xlu1 %3616  ;;  %v3720_v1 = vsel %vm1994_vm8, %v3665_v55, %v3656_v62  ;;  %v4650_v55 = vld [vmem:[#allocation18 + $0x84] ss:$16 sps:$4 sm:$0xff]   ;;  %v4657_v62 = vld [vmem:[#allocation18 + $0xa8] ss:$16 sps:$4 sm:$0xff]  }
 0x6af   : > { %v3673_v44 = vrot.slane %v3617_v41, %v5731_v22  ;;  %v4623_v41 = vld [vmem:[#allocation15 + $0x164] ss:$24 sps:$4 sm:$0xff]  }
 0x6b0   : > { %4297 = vmatmul.mubr.msk.bf16.vlgmr.msra.gmra.mrb[32].mxu1 %vm2009_vm15, %v2832_v35  ;;  %v4621_v35 = vld [vmem:[#allocation15 + $0x160] ss:$24 sps:$4 sm:$0xff]  }
 0x6b1   : > { %3137 = vmatprep.mubr.bf16.mxu1 %v5192_v6  ;;  %v3674_v12 = vsel %vm1929_vm7, %v3673_v44, %v3669_v56  ;;  %v4632_v44 = vld [vmem:[#allocation18 + $0x24] ss:$16 sps:$4 sm:$0xff]   ;;  %v4636_v56 = vld [vmem:[#allocation18 + $0x40] ss:$16 sps:$4 sm:$0xff]  }
 0x6b2   : > { %v3623_v42 = vpop.permute.xlu1 %3622  ;;  %v3721_v2 = vsel %vm1996_vm9, %v3674_v12, %v3720_v1  ;;  %v4651_v12 = vld [vmem:[#allocation18 + $0x88] ss:$16 sps:$4 sm:$0xff]   ;;  %v4660_v1 = vld [vmem:[#allocation18 + $0xc0] ss:$16 sps:$4 sm:$0xff]  }
 0x6b3   : > { %v3682_v15 = vrot.slane %v3623_v42, %v5731_v22  ;;  %v4626_v42 = vld [vmem:[#allocation18 + $0x4] ss:$16 sps:$4 sm:$0xff]  }
 0x6b4   : > { %3105 = vmatprep.subr.bf16.mxu1 %v4626_v42 }
 0x6b5   : > { %v3683_v0 = vsel %vm1929_vm7, %v3682_v15, %v3678_v53  ;;  %3106 = vmatpush1.bf16.msra.mxu1 %v4624_v48  ;;  %v4641_v15 = vld [vmem:[#allocation18 + $0x4c] ss:$16 sps:$4 sm:$0xff]   ;;  %v4645_v53 = vld [vmem:[#allocation18 + $0x68] ss:$16 sps:$4 sm:$0xff]  }
 0x6b6   : > { %v3629_v43 = vpop.permute.xlu1 %3628  ;;  %v3722_v4 = vsel %vm1998_vm10, %v3683_v0, %v3721_v2  ;;  %3107 = vmatprep.subr.bf16.mxu1 %v4632_v44  ;;  %v4659_v0 = vld [vmem:[#allocation18 + $0xac] ss:$16 sps:$4 sm:$0xff]   ;;  %v4666_v2 = vld [vmem:[#allocation18 + $0xe0] ss:$16 sps:$4 sm:$0xff]  }
 0x6b7   : > { %v3691_v51 = vrot.slane %v3629_v43, %v5731_v22  ;;  %v4629_v43 = vld [vmem:[#allocation18 + $0xc] ss:$16 sps:$4 sm:$0xff]  }
 0x6b9   : > { %v3692_v63 = vsel %vm1929_vm7, %v3691_v51, %v3687_v20  ;;  %3108 = vmatpush1.bf16.msra.mxu1 %v4630_v57  ;;  %v4639_v51 = vld [vmem:[#allocation18 + $0x48] ss:$16 sps:$4 sm:$0xff]   ;;  %v4648_v20 = vld [vmem:[#allocation18 + $0x80] ss:$16 sps:$4 sm:$0xff]  }
 0x6ba   : > { %v3635_v27 = vpop.permute.xlu1 %3634  ;;  %v3723_v28 = vsel %vm2000_vm11, %v3692_v63, %v3722_v4  ;;  %3109 = vmatprep.subr.bf16.mxu1 %v4638_v32  ;;  %v4663_v63 = vld [vmem:[#allocation18 + $0xc8] ss:$16 sps:$4 sm:$0xff]  }
 0x6bb   : > { %v3700_v60 = vrot.slane %v3635_v27, %v5731_v22  ;;  %v4633_v27 = vld [vmem:[#allocation18 + $0x28] ss:$16 sps:$4 sm:$0xff]  }
 0x6bc   : > { %v4669_v4 = vld [vmem:[#allocation18 + $0xe8] ss:$16 sps:$4 sm:$0xff]  }
 0x6bd   : > { %v3701_v5 = vsel %vm1929_vm7, %v3700_v60, %v3696_v61  ;;  %3110 = vmatpush1.bf16.msra.mxu1 %v4636_v56  ;;  %v4653_v60 = vld [vmem:[#allocation18 + $0x8c] ss:$16 sps:$4 sm:$0xff]   ;;  %v4656_v61 = vld [vmem:[#allocation18 + $0xa4] ss:$16 sps:$4 sm:$0xff]  }
 0x6be   : > { %v3641_v59 = vpop.permute.xlu1 %3640  ;;  %v3724_v50 = vsel %vm2002_vm12, %v3701_v5, %v3723_v28  ;;  %3111 = vmatprep.subr.bf16.mxu1 %v4644_v52  ;;  %v4668_v5 = vld [vmem:[#allocation18 + $0xe4] ss:$16 sps:$4 sm:$0xff]  }
 0x6bf   : > { %v3709_v19 = vrot.slane %v3641_v59, %v5731_v22  ;;  %v4654_v59 = vld [vmem:[#allocation18 + $0xa0] ss:$16 sps:$4 sm:$0xff]  }
 0x6c1   : > { %v3710_v7 = vsel %vm1929_vm7, %v3709_v19, %v3705_v24  ;;  %v4662_v19 = vld [vmem:[#allocation18 + $0xc4] ss:$16 sps:$4 sm:$0xff]   ;;  %v4665_v24 = vld [vmem:[#allocation18 + $0xcc] ss:$16 sps:$4 sm:$0xff]  }
 0x6c2   : > { %v3647_v36 = vpop.permute.xlu1 %3646  ;;  %v3725_v26 = vsel %vm2004_vm13, %v3710_v7, %v3724_v50  ;;  %v4671_v7 = vld [vmem:[#allocation18 + $0xec] ss:$16 sps:$4 sm:$0xff]  }
 0x6c3   : > { %v3718_v46 = vrot.slane %v3647_v36, %v5731_v22  ;;  %v4606_v22 = vld [vmem:[#allocation15 + $0x70] ss:$24 sps:$4 sm:$0xff]   ;;  %v4674_v36 = vld [vmem:[#allocation16 + $0x4] ss:$16 sps:$4 sm:$0xff]  }
 0x6c4   : > { %1665 = vmatpush1.bf16.msra.mxu0 %v4606_v22 }
 0x6c5   : > { %v3719_v30 = vsel %vm1929_vm7, %v3718_v46, %v3714_v10  ;;  %1666 = vmatprep.subr.bf16.mxu0 %v4611_v29  ;;  %v4677_v10 = vld [vmem:[#allocation16 + $0xc] ss:$16 sps:$4 sm:$0xff]  }
 0x6c6   : > { %v3726_v21 = vsel %vm2006_vm14, %v3719_v30, %v3725_v26 }
 0x6c7   : > { %v3728_v31 = vsel %vm3576_vm2, %v3726_v21, 0.0 }
 0x6c8   : > { %3729 = vst.msk [vmem:[%s5614_s10] sm:$0xff] %vm2009_vm15, %v3728_v31  ;;  %1667 = vmatpush1.bf16.msra.mxu0 %v4609_v37 }
 0x6c9   : > { %1668 = vmatprep.subr.bf16.mxu0 %v4614_v40 }
 0x6cc   : > { %1669 = vmatpush1.bf16.msra.mxu0 %v4612_v13 }
 0x6cd   : > { %1670 = vmatprep.subr.bf16.mxu0 %v4617_v9  ;;  %v6104_v9 = vld [vmem:[%s6301_s25] sm:$0x3f] }
 0x6d0   : > { %1671 = vmatpush1.bf16.msra.mxu0 %v4615_v14 }
 0x6d1   : > { %1672 = vmatprep.subr.bf16.mxu0 %v4620_v18  ;;  %v1315_v18 = vrot.slane %v6104_v9, %v5799_v3 }
 0x6d4   : > { %1673 = vmatpush1.bf16.msra.mxu0 %v4618_v45  ;;  %v1615_v45 = vadd.f32 %v5680_v34, %v1315_v18  ;;  %v4707_v18 = vld [vmem:[#allocation16 + $0xac] ss:$16 sps:$4 sm:$0xff]  }
 0x6d5   : > { %1674 = vmatprep.subr.bf16.mxu0 %v4623_v41 }
 0x6d6   : > { %v4095_v57 = vmul.f32 -1.442695, %v1615_v45  ;;  %v4702_v45 = vld [vmem:[#allocation16 + $0xa0] ss:$16 sps:$4 sm:$0xff]  }
 0x6d8   : > { %1675 = vmatpush1.bf16.msra.mxu0 %v4621_v35  ;;  %4776 = vpow2.f32 %v4095_v57  ;;  %v4719_v57 = vld [vmem:[#allocation16 + $0xec] ss:$16 sps:$4 sm:$0xff]  }
 0x6d9   : > { %3146 = vmatprep.subr.bf16.mxu0 %v4629_v43 }
 0x6db   : > { %1693 = vmatmul.mubr.bf16.vlgmr.msra.gmra.mrb[4].mxu0 %v5665_v23  ;;  %v4642_v23 = vld [vmem:[#allocation18 + $0x60] ss:$16 sps:$4 sm:$0xff]  }
 0x6dc   : > { %3147 = vmatpush1.bf16.msra.mxu0 %v4627_v17  ;;  %3178 = vmatprep.mubr.bf16.mxu0 %v5192_v6 }
 0x6dd   : > { %3148 = vmatprep.subr.bf16.mxu0 %v4635_v47  ;;  %3112 = vmatpush1.bf16.msra.mxu1 %v4642_v23 }
 0x6de   : > { %3113 = vmatprep.subr.bf16.mxu1 %v4650_v55 }
 0x6e0   : > { %3149 = vmatpush1.bf16.msra.mxu0 %v4633_v27 }
 0x6e1   : > { %3150 = vmatprep.subr.bf16.mxu0 %v4641_v15  ;;  %3114 = vmatpush1.bf16.msra.mxu1 %v4648_v20 }
 0x6e2   : > { %3115 = vmatprep.subr.bf16.mxu1 %v4656_v61  ;;  %v4777_v34 = vpop.eup %4776 }
 0x6e3   : > { %v2885_v55 = vadd.f32 1.0, %v4777_v34  ;;  %v4726_v34 = vld [vmem:[#allocation19 + $0x30] sm:$0xff]  }
 0x6e4   : > { %3151 = vmatpush1.bf16.msra.mxu0 %v4639_v51 }
 0x6e5   : > { %3152 = vmatprep.subr.bf16.mxu0 %v4647_v54  ;;  %3116 = vmatpush1.bf16.msra.mxu1 %v4654_v59  ;;  %4778 = vrcp.f32 %v2885_v55 }
 0x6e6   : > { %3117 = vmatprep.subr.bf16.mxu1 %v4662_v19 }
 0x6e8   : > { %3153 = vmatpush1.bf16.msra.mxu0 %v4645_v53 }
 0x6e9   : > { %3154 = vmatprep.subr.bf16.mxu0 %v4653_v60  ;;  %3118 = vmatpush1.bf16.msra.mxu1 %v4660_v1 }
 0x6ea   : > { %3119 = vmatprep.subr.bf16.mxu1 %v4668_v5 }
 0x6ec   : > { %3155 = vmatpush1.bf16.msra.mxu0 %v4651_v12 }
 0x6ed   : > { %3156 = vmatprep.subr.bf16.mxu0 %v4659_v0  ;;  %3120 = vmatpush1.bf16.msra.mxu1 %v4666_v2 }
 0x6ee   : > { %3347 = vmatprep.subr.bf16.mxu1 %v4674_v36  ;;  %v4675_v36 = vld [vmem:[#allocation16 + $0x8] ss:$16 sps:$4 sm:$0xff]  }
 0x6f0   : > { %3157 = vmatpush1.bf16.msra.mxu0 %v4657_v62 }
 0x6f1   : > { %3158 = vmatprep.subr.bf16.mxu0 %v4665_v24 }
 0x6f4   : > { %3159 = vmatpush1.bf16.msra.mxu0 %v4663_v63  ;;  %v4779_v63 = vpop.eup %4778 }
 0x6f5   : > { %3160 = vmatprep.subr.bf16.mxu0 %v4671_v7  ;;  %v4672_v7 = vld [vmem:[#allocation16] ss:$16 sps:$4 sm:$0xff]  }
 0x6f8   : > { %3161 = vmatpush1.bf16.msra.mxu0 %v4669_v4 }
 0x6f9   : > { %3388 = vmatprep.subr.bf16.mxu0 %v4677_v10 }
 0x74b   : > { %v2400_v28 = vpop.f32.mrb[4].mxu1 }
 0x74c   : > { %v4256_v46 = vpop.f32.mrb[5].mxu1 }
 0x74d   : > { %v2403_v50 = vpop.f32.mrb[6].mxu1  ;;  %v4683_v46 = vld [vmem:[#allocation16 + $0x2c] ss:$16 sps:$4 sm:$0xff]  }
 0x74e   : > { %v4257_v26 = vpop.f32.mrb[7].mxu1  ;;  %v4678_v50 = vld [vmem:[#allocation16 + $0x20] ss:$16 sps:$4 sm:$0xff]  }
 0x74f   : > { %v4681_v26 = vld [vmem:[#allocation16 + $0x28] ss:$16 sps:$4 sm:$0xff]  }
 0x753   : > { %v2468_v30 = vpop.f32.mrb[8].mxu1 }
 0x754   : > { %v2896_v21 = vrot.slane %v2468_v30, 7  ;;  %v4262_v31 = vpop.f32.mrb[9].mxu1  ;;  %v4686_v30 = vld [vmem:[#allocation16 + $0x44] ss:$16 sps:$4 sm:$0xff]  }
 0x755   : > { %v2471_v25 = vpop.f32.mrb[10].mxu1  ;;  %v4684_v31 = vld [vmem:[#allocation16 + $0x40] ss:$16 sps:$4 sm:$0xff]  }
 0x756   : > { %v2897_v33 = vsel %vm1994_vm8, %v2896_v21, %v2400_v28  ;;  %v4263_v11 = vpop.f32.mrb[11].mxu1  ;;  %v4680_v28 = vld [vmem:[#allocation16 + $0x24] ss:$16 sps:$4 sm:$0xff]   ;;  %v4689_v21 = vld [vmem:[#allocation16 + $0x4c] ss:$16 sps:$4 sm:$0xff]  }
 0x757   : > { %v4687_v25 = vld [vmem:[#allocation16 + $0x48] ss:$16 sps:$4 sm:$0xff]   ;;  %v4695_v11 = vld [vmem:[#allocation16 + $0x6c] ss:$16 sps:$4 sm:$0xff]  }
 0x75b   : > { %v2536_v22 = vpop.f32.mrb[12].mxu1 }
 0x75c   : > { %v2898_v37 = vrot.slane %v2536_v22, 6  ;;  %v4268_v29 = vpop.f32.mrb[13].mxu1  ;;  %v4690_v22 = vld [vmem:[#allocation16 + $0x60] ss:$16 sps:$4 sm:$0xff]  }
 0x75d   : > { %v2539_v40 = vpop.f32.mrb[14].mxu1  ;;  %v4698_v29 = vld [vmem:[#allocation16 + $0x84] ss:$16 sps:$4 sm:$0xff]  }
 0x75e   : > { %v2899_v13 = vsel %vm1996_vm9, %v2898_v37, %v2897_v33  ;;  %v4269_v14 = vpop.f32.mrb[15].mxu1  ;;  %v4692_v33 = vld [vmem:[#allocation16 + $0x64] ss:$16 sps:$4 sm:$0xff]   ;;  %v4693_v37 = vld [vmem:[#allocation16 + $0x68] ss:$16 sps:$4 sm:$0xff]  }
 0x75f   : > { %v4701_v40 = vld [vmem:[#allocation16 + $0x8c] ss:$16 sps:$4 sm:$0xff]   ;;  %v4704_v14 = vld [vmem:[#allocation16 + $0xa4] ss:$16 sps:$4 sm:$0xff]  }
 0x763   : > { %v2604_v35 = vpop.f32.mrb[16].mxu1 }
 0x764   : > { %v2900_v41 = vrot.slane %v2604_v35, 5  ;;  %v4274_v48 = vpop.f32.mrb[17].mxu1  ;;  %v4705_v35 = vld [vmem:[#allocation16 + $0xa8] ss:$16 sps:$4 sm:$0xff]  }
 0x765   : > { %v2607_v42 = vpop.f32.mrb[18].mxu1  ;;  %v4713_v48 = vld [vmem:[#allocation16 + $0xcc] ss:$16 sps:$4 sm:$0xff]  }
 0x766   : > { %v2901_v43 = vsel %vm1998_vm10, %v2900_v41, %v2899_v13  ;;  %v4275_v17 = vpop.f32.mrb[19].mxu1  ;;  %v4696_v13 = vld [vmem:[#allocation16 + $0x80] ss:$16 sps:$4 sm:$0xff]   ;;  %v4710_v41 = vld [vmem:[#allocation16 + $0xc4] ss:$16 sps:$4 sm:$0xff]  }
 0x767   : > { %v4708_v42 = vld [vmem:[#allocation16 + $0xc0] ss:$16 sps:$4 sm:$0xff]   ;;  %v4716_v17 = vld [vmem:[#allocation16 + $0xe4] ss:$16 sps:$4 sm:$0xff]  }
 0x76b   : > { %v2672_v44 = vpop.f32.mrb[20].mxu1 }
 0x76c   : > { %v2902_v27 = vrot.slane %v2672_v44, 4  ;;  %v4280_v47 = vpop.f32.mrb[21].mxu1  ;;  %v4714_v44 = vld [vmem:[#allocation16 + $0xe0] ss:$16 sps:$4 sm:$0xff]  }
 0x76d   : > { %v2675_v32 = vpop.f32.mrb[22].mxu1  ;;  %v1224_v47 = vld [vmem:[%s5587_s15] sm:$0xf] }
 0x76e   : > { %v2903_v15 = vsel %vm2000_vm11, %v2902_v27, %v2901_v43  ;;  %v4281_v56 = vpop.f32.mrb[23].mxu1  ;;  %v4711_v43 = vld [vmem:[#allocation16 + $0xc8] ss:$16 sps:$4 sm:$0xff]   ;;  %v4720_v32 = vld [vmem:[#allocation19] sm:$0xff]  }
 0x76f   : > { %v4717_v27 = vld [vmem:[#allocation16 + $0xe8] ss:$16 sps:$4 sm:$0xff]   ;;  %v4722_v56 = vld [vmem:[#allocation19 + $0x10] sm:$0xff]  }
 0x773   : > { %v2740_v51 = vpop.f32.mrb[24].mxu1 }
 0x774   : > { %v2904_v3 = vrot.slane %v2740_v51, 3  ;;  %v4286_v23 = vpop.f32.mrb[25].mxu1  ;;  %v4723_v51 = vld [vmem:[#allocation19 + $0x18] sm:$0xff]  }
 0x775   : > { %v2743_v52 = vpop.f32.mrb[26].mxu1  ;;  %v4725_v23 = vld [vmem:[#allocation19 + $0x28] sm:$0xff]  }
 0x776   : > { %v2905_v53 = vsel %vm2002_vm12, %v2904_v3, %v2903_v15  ;;  %v4287_v54 = vpop.f32.mrb[27].mxu1  ;;  %v4721_v15 = vld [vmem:[#allocation19 + $0x8] sm:$0xff]   ;;  %v4724_v3 = vld [vmem:[#allocation19 + $0x20] sm:$0xff]   ;;  %v4727_v52 = vld [vmem:[#allocation19 + $0x38] sm:$0xff]  }
 0x777   : > { %v1323_v54 = vrot.slane %v6104_v9, %v5826_v38  ;;  %v1327_v38 = vrot.slane %v6104_v9, %v5842_v49 }
 0x77b   : > { %v2808_v60 = vpop.f32.mrb[28].mxu1 }
 0x77c   : > { %v2906_v20 = vrot.slane %v2808_v60, 2  ;;  %v4292_v12 = vpop.f32.mrb[29].mxu1 }
 0x77d   : > { %v2811_v59 = vpop.f32.mrb[30].mxu1 }
 0x77e   : > { %v2907_v61 = vsel %vm2004_vm13, %v2906_v20, %v2905_v53  ;;  %v4293_v62 = vpop.f32.mrb[31].mxu1  ;;  %v1319_v53 = vrot.slane %v6104_v9, %v5809_v16 }
 0x783   : > { %v2876_v0 = vpop.f32.mrb[32].mxu1 }
 0x784   : > { %v2908_v19 = vrot.slane %v2876_v0, 1  ;;  %v4298_v24 = vpop.f32.mrb[33].mxu1 }
 0x785   : > { %v2879_v1 = vpop.f32.mrb[34].mxu1 }
 0x786   : > { %v2909_v2 = vsel %vm2006_vm14, %v2908_v19, %v2907_v61  ;;  %v4299_v5 = vpop.f32.mrb[35].mxu1 }
 0x787   : > { %v2911_v4 = vmul.f32 %v4779_v63, %v2909_v2 }
 0x789   : > { %v2912_v10 = vpack.c.bf16 %v2911_v4, %v2911_v4 }
 0x78b   : > { %3138 = vmatmul.mubr.bf16.vlgmr.msra.gmra.mrb[0].mxu1 %v2912_v10  ;;  %3179 = vmatmul.mubr.bf16.vlgmr.msra.gmra.mrb[4].mxu0 %v2912_v10 }
 0x78c   : > { %3348 = vmatpush1.bf16.msra.mxu1 %v4672_v7  ;;  %3389 = vmatpush1.bf16.msra.mxu0 %v4675_v36 }
 0x78d   : > { %3349 = vmatprep.subr.bf16.mxu1 %v4680_v28  ;;  %3390 = vmatprep.subr.bf16.mxu0 %v4683_v46 }
 0x78e   : > { %3379 = vmatprep.mubr.bf16.mxu1 %v5192_v6  ;;  %3420 = vmatprep.mubr.bf16.mxu0 %v5192_v6  ;;  %v4699_v6 = vld [vmem:[#allocation16 + $0x88] ss:$16 sps:$4 sm:$0xff]  }
 0x790   : > { %3350 = vmatpush1.bf16.msra.mxu1 %v4678_v50  ;;  %3391 = vmatpush1.bf16.msra.mxu0 %v4681_v26  ;;  %v1223_v50 = vld [vmem:[#allocation3] sm:$0xff] }
 0x791   : > { %3351 = vmatprep.subr.bf16.mxu1 %v4686_v30  ;;  %3392 = vmatprep.subr.bf16.mxu0 %v4689_v21 }
 0x794   : > { %3352 = vmatpush1.bf16.msra.mxu1 %v4684_v31  ;;  %3393 = vmatpush1.bf16.msra.mxu0 %v4687_v25 }
 0x795   : > { %3353 = vmatprep.subr.bf16.mxu1 %v4692_v33  ;;  %3394 = vmatprep.subr.bf16.mxu0 %v4695_v11 }
 0x798   : > { %3354 = vmatpush1.bf16.msra.mxu1 %v4690_v22  ;;  %3395 = vmatpush1.bf16.msra.mxu0 %v4693_v37  ;;  %v4797_v37 = vld [vmem:[#allocation2] sm:$0xff] }
 0x799   : > { %3355 = vmatprep.subr.bf16.mxu1 %v4698_v29  ;;  %3396 = vmatprep.subr.bf16.mxu0 %v4701_v40  ;;  %v4163_v40 = vld [vmem:[%s6305_s3] ss:$0 sm:$0xff] }
 0x79c   : > { %3356 = vmatpush1.bf16.msra.mxu1 %v4696_v13  ;;  %3397 = vmatpush1.bf16.msra.mxu0 %v4699_v6 }
 0x79d   : > { %3357 = vmatprep.subr.bf16.mxu1 %v4704_v14  ;;  %3398 = vmatprep.subr.bf16.mxu0 %v4707_v18 }
 0x7a0   : > { %3358 = vmatpush1.bf16.msra.mxu1 %v4702_v45  ;;  %3399 = vmatpush1.bf16.msra.mxu0 %v4705_v35 }
 0x7a1   : > { %3359 = vmatprep.subr.bf16.mxu1 %v4710_v41  ;;  %3400 = vmatprep.subr.bf16.mxu0 %v4713_v48 }
 0x7a4   : > { %3360 = vmatpush1.bf16.msra.mxu1 %v4708_v42  ;;  %3401 = vmatpush1.bf16.msra.mxu0 %v4711_v43 }
 0x7a5   : > { %3361 = vmatprep.subr.bf16.mxu1 %v4716_v17  ;;  %3402 = vmatprep.subr.bf16.mxu0 %v4719_v57 }
 0x7a8   : > { %3362 = vmatpush1.bf16.msra.mxu1 %v4714_v44  ;;  %3403 = vmatpush1.bf16.msra.mxu0 %v4717_v27 }
 0x7a9   : > { %4300 = vmatprep.subr.bf16.mxu0 %v5194_v39 }
 0x7ab   : > { %3380 = vmatmul.mubr.bf16.vlgmr.msra.gmra.mrb[0].mxu1 %v1224_v47  ;;  %3421 = vmatmul.mubr.bf16.vlgmr.msra.gmra.mrb[4].mxu0 %v1224_v47 }
 0x7ac   : > { %4316 = vmatprep.mubr.msk.bf16.mxu0 %vm5195_vm0, %v5194_v39  ;;  %4301 = vmatpush3.bf16.msra.mxu0 %v4720_v32 }
 0x7ad   : > { %4302 = vmatprep.subr.bf16.mxu0 %v5194_v39 }
 0x7b0   : > { %4303 = vmatpush3.bf16.msra.mxu0 %v4721_v15 }
 0x7b1   : > { %4304 = vmatprep.subr.bf16.mxu0 %v5194_v39 }
 0x7b4   : > { %4305 = vmatpush3.bf16.msra.mxu0 %v4722_v56 }
 0x7b5   : > { %4306 = vmatprep.subr.bf16.mxu0 %v5194_v39 }
 0x7b8   : > { %4307 = vmatpush3.bf16.msra.mxu0 %v4723_v51 }
 0x7b9   : > { %4308 = vmatprep.subr.bf16.mxu0 %v5194_v39 }
 0x7bc   : > { %4309 = vmatpush3.bf16.msra.mxu0 %v4724_v3 }
 0x7bd   : > { %4310 = vmatprep.subr.bf16.mxu0 %v5194_v39 }
 0x7c0   : > { %4311 = vmatpush3.bf16.msra.mxu0 %v4725_v23 }
 0x7c1   : > { %4312 = vmatprep.subr.bf16.mxu0 %v5194_v39 }
 0x7c4   : > { %4313 = vmatpush3.bf16.msra.mxu0 %v4726_v34 }
 0x7c5   : > { %4314 = vmatprep.subr.bf16.mxu0 %v5194_v39  ;;  %v1331_v39 = vrot.slane %v6104_v9, %v5804_v8 }
 0x7c8   : > { %4315 = vmatpush3.bf16.msra.mxu0 %v4727_v52 }
 0x87e   : > { %v3381_v55 = vpop.f32.mrb[0].mxu1  ;;  %v3422_v60 = vpop.f32.mrb[4].mxu0 }
 0x87f   : > { %v4320_v20 = vadd.f32 %v3381_v55, %v1319_v53  ;;  %v3383_v12 = vpop.f32.mrb[1].mxu1  ;;  %v3424_v59 = vpop.f32.mrb[5].mxu0  ;;  %v4322_v5 = vadd.f32 %v3422_v60, %v1327_v38 }
 0x880   : > { %v4321_v61 = vadd.f32 %v3383_v12, %v1323_v54  ;;  %v3385_v62 = vpop.f32.mrb[2].mxu1  ;;  %v3426_v0 = vpop.f32.mrb[6].mxu0  ;;  %v4323_v16 = vadd.f32 %v3424_v59, %v1331_v39 }
 0x881   : > { %v4160_v19 = vmul.f32 -1.442695, %v4320_v20  ;;  %v3386_v24 = vpop.f32.mrb[3].mxu1  ;;  %v3427_v1 = vpop.f32.mrb[7].mxu0 }
 0x882   : > { %v4161_v63 = vmul.f32 -1.442695, %v4321_v61  ;;  %v4162_v2 = vmul.f32 -1.442695, %v4323_v16 }
 0x883   : > { %4780 = vpow2.f32 %v4160_v19 }
 0x884   : > { %4782 = vpow2.f32 %v4161_v63 }
 0x885   : > { %4784 = vpow2.f32 %v4162_v2 }
 0x886   : > { %4786 = vtanh.f32 %v4322_v5 }
 0x88d   : > { %v4781_v4 = vpop.eup %4780 }
 0x88e   : > { %v4783_v7 = vpop.eup %4782  ;;  %v3436_v36 = vadd.f32 1.0, %v4781_v4 }
 0x88f   : > { %v3442_v10 = vadd.f32 1.0, %v4783_v7  ;;  %v4785_v28 = vpop.eup %4784 }
 0x890   : > { %4788 = vrcp.f32 %v3436_v36  ;;  %v4787_v46 = vpop.eup %4786  ;;  %v3449_v21 = vadd.f32 1.0, %v4785_v28 }
 0x891   : > { %4790 = vrcp.f32 %v3442_v10 }
 0x892   : > { %4792 = vrcp.f32 %v3449_v21 }
 0x89a   : > { %v4789_v8 = vpop.eup %4788 }
 0x89b   : > { %v4791_v26 = vpop.eup %4790  ;;  %v3453_v30 = vmul.f32 %v4789_v8, %v4787_v46 }
 0x89c   : > { %v3452_v31 = vmul.f32 %v4791_v26, %v1223_v50  ;;  %v4793_v9 = vpop.eup %4792 }
 0x89e   : > { %v3454_v25 = vadd.f32 %v3453_v30, %v3452_v31 }
 0x8a0   : > { %4794 = vtanh.f32 %v3454_v25  ;;  %v3579_v49 = vsel %vm3576_vm2, %v3454_v25, %v1223_v50 }
 0x8a1   : > { %3580 = vst [vmem:[#allocation3] sm:$0xff] %v3579_v49 }
 0x8aa   : > { %v4795_v33 = vpop.eup %4794 }
 0x8ab   : > { %v3456_v11 = vmul.f32 %v4795_v33, %v4793_v9 }
 0x8ad   : > { %v3457_v22 = vpack.c.bf16 %v3456_v11, %v3456_v11  ;;  %v3577_v29 = vsel %vm3576_vm2, %v3456_v11, %v4797_v37 }
 0x8ae   : > { %3578 = vst [vmem:[#allocation2] sm:$0xff] %v3577_v29 }
 0x8af   : > { %4317 = vmatmul.mubr.bf16.vlgmr.msra.gmra.mrb[8].mxu0 %v3457_v22 }
 0x982   : > { %v3563_v13 = vpop.f32.mrb[8].mxu0 }
 0x983   : > { %v3564_v6 = vadd.f32 %v4163_v40, %v3563_v13  ;;  %v4318_v14 = vpop.f32.mrb[9].mxu0 }
 0x984   : > { %v3566_v18 = vpop.f32.mrb[10].mxu0 }
 0x985   : > { %v3581_v45 = vsel %vm3576_vm2, %v3564_v6, 0.0  ;;  %v4319_v35 = vpop.f32.mrb[11].mxu0 }
 0x986   : > { %v3582_v41 = vpack.c.bf16 %v3581_v45, %v3581_v45 }
 0x988   : > { %3583 = vst [vmem:[%s5612_s23] sm:$0xf] %v3582_v41 }
 0x989 PF: > { %s6306_s19 = sld [smem:[#allocation33_spill]] }
 0x98f   : > { %p4172_p5 = scmp.gt.s32.totalorder %s5610_s6, %s6306_s19 }
 0x990   : > { %vm3735_vm3 = vcmask (!%p4172_p5), 130048   ;;  %v5196_v48 = vmov (!%p4172_p5), 0   ;;  %v5197_v42 = vmov (!%p4172_p5), 0.0  }
 0x991   : > { %3733 = sbr.rel (%p4172_p5) target bundleno = 2456 (0x998), region = 120  ;;  %3734 = vst [vmem:[%s5612_s23] sm:$0xf] (!%p4172_p5), %v5196_v48  ;;  %3736 = vst.msk [vmem:[%s5614_s10] sm:$0xff] (!%p4172_p5), %vm3735_vm3, %v5197_v42 }
 0x998 PF: > { %s6307_s18 = sld [smem:[#allocation33_spill]]  ;;  %s6308_s0 = sld [smem:[#allocation46_spill]] }
 0x999   : > { %s3757_s6 = sshll.u32 %s5612_s23, 4  ;;  %s3738_s4 = scalar_lea.sflag [#allocation9], %s5584_s22  ;;  %s3758_s6 = int_to_ptr.vmem [resolvable:$true] %s3757_s6 }
 0x99a   : > { %s5036_s11 = scalar_lea.vmem %s3758_s6, 64  ;;  %p6309_p6 = scmp.ne.s32.totalorder %s6282_s14, 0 }
 0x99b   : > { %p5037_p2 = scmp.ne.s32.totalorder %s3758_s6, %s5036_s11  ;;  %s5198_s7 = smov [#allocation21]  }
 0x99c   : > { %s5040_s15 = sshll.u32 %s5198_s7, 4  ;;  %s5041_s15 = int_to_ptr.vmem [resolvable:$false] %s5040_s15 }
 0x99d   : > { %p5038_p7 = pnand %p5037_p2, %p6309_p6  ;;  %s5042_s5 = scalar_lea.vmem %s5041_s15, 128 }
 0x99e   : > { %s4175_s17 = sshll.u32 %s6307_s18, 6  ;;  %p5043_p0 = scmp.lt.s32.totalorder %s3758_s6, %s5041_s15 }
 0x99f   : > { %s6153_s16 = scalar_lea.hbm %s6308_s0, %s4175_s17  ;;  %p5039_p11 = pneg %p5038_p7 }
 0x9a0   : > { %p5044_p1 = scmp.lt.s32.totalorder %s5042_s5, %s5036_s11 }
 0x9a2   : > { %p5045_p9 = por %p5044_p1, %p5043_p0 }
 0x9a4   : > { %p5046_p13 = pnand %p5045_p9, %p5039_p11 }
 0x9a6   : > { %5049 = shalt.err (!%p5046_p13)
}
 0x9a7   : > { %s5050_s23 = scalar_lea.hbm %s6153_s16, 64  ;;  %s5054_s17 = scalar_lea.hbm %s6308_s0, 448 }
 0x9a8   : > { %p5051_p12 = scmp.ne.s32.totalorder %s6153_s16, %s5050_s23  ;;  %p5055_p3 = scmp.lt.u32.totalorder %s6153_s16, %s6308_s0 }
 0x9a9   : > { %p5056_p10 = scmp.lt.u32.totalorder %s5054_s17, %s5050_s23  ;;  %p5058_p2 = scmp.lt.u32.totalorder %s5050_s23, %s6153_s16 }
 0x9aa   : > { %p5052_p4 = pnand %p5051_p12, %p6309_p6 }
 0x9ab   : > { %p5057_p5 = por %p5056_p10, %p5055_p3 }
 0x9ac   : > { %p5053_p8 = pneg %p5052_p4 }
 0x9ad   : > { %p5059_p7 = por %p5058_p2, %p5057_p5 }
 0x9af   : > { %p5060_p11 = pnand %p5059_p7, %p5053_p8 }
 0x9b1   : > { %5063 = shalt.err (!%p5060_p11)
}
 0x9b2   : > { %4370 = dma.vmem_to_hbm [thread:$0]  (%p6309_p6), %s3758_s6, 64, %s6153_s16, %s3738_s4  }
 0x9b3   : > { %s4176_s11 = sshll.u32 %s6307_s18, 7  ;;  %s3771_s7 = sshll.u32 %s5614_s10, 4  ;;  %s3772_s7 = int_to_ptr.vmem [resolvable:$true] %s3771_s7 }
 0x9b4   : > { %s6310_s3 = sld [smem:[#allocation47_spill]]  ;;  %s3743_s23 = scalar_lea.sflag [#allocation23], %s5584_s22 }
 0x9b5   : > { %s5064_s17 = scalar_lea.vmem %s3772_s7, 128  ;;  %s5199_s21 = smov [#allocation22]  }
 0x9b6   : > { %p5065_p0 = scmp.ne.s32.totalorder %s3772_s7, %s5064_s17  ;;  %s5068_s0 = sshll.u32 %s5199_s21, 4  ;;  %s5069_s0 = int_to_ptr.vmem [resolvable:$false] %s5068_s0 }
 0x9b7   : > { %s5070_s2 = scalar_lea.vmem %s5069_s0, 256  ;;  %p5071_p13 = scmp.lt.s32.totalorder %s3772_s7, %s5069_s0 }
 0x9b8   : > { %p5066_p1 = pnand %p5065_p0, %p6309_p6  ;;  %p5072_p12 = scmp.lt.s32.totalorder %s5070_s2, %s5064_s17 }
 0x9ba   : > { %s6311_s19 = smov %s6310_s3  ;;  %s6179_s24 = scalar_lea.hbm %s6310_s3, %s4176_s11 }
 0x9bb   : > { %p5067_p9 = pneg %p5066_p1  ;;  %p5073_p4 = por %p5072_p12, %p5071_p13 }
 0x9bd   : > { %p5074_p8 = pnand %p5073_p4, %p5067_p9 }
 0x9bf   : > { %5077 = shalt.err (!%p5074_p8)
}
 0x9c0   : > { %s5078_s22 = scalar_lea.hbm %s6179_s24, 128  ;;  %s5082_s16 = scalar_lea.hbm %s6311_s19, 896 }
 0x9c1   : > { %p5079_p3 = scmp.ne.s32.totalorder %s6179_s24, %s5078_s22  ;;  %p5083_p2 = scmp.lt.u32.totalorder %s6179_s24, %s6311_s19 }
 0x9c2   : > { %p5084_p7 = scmp.lt.u32.totalorder %s5082_s16, %s5078_s22  ;;  %p5086_p0 = scmp.lt.u32.totalorder %s5078_s22, %s6179_s24 }
 0x9c3   : > { %p5080_p10 = pnand %p5079_p3, %p6309_p6 }
 0x9c4   : > { %p5085_p11 = por %p5084_p7, %p5083_p2 }
 0x9c5   : > { %p5081_p5 = pneg %p5080_p10 }
 0x9c6   : > { %p5087_p1 = por %p5086_p0, %p5085_p11 }
 0x9c8   : > { %p5088_p9 = pnand %p5087_p1, %p5081_p5 }
 0x9ca   : > { %5091 = shalt.err (!%p5088_p9)
}
 0x9cb   : > { %4371 = dma.vmem_to_hbm [thread:$0]  (%p6309_p6), %s3772_s7, 128, %s6179_s24, %s3743_s23  }
 0x9cc PF: > { %p4422_p13 = scmp.ge.s32.totalorder %s5172_s30, 2  ;;  %s3783_s2 = sand.u32 1, %s5152_s26  }
 0x9cd   : > { %p6312_p12 = scmp.ne.s32.totalorder %s6283_s1, 0  ;;  %s3784_s4 = scalar_lea.sflag [#allocation9], %s3783_s2 }
 0x9cf   : > { %p4401_p4 = pnand %p4422_p13, %p6312_p12 }
 0x9d1   : > { %5143 = dma.done.wait (!%p4401_p4), %s3784_s4, 64  }
 0x9d2   : > { %5145 = vsyncadd (!%p4401_p4), %s3784_s4, 4294967232  ;;  %s3793_s11 = scalar_lea.sflag [#allocation23], %s3783_s2 }
 0x9d3   : > { %5147 = dma.done.wait (!%p4401_p4), %s3793_s11, 128  }
 0x9d4   : > { %5149 = vsyncadd (!%p4401_p4), %s3793_s11, 4294967168  ;;  %s46_s30 = sadd.s32 1, %s5172_s30   ;;  %s6313_s26 = smov %s5156_s27 }
 0x9d5   : > { %p43_p8 = scmp.ge.s32.totalorder %s46_s30, 9   ;;  %s6314_s27 = smov %s5160_s28 }
 0x9d6   : > { %s6315_s28 = smov %s5529_s8  ;;  %s6316_s3 = smov %s5168_s29 }
 0x9d7   : > { %s6317_s29 = smov %s6319_s20  ;;  %45 = sbr.rel (!%p43_p8) target bundleno = 36 (0x24), region = 183 }
 0x9de   :  { %3798 = vsyncpa [#allocation8], 1 }
 0x9df   :  { %3800 = vsyncpa [#allocation8 + $0x1], 1 }
 0x9e0   :  { %3801 = vsyncpa [#allocation11], 1 }
 0x9e1   :  { %3803 = vsyncpa [#allocation11 + $0x1], 1 }
 0x9e2   :  { %3804 = vsyncpa [#allocation14], 1 }
 0x9e3   :  { %3805 = vsyncpa [#allocation17], 1 }
 0x9e4   :  { %3806 = vsyncpa [#allocation20], 1 }
 0x9e5   :  { %3807 = vsyncpa [#allocation9], 1 }
 0x9e6   :  { %3809 = vsyncpa [#allocation9 + $0x1], 1 }
 0x9e7   :  { %3810 = vsyncpa [#allocation23], 1 }
 0x9e8   :  { %3812 = vsyncpa [#allocation23 + $0x1], 1 }

</bundles_post_ra>
